<compile_context>
chip_gen: v7x
topology: tpu7x:2x2x1
jax: 0.10.0
libtpu: 0.0.40
codegen_flags: <defaults>
</compile_context>

<pallas_src>
import jax
import jax.numpy as jnp
from jax.experimental import pallas as pl
from jax.experimental.pallas import tpu as pltpu


def _dae_kernel(x_ref,
                w1_ref, b1_ref,
                w2_ref, b2_ref,
                w3_ref, b3_ref,
                w4_ref, b4_ref,
                o_ref):
    """Fused 4-layer MLP (DAE) on one [tile_b, D] batch tile; weights VMEM-resident."""
    # In-kernel f32 -> bf16 cast (replaces the wrapper-side cast / HBM roundtrip).
    x = x_ref[...].astype(jnp.bfloat16)                              # bf16 [tb, D]

    # Hoist bias loads once per tile (keeps them out of any future inner D-loop).
    b1 = b1_ref[...]
    b2 = b2_ref[...]
    b3 = b3_ref[...]
    b4 = b4_ref[...]

    # encoder: bf16 MXU matmul -> f32 accumulator -> bias/ReLU in f32 -> bf16
    h = jnp.dot(x, w1_ref[...], preferred_element_type=jnp.float32) + b1
    h = jnp.maximum(h, 0.0).astype(jnp.bfloat16)
    h = jnp.dot(h, w2_ref[...], preferred_element_type=jnp.float32) + b2
    h = jnp.maximum(h, 0.0).astype(jnp.bfloat16)

    # decoder
    h = jnp.dot(h, w3_ref[...], preferred_element_type=jnp.float32) + b3
    h = jnp.maximum(h, 0.0).astype(jnp.bfloat16)
    h = jnp.dot(h, w4_ref[...], preferred_element_type=jnp.float32) + b4

    o_ref[...] = h.astype(o_ref.dtype)


def _round_up(n, m):
    return (n + m - 1) // m * m


def _default_max_tile():
    """Per-generation batch-tile ceiling.

    v5e's 128x128 MXU already gives ~1us of matmul work per 256-row step (>> the
    ~0.35us pipeline overhead), so larger tiles only grow f32 intermediates under
    its 16 MiB scoped-VMEM default.  v6e/v7x's 918+ TF/s MXUs need ~1024 rows per
    step before the fixed per-step cost is amortized.
    """
    try:
        kind = jax.devices()[0].device_kind.lower()
    except Exception:
        return 1024
    return 256 if "v5" in kind else 1024


def _pick_batch_tile(B, max_tile):
    """Batch tile: multiple of 16 (bf16 sublane pack = 16 rows/vreg), >=256 rows
    per grid step when the batch allows, 256-granular, and sized so large batches
    get >=4 grid steps (>=2 steps per v7x TensorCore for prefetch overlap)."""
    Bp = _round_up(B, 16)
    if Bp <= 256:
        return Bp                                  # one tile covers the whole batch
    tb = _round_up(max(256, Bp // 4), 256)         # >=4 steps for large batches
    return min(max_tile, tb)


def _call_dae(xp, operands, *, tb, single_buffer_weights):
    Bp, D = xp.shape
    out_dtype = xp.dtype

    if single_buffer_weights:
        # Grid-invariant operands: constant index_map + single buffer (no point
        # double-buffering something that is never re-fetched).
        inv = lambda shape: pl.BlockSpec(shape, lambda i: (0, 0),
                                         pipeline_mode=pl.Buffered(1))
    else:
        inv = lambda shape: pl.BlockSpec(shape, lambda i: (0, 0))

    flops = 2 * Bp * (D * 512 + 512 * 256 + 256 * 512 + 512 * D)
    weight_bytes = 2 * (D * 512 + 512 * 256 + 256 * 512 + 512 * D)   # bf16
    bias_bytes = 4 * (512 + 256 + 512 + D)                           # f32
    bytes_accessed = Bp * D * 4 + Bp * D * 4 + weight_bytes + bias_bytes

    return pl.pallas_call(
        _dae_kernel,
        out_shape=jax.ShapeDtypeStruct((Bp, D), out_dtype),
        grid_spec=pltpu.PrefetchScalarGridSpec(
            num_scalar_prefetch=0,
            grid=(Bp // tb,),
            in_specs=[pl.BlockSpec((tb, D), lambda i: (i, 0))]       # x batch tile (f32)
                     + [inv(op.shape) for op in operands],           # weights/biases
            out_specs=pl.BlockSpec((tb, D), lambda i: (i, 0)),
        ),
        compiler_params=pltpu.CompilerParams(
            dimension_semantics=("parallel",),        # megacore-shardable batch axis
            vmem_limit_bytes=32 * 1024 * 1024),       # explicit; fits v5e/v6e/v7x at D=128
        cost_estimate=pl.CostEstimate(flops=flops,
                                      transcendentals=0,
                                      bytes_accessed=bytes_accessed),
    )(xp, *operands)


def latent_dae_forward(x, params, *, max_tile=None):
    """x: [B, latent_dim] float32.  params: dict of w1..w4 ([in,out]) and b1..b4 ([1,out])."""
    B, D = x.shape
    if max_tile is None:
        max_tile = _default_max_tile()

    # bf16 weights feed the MXU (half the VMEM/HBM footprint); f32 biases are
    # added on the f32 accumulator inside the kernel.
    w1 = params["w1"].astype(jnp.bfloat16)   # [D, 512]
    w2 = params["w2"].astype(jnp.bfloat16)   # [512, 256]
    w3 = params["w3"].astype(jnp.bfloat16)   # [256, 512]
    w4 = params["w4"].astype(jnp.bfloat16)   # [512, D]
    b1 = params["b1"].astype(jnp.float32)    # [1, 512]
    b2 = params["b2"].astype(jnp.float32)    # [1, 256]
    b3 = params["b3"].astype(jnp.float32)    # [1, 512]
    b4 = params["b4"].astype(jnp.float32)    # [1, D]

    tb = _pick_batch_tile(B, max_tile)
    Bp = _round_up(B, tb)

    # Pad only when B isn't a tile multiple (padded rows compute relu(bias)
    # garbage that is sliced off; no extra HBM pass in the divisible case).
    xp = x if Bp == B else jnp.pad(x, ((0, Bp - B), (0, 0)))

    operands = (w1, b1, w2, b2, w3, b3, w4, b4)
    try:
        out = _call_dae(xp, operands, tb=tb, single_buffer_weights=True)
    except Exception:
        # Fallback for Pallas versions that reject pipeline_mode on top-level
        # pallas_call BlockSpecs; double-buffered weights are still correct and
        # only cost ~0.8 MiB of extra VMEM at D=128.
        out = _call_dae(xp, operands, tb=tb, single_buffer_weights=False)

    return out if Bp == B else out[:B]


def init_params(key, latent_dim):
    """Deterministic init mimicking PyTorch Linear default: U(-1/sqrt(fan_in), 1/sqrt(fan_in))."""
    dims = [(latent_dim, 512), (512, 256), (256, 512), (512, latent_dim)]
    params = {}
    keys = jax.random.split(key, 2 * len(dims))
    for idx, (fan_in, fan_out) in enumerate(dims):
        bound = 1.0 / jnp.sqrt(fan_in)
        w = jax.random.uniform(keys[2 * idx], (fan_in, fan_out),
                               minval=-bound, maxval=bound, dtype=jnp.float32)
        b = jax.random.uniform(keys[2 * idx + 1], (1, fan_out),
                               minval=-bound, maxval=bound, dtype=jnp.float32)
        params[f"w{idx + 1}"] = w
        params[f"b{idx + 1}"] = b
    return params


def latent_dae_ref_bf16(x, p):
    """Pure-JAX reference matching the kernel's numerics (bf16 matmuls, f32 accum)."""
    bf = jnp.bfloat16
    dot = lambda a, w: jax.lax.dot(a.astype(bf), w.astype(bf),
                                   preferred_element_type=jnp.float32)
    h = jnp.maximum(dot(x, p["w1"]) + p["b1"], 0.0)
    h = jnp.maximum(dot(h, p["w2"]) + p["b2"], 0.0)
    h = jnp.maximum(dot(h, p["w3"]) + p["b3"], 0.0)
    return dot(h, p["w4"]) + p["b4"]


def latent_dae_ref_f32(x, p):
    """Full-precision reference of the PyTorch forward (sanity bound)."""
    h = jnp.maximum(x @ p["w1"] + p["b1"], 0.0)
    h = jnp.maximum(h @ p["w2"] + p["b2"], 0.0)
    h = jnp.maximum(h @ p["w3"] + p["b3"], 0.0)
    return h @ p["w4"] + p["b4"]


if __name__ == "__main__":
    latent_dim = 128   # lane axis (multiple of 128; half-fills the 256-wide MXU on v6e/v7x)
    batch = 1024       # 4 batch tiles of 256 -> >=2 "parallel" grid steps per v7x TensorCore

    key = jax.random.PRNGKey(0)
    pkey, xkey = jax.random.split(key)
    params = init_params(pkey, latent_dim)
    x = jax.random.normal(xkey, (batch, latent_dim), dtype=jnp.float32)

    out = jax.block_until_ready(latent_dae_forward(x, params))
    assert out.shape == (batch, latent_dim)
    assert out.dtype == x.dtype

    ref_bf16 = latent_dae_ref_bf16(x, params)
    assert jnp.allclose(out, ref_bf16, atol=1e-2, rtol=1e-2), \
        f"mismatch vs bf16 reference, max abs diff {float(jnp.max(jnp.abs(out - ref_bf16)))}"

    ref_f32 = latent_dae_ref_f32(x, params)
    assert jnp.allclose(out, ref_f32, atol=1e-1, rtol=1e-1), \
        f"mismatch vs f32 reference, max abs diff {float(jnp.max(jnp.abs(out - ref_f32)))}"

    print("KERNEL_OK")
</pallas_src>

<mosaic_0001>
module attributes {stable_mosaic.version = 11 : i64} {
  func.func @_dae_kernel(%arg0: i32, %arg1: memref<256x128xf32, #tpu.memory_space<vmem>>, %arg2: memref<128x512xbf16, #tpu.memory_space<vmem>>, %arg3: memref<1x512xf32, #tpu.memory_space<vmem>>, %arg4: memref<512x256xbf16, #tpu.memory_space<vmem>>, %arg5: memref<1x256xf32, #tpu.memory_space<vmem>>, %arg6: memref<256x512xbf16, #tpu.memory_space<vmem>>, %arg7: memref<1x512xf32, #tpu.memory_space<vmem>>, %arg8: memref<512x128xbf16, #tpu.memory_space<vmem>>, %arg9: memref<1x128xf32, #tpu.memory_space<vmem>>, %arg10: memref<256x128xf32, #tpu.memory_space<vmem>>) attributes {dimension_semantics = [#tpu.dimension_semantics<parallel>], iteration_bounds = array<i64: 4>, scalar_prefetch = 0 : i64, scratch_operands = 0 : i64, tpu.core_type = #tpu.core_type<tc>, window_params = [{transform_indices = @transform_0, window_bounds = array<i64: 256, 128>}, {pipeline_mode = #tpu.pipeline_mode<synchronous>, transform_indices = @transform_1, window_bounds = array<i64: 128, 512>}, {pipeline_mode = #tpu.pipeline_mode<synchronous>, transform_indices = @transform_2, window_bounds = array<i64: 1, 512>}, {pipeline_mode = #tpu.pipeline_mode<synchronous>, transform_indices = @transform_3, window_bounds = array<i64: 512, 256>}, {pipeline_mode = #tpu.pipeline_mode<synchronous>, transform_indices = @transform_4, window_bounds = array<i64: 1, 256>}, {pipeline_mode = #tpu.pipeline_mode<synchronous>, transform_indices = @transform_5, window_bounds = array<i64: 256, 512>}, {pipeline_mode = #tpu.pipeline_mode<synchronous>, transform_indices = @transform_6, window_bounds = array<i64: 1, 512>}, {pipeline_mode = #tpu.pipeline_mode<synchronous>, transform_indices = @transform_7, window_bounds = array<i64: 512, 128>}, {pipeline_mode = #tpu.pipeline_mode<synchronous>, transform_indices = @transform_8, window_bounds = array<i64: 1, 128>}, {transform_indices = @transform_9, window_bounds = array<i64: 256, 128>}]} {
    %c0 = arith.constant 0 : index
    %c0_0 = arith.constant 0 : index
    %0 = vector.load %arg1[%c0, %c0_0] : memref<256x128xf32, #tpu.memory_space<vmem>>, vector<256x128xf32>
    %1 = arith.truncf %0 : vector<256x128xf32> to vector<256x128xbf16>
    %c0_1 = arith.constant 0 : index
    %c0_2 = arith.constant 0 : index
    %2 = vector.load %arg3[%c0_1, %c0_2] : memref<1x512xf32, #tpu.memory_space<vmem>>, vector<1x512xf32>
    %c0_3 = arith.constant 0 : index
    %c0_4 = arith.constant 0 : index
    %3 = vector.load %arg5[%c0_3, %c0_4] : memref<1x256xf32, #tpu.memory_space<vmem>>, vector<1x256xf32>
    %c0_5 = arith.constant 0 : index
    %c0_6 = arith.constant 0 : index
    %4 = vector.load %arg7[%c0_5, %c0_6] : memref<1x512xf32, #tpu.memory_space<vmem>>, vector<1x512xf32>
    %c0_7 = arith.constant 0 : index
    %c0_8 = arith.constant 0 : index
    %5 = vector.load %arg9[%c0_7, %c0_8] : memref<1x128xf32, #tpu.memory_space<vmem>>, vector<1x128xf32>
    %c0_9 = arith.constant 0 : index
    %c0_10 = arith.constant 0 : index
    %6 = vector.load %arg2[%c0_9, %c0_10] : memref<128x512xbf16, #tpu.memory_space<vmem>>, vector<128x512xbf16>
    %cst = arith.constant dense<0.000000e+00> : vector<256x512xf32>
    %7 = tpu.matmul %1, %6, %cst {dimension_numbers = #tpu.dot_dimension_numbers<[1], [0], [0], [1], [0, 0, 1, 1], [], []>} : vector<256x128xbf16>, vector<128x512xbf16>, vector<256x512xf32> -> vector<256x512xf32>
    %8 = vector.broadcast %2 : vector<1x512xf32> to vector<256x512xf32>
    %9 = arith.addf %7, %8 : vector<256x512xf32>
    %cst_11 = arith.constant 0.000000e+00 : f32
    %10 = vector.broadcast %cst_11 : f32 to vector<256x512xf32>
    %11 = arith.maximumf %9, %10 : vector<256x512xf32>
    %12 = arith.truncf %11 : vector<256x512xf32> to vector<256x512xbf16>
    %c0_12 = arith.constant 0 : index
    %c0_13 = arith.constant 0 : index
    %13 = vector.load %arg4[%c0_12, %c0_13] : memref<512x256xbf16, #tpu.memory_space<vmem>>, vector<512x256xbf16>
    %cst_14 = arith.constant dense<0.000000e+00> : vector<256x256xf32>
    %14 = tpu.matmul %12, %13, %cst_14 {dimension_numbers = #tpu.dot_dimension_numbers<[1], [0], [0], [1], [0, 0, 1, 1], [], []>} : vector<256x512xbf16>, vector<512x256xbf16>, vector<256x256xf32> -> vector<256x256xf32>
    %15 = vector.broadcast %3 : vector<1x256xf32> to vector<256x256xf32>
    %16 = arith.addf %14, %15 : vector<256x256xf32>
    %cst_15 = arith.constant 0.000000e+00 : f32
    %17 = vector.broadcast %cst_15 : f32 to vector<256x256xf32>
    %18 = arith.maximumf %16, %17 : vector<256x256xf32>
    %19 = arith.truncf %18 : vector<256x256xf32> to vector<256x256xbf16>
    %c0_16 = arith.constant 0 : index
    %c0_17 = arith.constant 0 : index
    %20 = vector.load %arg6[%c0_16, %c0_17] : memref<256x512xbf16, #tpu.memory_space<vmem>>, vector<256x512xbf16>
    %cst_18 = arith.constant dense<0.000000e+00> : vector<256x512xf32>
    %21 = tpu.matmul %19, %20, %cst_18 {dimension_numbers = #tpu.dot_dimension_numbers<[1], [0], [0], [1], [0, 0, 1, 1], [], []>} : vector<256x256xbf16>, vector<256x512xbf16>, vector<256x512xf32> -> vector<256x512xf32>
    %22 = vector.broadcast %4 : vector<1x512xf32> to vector<256x512xf32>
    %23 = arith.addf %21, %22 : vector<256x512xf32>
    %cst_19 = arith.constant 0.000000e+00 : f32
    %24 = vector.broadcast %cst_19 : f32 to vector<256x512xf32>
    %25 = arith.maximumf %23, %24 : vector<256x512xf32>
    %26 = arith.truncf %25 : vector<256x512xf32> to vector<256x512xbf16>
    %c0_20 = arith.constant 0 : index
    %c0_21 = arith.constant 0 : index
    %27 = vector.load %arg8[%c0_20, %c0_21] : memref<512x128xbf16, #tpu.memory_space<vmem>>, vector<512x128xbf16>
    %cst_22 = arith.constant dense<0.000000e+00> : vector<256x128xf32>
    %28 = tpu.matmul %26, %27, %cst_22 {dimension_numbers = #tpu.dot_dimension_numbers<[1], [0], [0], [1], [0, 0, 1, 1], [], []>} : vector<256x512xbf16>, vector<512x128xbf16>, vector<256x128xf32> -> vector<256x128xf32>
    %29 = vector.broadcast %5 : vector<1x128xf32> to vector<256x128xf32>
    %30 = arith.addf %28, %29 : vector<256x128xf32>
    %c0_23 = arith.constant 0 : index
    %c0_24 = arith.constant 0 : index
    %31 = vector.load %arg10[%c0_23, %c0_24] : memref<256x128xf32, #tpu.memory_space<vmem>>, vector<256x128xf32>
    tpu.vector_store %arg10[%c0_23, %c0_24], %30 {strides = array<i32>} : memref<256x128xf32, #tpu.memory_space<vmem>>, vector<256x128xf32>,
    return
  }
  func.func @transform_0(%arg0: i32) -> (i32, i32) {
    %c0_i32 = arith.constant 0 : i32
    %c0_i32_0 = arith.constant 0 : i32
    return %arg0, %c0_i32 : i32, i32
  }
  func.func @transform_1(%arg0: i32) -> (i32, i32) {
    %c0_i32 = arith.constant 0 : i32
    %c0_i32_0 = arith.constant 0 : i32
    %c0_i32_1 = arith.constant 0 : i32
    return %c0_i32, %c0_i32_0 : i32, i32
  }
  func.func @transform_2(%arg0: i32) -> (i32, i32) {
    %c0_i32 = arith.constant 0 : i32
    %c0_i32_0 = arith.constant 0 : i32
    %c0_i32_1 = arith.constant 0 : i32
    return %c0_i32, %c0_i32_0 : i32, i32
  }
  func.func @transform_3(%arg0: i32) -> (i32, i32) {
    %c0_i32 = arith.constant 0 : i32
    %c0_i32_0 = arith.constant 0 : i32
    %c0_i32_1 = arith.constant 0 : i32
    return %c0_i32, %c0_i32_0 : i32, i32
  }
  func.func @transform_4(%arg0: i32) -> (i32, i32) {
    %c0_i32 = arith.constant 0 : i32
    %c0_i32_0 = arith.constant 0 : i32
    %c0_i32_1 = arith.constant 0 : i32
    return %c0_i32, %c0_i32_0 : i32, i32
  }
  func.func @transform_5(%arg0: i32) -> (i32, i32) {
    %c0_i32 = arith.constant 0 : i32
    %c0_i32_0 = arith.constant 0 : i32
    %c0_i32_1 = arith.constant 0 : i32
    return %c0_i32, %c0_i32_0 : i32, i32
  }
  func.func @transform_6(%arg0: i32) -> (i32, i32) {
    %c0_i32 = arith.constant 0 : i32
    %c0_i32_0 = arith.constant 0 : i32
    %c0_i32_1 = arith.constant 0 : i32
    return %c0_i32, %c0_i32_0 : i32, i32
  }
  func.func @transform_7(%arg0: i32) -> (i32, i32) {
    %c0_i32 = arith.constant 0 : i32
    %c0_i32_0 = arith.constant 0 : i32
    %c0_i32_1 = arith.constant 0 : i32
    return %c0_i32, %c0_i32_0 : i32, i32
  }
  func.func @transform_8(%arg0: i32) -> (i32, i32) {
    %c0_i32 = arith.constant 0 : i32
    %c0_i32_0 = arith.constant 0 : i32
    %c0_i32_1 = arith.constant 0 : i32
    return %c0_i32, %c0_i32_0 : i32, i32
  }
  func.func @transform_9(%arg0: i32) -> (i32, i32) {
    %c0_i32 = arith.constant 0 : i32
    %c0_i32_0 = arith.constant 0 : i32
    return %arg0, %c0_i32 : i32, i32
  }
}

module attributes {stable_mosaic.version = 11 : i64} {
  func.func @_dae_kernel(%arg0: i32, %arg1: memref<256x128xf32, #tpu.memory_space<vmem>>, %arg2: memref<128x512xbf16, #tpu.memory_space<vmem>>, %arg3: memref<1x512xf32, #tpu.memory_space<vmem>>, %arg4: memref<512x256xbf16, #tpu.memory_space<vmem>>, %arg5: memref<1x256xf32, #tpu.memory_space<vmem>>, %arg6: memref<256x512xbf16, #tpu.memory_space<vmem>>, %arg7: memref<1x512xf32, #tpu.memory_space<vmem>>, %arg8: memref<512x128xbf16, #tpu.memory_space<vmem>>, %arg9: memref<1x128xf32, #tpu.memory_space<vmem>>, %arg10: memref<256x128xf32, #tpu.memory_space<vmem>>) attributes {dimension_semantics = [#tpu.dimension_semantics<parallel>], iteration_bounds = array<i64: 4>, scalar_prefetch = 0 : i64, scratch_operands = 0 : i64, tpu.core_type = #tpu.core_type<tc>, window_params = [{transform_indices = @transform_0, window_bounds = array<i64: 256, 128>}, {pipeline_mode = #tpu.pipeline_mode<synchronous>, transform_indices = @transform_1, window_bounds = array<i64: 128, 512>}, {pipeline_mode = #tpu.pipeline_mode<synchronous>, transform_indices = @transform_2, window_bounds = array<i64: 1, 512>}, {pipeline_mode = #tpu.pipeline_mode<synchronous>, transform_indices = @transform_3, window_bounds = array<i64: 512, 256>}, {pipeline_mode = #tpu.pipeline_mode<synchronous>, transform_indices = @transform_4, window_bounds = array<i64: 1, 256>}, {pipeline_mode = #tpu.pipeline_mode<synchronous>, transform_indices = @transform_5, window_bounds = array<i64: 256, 512>}, {pipeline_mode = #tpu.pipeline_mode<synchronous>, transform_indices = @transform_6, window_bounds = array<i64: 1, 512>}, {pipeline_mode = #tpu.pipeline_mode<synchronous>, transform_indices = @transform_7, window_bounds = array<i64: 512, 128>}, {pipeline_mode = #tpu.pipeline_mode<synchronous>, transform_indices = @transform_8, window_bounds = array<i64: 1, 128>}, {transform_indices = @transform_9, window_bounds = array<i64: 256, 128>}]} {
    %c0 = arith.constant 0 : index
    %c0_0 = arith.constant 0 : index
    %0 = vector.load %arg1[%c0, %c0_0] : memref<256x128xf32, #tpu.memory_space<vmem>>, vector<256x128xf32>
    %1 = arith.truncf %0 : vector<256x128xf32> to vector<256x128xbf16>
    %c0_1 = arith.constant 0 : index
    %c0_2 = arith.constant 0 : index
    %2 = vector.load %arg3[%c0_1, %c0_2] : memref<1x512xf32, #tpu.memory_space<vmem>>, vector<1x512xf32>
    %c0_3 = arith.constant 0 : index
    %c0_4 = arith.constant 0 : index
    %3 = vector.load %arg5[%c0_3, %c0_4] : memref<1x256xf32, #tpu.memory_space<vmem>>, vector<1x256xf32>
    %c0_5 = arith.constant 0 : index
    %c0_6 = arith.constant 0 : index
    %4 = vector.load %arg7[%c0_5, %c0_6] : memref<1x512xf32, #tpu.memory_space<vmem>>, vector<1x512xf32>
    %c0_7 = arith.constant 0 : index
    %c0_8 = arith.constant 0 : index
    %5 = vector.load %arg9[%c0_7, %c0_8] : memref<1x128xf32, #tpu.memory_space<vmem>>, vector<1x128xf32>
    %c0_9 = arith.constant 0 : index
    %c0_10 = arith.constant 0 : index
    %6 = vector.load %arg2[%c0_9, %c0_10] : memref<128x512xbf16, #tpu.memory_space<vmem>>, vector<128x512xbf16>
    %cst = arith.constant dense<0.000000e+00> : vector<256x512xf32>
    %7 = tpu.matmul %1, %6, %cst {dimension_numbers = #tpu.dot_dimension_numbers<[1], [0], [0], [1], [0, 0, 1, 1], [], []>} : vector<256x128xbf16>, vector<128x512xbf16>, vector<256x512xf32> -> vector<256x512xf32>
    %8 = vector.broadcast %2 : vector<1x512xf32> to vector<256x512xf32>
    %9 = arith.addf %7, %8 : vector<256x512xf32>
    %cst_11 = arith.constant 0.000000e+00 : f32
    %10 = vector.broadcast %cst_11 : f32 to vector<256x512xf32>
    %11 = arith.maximumf %9, %10 : vector<256x512xf32>
    %12 = arith.truncf %11 : vector<256x512xf32> to vector<256x512xbf16>
    %c0_12 = arith.constant 0 : index
    %c0_13 = arith.constant 0 : index
    %13 = vector.load %arg4[%c0_12, %c0_13] : memref<512x256xbf16, #tpu.memory_space<vmem>>, vector<512x256xbf16>
    %cst_14 = arith.constant dense<0.000000e+00> : vector<256x256xf32>
    %14 = tpu.matmul %12, %13, %cst_14 {dimension_numbers = #tpu.dot_dimension_numbers<[1], [0], [0], [1], [0, 0, 1, 1], [], []>} : vector<256x512xbf16>, vector<512x256xbf16>, vector<256x256xf32> -> vector<256x256xf32>
    %15 = vector.broadcast %3 : vector<1x256xf32> to vector<256x256xf32>
    %16 = arith.addf %14, %15 : vector<256x256xf32>
    %cst_15 = arith.constant 0.000000e+00 : f32
    %17 = vector.broadcast %cst_15 : f32 to vector<256x256xf32>
    %18 = arith.maximumf %16, %17 : vector<256x256xf32>
    %19 = arith.truncf %18 : vector<256x256xf32> to vector<256x256xbf16>
    %c0_16 = arith.constant 0 : index
    %c0_17 = arith.constant 0 : index
    %20 = vector.load %arg6[%c0_16, %c0_17] : memref<256x512xbf16, #tpu.memory_space<vmem>>, vector<256x512xbf16>
    %cst_18 = arith.constant dense<0.000000e+00> : vector<256x512xf32>
    %21 = tpu.matmul %19, %20, %cst_18 {dimension_numbers = #tpu.dot_dimension_numbers<[1], [0], [0], [1], [0, 0, 1, 1], [], []>} : vector<256x256xbf16>, vector<256x512xbf16>, vector<256x512xf32> -> vector<256x512xf32>
    %22 = vector.broadcast %4 : vector<1x512xf32> to vector<256x512xf32>
    %23 = arith.addf %21, %22 : vector<256x512xf32>
    %cst_19 = arith.constant 0.000000e+00 : f32
    %24 = vector.broadcast %cst_19 : f32 to vector<256x512xf32>
    %25 = arith.maximumf %23, %24 : vector<256x512xf32>
    %26 = arith.truncf %25 : vector<256x512xf32> to vector<256x512xbf16>
    %c0_20 = arith.constant 0 : index
    %c0_21 = arith.constant 0 : index
    %27 = vector.load %arg8[%c0_20, %c0_21] : memref<512x128xbf16, #tpu.memory_space<vmem>>, vector<512x128xbf16>
    %cst_22 = arith.constant dense<0.000000e+00> : vector<256x128xf32>
    %28 = tpu.matmul %26, %27, %cst_22 {dimension_numbers = #tpu.dot_dimension_numbers<[1], [0], [0], [1], [0, 0, 1, 1], [], []>} : vector<256x512xbf16>, vector<512x128xbf16>, vector<256x128xf32> -> vector<256x128xf32>
    %29 = vector.broadcast %5 : vector<1x128xf32> to vector<256x128xf32>
    %30 = arith.addf %28, %29 : vector<256x128xf32>
    %c0_23 = arith.constant 0 : index
    %c0_24 = arith.constant 0 : index
    %31 = vector.load %arg10[%c0_23, %c0_24] : memref<256x128xf32, #tpu.memory_space<vmem>>, vector<256x128xf32>
    tpu.vector_store %arg10[%c0_23, %c0_24], %30 {strides = array<i32>} : memref<256x128xf32, #tpu.memory_space<vmem>>, vector<256x128xf32>,
    return
  }
  func.func @transform_0(%arg0: i32) -> (i32, i32) {
    %c0_i32 = arith.constant 0 : i32
    %c0_i32_0 = arith.constant 0 : i32
    return %arg0, %c0_i32 : i32, i32
  }
  func.func @transform_1(%arg0: i32) -> (i32, i32) {
    %c0_i32 = arith.constant 0 : i32
    %c0_i32_0 = arith.constant 0 : i32
    %c0_i32_1 = arith.constant 0 : i32
    return %c0_i32, %c0_i32_0 : i32, i32
  }
  func.func @transform_2(%arg0: i32) -> (i32, i32) {
    %c0_i32 = arith.constant 0 : i32
    %c0_i32_0 = arith.constant 0 : i32
    %c0_i32_1 = arith.constant 0 : i32
    return %c0_i32, %c0_i32_0 : i32, i32
  }
  func.func @transform_3(%arg0: i32) -> (i32, i32) {
    %c0_i32 = arith.constant 0 : i32
    %c0_i32_0 = arith.constant 0 : i32
    %c0_i32_1 = arith.constant 0 : i32
    return %c0_i32, %c0_i32_0 : i32, i32
  }
  func.func @transform_4(%arg0: i32) -> (i32, i32) {
    %c0_i32 = arith.constant 0 : i32
    %c0_i32_0 = arith.constant 0 : i32
    %c0_i32_1 = arith.constant 0 : i32
    return %c0_i32, %c0_i32_0 : i32, i32
  }
  func.func @transform_5(%arg0: i32) -> (i32, i32) {
    %c0_i32 = arith.constant 0 : i32
    %c0_i32_0 = arith.constant 0 : i32
    %c0_i32_1 = arith.constant 0 : i32
    return %c0_i32, %c0_i32_0 : i32, i32
  }
  func.func @transform_6(%arg0: i32) -> (i32, i32) {
    %c0_i32 = arith.constant 0 : i32
    %c0_i32_0 = arith.constant 0 : i32
    %c0_i32_1 = arith.constant 0 : i32
    return %c0_i32, %c0_i32_0 : i32, i32
  }
  func.func @transform_7(%arg0: i32) -> (i32, i32) {
    %c0_i32 = arith.constant 0 : i32
    %c0_i32_0 = arith.constant 0 : i32
    %c0_i32_1 = arith.constant 0 : i32
    return %c0_i32, %c0_i32_0 : i32, i32
  }
  func.func @transform_8(%arg0: i32) -> (i32, i32) {
    %c0_i32 = arith.constant 0 : i32
    %c0_i32_0 = arith.constant 0 : i32
    %c0_i32_1 = arith.constant 0 : i32
    return %c0_i32, %c0_i32_0 : i32, i32
  }
  func.func @transform_9(%arg0: i32) -> (i32, i32) {
    %c0_i32 = arith.constant 0 : i32
    %c0_i32_0 = arith.constant 0 : i32
    return %arg0, %c0_i32 : i32, i32
  }
}

</mosaic_0001>

<bundles_post_ra>
// kernel: tpu_custom_call.1
= control target key start
LH: loop header
LB: loop body
LE: loop exit
PB: predicated region body
PF: predicated region fallthrough
CT: control target
= control target key end

     0   :  { %s6192_s0 = inlined_call_operand.hbm [shape: f32[1024,128], index: 0, kind: input, shape index: {}]   ;;  %s6193_s1 = inlined_call_operand.hbm [shape: bf16[128,512], index: 1, kind: input, shape index: {}]   ;;  %s6194_s2 = inlined_call_operand.vmem [shape: f32[1,512], index: 2, kind: input, shape index: {}]   ;;  %s6195_s3 = inlined_call_operand.hbm [shape: bf16[512,256], index: 3, kind: input, shape index: {}]   ;;  %s6196_s4 = inlined_call_operand.vmem [shape: f32[1,256], index: 4, kind: input, shape index: {}]   ;;  %s6197_s5 = inlined_call_operand.hbm [shape: bf16[256,512], index: 5, kind: input, shape index: {}]   ;;  %s6198_s6 = inlined_call_operand.vmem [shape: f32[1,512], index: 6, kind: input, shape index: {}]   ;;  %s6199_s7 = inlined_call_operand.hbm [shape: bf16[512,128], index: 7, kind: input, shape index: {}]   ;;  %s6200_s8 = inlined_call_operand.vmem [shape: f32[1,128], index: 8, kind: input, shape index: {}]   ;;  %s6201_s9 = inlined_call_operand.hbm [shape: f32[1024,128], index: 9, kind: output, shape index: {}]  }
   0x1   :  { %6208 = sst [smem:[#allocation18_spill]] %s6201_s9 }
   0x2   :  { %14 = vsyncpa [#allocation3], 0 }
   0x3   :  { %16 = vsyncpa [#allocation3 + $0x1], 0 }
   0x4   :  { %17 = vsyncpa [#allocation6], 0 }
   0x5   :  { %18 = vsyncpa [#allocation9], 0 }
   0x6   :  { %19 = vsyncpa [#allocation4], 0 }
   0x7   :  { %21 = vsyncpa [#allocation4 + $0x1], 0  ;;  %s5076_s30 = smov 0   ;;  %s5078_s10 = smov 0  }
   0x8   :  { %s5080_s11 = smov 0   ;;  %s5082_s12 = smov 0  }
   0x9 LB: > { %6209 = sst [smem:[#allocation16_spill]] %s4997_s30  ;;  %s5097_s13 = sadd.s32 4294967295, %s5009_s12   ;;  %s5009_s12 = sphi %s5082_s12, %s6233_s12   ;;  %s5005_s11 = sphi %s5080_s11, %s6232_s11   ;;  %s5001_s10 = sphi %s5078_s10, %s6231_s10   ;;  %s4997_s30 = sphi %s5076_s30, %s6230_s30  }
   0xa   : > { %s3856_s14 = sadd.s32 4294967294, %s5009_s12   ;;  %p47_p0 = scmp.ne.s32.totalorder %s5001_s10, %s4997_s30 }
   0xb   : > { %p6202_p1 = scmp.eq.s32.totalorder %s5097_s13, 0  ;;  %p245_p3 = scmp.eq.s32.totalorder %s3856_s14, 3 }
   0xc   : > { %p3857_p5 = scmp.ge.s32.totalorder %s5009_s12, 1  ;;  %p252_p7 = scmp.lt.s32.totalorder %s5009_s12, 5 }
   0xd   : > { %p5106_p4 = por %p6202_p1, %p47_p0  ;;  %p5111_p6 = por %p245_p3, %p47_p0 }
   0xe   : > { %p5116_p8 = pnand %p3857_p5, %p252_p7  ;;  %s5011_s18 = smov [#allocation5]  }
   0xf   : > { %s6210_s15 = scalar_select %p5106_p4, 1, 0 }
  0x10   : > { %s6211_s16 = scalar_select %p5111_p6, 1, 0 }
  0x11   : > { %s6213_s17 = scalar_select %p5116_p8, 1, 0 }
  0x12   : > { %6212 = sst [smem:[#allocation17_spill]] %s6211_s16  ;;  %s264_s19 = sshll.u32 %s5011_s18, 4  ;;  %s5120_s19 = int_to_ptr.vmem [resolvable:$true] %s264_s19 }
  0x13   : > { %p4445_p9 = pneg %p5116_p8  ;;  %s5012_s21 = smov [#allocation8]  }
  0x14   : > { %s296_s22 = sshll.u32 %s5012_s21, 4  ;;  %s5013_s23 = smov [#allocation7]   ;;  %s5130_s22 = int_to_ptr.vmem [resolvable:$true] %s296_s22 }
  0x15   : > { %p5126_p10 = pnand %p4445_p9, %p6202_p1  ;;  %s5132_s24 = sshll.u32 %s5013_s23, 4  ;;  %s281_s24 = int_to_ptr.vmem [resolvable:$true] %s5132_s24 }
  0x16   : > { %s4793_s27 = scalar_lea.hbm %s6193_s1, 4096 }
  0x17   : > { %p4794_p11 = scmp.ne.s32.totalorder %s6193_s1, %s4793_s27  ;;  %p5142_p12 = pneg %p5126_p10 }
  0x18   : > { %p4800_p3 = scmp.lt.u32.totalorder %s4793_s27, %s6193_s1 }
  0x19   : > { %p4796_p13 = pnand %p5142_p12, %p4794_p11 }
  0x1b   : > { %p4797_p0 = pneg %p4796_p13 }
  0x1d   : > { %p4802_p5 = pnand %p4800_p3, %p4797_p0 }
  0x1f   : > { %4805 = shalt.err (!%p4802_p5)
}
  0x20   : > { %s4806_s23 = scalar_lea.vmem %s5120_s19, 4096  ;;  %p4814_p2 = scmp.lt.s32.totalorder %s5120_s19, %s5120_s19 }
  0x21   : > { %p4807_p7 = scmp.ne.s32.totalorder %s5120_s19, %s4806_s23  ;;  %p4815_p6 = scmp.lt.s32.totalorder %s4806_s23, %s4806_s23 }
  0x23   : > { %p4809_p9 = pnand %p4807_p7, %p5142_p12  ;;  %p4816_p11 = por %p4815_p6, %p4814_p2 }
  0x25   : > { %p4810_p1 = pneg %p4809_p9 }
  0x27   : > { %p4817_p13 = pnand %p4816_p11, %p4810_p1 }
  0x29   : > { %4820 = shalt.err (!%p4817_p13)
}
  0x2a   : > { %s5014_s25 = smov 256   ;;  %s5015_s26 = smov 16  }
  0x2b   : > { %4448 = dma.hbm_to_vmem [thread:$0]  (!%p5126_p10), %s6193_s1, 4096, %s5120_s19, [#allocation6], %s5014_s25, %s5014_s25, %s5015_s26  }
  0x2c   : > { %s4821_s21 = scalar_lea.hbm %s6197_s5, 8192 }
  0x2d   : > { %p4822_p2 = scmp.ne.s32.totalorder %s6197_s5, %s4821_s21  ;;  %p4828_p0 = scmp.lt.u32.totalorder %s4821_s21, %s6197_s5 }
  0x2f   : > { %p4824_p1 = pnand %p4822_p2, %p5142_p12 }
  0x31   : > { %p4825_p6 = pneg %p4824_p1 }
  0x33   : > { %p4830_p3 = pnand %p4828_p0, %p4825_p6 }
  0x35   : > { %4833 = shalt.err (!%p4830_p3)
}
  0x36   : > { %s4834_s19 = scalar_lea.vmem %s5130_s22, 8192  ;;  %p4842_p11 = scmp.lt.s32.totalorder %s5130_s22, %s5130_s22 }
  0x37   : > { %p4835_p5 = scmp.ne.s32.totalorder %s5130_s22, %s4834_s19  ;;  %p4843_p13 = scmp.lt.s32.totalorder %s4834_s19, %s4834_s19 }
  0x39   : > { %p4837_p7 = pnand %p4835_p5, %p5142_p12  ;;  %p4844_p2 = por %p4843_p13, %p4842_p11 }
  0x3b   : > { %p4838_p9 = pneg %p4837_p7 }
  0x3d   : > { %p4845_p1 = pnand %p4844_p2, %p4838_p9 }
  0x3f   : > { %4848 = shalt.err (!%p4845_p1)
}
  0x40   : > { %4454 = dma.hbm_to_vmem [thread:$0]  (!%p5126_p10), %s6197_s5, 8192, %s5130_s22, [#allocation9], %s5014_s25, %s5014_s25, %s5015_s26  }
  0x41   : > { %s4849_s28 = scalar_lea.hbm %s6195_s3, 8192 }
  0x42   : > { %p4850_p6 = scmp.ne.s32.totalorder %s6195_s3, %s4849_s28  ;;  %p4856_p5 = scmp.lt.u32.totalorder %s4849_s28, %s6195_s3 }
  0x44   : > { %p4852_p0 = pnand %p4850_p6, %p5142_p12 }
  0x46   : > { %p4853_p3 = pneg %p4852_p0 }
  0x48   : > { %p4858_p7 = pnand %p4856_p5, %p4853_p3 }
  0x4a   : > { %4861 = shalt.err (!%p4858_p7)
}
  0x4b   : > { %s4862_s19 = scalar_lea.vmem %s281_s24, 8192  ;;  %p4870_p2 = scmp.lt.s32.totalorder %s281_s24, %s281_s24 }
  0x4c   : > { %p4863_p9 = scmp.ne.s32.totalorder %s281_s24, %s4862_s19  ;;  %p4871_p1 = scmp.lt.s32.totalorder %s4862_s19, %s4862_s19 }
  0x4e   : > { %p4865_p11 = pnand %p4863_p9, %p5142_p12  ;;  %p4872_p4 = por %p4871_p1, %p4870_p2 }
  0x50   : > { %p4866_p13 = pneg %p4865_p11 }
  0x52   : > { %p4873_p8 = pnand %p4872_p4, %p4866_p13 }
  0x54   : > { %4876 = shalt.err (!%p4873_p8)
}
  0x55   : > { %s5016_s22 = smov 128   ;;  %s5017_s25 = smov 8  }
  0x56   : > { %4451 = dma.hbm_to_vmem [thread:$0]  (!%p5126_p10), %s6195_s3, 8192, %s281_s24, [#allocation6], %s5016_s22, %s5016_s22, %s5017_s25  }
  0x57   : > { %s5018_s30 = smov [#allocation10]   ;;  %s4877_s29 = scalar_lea.hbm %s6199_s7, 4096 }
  0x58   : > { %s312_s16 = sshll.u32 %s5018_s30, 4  ;;  %p4878_p4 = scmp.ne.s32.totalorder %s6199_s7, %s4877_s29  ;;  %s313_s16 = int_to_ptr.vmem [resolvable:$true] %s312_s16 }
  0x59   : > { %p4884_p0 = scmp.lt.u32.totalorder %s4877_s29, %s6199_s7 }
  0x5a   : > { %p4880_p8 = pnand %p4878_p4, %p5142_p12 }
  0x5c   : > { %p4881_p6 = pneg %p4880_p8 }
  0x5e   : > { %p4886_p3 = pnand %p4884_p0, %p4881_p6 }
  0x60   : > { %4889 = shalt.err (!%p4886_p3)
}
  0x61   : > { %s4890_s24 = scalar_lea.vmem %s313_s16, 4096  ;;  %p4898_p11 = scmp.lt.s32.totalorder %s313_s16, %s313_s16 }
  0x62   : > { %p4891_p5 = scmp.ne.s32.totalorder %s313_s16, %s4890_s24  ;;  %p4899_p13 = scmp.lt.s32.totalorder %s4890_s24, %s4890_s24 }
  0x64   : > { %p4893_p7 = pnand %p4891_p5, %p5142_p12  ;;  %p4900_p2 = por %p4899_p13, %p4898_p11 }
  0x66   : > { %p4894_p9 = pneg %p4893_p7 }
  0x68   : > { %p4901_p1 = pnand %p4900_p2, %p4894_p9 }
  0x6a   : > { %4904 = shalt.err (!%p4901_p1)
}
  0x6b   : > { %s5019_s26 = smov 64   ;;  %s5020_s14 = smov 4  }
  0x6c   : > { %4457 = dma.hbm_to_vmem [thread:$0]  (!%p5126_p10), %s6199_s7, 4096, %s313_s16, [#allocation9], %s5019_s26, %s5019_s26, %s5020_s14  }
  0x6d   : > { %s5227_s27 = sadd.s32 1, %s5009_s12   ;;  %s34_s29 = sadd.s32 1, %s5005_s11 }
  0x6e   : > { %s31_s28 = ssub.s32 %s5009_s12, %s5227_s27  ;;  %p41_p4 = scmp.ne.s32.totalorder %s5005_s11, %s5001_s10 }
  0x6f   : > { %p32_p12 = scmp.eq.s32.totalorder %s31_s28, 0  ;;  %p42_p8 = scmp.eq.s32.totalorder %s5009_s12, 0 }
  0x70   : > { %p6216_p0 = scmp.eq.s32.totalorder %s5097_s13, 3  ;;  %p4470_p5 = scmp.lt.s32.totalorder %s5009_s12, 4 }
  0x71   : > { %s5236_s18 = scalar_select %p32_p12, %s5005_s11, %s34_s29  }
  0x72   : > { %p43_p6 = por %p42_p8, %p41_p4  ;;  %p5240_p3 = por %p6216_p0, %p41_p4 }
  0x73   : > { %s329_s20 = sand.u32 1, %s5005_s11   ;;  %s4071_s16 = sshll.u32 %s5009_s12, 12 }
  0x74   : > { %s3863_s23 = sshll.u32 %s329_s20, 8  ;;  %s5250_s26 = scalar_lea.hbm %s6192_s0, %s4071_s16 }
  0x75   : > { %s333_s14 = scalar_lea.vmem [#allocation2], %s3863_s23  ;;  %p5254_p10 = pnand %p4470_p5, %p43_p6 }
  0x76   : > { %s340_s9 = sshll.u32 %s333_s14, 4  ;;  %s5258_s28 = scalar_lea.sflag [#allocation3], %s329_s20  ;;  %s5252_s9 = int_to_ptr.vmem [resolvable:$true] %s340_s9 }
  0x77   : > { %s4905_s29 = scalar_lea.hbm %s5250_s26, 4096  ;;  %p4907_p9 = pneg %p5254_p10 }
  0x78   : > { %p4906_p7 = scmp.ne.s32.totalorder %s5250_s26, %s4905_s29  ;;  %s4910_s19 = scalar_lea.hbm %s6192_s0, 16384 }
  0x79   : > { %p4911_p2 = scmp.lt.u32.totalorder %s5250_s26, %s6192_s0  ;;  %p4912_p1 = scmp.lt.u32.totalorder %s4910_s19, %s4905_s29 }
  0x7a   : > { %p4908_p11 = pnand %p4907_p9, %p4906_p7  ;;  %p4914_p4 = scmp.lt.u32.totalorder %s4905_s29, %s5250_s26 }
  0x7b   : > { %p4913_p12 = por %p4912_p1, %p4911_p2 }
  0x7c   : > { %p4909_p13 = pneg %p4908_p11 }
  0x7d   : > { %p4915_p8 = por %p4914_p4, %p4913_p12 }
  0x7f   : > { %p4916_p6 = pnand %p4915_p8, %p4909_p13 }
  0x81   : > { %4919 = shalt.err (!%p4916_p6)
}
  0x82   : > { %s4920_s20 = scalar_lea.vmem %s5252_s9, 4096  ;;  %s5021_s23 = smov [#allocation2]  }
  0x83   : > { %p4921_p0 = scmp.ne.s32.totalorder %s5252_s9, %s4920_s20  ;;  %s4925_s16 = sshll.u32 %s5021_s23, 4  ;;  %s4926_s16 = int_to_ptr.vmem [resolvable:$false] %s4925_s16 }
  0x84   : > { %s4927_s24 = scalar_lea.vmem %s4926_s16, 8192  ;;  %p4928_p11 = scmp.lt.s32.totalorder %s5252_s9, %s4926_s16 }
  0x85   : > { %p4923_p5 = pnand %p4921_p0, %p4907_p9  ;;  %p4929_p2 = scmp.lt.s32.totalorder %s4927_s24, %s4920_s20 }
  0x87   : > { %p4924_p7 = pneg %p4923_p5  ;;  %p4930_p1 = por %p4929_p2, %p4928_p11 }
  0x89   : > { %p4931_p12 = pnand %p4930_p1, %p4924_p7 }
  0x8b   : > { %4934 = shalt.err (!%p4931_p12)
}
  0x8c   : > { %4461 = dma.hbm_to_vmem [thread:$0]  (!%p5254_p10), %s5250_s26, 4096, %s5252_s9, %s5258_s28, %s5016_s22, %s5016_s22, %s5017_s25  }
  0x8d   : > { %p6219_p9 = scmp.ne.s32.totalorder %s6213_s17, 0 }
  0x8e   : > { %s5292_s29 = sand.u32 (!%p6219_p9), 1, %s5001_s10   ;;  %p6220_p13 = scmp.ne.s32.totalorder (!%p6219_p9), %s6210_s15, 0 }
  0x8f   : > { %352 = sbr.rel (%p6219_p9) target bundleno = 1468 (0x5bc), region = 56  ;;  %s3867_s19 = sshll.u32 (!%p6219_p9), %s5292_s29, 8 }
  0x90   : > { %s355_s14 = scalar_lea.sflag (!%p6219_p9), [#allocation3], %s5292_s29  ;;  %s5298_s30 = scalar_lea.vmem (!%p6219_p9), [#allocation2], %s3867_s19 }
  0x96   : > { %4980 = dma.done.wait (%p6220_p13), %s355_s14, 4096  }
  0x97   : > { %4982 = vsyncadd (%p6220_p13), %s355_s14, 4294963200  ;;  %p6221_p10 = scmp.eq.s32.totalorder %s5097_s13, 0 }
  0x99   : > { %4984 = dma.done.wait (%p6221_p10), [#allocation6], 12288   ;;  %p6222_p4 = pmov %p6221_p10 }
  0x9b   : > { %4986 = vsyncadd (%p6222_p4), [#allocation6], 4294955008  ;;  %p6223_p8 = pmov %p6222_p4 }
  0x9c   : > { %p6224_p6 = pmov %p6222_p4 }
  0x9d   : > { %4988 = dma.done.wait (%p6223_p8), [#allocation9], 12288  }
  0x9e   : > { %4990 = vsyncadd (%p6224_p6), [#allocation9], 4294955008  ;;  %v5022_v0 = vmov 0   ;;  %v4521_v1 = vld [vmem:[#allocation5 + $0x4] ss:$16 sps:$4 sm:$0xff]   ;;  %v413_v23 = vld [vmem:[%s5298_s30 + $0x8] sm:$0xff] }
  0x9f   : > { %709 = vmatprep.mubr.bf16.mxu0 %v5022_v0  ;;  %902 = vmatprep.mubr.bf16.mxu1 %v5022_v0  ;;  %v4523_v2 = vld [vmem:[#allocation5] ss:$16 sps:$4 sm:$0xff]   ;;  %v4524_v3 = vld [vmem:[#allocation5 + $0x24] ss:$16 sps:$4 sm:$0xff]   ;;  %v4545_v13 = vld [vmem:[#allocation5 + $0xc] ss:$16 sps:$4 sm:$0xff]  }
  0xa0   : > { %677 = vmatprep.subr.bf16.mxu0 %v4521_v1  ;;  %v4526_v4 = vld [vmem:[#allocation5 + $0x20] ss:$16 sps:$4 sm:$0xff]   ;;  %v4527_v5 = vld [vmem:[#allocation5 + $0x44] ss:$16 sps:$4 sm:$0xff]   ;;  %870 = vmatprep.subr.bf16.mxu1 %v4545_v13  ;;  %v4550_v16 = vld [vmem:[#allocation5 + $0x8] ss:$16 sps:$4 sm:$0xff]  }
  0xa1   : > { %678 = vmatpush1.bf16.msra.mxu0 %v4523_v2  ;;  %v4529_v6 = vld [vmem:[#allocation5 + $0x40] ss:$16 sps:$4 sm:$0xff]   ;;  %v4530_v7 = vld [vmem:[#allocation5 + $0x64] ss:$16 sps:$4 sm:$0xff]   ;;  %v4551_v18 = vld [vmem:[#allocation5 + $0x2c] ss:$16 sps:$4 sm:$0xff]   ;;  %871 = vmatpush1.bf16.msra.mxu1 %v4550_v16 }
  0xa2   : > { %679 = vmatprep.subr.bf16.mxu0 %v4524_v3  ;;  %v4532_v8 = vld [vmem:[#allocation5 + $0x60] ss:$16 sps:$4 sm:$0xff]   ;;  %v4533_v9 = vld [vmem:[#allocation5 + $0x84] ss:$16 sps:$4 sm:$0xff]   ;;  %v4553_v19 = vld [vmem:[#allocation5 + $0x28] ss:$16 sps:$4 sm:$0xff]   ;;  %872 = vmatprep.subr.bf16.mxu1 %v4551_v18 }
  0xa3   : > { %v4535_v10 = vld [vmem:[#allocation5 + $0x80] ss:$16 sps:$4 sm:$0xff]   ;;  %v4536_v11 = vld [vmem:[#allocation5 + $0xa4] ss:$16 sps:$4 sm:$0xff]   ;;  %v4554_v20 = vld [vmem:[#allocation5 + $0x4c] ss:$16 sps:$4 sm:$0xff]  }
  0xa4   : > { %v4538_v12 = vld [vmem:[#allocation5 + $0xa0] ss:$16 sps:$4 sm:$0xff]   ;;  %v4539_v14 = vld [vmem:[#allocation5 + $0xc4] ss:$16 sps:$4 sm:$0xff]   ;;  %v4559_v25 = vld [vmem:[#allocation5 + $0x48] ss:$16 sps:$4 sm:$0xff]  }
  0xa5   : > { %680 = vmatpush1.bf16.msra.mxu0 %v4526_v4  ;;  %v4541_v15 = vld [vmem:[#allocation5 + $0xc0] ss:$16 sps:$4 sm:$0xff]   ;;  %v4542_v17 = vld [vmem:[#allocation5 + $0xe4] ss:$16 sps:$4 sm:$0xff]   ;;  %873 = vmatpush1.bf16.msra.mxu1 %v4553_v19  ;;  %v4560_v26 = vld [vmem:[#allocation5 + $0x6c] ss:$16 sps:$4 sm:$0xff]  }
  0xa6   : > { %681 = vmatprep.subr.bf16.mxu0 %v4527_v5  ;;  %v4544_v21 = vld [vmem:[#allocation5 + $0xe0] ss:$16 sps:$4 sm:$0xff]   ;;  %v4549_v24 = vld [vmem:[#allocation7 + $0x4] ss:$8 sps:$4 sm:$0xff]   ;;  %874 = vmatprep.subr.bf16.mxu1 %v4554_v20  ;;  %v4558_v29 = vld [vmem:[#allocation7 + $0x14] ss:$8 sps:$4 sm:$0xff]  }
  0xa7   : > { %v412_v22 = vld [vmem:[%s5298_s30] sm:$0xff]  ;;  %v4562_v30 = vld [vmem:[#allocation5 + $0x68] ss:$16 sps:$4 sm:$0xff]   ;;  %v4563_v31 = vld [vmem:[#allocation5 + $0x8c] ss:$16 sps:$4 sm:$0xff]   ;;  %s6048_s23 = scalar_lea.vmem [#allocation11], %s3867_s19 }
  0xa8   : > { %v444_v27 = vpack.c.bf16 %v413_v23, %v412_v22  ;;  %v4547_v28 = vld [vmem:[#allocation7] ss:$8 sps:$4 sm:$0xff]   ;;  %v414_v32 = vld [vmem:[%s5298_s30 + $0x10] sm:$0xff]  ;;  %v415_v33 = vld [vmem:[%s5298_s30 + $0x18] sm:$0xff]  ;;  %s4072_s16 = sshll.u32 %s5097_s13, 12  ;;  %s3745_s24 = sshll.u32 %s6048_s23, 4  ;;  %s6147_s24 = int_to_ptr.vmem [resolvable:$true] %s3745_s24 }
  0xa9   : > { %682 = vmatpush1.bf16.msra.mxu0 %v4529_v6  ;;  %875 = vmatpush1.bf16.msra.mxu1 %v4559_v25  ;;  %v4556_v34 = vld [vmem:[#allocation7 + $0x10] ss:$8 sps:$4 sm:$0xff]   ;;  %v4567_v35 = vld [vmem:[#allocation7 + $0x24] ss:$8 sps:$4 sm:$0xff]   ;;  %v445_v38 = vpack.c.bf16 %v415_v33, %v414_v32  ;;  %v4565_v39 = vld [vmem:[#allocation7 + $0x20] ss:$8 sps:$4 sm:$0xff]  }
  0xaa   : > { %683 = vmatprep.subr.bf16.mxu0 %v4530_v7  ;;  %876 = vmatprep.subr.bf16.mxu1 %v4560_v26  ;;  %v4568_v36 = vld [vmem:[#allocation5 + $0x88] ss:$16 sps:$4 sm:$0xff]   ;;  %v4569_v37 = vld [vmem:[#allocation5 + $0xac] ss:$16 sps:$4 sm:$0xff]   ;;  %v416_v43 = vld [vmem:[%s5298_s30 + $0x20] sm:$0xff]  ;;  %s3732_s13 = scalar_lea.sflag [#allocation4], %s5292_s29 }
  0xab   : > { %v4571_v40 = vld [vmem:[#allocation5 + $0xa8] ss:$16 sps:$4 sm:$0xff]   ;;  %v4576_v41 = vld [vmem:[#allocation7 + $0x34] ss:$8 sps:$4 sm:$0xff]   ;;  %v4583_v47 = vld [vmem:[#allocation7 + $0x44] ss:$8 sps:$4 sm:$0xff]  }
  0xac   : > { %v4572_v42 = vld [vmem:[#allocation5 + $0xcc] ss:$16 sps:$4 sm:$0xff]   ;;  %v4574_v45 = vld [vmem:[#allocation7 + $0x30] ss:$8 sps:$4 sm:$0xff]   ;;  %v4581_v51 = vld [vmem:[#allocation7 + $0x40] ss:$8 sps:$4 sm:$0xff]  }
  0xad   : > { %684 = vmatpush1.bf16.msra.mxu0 %v4532_v8  ;;  %877 = vmatpush1.bf16.msra.mxu1 %v4562_v30  ;;  %v417_v44 = vld [vmem:[%s5298_s30 + $0x28] sm:$0xff]  ;;  %v4586_v52 = vld [vmem:[#allocation7 + $0x54] ss:$8 sps:$4 sm:$0xff]   ;;  %v4584_v55 = vld [vmem:[#allocation7 + $0x50] ss:$8 sps:$4 sm:$0xff]   ;;  %s4935_s22 = scalar_lea.vmem %s6147_s24, 4096 }
  0xae   : > { %685 = vmatprep.subr.bf16.mxu0 %v4533_v9  ;;  %878 = vmatprep.subr.bf16.mxu1 %v4563_v31  ;;  %v4577_v46 = vld [vmem:[#allocation5 + $0xc8] ss:$16 sps:$4 sm:$0xff]   ;;  %v4578_v48 = vld [vmem:[#allocation5 + $0xec] ss:$16 sps:$4 sm:$0xff]   ;;  %v446_v49 = vpack.c.bf16 %v417_v44, %v416_v43  ;;  %v418_v53 = vld [vmem:[%s5298_s30 + $0x30] sm:$0xff]  ;;  %p4936_p0 = scmp.ne.s32.totalorder %s6147_s24, %s4935_s22  ;;  %s5023_s25 = smov [#allocation11]  }
  0xaf   : > { %v4580_v50 = vld [vmem:[#allocation5 + $0xe8] ss:$16 sps:$4 sm:$0xff]   ;;  %v4589_v56 = vld [vmem:[#allocation7 + $0x64] ss:$8 sps:$4 sm:$0xff]   ;;  %v4592_v59 = vld [vmem:[#allocation7 + $0x74] ss:$8 sps:$4 sm:$0xff]  }
  0xb0   : > { %v419_v54 = vld [vmem:[%s5298_s30 + $0x38] sm:$0xff]  ;;  %v4587_v57 = vld [vmem:[#allocation7 + $0x60] ss:$8 sps:$4 sm:$0xff]   ;;  %v4595_v63 = vld [vmem:[#allocation7 + $0x84] ss:$8 sps:$4 sm:$0xff]   ;;  %p4937_p5 = pnand %p4936_p0, %p5240_p3  ;;  %s4939_s26 = sshll.u32 %s5023_s25, 4  ;;  %s4940_s26 = int_to_ptr.vmem [resolvable:$false] %s4939_s26 }
  0xb1   : > { %686 = vmatpush1.bf16.msra.mxu0 %v4535_v10  ;;  %879 = vmatpush1.bf16.msra.mxu1 %v4568_v36  ;;  %v447_v58 = vpack.c.bf16 %v419_v54, %v418_v53  ;;  %v420_v60 = vld [vmem:[%s5298_s30 + $0x40] sm:$0xff]  ;;  %v421_v61 = vld [vmem:[%s5298_s30 + $0x48] sm:$0xff]  ;;  %v4590_v62 = vld [vmem:[#allocation7 + $0x70] ss:$8 sps:$4 sm:$0xff]   ;;  %s4941_s9 = scalar_lea.vmem %s4940_s26, 8192  ;;  %p4942_p11 = scmp.lt.s32.totalorder %s6147_s24, %s4940_s26 }
  0xb2   : > { %687 = vmatprep.subr.bf16.mxu0 %v4536_v11  ;;  %880 = vmatprep.subr.bf16.mxu1 %v4569_v37  ;;  %v4593_v1 = vld [vmem:[#allocation7 + $0x80] ss:$8 sps:$4 sm:$0xff]   ;;  %v448_v2 = vpack.c.bf16 %v421_v61, %v420_v60  ;;  %v4598_v3 = vld [vmem:[#allocation7 + $0x94] ss:$8 sps:$4 sm:$0xff]   ;;  %v4596_v6 = vld [vmem:[#allocation7 + $0x90] ss:$8 sps:$4 sm:$0xff]   ;;  %p4938_p7 = pneg %p4937_p5  ;;  %p4943_p2 = scmp.lt.s32.totalorder %s4941_s9, %s4935_s22 }
  0xb3   : > { %v422_v4 = vld [vmem:[%s5298_s30 + $0x50] sm:$0xff]  ;;  %v423_v5 = vld [vmem:[%s5298_s30 + $0x58] sm:$0xff]  ;;  %v4601_v7 = vld [vmem:[#allocation7 + $0xa4] ss:$8 sps:$4 sm:$0xff]  }
  0xb4   : > { %v4599_v8 = vld [vmem:[#allocation7 + $0xa0] ss:$8 sps:$4 sm:$0xff]   ;;  %v449_v9 = vpack.c.bf16 %v423_v5, %v422_v4  ;;  %v4604_v10 = vld [vmem:[#allocation7 + $0xb4] ss:$8 sps:$4 sm:$0xff]   ;;  %v4602_v13 = vld [vmem:[#allocation7 + $0xb0] ss:$8 sps:$4 sm:$0xff]   ;;  %p4944_p1 = por %p4943_p2, %p4942_p11 }
  0xb5   : > { %688 = vmatpush1.bf16.msra.mxu0 %v4538_v12  ;;  %881 = vmatpush1.bf16.msra.mxu1 %v4571_v40  ;;  %v424_v11 = vld [vmem:[%s5298_s30 + $0x60] sm:$0xff]  ;;  %v425_v12 = vld [vmem:[%s5298_s30 + $0x68] sm:$0xff]  ;;  %v426_v18 = vld [vmem:[%s5298_s30 + $0x70] sm:$0xff] }
  0xb6   : > { %689 = vmatprep.subr.bf16.mxu0 %v4539_v14  ;;  %882 = vmatprep.subr.bf16.mxu1 %v4572_v42  ;;  %v4607_v14 = vld [vmem:[#allocation7 + $0xc4] ss:$8 sps:$4 sm:$0xff]   ;;  %v450_v16 = vpack.c.bf16 %v425_v12, %v424_v11  ;;  %v427_v19 = vld [vmem:[%s5298_s30 + $0x78] sm:$0xff]  ;;  %v4611_v22 = vld [vmem:[#allocation7 + $0xe0] ss:$8 sps:$4 sm:$0xff]   ;;  %p4945_p12 = pnand %p4944_p1, %p4938_p7 }
  0xb7   : > { %v4608_v20 = vld [vmem:[#allocation7 + $0xd0] ss:$8 sps:$4 sm:$0xff]   ;;  %v451_v23 = vpack.c.bf16 %v427_v19, %v426_v18  ;;  %v429_v25 = vld [vmem:[%s5298_s30 + $0x88] sm:$0xff]  ;;  %v432_v30 = vld [vmem:[%s5298_s30 + $0xa0] sm:$0xff] }
  0xb8   : > { %v433_v31 = vld [vmem:[%s5298_s30 + $0xa8] sm:$0xff]  ;;  %v434_v33 = vld [vmem:[%s5298_s30 + $0xb0] sm:$0xff]  ;;  %v436_v37 = vld [vmem:[%s5298_s30 + $0xc0] sm:$0xff] }
  0xb9   : > { %690 = vmatpush1.bf16.msra.mxu0 %v4541_v15  ;;  %883 = vmatpush1.bf16.msra.mxu1 %v4577_v46  ;;  %v4605_v15 = vld [vmem:[#allocation7 + $0xc0] ss:$8 sps:$4 sm:$0xff]   ;;  %v454_v32 = vpack.c.bf16 %v433_v31, %v432_v30  ;;  %v4616_v36 = vld [vmem:[#allocation7 + $0xf4] ss:$8 sps:$4 sm:$0xff]   ;;  %v4619_v43 = vld [vmem:[#allocation7 + $0x104] ss:$8 sps:$4 sm:$0xff]  }
  0xba   : > { %691 = vmatprep.subr.bf16.mxu0 %v4542_v17  ;;  %884 = vmatprep.subr.bf16.mxu1 %v4578_v48  ;;  %v4610_v17 = vld [vmem:[#allocation7 + $0xd4] ss:$8 sps:$4 sm:$0xff]   ;;  %v441_v46 = vld [vmem:[%s5298_s30 + $0xe8] sm:$0xff]  ;;  %v460_v54 = vld [vmem:[%s6194_s2] sm:$0xf] }
  0xbb   : > { %v439_v42 = vld [vmem:[%s5298_s30 + $0xd8] sm:$0xff]  ;;  %v442_v48 = vld [vmem:[%s5298_s30 + $0xf0] sm:$0xff] }
  0xbc   : > { %v4622_v12 = vld [vmem:[#allocation7 + $0x114] ss:$8 sps:$4 sm:$0xff]   ;;  %v4620_v18 = vld [vmem:[#allocation7 + $0x110] ss:$8 sps:$4 sm:$0xff]  }
  0xbd   : > { %692 = vmatpush1.bf16.msra.mxu0 %v4544_v21  ;;  %885 = vmatpush1.bf16.msra.mxu1 %v4580_v50  ;;  %v4613_v21 = vld [vmem:[#allocation7 + $0xe4] ss:$8 sps:$4 sm:$0xff]  }
  0xbe   : > { %1650 = vmatprep.subr.bf16.mxu0 %v4549_v24  ;;  %v428_v24 = vld [vmem:[%s5298_s30 + $0x80] sm:$0xff] }
  0xbf   : > { %v452_v26 = vpack.c.bf16 %v429_v25, %v428_v24 }
  0xc0   : > { %710 = vmatmul.mubr.bf16.vlgmr.msra.gmra.mrb[0].mxu0 %v444_v27  ;;  %903 = vmatmul.mubr.bf16.vlgmr.msra.gmra.mrb[0].mxu1 %v444_v27  ;;  %v430_v27 = vld [vmem:[%s5298_s30 + $0x90] sm:$0xff] }
  0xc1   : > { %719 = vmatprep.mubr.bf16.mxu0 %v5022_v0  ;;  %1651 = vmatpush1.bf16.msra.mxu0 %v4547_v28  ;;  %v431_v28 = vld [vmem:[%s5298_s30 + $0x98] sm:$0xff] }
  0xc2   : > { %1652 = vmatprep.subr.bf16.mxu0 %v4558_v29  ;;  %912 = vmatprep.mubr.bf16.mxu1 %v5022_v0  ;;  %v453_v29 = vpack.c.bf16 %v431_v28, %v430_v27 }
  0xc5   : > { %1653 = vmatpush1.bf16.msra.mxu0 %v4556_v34  ;;  %v435_v34 = vld [vmem:[%s5298_s30 + $0xb8] sm:$0xff] }
  0xc6   : > { %1654 = vmatprep.subr.bf16.mxu0 %v4567_v35  ;;  %v455_v35 = vpack.c.bf16 %v435_v34, %v434_v33 }
  0xc8   : > { %720 = vmatmul.mubr.bf16.gmra.mrb[4].mxu0 %v445_v38  ;;  %913 = vmatmul.mubr.bf16.gmra.mrb[4].mxu1 %v445_v38  ;;  %v437_v38 = vld [vmem:[%s5298_s30 + $0xc8] sm:$0xff] }
  0xc9   : > { %729 = vmatprep.mubr.bf16.mxu0 %v5022_v0  ;;  %1655 = vmatpush1.bf16.msra.mxu0 %v4565_v39  ;;  %v4614_v39 = vld [vmem:[#allocation7 + $0xf0] ss:$8 sps:$4 sm:$0xff]   ;;  %v456_v40 = vpack.c.bf16 %v437_v38, %v436_v37 }
  0xca   : > { %1656 = vmatprep.subr.bf16.mxu0 %v4576_v41  ;;  %922 = vmatprep.mubr.bf16.mxu1 %v5022_v0  ;;  %v438_v41 = vld [vmem:[%s5298_s30 + $0xd0] sm:$0xff] }
  0xcb   : > { %v457_v44 = vpack.c.bf16 %v439_v42, %v438_v41 }
  0xcd   : > { %1657 = vmatpush1.bf16.msra.mxu0 %v4574_v45  ;;  %v440_v45 = vld [vmem:[%s5298_s30 + $0xe0] sm:$0xff] }
  0xce   : > { %1658 = vmatprep.subr.bf16.mxu0 %v4583_v47  ;;  %v458_v47 = vpack.c.bf16 %v441_v46, %v440_v45 }
  0xd0   : > { %730 = vmatmul.mubr.bf16.gmra.mrb[8].mxu0 %v446_v49  ;;  %923 = vmatmul.mubr.bf16.gmra.mrb[8].mxu1 %v446_v49  ;;  %v443_v49 = vld [vmem:[%s5298_s30 + $0xf8] sm:$0xff]  ;;  %s6225_s30 = sld [smem:[#allocation18_spill]] }
  0xd1   : > { %739 = vmatprep.mubr.bf16.mxu0 %v5022_v0  ;;  %1659 = vmatpush1.bf16.msra.mxu0 %v4581_v51  ;;  %v459_v50 = vpack.c.bf16 %v443_v49, %v442_v48  ;;  %v497_v51 = vlaneseq }
  0xd2   : > { %1660 = vmatprep.subr.bf16.mxu0 %v4586_v52  ;;  %932 = vmatprep.mubr.bf16.mxu1 %v5022_v0 }
  0xd3   : > { %v5376_v52 = vshrl.u32 %v497_v51, 7 }
  0xd5   : > { %1661 = vmatpush1.bf16.msra.mxu0 %v4584_v55  ;;  %v5379_v53 = vsub.s32 0, %v5376_v52  ;;  %v5385_v55 = vsub.s32 1, %v5376_v52  ;;  %v507_v24 = vsub.s32 2, %v5376_v52 }
  0xd6   : > { %1662 = vmatprep.subr.bf16.mxu0 %v4589_v56  ;;  %s6226_s15 = smov %s6225_s30  ;;  %s6145_s17 = scalar_lea.hbm %s6225_s30, %s4072_s16 }
  0xd7   : > { %v5388_v56 = vrot.slane %v460_v54, %v5379_v53 }
  0xd8   : > { %740 = vmatmul.mubr.bf16.gmra.mrb[12].mxu0 %v447_v58  ;;  %933 = vmatmul.mubr.bf16.gmra.mrb[12].mxu1 %v447_v58 }
  0xd9   : > { %749 = vmatprep.mubr.bf16.mxu0 %v5022_v0  ;;  %1663 = vmatpush1.bf16.msra.mxu0 %v4587_v57  ;;  %v5391_v57 = vrot.slane %v460_v54, %v5385_v55 }
  0xda   : > { %1664 = vmatprep.subr.bf16.mxu0 %v4592_v59  ;;  %942 = vmatprep.mubr.bf16.mxu1 %v5022_v0 }
  0xdd   : > { %1665 = vmatpush1.bf16.msra.mxu0 %v4590_v62 }
  0xde   : > { %1666 = vmatprep.subr.bf16.mxu0 %v4595_v63 }
  0xe0   : > { %750 = vmatmul.mubr.bf16.gmra.mrb[16].mxu0 %v448_v2  ;;  %943 = vmatmul.mubr.bf16.gmra.mrb[16].mxu1 %v448_v2 }
  0xe1   : > { %759 = vmatprep.mubr.bf16.mxu0 %v5022_v0  ;;  %1667 = vmatpush1.bf16.msra.mxu0 %v4593_v1 }
  0xe2   : > { %1668 = vmatprep.subr.bf16.mxu0 %v4598_v3  ;;  %952 = vmatprep.mubr.bf16.mxu1 %v5022_v0 }
  0xe5   : > { %1669 = vmatpush1.bf16.msra.mxu0 %v4596_v6 }
  0xe6   : > { %1670 = vmatprep.subr.bf16.mxu0 %v4601_v7 }
  0xe8   : > { %760 = vmatmul.mubr.bf16.gmra.mrb[20].mxu0 %v449_v9  ;;  %953 = vmatmul.mubr.bf16.gmra.mrb[20].mxu1 %v449_v9  ;;  %v4617_v9 = vld [vmem:[#allocation7 + $0x100] ss:$8 sps:$4 sm:$0xff]  }
  0xe9   : > { %769 = vmatprep.mubr.bf16.mxu0 %v5022_v0  ;;  %1671 = vmatpush1.bf16.msra.mxu0 %v4599_v8 }
  0xea   : > { %1672 = vmatprep.subr.bf16.mxu0 %v4604_v10  ;;  %962 = vmatprep.mubr.bf16.mxu1 %v5022_v0 }
  0xed   : > { %1673 = vmatpush1.bf16.msra.mxu0 %v4602_v13 }
  0xee   : > { %1674 = vmatprep.subr.bf16.mxu0 %v4607_v14 }
  0xf0   : > { %770 = vmatmul.mubr.bf16.gmra.mrb[24].mxu0 %v450_v16  ;;  %963 = vmatmul.mubr.bf16.gmra.mrb[24].mxu1 %v450_v16 }
  0xf1   : > { %779 = vmatprep.mubr.bf16.mxu0 %v5022_v0  ;;  %1675 = vmatpush1.bf16.msra.mxu0 %v4605_v15 }
  0xf2   : > { %1676 = vmatprep.subr.bf16.mxu0 %v4610_v17  ;;  %972 = vmatprep.mubr.bf16.mxu1 %v5022_v0 }
  0xf5   : > { %1677 = vmatpush1.bf16.msra.mxu0 %v4608_v20 }
  0xf6   : > { %1678 = vmatprep.subr.bf16.mxu0 %v4613_v21  ;;  %v4625_v21 = vld [vmem:[#allocation7 + $0x124] ss:$8 sps:$4 sm:$0xff]  }
  0xf8   : > { %780 = vmatmul.mubr.bf16.gmra.mrb[28].mxu0 %v451_v23  ;;  %973 = vmatmul.mubr.bf16.gmra.mrb[28].mxu1 %v451_v23 }
  0xf9   : > { %789 = vmatprep.mubr.bf16.mxu0 %v5022_v0  ;;  %1679 = vmatpush1.bf16.msra.mxu0 %v4611_v22 }
  0xfa   : > { %982 = vmatprep.mubr.bf16.mxu1 %v5022_v0  ;;  %1680 = vmatprep.subr.bf16.mxu0 %v4616_v36 }
  0xfd   : > { %1681 = vmatpush1.bf16.msra.mxu0 %v4614_v39 }
  0xfe   : > { %1843 = vmatprep.subr.bf16.mxu0 %v4619_v43  ;;  %v4631_v43 = vld [vmem:[#allocation7 + $0x144] ss:$8 sps:$4 sm:$0xff]  }
 0x100   : > { %790 = vmatmul.mubr.bf16.gmra.mrb[32].mxu0 %v452_v26  ;;  %983 = vmatmul.mubr.bf16.gmra.mrb[32].mxu1 %v452_v26  ;;  %v511_v26 = vsub.s32 3, %v5376_v52 }
 0x101   : > { %799 = vmatprep.mubr.bf16.mxu0 %v5022_v0  ;;  %992 = vmatprep.mubr.bf16.mxu1 %v5022_v0 }
 0x102   : > { %v5412_v38 = vrot.slane %v460_v54, %v511_v26 }
 0x108   : > { %800 = vmatmul.mubr.bf16.gmra.mrb[36].mxu0 %v453_v29  ;;  %993 = vmatmul.mubr.bf16.gmra.mrb[36].mxu1 %v453_v29  ;;  %v4623_v29 = vld [vmem:[#allocation7 + $0x120] ss:$8 sps:$4 sm:$0xff]  }
 0x109   : > { %809 = vmatprep.mubr.bf16.mxu0 %v5022_v0  ;;  %1002 = vmatprep.mubr.bf16.mxu1 %v5022_v0 }
 0x110   : > { %810 = vmatmul.mubr.bf16.gmra.mrb[40].mxu0 %v454_v32  ;;  %1003 = vmatmul.mubr.bf16.gmra.mrb[40].mxu1 %v454_v32  ;;  %v4628_v32 = vld [vmem:[#allocation7 + $0x134] ss:$8 sps:$4 sm:$0xff]  }
 0x111   : > { %819 = vmatprep.mubr.bf16.mxu0 %v5022_v0  ;;  %1012 = vmatprep.mubr.bf16.mxu1 %v5022_v0 }
 0x118   : > { %820 = vmatmul.mubr.bf16.gmra.mrb[44].mxu0 %v455_v35  ;;  %1013 = vmatmul.mubr.bf16.gmra.mrb[44].mxu1 %v455_v35  ;;  %v5407_v35 = vrot.slane %v460_v54, %v507_v24 }
 0x119   : > { %829 = vmatprep.mubr.bf16.mxu0 %v5022_v0  ;;  %1022 = vmatprep.mubr.bf16.mxu1 %v5022_v0 }
 0x120   : > { %830 = vmatmul.mubr.bf16.gmra.mrb[48].mxu0 %v456_v40  ;;  %1023 = vmatmul.mubr.bf16.gmra.mrb[48].mxu1 %v456_v40  ;;  %v4626_v40 = vld [vmem:[#allocation7 + $0x130] ss:$8 sps:$4 sm:$0xff]  }
 0x121   : > { %839 = vmatprep.mubr.bf16.mxu0 %v5022_v0  ;;  %1032 = vmatprep.mubr.bf16.mxu1 %v5022_v0 }
 0x128   : > { %840 = vmatmul.mubr.bf16.gmra.mrb[52].mxu0 %v457_v44  ;;  %1033 = vmatmul.mubr.bf16.gmra.mrb[52].mxu1 %v457_v44 }
 0x129   : > { %849 = vmatprep.mubr.bf16.mxu0 %v5022_v0  ;;  %1042 = vmatprep.mubr.bf16.mxu1 %v5022_v0 }
 0x130   : > { %850 = vmatmul.mubr.bf16.gmra.mrb[56].mxu0 %v458_v47  ;;  %1043 = vmatmul.mubr.bf16.gmra.mrb[56].mxu1 %v458_v47 }
 0x131   : > { %859 = vmatprep.mubr.bf16.mxu0 %v5022_v0  ;;  %1052 = vmatprep.mubr.bf16.mxu1 %v5022_v0 }
 0x138   : > { %860 = vmatmul.mubr.bf16.gmra.mrb[60].mxu0 %v459_v50  ;;  %1053 = vmatmul.mubr.bf16.gmra.mrb[60].mxu1 %v459_v50 }
 0x193   : > { %v711_v0 = vpop.f32.mrb[0].mxu0  ;;  %v904_v44 = vpop.f32.mrb[0].mxu1 }
 0x194   : > { %v712_v58 = vadd.f32 %v711_v0, %v5388_v56  ;;  %v713_v59 = vpop.f32.mrb[1].mxu0  ;;  %v905_v47 = vadd.f32 %v904_v44, %v5407_v35  ;;  %v906_v48 = vpop.f32.mrb[1].mxu1 }
 0x195   : > { %v714_v60 = vadd.f32 %v713_v59, %v5391_v57  ;;  %v715_v61 = vpop.f32.mrb[2].mxu0  ;;  %v907_v50 = vadd.f32 %v906_v48, %v5412_v38  ;;  %v908_v51 = vpop.f32.mrb[2].mxu1 }
 0x196   : > { %v716_v62 = vadd.f32 %v715_v61, %v5388_v56  ;;  %v717_v63 = vpop.f32.mrb[3].mxu0  ;;  %v1063_v2 = vmax.f32 %v712_v58, 0.0  ;;  %v4629_v58 = vld [vmem:[#allocation7 + $0x140] ss:$8 sps:$4 sm:$0xff]   ;;  %v1065_v59 = vmax.f32 %v905_v47, 0.0  ;;  %v910_v61 = vpop.f32.mrb[3].mxu1 }
 0x197   : > { %v718_v1 = vadd.f32 %v717_v63, %v5391_v57  ;;  %v1064_v4 = vmax.f32 %v714_v60, 0.0  ;;  %v909_v60 = vadd.f32 %v908_v51, %v5407_v35  ;;  %v4638_v47 = vld [vmem:[#allocation7 + $0x170] ss:$8 sps:$4 sm:$0xff]   ;;  %v4643_v51 = vld [vmem:[#allocation7 + $0x184] ss:$8 sps:$4 sm:$0xff]  }
 0x198   : > { %v1067_v3 = vmax.f32 %v716_v62, 0.0 }
 0x199   : > { %v1068_v5 = vmax.f32 %v718_v1, 0.0  ;;  %v4634_v1 = vld [vmem:[#allocation7 + $0x154] ss:$8 sps:$4 sm:$0xff]  }
 0x19a   : > { %v1191_v6 = vpack.c.bf16 %v1067_v3, %v1063_v2  ;;  %v1066_v2 = vmax.f32 %v907_v50, 0.0  ;;  %v911_v3 = vadd.f32 %v910_v61, %v5412_v38 }
 0x19b   : > { %v1192_v7 = vpack.c.bf16 %v1068_v5, %v1064_v4  ;;  %v721_v8 = vpop.f32.mrb[4].mxu0 }
 0x19c   : > { %v722_v10 = vadd.f32 %v721_v8, %v5388_v56  ;;  %v723_v11 = vpop.f32.mrb[5].mxu0 }
 0x19d   : > { %v724_v13 = vadd.f32 %v723_v11, %v5391_v57  ;;  %v725_v14 = vpop.f32.mrb[6].mxu0  ;;  %1682 = vmatprep.mubr.bf16.mxu0 %v1192_v7  ;;  %v4632_v11 = vld [vmem:[#allocation7 + $0x150] ss:$8 sps:$4 sm:$0xff]  }
 0x19e   : > { %v726_v15 = vadd.f32 %v725_v14, %v5388_v56  ;;  %v727_v16 = vpop.f32.mrb[7].mxu0  ;;  %1683 = vmatmul.mubr.bf16.vlgmr.msra.gmra.mrb[64].mxu0 %v1191_v6  ;;  %v1071_v19 = vmax.f32 %v722_v10, 0.0  ;;  %v1069_v6 = vmax.f32 %v909_v60, 0.0 }
 0x19f   : > { %v728_v17 = vadd.f32 %v727_v16, %v5391_v57  ;;  %1844 = vmatpush1.bf16.msra.mxu0 %v4617_v9  ;;  %v1072_v22 = vmax.f32 %v724_v13, 0.0  ;;  %v1070_v9 = vmax.f32 %v911_v3, 0.0 }
 0x1a0   : > { %v1075_v20 = vmax.f32 %v726_v15, 0.0  ;;  %1845 = vmatprep.subr.bf16.mxu0 %v4622_v12  ;;  %v5423_v12 = vpack.c.bf16 %v1069_v6, %v1065_v59  ;;  %v4637_v15 = vld [vmem:[#allocation7 + $0x164] ss:$8 sps:$4 sm:$0xff]  }
 0x1a1   : > { %v1076_v23 = vmax.f32 %v728_v17, 0.0  ;;  %v5425_v16 = vpack.c.bf16 %v1070_v9, %v1066_v2  ;;  %v914_v17 = vpop.f32.mrb[4].mxu1 }
 0x1a2   : > { %v1195_v25 = vpack.c.bf16 %v1075_v20, %v1071_v19  ;;  %v915_v20 = vadd.f32 %v914_v17, %v5407_v35 }
 0x1a3   : > { %v1196_v27 = vpack.c.bf16 %v1076_v23, %v1072_v22  ;;  %v731_v28 = vpop.f32.mrb[8].mxu0  ;;  %1846 = vmatpush1.bf16.msra.mxu0 %v4620_v18 }
 0x1a4   : > { %v732_v30 = vadd.f32 %v731_v28, %v5388_v56  ;;  %v733_v31 = vpop.f32.mrb[9].mxu0  ;;  %1847 = vmatprep.subr.bf16.mxu0 %v4625_v21  ;;  %v916_v21 = vpop.f32.mrb[5].mxu1 }
 0x1a5   : > { %v734_v33 = vadd.f32 %v733_v31, %v5391_v57  ;;  %v735_v34 = vpop.f32.mrb[10].mxu0  ;;  %1692 = vmatprep.mubr.bf16.mxu0 %v1196_v27  ;;  %v917_v23 = vadd.f32 %v916_v21, %v5412_v38 }
 0x1a6   : > { %v736_v36 = vadd.f32 %v735_v34, %v5388_v56  ;;  %v737_v37 = vpop.f32.mrb[11].mxu0  ;;  %1693 = vmatmul.mubr.bf16.gmra.mrb[68].mxu0 %v1195_v25  ;;  %v1079_v41 = vmax.f32 %v732_v30, 0.0  ;;  %v918_v25 = vpop.f32.mrb[6].mxu1  ;;  %v1073_v30 = vmax.f32 %v915_v20, 0.0 }
 0x1a7   : > { %v738_v39 = vadd.f32 %v737_v37, %v5391_v57  ;;  %1848 = vmatpush1.bf16.msra.mxu0 %v4623_v29  ;;  %v1080_v45 = vmax.f32 %v734_v33, 0.0  ;;  %v4635_v29 = vld [vmem:[#allocation7 + $0x160] ss:$8 sps:$4 sm:$0xff]   ;;  %v919_v31 = vadd.f32 %v918_v25, %v5407_v35  ;;  %v1074_v37 = vmax.f32 %v917_v23, 0.0 }
 0x1a8   : > { %v1083_v42 = vmax.f32 %v736_v36, 0.0  ;;  %1849 = vmatprep.subr.bf16.mxu0 %v4628_v32  ;;  %v920_v32 = vpop.f32.mrb[7].mxu1  ;;  %v4640_v36 = vld [vmem:[#allocation7 + $0x174] ss:$8 sps:$4 sm:$0xff]  }
 0x1a9   : > { %v1084_v46 = vmax.f32 %v738_v39, 0.0  ;;  %v921_v39 = vadd.f32 %v920_v32, %v5412_v38 }
 0x1aa   : > { %v1199_v49 = vpack.c.bf16 %v1083_v42, %v1079_v41  ;;  %v1077_v42 = vmax.f32 %v919_v31, 0.0 }
 0x1ab   : > { %v1200_v54 = vpack.c.bf16 %v1084_v46, %v1080_v45  ;;  %v741_v0 = vpop.f32.mrb[12].mxu0  ;;  %1850 = vmatpush1.bf16.msra.mxu0 %v4626_v40  ;;  %v1078_v45 = vmax.f32 %v921_v39, 0.0 }
 0x1ac   : > { %v742_v62 = vadd.f32 %v741_v0, %v5388_v56  ;;  %v743_v63 = vpop.f32.mrb[13].mxu0  ;;  %1851 = vmatprep.subr.bf16.mxu0 %v4631_v43  ;;  %v5435_v48 = vpack.c.bf16 %v1077_v42, %v1073_v30  ;;  %v924_v0 = vpop.f32.mrb[8].mxu1  ;;  %v4647_v42 = vld [vmem:[#allocation7 + $0x1a0] ss:$8 sps:$4 sm:$0xff]  }
 0x1ad   : > { %v744_v4 = vadd.f32 %v743_v63, %v5391_v57  ;;  %v745_v5 = vpop.f32.mrb[14].mxu0  ;;  %1702 = vmatprep.mubr.bf16.mxu0 %v1200_v54  ;;  %v5437_v54 = vpack.c.bf16 %v1078_v45, %v1074_v37  ;;  %v925_v60 = vadd.f32 %v924_v0, %v5407_v35  ;;  %v926_v61 = vpop.f32.mrb[9].mxu1 }
 0x1ae   : > { %v746_v7 = vadd.f32 %v745_v5, %v5388_v56  ;;  %v747_v8 = vpop.f32.mrb[15].mxu0  ;;  %1703 = vmatmul.mubr.bf16.gmra.mrb[72].mxu0 %v1199_v49  ;;  %v1087_v13 = vmax.f32 %v742_v62, 0.0  ;;  %v927_v63 = vadd.f32 %v926_v61, %v5412_v38 }
 0x1af   : > { %v748_v10 = vadd.f32 %v747_v8, %v5391_v57  ;;  %1852 = vmatpush1.bf16.msra.mxu0 %v4629_v58  ;;  %v1088_v18 = vmax.f32 %v744_v4, 0.0  ;;  %v4641_v4 = vld [vmem:[#allocation7 + $0x180] ss:$8 sps:$4 sm:$0xff]   ;;  %v1081_v5 = vmax.f32 %v925_v60, 0.0 }
 0x1b0   : > { %v1091_v14 = vmax.f32 %v746_v7, 0.0  ;;  %1853 = vmatprep.subr.bf16.mxu0 %v4634_v1  ;;  %v928_v1 = vpop.f32.mrb[10].mxu1 }
 0x1b1   : > { %v1092_v19 = vmax.f32 %v748_v10, 0.0  ;;  %v929_v6 = vadd.f32 %v928_v1, %v5407_v35  ;;  %v930_v7 = vpop.f32.mrb[11].mxu1  ;;  %v4646_v10 = vld [vmem:[#allocation7 + $0x194] ss:$8 sps:$4 sm:$0xff]   ;;  %v4650_v1 = vld [vmem:[#allocation7 + $0x1b0] ss:$8 sps:$4 sm:$0xff]  }
 0x1b2   : > { %v1203_v22 = vpack.c.bf16 %v1091_v14, %v1087_v13  ;;  %v931_v13 = vadd.f32 %v930_v7, %v5412_v38  ;;  %v934_v30 = vpop.f32.mrb[12].mxu1 }
 0x1b3   : > { %v1204_v27 = vpack.c.bf16 %v1092_v19, %v1088_v18  ;;  %v751_v28 = vpop.f32.mrb[16].mxu0  ;;  %1854 = vmatpush1.bf16.msra.mxu0 %v4632_v11  ;;  %v1082_v11 = vmax.f32 %v927_v63, 0.0  ;;  %v1085_v17 = vmax.f32 %v929_v6, 0.0 }
 0x1b4   : > { %v752_v33 = vadd.f32 %v751_v28, %v5388_v56  ;;  %v753_v34 = vpop.f32.mrb[17].mxu0  ;;  %1855 = vmatprep.subr.bf16.mxu0 %v4637_v15  ;;  %v1086_v20 = vmax.f32 %v931_v13, 0.0  ;;  %v4649_v28 = vld [vmem:[#allocation7 + $0x1a4] ss:$8 sps:$4 sm:$0xff]  }
 0x1b5   : > { %v754_v40 = vadd.f32 %v753_v34, %v5391_v57  ;;  %v755_v41 = vpop.f32.mrb[18].mxu0  ;;  %1712 = vmatprep.mubr.bf16.mxu0 %v1204_v27  ;;  %v5447_v23 = vpack.c.bf16 %v1085_v17, %v1081_v5  ;;  %v936_v34 = vpop.f32.mrb[13].mxu1  ;;  %v4655_v5 = vld [vmem:[#allocation7 + $0x1c4] ss:$8 sps:$4 sm:$0xff]  }
 0x1b6   : > { %v756_v43 = vadd.f32 %v755_v41, %v5388_v56  ;;  %v757_v44 = vpop.f32.mrb[19].mxu0  ;;  %1713 = vmatmul.mubr.bf16.gmra.mrb[76].mxu0 %v1203_v22  ;;  %v1095_v49 = vmax.f32 %v752_v33, 0.0  ;;  %v4644_v22 = vld [vmem:[#allocation7 + $0x190] ss:$8 sps:$4 sm:$0xff]   ;;  %v935_v33 = vadd.f32 %v934_v30, %v5407_v35  ;;  %v937_v37 = vadd.f32 %v936_v34, %v5412_v38  ;;  %v938_v39 = vpop.f32.mrb[14].mxu1 }
 0x1b7   : > { %v758_v46 = vadd.f32 %v757_v44, %v5391_v57  ;;  %1856 = vmatpush1.bf16.msra.mxu0 %v4635_v29  ;;  %v1096_v58 = vmax.f32 %v754_v40, 0.0  ;;  %v5449_v29 = vpack.c.bf16 %v1086_v20, %v1082_v11  ;;  %v939_v44 = vadd.f32 %v938_v39, %v5407_v35  ;;  %v940_v45 = vpop.f32.mrb[15].mxu1 }
 0x1b8   : > { %v1099_v50 = vmax.f32 %v756_v43, 0.0  ;;  %1857 = vmatprep.subr.bf16.mxu0 %v4640_v36  ;;  %v1089_v43 = vmax.f32 %v935_v33, 0.0  ;;  %v944_v7 = vpop.f32.mrb[16].mxu1 }
 0x1b9   : > { %v1100_v59 = vmax.f32 %v758_v46, 0.0  ;;  %v946_v11 = vpop.f32.mrb[17].mxu1 }
 0x1ba   : > { %v1207_v62 = vpack.c.bf16 %v1099_v50, %v1095_v49  ;;  %v4652_v49 = vld [vmem:[#allocation7 + $0x1b4] ss:$8 sps:$4 sm:$0xff]   ;;  %v1090_v50 = vmax.f32 %v937_v37, 0.0 }
 0x1bb   : > { %v1208_v2 = vpack.c.bf16 %v1100_v59, %v1096_v58  ;;  %v761_v3 = vpop.f32.mrb[20].mxu0  ;;  %1858 = vmatpush1.bf16.msra.mxu0 %v4638_v47  ;;  %v1093_v59 = vmax.f32 %v939_v44, 0.0 }
 0x1bc   : > { %v762_v8 = vadd.f32 %v761_v3, %v5388_v56  ;;  %v763_v9 = vpop.f32.mrb[21].mxu0  ;;  %1859 = vmatprep.subr.bf16.mxu0 %v4643_v51  ;;  %v941_v51 = vadd.f32 %v940_v45, %v5412_v38  ;;  %v4661_v45 = vld [vmem:[#allocation7 + $0x1e4] ss:$8 sps:$4 sm:$0xff]  }
 0x1bd   : > { %v764_v14 = vadd.f32 %v763_v9, %v5391_v57  ;;  %v765_v15 = vpop.f32.mrb[22].mxu0  ;;  %1722 = vmatprep.mubr.bf16.mxu0 %v1208_v2  ;;  %v5459_v2 = vpack.c.bf16 %v1093_v59, %v1089_v43 }
 0x1be   : > { %v766_v18 = vadd.f32 %v765_v15, %v5388_v56  ;;  %v767_v19 = vpop.f32.mrb[23].mxu0  ;;  %1723 = vmatmul.mubr.bf16.gmra.mrb[80].mxu0 %v1207_v62  ;;  %v1103_v25 = vmax.f32 %v762_v8, 0.0  ;;  %v1094_v62 = vmax.f32 %v941_v51, 0.0  ;;  %v948_v15 = vpop.f32.mrb[18].mxu1 }
 0x1bf   : > { %v768_v21 = vadd.f32 %v767_v19, %v5391_v57  ;;  %1860 = vmatpush1.bf16.msra.mxu0 %v4641_v4  ;;  %v1104_v31 = vmax.f32 %v764_v14, 0.0  ;;  %v947_v14 = vadd.f32 %v946_v11, %v5412_v38  ;;  %v4653_v19 = vld [vmem:[#allocation7 + $0x1c0] ss:$8 sps:$4 sm:$0xff]  }
 0x1c0   : > { %v1107_v27 = vmax.f32 %v766_v18, 0.0  ;;  %1861 = vmatprep.subr.bf16.mxu0 %v4646_v10  ;;  %v5461_v6 = vpack.c.bf16 %v1094_v62, %v1090_v50  ;;  %v945_v10 = vadd.f32 %v944_v7, %v5407_v35 }
 0x1c1   : > { %v1108_v32 = vmax.f32 %v768_v21, 0.0  ;;  %v949_v21 = vadd.f32 %v948_v15, %v5407_v35  ;;  %v1098_v30 = vmax.f32 %v947_v14, 0.0 }
 0x1c2   : > { %v1211_v36 = vpack.c.bf16 %v1107_v27, %v1103_v25  ;;  %v1097_v20 = vmax.f32 %v945_v10, 0.0 }
 0x1c3   : > { %v1212_v40 = vpack.c.bf16 %v1108_v32, %v1104_v31  ;;  %v771_v41 = vpop.f32.mrb[24].mxu0  ;;  %1862 = vmatpush1.bf16.msra.mxu0 %v4644_v22  ;;  %v950_v22 = vpop.f32.mrb[19].mxu1  ;;  %v1101_v34 = vmax.f32 %v949_v21, 0.0 }
 0x1c4   : > { %v772_v46 = vadd.f32 %v771_v41, %v5388_v56  ;;  %v773_v47 = vpop.f32.mrb[25].mxu0  ;;  %1863 = vmatprep.subr.bf16.mxu0 %v4649_v28  ;;  %v4658_v28 = vld [vmem:[#allocation7 + $0x1d4] ss:$8 sps:$4 sm:$0xff]   ;;  %v951_v31 = vadd.f32 %v950_v22, %v5412_v38  ;;  %v4656_v41 = vld [vmem:[#allocation7 + $0x1d0] ss:$8 sps:$4 sm:$0xff]  }
 0x1c5   : > { %v774_v0 = vadd.f32 %v773_v47, %v5391_v57  ;;  %v775_v58 = vpop.f32.mrb[26].mxu0  ;;  %1732 = vmatprep.mubr.bf16.mxu0 %v1212_v40  ;;  %v954_v47 = vpop.f32.mrb[20].mxu1 }
 0x1c6   : > { %v776_v60 = vadd.f32 %v775_v58, %v5388_v56  ;;  %v777_v61 = vpop.f32.mrb[27].mxu0  ;;  %1733 = vmatmul.mubr.bf16.gmra.mrb[84].mxu0 %v1211_v36  ;;  %v1111_v3 = vmax.f32 %v772_v46, 0.0  ;;  %v1102_v39 = vmax.f32 %v951_v31, 0.0  ;;  %v955_v51 = vadd.f32 %v954_v47, %v5407_v35 }
 0x1c7   : > { %v778_v63 = vadd.f32 %v777_v61, %v5391_v57  ;;  %1864 = vmatpush1.bf16.msra.mxu0 %v4647_v42  ;;  %v1112_v8 = vmax.f32 %v774_v0, 0.0  ;;  %v5471_v42 = vpack.c.bf16 %v1101_v34, %v1097_v20  ;;  %v956_v0 = vpop.f32.mrb[21].mxu1  ;;  %v4662_v20 = vld [vmem:[#allocation7 + $0x1f0] ss:$8 sps:$4 sm:$0xff]  }
 0x1c8   : > { %v1115_v4 = vmax.f32 %v776_v60, 0.0  ;;  %1865 = vmatprep.subr.bf16.mxu0 %v4652_v49  ;;  %v5473_v46 = vpack.c.bf16 %v1102_v39, %v1098_v30  ;;  %v957_v59 = vadd.f32 %v956_v0, %v5412_v38  ;;  %v958_v60 = vpop.f32.mrb[22].mxu1 }
 0x1c9   : > { %v1116_v9 = vmax.f32 %v778_v63, 0.0  ;;  %v4659_v63 = vld [vmem:[#allocation7 + $0x1e0] ss:$8 sps:$4 sm:$0xff]  }
 0x1ca   : > { %v1215_v13 = vpack.c.bf16 %v1115_v4, %v1111_v3  ;;  %v959_v3 = vadd.f32 %v958_v60, %v5407_v35  ;;  %v960_v4 = vpop.f32.mrb[23].mxu1 }
 0x1cb   : > { %v1216_v17 = vpack.c.bf16 %v1116_v9, %v1112_v8  ;;  %v781_v18 = vpop.f32.mrb[28].mxu0  ;;  %1866 = vmatpush1.bf16.msra.mxu0 %v4650_v1  ;;  %v1105_v1 = vmax.f32 %v955_v51, 0.0  ;;  %v4664_v8 = vld [vmem:[#allocation7 + $0x1f4] ss:$8 sps:$4 sm:$0xff]   ;;  %v1106_v9 = vmax.f32 %v957_v59, 0.0  ;;  %v961_v10 = vadd.f32 %v960_v4, %v5412_v38 }
 0x1cc   : > { %v782_v25 = vadd.f32 %v781_v18, %v5388_v56  ;;  %v783_v27 = vpop.f32.mrb[29].mxu0  ;;  %1867 = vmatprep.subr.bf16.mxu0 %v4655_v5  ;;  %v1109_v14 = vmax.f32 %v959_v3, 0.0 }
 0x1cd   : > { %v784_v32 = vadd.f32 %v783_v27, %v5391_v57  ;;  %v785_v33 = vpop.f32.mrb[30].mxu0  ;;  %1742 = vmatprep.mubr.bf16.mxu0 %v1216_v17  ;;  %v1110_v18 = vmax.f32 %v961_v10, 0.0 }
 0x1ce   : > { %v786_v36 = vadd.f32 %v785_v33, %v5388_v56  ;;  %v787_v37 = vpop.f32.mrb[31].mxu0  ;;  %1743 = vmatmul.mubr.bf16.gmra.mrb[88].mxu0 %v1215_v13  ;;  %v1119_v43 = vmax.f32 %v782_v25, 0.0  ;;  %v5483_v21 = vpack.c.bf16 %v1109_v14, %v1105_v1 }
 0x1cf   : > { %v788_v40 = vadd.f32 %v787_v37, %v5391_v57  ;;  %1868 = vmatpush1.bf16.msra.mxu0 %v4653_v19  ;;  %v1120_v49 = vmax.f32 %v784_v32, 0.0  ;;  %v5485_v27 = vpack.c.bf16 %v1110_v18, %v1106_v9 }
 0x1d0   : > { %v1123_v44 = vmax.f32 %v786_v36, 0.0  ;;  %1869 = vmatprep.subr.bf16.mxu0 %v4658_v28  ;;  %v964_v28 = vpop.f32.mrb[24].mxu1 }
 0x1d1   : > { %v1124_v50 = vmax.f32 %v788_v40, 0.0  ;;  %v965_v32 = vadd.f32 %v964_v28, %v5407_v35  ;;  %v966_v33 = vpop.f32.mrb[25].mxu1 }
 0x1d2   : > { %v1219_v58 = vpack.c.bf16 %v1123_v44, %v1119_v43  ;;  %v967_v36 = vadd.f32 %v966_v33, %v5412_v38  ;;  %v968_v37 = vpop.f32.mrb[26].mxu1 }
 0x1d3   : > { %v1220_v61 = vpack.c.bf16 %v1124_v50, %v1120_v49  ;;  %v791_v62 = vpop.f32.mrb[32].mxu0  ;;  %1870 = vmatpush1.bf16.msra.mxu0 %v4656_v41  ;;  %v1113_v41 = vmax.f32 %v965_v32, 0.0  ;;  %v969_v43 = vadd.f32 %v968_v37, %v5407_v35  ;;  %v970_v44 = vpop.f32.mrb[27].mxu1 }
 0x1d4   : > { %v792_v5 = vadd.f32 %v791_v62, %v5388_v56  ;;  %v793_v7 = vpop.f32.mrb[33].mxu0  ;;  %1871 = vmatprep.subr.bf16.mxu0 %v4661_v45  ;;  %v1114_v49 = vmax.f32 %v967_v36, 0.0  ;;  %v971_v50 = vadd.f32 %v970_v44, %v5412_v38 }
 0x1d5   : > { %v794_v11 = vadd.f32 %v793_v7, %v5391_v57  ;;  %v795_v13 = vpop.f32.mrb[34].mxu0  ;;  %1752 = vmatprep.mubr.bf16.mxu0 %v1220_v61 }
 0x1d6   : > { %v796_v15 = vadd.f32 %v795_v13, %v5388_v56  ;;  %v797_v17 = vpop.f32.mrb[35].mxu0  ;;  %1753 = vmatmul.mubr.bf16.gmra.mrb[92].mxu0 %v1219_v58  ;;  %v1127_v22 = vmax.f32 %v792_v5, 0.0  ;;  %v1117_v58 = vmax.f32 %v969_v43, 0.0  ;;  %v1118_v61 = vmax.f32 %v971_v50, 0.0  ;;  %v974_v5 = vpop.f32.mrb[28].mxu1 }
 0x1d7   : > { %v798_v19 = vadd.f32 %v797_v17, %v5391_v57  ;;  %1872 = vmatpush1.bf16.msra.mxu0 %v4659_v63  ;;  %v1128_v30 = vmax.f32 %v794_v11, 0.0  ;;  %v975_v9 = vadd.f32 %v974_v5, %v5407_v35  ;;  %v976_v10 = vpop.f32.mrb[29].mxu1 }
 0x1d8   : > { %v1131_v25 = vmax.f32 %v796_v15, 0.0  ;;  %1873 = vmatprep.subr.bf16.mxu0 %v4664_v8  ;;  %v5495_v63 = vpack.c.bf16 %v1117_v58, %v1113_v41  ;;  %v5497_v4 = vpack.c.bf16 %v1118_v61, %v1114_v49  ;;  %v977_v13 = vadd.f32 %v976_v10, %v5412_v38  ;;  %v978_v14 = vpop.f32.mrb[30].mxu1 }
 0x1d9   : > { %v1132_v31 = vmax.f32 %v798_v19, 0.0  ;;  %v1121_v18 = vmax.f32 %v975_v9, 0.0  ;;  %v979_v19 = vadd.f32 %v978_v14, %v5407_v35 }
 0x1da   : > { %v1223_v34 = vpack.c.bf16 %v1131_v25, %v1127_v22  ;;  %v1122_v28 = vmax.f32 %v977_v13, 0.0 }
 0x1db   : > { %v1224_v39 = vpack.c.bf16 %v1132_v31, %v1128_v30  ;;  %v801_v40 = vpop.f32.mrb[36].mxu0  ;;  %1874 = vmatpush1.bf16.msra.mxu0 %v4662_v20  ;;  %v980_v20 = vpop.f32.mrb[31].mxu1  ;;  %v1125_v33 = vmax.f32 %v979_v19, 0.0 }
 0x1dc   : > { %v802_v45 = vadd.f32 %v801_v40, %v5388_v56  ;;  %v803_v47 = vpop.f32.mrb[37].mxu0  ;;  %v981_v30 = vadd.f32 %v980_v20, %v5412_v38 }
 0x1dd   : > { %v804_v51 = vadd.f32 %v803_v47, %v5391_v57  ;;  %v805_v0 = vpop.f32.mrb[38].mxu0  ;;  %1762 = vmatprep.mubr.bf16.mxu0 %v1224_v39  ;;  %v5507_v40 = vpack.c.bf16 %v1125_v33, %v1121_v18 }
 0x1de   : > { %v806_v59 = vadd.f32 %v805_v0, %v5388_v56  ;;  %v807_v60 = vpop.f32.mrb[39].mxu0  ;;  %1763 = vmatmul.mubr.bf16.gmra.mrb[96].mxu0 %v1223_v34  ;;  %v1135_v1 = vmax.f32 %v802_v45, 0.0  ;;  %v1126_v37 = vmax.f32 %v981_v30, 0.0  ;;  %v984_v45 = vpop.f32.mrb[32].mxu1 }
 0x1df   : > { %v808_v62 = vadd.f32 %v807_v60, %v5391_v57  ;;  %v1136_v7 = vmax.f32 %v804_v51, 0.0  ;;  %v985_v50 = vadd.f32 %v984_v45, %v5407_v35  ;;  %v986_v51 = vpop.f32.mrb[33].mxu1 }
 0x1e0   : > { %v1139_v3 = vmax.f32 %v806_v59, 0.0  ;;  %v5509_v44 = vpack.c.bf16 %v1126_v37, %v1122_v28  ;;  %v987_v58 = vadd.f32 %v986_v51, %v5412_v38  ;;  %v988_v59 = vpop.f32.mrb[34].mxu1 }
 0x1e1   : > { %v1140_v8 = vmax.f32 %v808_v62, 0.0  ;;  %v1129_v62 = vmax.f32 %v985_v50, 0.0 }
 0x1e2   : > { %v1227_v11 = vpack.c.bf16 %v1139_v3, %v1135_v1  ;;  %v989_v1 = vadd.f32 %v988_v59, %v5407_v35  ;;  %v990_v3 = vpop.f32.mrb[35].mxu1 }
 0x1e3   : > { %v1228_v15 = vpack.c.bf16 %v1140_v8, %v1136_v7  ;;  %v811_v17 = vpop.f32.mrb[40].mxu0  ;;  %v1130_v8 = vmax.f32 %v987_v58, 0.0  ;;  %v991_v9 = vadd.f32 %v990_v3, %v5412_v38  ;;  %v994_v28 = vpop.f32.mrb[36].mxu1 }
 0x1e4   : > { %v812_v22 = vadd.f32 %v811_v17, %v5388_v56  ;;  %v813_v25 = vpop.f32.mrb[41].mxu0  ;;  %v1133_v13 = vmax.f32 %v989_v1, 0.0  ;;  %v996_v33 = vpop.f32.mrb[37].mxu1 }
 0x1e5   : > { %v814_v31 = vadd.f32 %v813_v25, %v5391_v57  ;;  %v815_v32 = vpop.f32.mrb[42].mxu0  ;;  %1772 = vmatprep.mubr.bf16.mxu0 %v1228_v15  ;;  %v1134_v17 = vmax.f32 %v991_v9, 0.0  ;;  %v998_v37 = vpop.f32.mrb[38].mxu1 }
 0x1e6   : > { %v816_v34 = vadd.f32 %v815_v32, %v5388_v56  ;;  %v817_v36 = vpop.f32.mrb[43].mxu0  ;;  %1773 = vmatmul.mubr.bf16.gmra.mrb[100].mxu0 %v1227_v11  ;;  %v1143_v41 = vmax.f32 %v812_v22, 0.0  ;;  %v5519_v19 = vpack.c.bf16 %v1133_v13, %v1129_v62  ;;  %v995_v32 = vadd.f32 %v994_v28, %v5407_v35 }
 0x1e7   : > { %v818_v39 = vadd.f32 %v817_v36, %v5391_v57  ;;  %v1144_v47 = vmax.f32 %v814_v31, 0.0  ;;  %v5521_v25 = vpack.c.bf16 %v1134_v17, %v1130_v8  ;;  %v997_v36 = vadd.f32 %v996_v33, %v5412_v38  ;;  %v4667_v8 = vld [vmem:[#allocation8 + $0x4] ss:$16 sps:$4 sm:$0xff]  }
 0x1e8   : > { %v1147_v43 = vmax.f32 %v816_v34, 0.0  ;;  %v999_v45 = vadd.f32 %v998_v37, %v5407_v35  ;;  %2537 = vmatprep.subr.bf16.mxu1 %v4667_v8 }
 0x1e9   : > { %v1148_v49 = vmax.f32 %v818_v39, 0.0  ;;  %v1138_v51 = vmax.f32 %v997_v36, 0.0 }
 0x1ea   : > { %v1231_v0 = vpack.c.bf16 %v1147_v43, %v1143_v41  ;;  %v1137_v43 = vmax.f32 %v995_v32, 0.0 }
 0x1eb   : > { %v1232_v60 = vpack.c.bf16 %v1148_v49, %v1144_v47  ;;  %v821_v61 = vpop.f32.mrb[44].mxu0  ;;  %v1000_v47 = vpop.f32.mrb[39].mxu1 }
 0x1ec   : > { %v822_v5 = vadd.f32 %v821_v61, %v5388_v56  ;;  %v823_v7 = vpop.f32.mrb[45].mxu0  ;;  %v1004_v13 = vpop.f32.mrb[40].mxu1 }
 0x1ed   : > { %v824_v10 = vadd.f32 %v823_v7, %v5391_v57  ;;  %v825_v11 = vpop.f32.mrb[46].mxu0  ;;  %1782 = vmatprep.mubr.bf16.mxu0 %v1232_v60  ;;  %v1141_v60 = vmax.f32 %v999_v45, 0.0  ;;  %v4665_v7 = vld [vmem:[#allocation8] ss:$16 sps:$4 sm:$0xff]   ;;  %v1005_v17 = vadd.f32 %v1004_v13, %v5407_v35 }
 0x1ee   : > { %v826_v14 = vadd.f32 %v825_v11, %v5388_v56  ;;  %v827_v15 = vpop.f32.mrb[47].mxu0  ;;  %1783 = vmatmul.mubr.bf16.gmra.mrb[104].mxu0 %v1231_v0  ;;  %v1151_v20 = vmax.f32 %v822_v5, 0.0  ;;  %v1001_v0 = vadd.f32 %v1000_v47, %v5412_v38  ;;  %2538 = vmatpush1.bf16.msra.mxu1 %v4665_v7 }
 0x1ef   : > { %v828_v18 = vadd.f32 %v827_v15, %v5391_v57  ;;  %v1152_v30 = vmax.f32 %v824_v10, 0.0  ;;  %v5531_v5 = vpack.c.bf16 %v1141_v60, %v1137_v43  ;;  %v1145_v32 = vmax.f32 %v1005_v17, 0.0  ;;  %v4670_v60 = vld [vmem:[#allocation8 + $0x24] ss:$16 sps:$4 sm:$0xff]  }
 0x1f0   : > { %v1155_v22 = vmax.f32 %v826_v14, 0.0  ;;  %v1142_v1 = vmax.f32 %v1001_v0, 0.0  ;;  %2539 = vmatprep.subr.bf16.mxu1 %v4670_v60 }
 0x1f1   : > { %v1156_v31 = vmax.f32 %v828_v18, 0.0  ;;  %v1006_v18 = vpop.f32.mrb[41].mxu1 }
 0x1f2   : > { %v1235_v34 = vpack.c.bf16 %v1155_v22, %v1151_v20  ;;  %v5533_v11 = vpack.c.bf16 %v1142_v1, %v1138_v51  ;;  %v1007_v22 = vadd.f32 %v1006_v18, %v5412_v38  ;;  %v1008_v28 = vpop.f32.mrb[42].mxu1 }
 0x1f3   : > { %v1236_v39 = vpack.c.bf16 %v1156_v31, %v1152_v30  ;;  %v831_v41 = vpop.f32.mrb[48].mxu0  ;;  %v1009_v33 = vadd.f32 %v1008_v28, %v5407_v35 }
 0x1f4   : > { %v832_v49 = vadd.f32 %v831_v41, %v5388_v56  ;;  %v833_v50 = vpop.f32.mrb[49].mxu0 }
 0x1f5   : > { %v834_v58 = vadd.f32 %v833_v50, %v5391_v57  ;;  %v835_v59 = vpop.f32.mrb[50].mxu0  ;;  %1792 = vmatprep.mubr.bf16.mxu0 %v1236_v39  ;;  %v1146_v39 = vmax.f32 %v1007_v22, 0.0  ;;  %v1149_v47 = vmax.f32 %v1009_v33, 0.0 }
 0x1f6   : > { %v836_v61 = vadd.f32 %v835_v59, %v5388_v56  ;;  %v837_v62 = vpop.f32.mrb[51].mxu0  ;;  %1793 = vmatmul.mubr.bf16.gmra.mrb[108].mxu0 %v1235_v34  ;;  %v1159_v9 = vmax.f32 %v832_v49, 0.0  ;;  %v1010_v34 = vpop.f32.mrb[43].mxu1  ;;  %v4668_v59 = vld [vmem:[#allocation8 + $0x20] ss:$16 sps:$4 sm:$0xff]  }
 0x1f7   : > { %v838_v3 = vadd.f32 %v837_v62, %v5391_v57  ;;  %v1160_v14 = vmax.f32 %v834_v58, 0.0  ;;  %v1011_v41 = vadd.f32 %v1010_v34, %v5412_v38  ;;  %v5543_v58 = vpack.c.bf16 %v1149_v47, %v1145_v32  ;;  %2540 = vmatpush1.bf16.msra.mxu1 %v4668_v59 }
 0x1f8   : > { %v1163_v10 = vmax.f32 %v836_v61, 0.0 }
 0x1f9   : > { %v1164_v15 = vmax.f32 %v838_v3, 0.0  ;;  %v1150_v51 = vmax.f32 %v1011_v41, 0.0  ;;  %v1014_v3 = vpop.f32.mrb[44].mxu1 }
 0x1fa   : > { %v1239_v20 = vpack.c.bf16 %v1163_v10, %v1159_v9  ;;  %v1015_v9 = vadd.f32 %v1014_v3, %v5407_v35  ;;  %v1016_v10 = vpop.f32.mrb[45].mxu1 }
 0x1fb   : > { %v1240_v30 = vpack.c.bf16 %v1164_v15, %v1160_v14  ;;  %v841_v31 = vpop.f32.mrb[52].mxu0  ;;  %v5545_v1 = vpack.c.bf16 %v1150_v51, %v1146_v39  ;;  %v1017_v14 = vadd.f32 %v1016_v10, %v5412_v38  ;;  %v1018_v15 = vpop.f32.mrb[46].mxu1 }
 0x1fc   : > { %v842_v36 = vadd.f32 %v841_v31, %v5388_v56  ;;  %v843_v37 = vpop.f32.mrb[53].mxu0  ;;  %v1019_v22 = vadd.f32 %v1018_v15, %v5407_v35  ;;  %v1020_v28 = vpop.f32.mrb[47].mxu1 }
 0x1fd   : > { %v844_v43 = vadd.f32 %v843_v37, %v5391_v57  ;;  %v845_v45 = vpop.f32.mrb[54].mxu0  ;;  %1802 = vmatprep.mubr.bf16.mxu0 %v1240_v30  ;;  %v1154_v32 = vmax.f32 %v1017_v14, 0.0  ;;  %v1021_v33 = vadd.f32 %v1020_v28, %v5412_v38  ;;  %v1024_v60 = vpop.f32.mrb[48].mxu1 }
 0x1fe   : > { %v846_v49 = vadd.f32 %v845_v45, %v5388_v56  ;;  %v847_v50 = vpop.f32.mrb[55].mxu0  ;;  %1803 = vmatmul.mubr.bf16.gmra.mrb[112].mxu0 %v1239_v20  ;;  %v1167_v61 = vmax.f32 %v842_v36, 0.0  ;;  %v1153_v20 = vmax.f32 %v1015_v9, 0.0  ;;  %v1157_v37 = vmax.f32 %v1019_v22, 0.0 }
 0x1ff   : > { %v848_v0 = vadd.f32 %v847_v50, %v5391_v57  ;;  %v1168_v7 = vmax.f32 %v844_v43, 0.0  ;;  %v1158_v43 = vmax.f32 %v1021_v33, 0.0  ;;  %v4673_v50 = vld [vmem:[#allocation8 + $0x44] ss:$16 sps:$4 sm:$0xff]   ;;  %v1025_v3 = vadd.f32 %v1024_v60, %v5407_v35 }
 0x200   : > { %v1171_v62 = vmax.f32 %v846_v49, 0.0  ;;  %v5555_v47 = vpack.c.bf16 %v1157_v37, %v1153_v20  ;;  %v4671_v49 = vld [vmem:[#allocation8 + $0x40] ss:$16 sps:$4 sm:$0xff]   ;;  %2541 = vmatprep.subr.bf16.mxu1 %v4673_v50 }
 0x201   : > { %v1172_v8 = vmax.f32 %v848_v0, 0.0  ;;  %v5557_v59 = vpack.c.bf16 %v1158_v43, %v1154_v32  ;;  %2542 = vmatpush1.bf16.msra.mxu1 %v4671_v49  ;;  %v1161_v15 = vmax.f32 %v1025_v3, 0.0  ;;  %v4674_v43 = vld [vmem:[#allocation8 + $0x60] ss:$16 sps:$4 sm:$0xff]  }
 0x202   : > { %v1243_v13 = vpack.c.bf16 %v1171_v62, %v1167_v61 }
 0x203   : > { %v1244_v17 = vpack.c.bf16 %v1172_v8, %v1168_v7  ;;  %v851_v18 = vpop.f32.mrb[56].mxu0  ;;  %v1026_v7 = vpop.f32.mrb[49].mxu1 }
 0x204   : > { %v852_v30 = vadd.f32 %v851_v18, %v5388_v56  ;;  %v853_v31 = vpop.f32.mrb[57].mxu0  ;;  %v1027_v9 = vadd.f32 %v1026_v7, %v5412_v38  ;;  %v1028_v10 = vpop.f32.mrb[50].mxu1 }
 0x205   : > { %v854_v34 = vadd.f32 %v853_v31, %v5391_v57  ;;  %v855_v36 = vpop.f32.mrb[58].mxu0  ;;  %1812 = vmatprep.mubr.bf16.mxu0 %v1244_v17  ;;  %v1029_v17 = vadd.f32 %v1028_v10, %v5407_v35  ;;  %v1030_v18 = vpop.f32.mrb[51].mxu1 }
 0x206   : > { %v856_v39 = vadd.f32 %v855_v36, %v5388_v56  ;;  %v857_v41 = vpop.f32.mrb[59].mxu0  ;;  %1813 = vmatmul.mubr.bf16.gmra.mrb[116].mxu0 %v1243_v13  ;;  %v1175_v51 = vmax.f32 %v852_v30, 0.0  ;;  %v1162_v28 = vmax.f32 %v1027_v9, 0.0  ;;  %v1031_v30 = vadd.f32 %v1030_v18, %v5412_v38 }
 0x207   : > { %v858_v45 = vadd.f32 %v857_v41, %v5391_v57  ;;  %v1176_v61 = vmax.f32 %v854_v34, 0.0  ;;  %v1165_v33 = vmax.f32 %v1029_v17, 0.0 }
 0x208   : > { %v1179_v0 = vmax.f32 %v856_v39, 0.0  ;;  %v1166_v37 = vmax.f32 %v1031_v30, 0.0  ;;  %v4682_v30 = vld [vmem:[#allocation8 + $0xa4] ss:$16 sps:$4 sm:$0xff]  }
 0x209   : > { %v1180_v62 = vmax.f32 %v858_v45, 0.0  ;;  %v5567_v41 = vpack.c.bf16 %v1165_v33, %v1161_v15  ;;  %v4676_v45 = vld [vmem:[#allocation8 + $0x64] ss:$16 sps:$4 sm:$0xff]  }
 0x20a   : > { %v1247_v8 = vpack.c.bf16 %v1179_v0, %v1175_v51  ;;  %v5569_v51 = vpack.c.bf16 %v1166_v37, %v1162_v28  ;;  %v1034_v0 = vpop.f32.mrb[52].mxu1  ;;  %2543 = vmatprep.subr.bf16.mxu1 %v4676_v45 }
 0x20b   : > { %v1248_v13 = vpack.c.bf16 %v1180_v62, %v1176_v61  ;;  %v861_v14 = vpop.f32.mrb[60].mxu0  ;;  %v1035_v62 = vadd.f32 %v1034_v0, %v5407_v35  ;;  %v1036_v3 = vpop.f32.mrb[53].mxu1  ;;  %2544 = vmatpush1.bf16.msra.mxu1 %v4674_v43  ;;  %v4685_v43 = vld [vmem:[#allocation8 + $0xc4] ss:$16 sps:$4 sm:$0xff]  }
 0x20c   : > { %v862_v20 = vadd.f32 %v861_v14, %v5388_v56  ;;  %v863_v22 = vpop.f32.mrb[61].mxu0  ;;  %v1037_v7 = vadd.f32 %v1036_v3, %v5412_v38  ;;  %v4688_v3 = vld [vmem:[#allocation8 + $0xe4] ss:$16 sps:$4 sm:$0xff]  }
 0x20d   : > { %v864_v31 = vadd.f32 %v863_v22, %v5391_v57  ;;  %v865_v32 = vpop.f32.mrb[62].mxu0  ;;  %1822 = vmatprep.mubr.bf16.mxu0 %v1248_v13  ;;  %v1169_v9 = vmax.f32 %v1035_v62, 0.0  ;;  %v4679_v22 = vld [vmem:[#allocation8 + $0x84] ss:$16 sps:$4 sm:$0xff]  }
 0x20e   : > { %v866_v34 = vadd.f32 %v865_v32, %v5388_v56  ;;  %v867_v36 = vpop.f32.mrb[63].mxu0  ;;  %1823 = vmatmul.mubr.bf16.gmra.mrb[120].mxu0 %v1247_v8  ;;  %v1183_v49 = vmax.f32 %v862_v20, 0.0  ;;  %v1038_v8 = vpop.f32.mrb[54].mxu1  ;;  %v1170_v14 = vmax.f32 %v1037_v7, 0.0  ;;  %v4677_v20 = vld [vmem:[#allocation8 + $0x80] ss:$16 sps:$4 sm:$0xff]   ;;  %2545 = vmatprep.subr.bf16.mxu1 %v4679_v22 }
 0x20f   : > { %v868_v39 = vadd.f32 %v867_v36, %v5391_v57  ;;  %v1184_v60 = vmax.f32 %v864_v31, 0.0  ;;  %v1039_v10 = vadd.f32 %v1038_v8, %v5407_v35  ;;  %v1040_v13 = vpop.f32.mrb[55].mxu1  ;;  %2546 = vmatpush1.bf16.msra.mxu1 %v4677_v20  ;;  %v4680_v36 = vld [vmem:[#allocation8 + $0xa0] ss:$16 sps:$4 sm:$0xff]  }
 0x210   : > { %v1187_v50 = vmax.f32 %v866_v34, 0.0  ;;  %v1041_v15 = vadd.f32 %v1040_v13, %v5412_v38  ;;  %v1044_v32 = vpop.f32.mrb[56].mxu1  ;;  %2547 = vmatprep.subr.bf16.mxu1 %v4682_v30  ;;  %v4689_v30 = vld [vmem:[#allocation8 + $0x100] ss:$16 sps:$4 sm:$0xff]  }
 0x211   : > { %v1188_v61 = vmax.f32 %v868_v39, 0.0  ;;  %v1173_v17 = vmax.f32 %v1039_v10, 0.0  ;;  %v1045_v33 = vadd.f32 %v1044_v32, %v5407_v35  ;;  %v1046_v34 = vpop.f32.mrb[57].mxu1  ;;  %v4686_v10 = vld [vmem:[#allocation8 + $0xe0] ss:$16 sps:$4 sm:$0xff]  }
 0x212   : > { %v1251_v56 = vpack.c.bf16 %v1187_v50, %v1183_v49  ;;  %v1174_v18 = vmax.f32 %v1041_v15, 0.0  ;;  %v1047_v37 = vadd.f32 %v1046_v34, %v5412_v38  ;;  %v1048_v39 = vpop.f32.mrb[58].mxu1 }
 0x213   : > { %v1252_v57 = vpack.c.bf16 %v1188_v61, %v1184_v60  ;;  %v5576_v28 = vpack.c.bf16 %v1173_v17, %v1169_v9  ;;  %v1177_v45 = vmax.f32 %v1045_v33, 0.0  ;;  %v1050_v49 = vpop.f32.mrb[59].mxu1  ;;  %2548 = vmatpush1.bf16.msra.mxu1 %v4680_v36  ;;  %v4683_v61 = vld [vmem:[#allocation8 + $0xc0] ss:$16 sps:$4 sm:$0xff]   ;;  %v4694_v33 = vld [vmem:[#allocation8 + $0x124] ss:$16 sps:$4 sm:$0xff]  }
 0x214   : > { %v5578_v31 = vpack.c.bf16 %v1174_v18, %v1170_v14  ;;  %v1178_v50 = vmax.f32 %v1047_v37, 0.0  ;;  %v1051_v0 = vadd.f32 %v1050_v49, %v5412_v38  ;;  %2549 = vmatprep.subr.bf16.mxu1 %v4685_v43  ;;  %v1054_v8 = vpop.f32.mrb[60].mxu1  ;;  %v4692_v37 = vld [vmem:[#allocation8 + $0x120] ss:$16 sps:$4 sm:$0xff]   ;;  %v4703_v43 = vld [vmem:[#allocation8 + $0x184] ss:$16 sps:$4 sm:$0xff]  }
 0x215   : > { %1832 = vmatprep.mubr.bf16.mxu0 %v1252_v57  ;;  %v1055_v57 = vadd.f32 %v1054_v8, %v5407_v35  ;;  %v1056_v9 = vpop.f32.mrb[61].mxu1  ;;  %v4707_v49 = vld [vmem:[#allocation8 + $0x1c0] ss:$16 sps:$4 sm:$0xff]   ;;  %v4716_v8 = vld [vmem:[#allocation8 + $0x28] ss:$16 sps:$4 sm:$0xff]  }
 0x216   : > { %1833 = vmatmul.mubr.bf16.gmra.mrb[124].mxu0 %v1251_v56  ;;  %v1182_v62 = vmax.f32 %v1051_v0, 0.0  ;;  %v1057_v13 = vadd.f32 %v1056_v9, %v5412_v38  ;;  %v1058_v14 = vpop.f32.mrb[62].mxu1 }
 0x217   : > { %1875 = vmatprep.mubr.bf16.mxu0 %v5425_v16  ;;  %v1049_v16 = vadd.f32 %v1048_v39, %v5407_v35  ;;  %2550 = vmatpush1.bf16.msra.mxu1 %v4683_v61  ;;  %v1185_v15 = vmax.f32 %v1055_v57, 0.0  ;;  %v1059_v17 = vadd.f32 %v1058_v14, %v5407_v35  ;;  %v1060_v18 = vpop.f32.mrb[63].mxu1  ;;  %v4697_v35 = vld [vmem:[#allocation8 + $0x144] ss:$16 sps:$4 sm:$0xff]   ;;  %v4695_v39 = vld [vmem:[#allocation8 + $0x140] ss:$16 sps:$4 sm:$0xff]  }
 0x218   : > { %v5588_v7 = vpack.c.bf16 %v1182_v62, %v1178_v50  ;;  %2551 = vmatprep.subr.bf16.mxu1 %v4688_v3  ;;  %v1061_v20 = vadd.f32 %v1060_v18, %v5412_v38  ;;  %v4700_v38 = vld [vmem:[#allocation8 + $0x164] ss:$16 sps:$4 sm:$0xff]   ;;  %v4719_v18 = vld [vmem:[#allocation8 + $0x48] ss:$16 sps:$4 sm:$0xff]  }
 0x219   : > { %v1181_v60 = vmax.f32 %v1049_v16, 0.0  ;;  %v1189_v22 = vmax.f32 %v1059_v17, 0.0  ;;  %v4704_v16 = vld [vmem:[#allocation8 + $0x1a0] ss:$16 sps:$4 sm:$0xff]  }
 0x21a   : > { %v1190_v32 = vmax.f32 %v1061_v20, 0.0 }
 0x21b   : > { %v5586_v56 = vpack.c.bf16 %v1181_v60, %v1177_v45  ;;  %2552 = vmatpush1.bf16.msra.mxu1 %v4686_v10  ;;  %v1253_v34 = vpack.c.bf16 %v1189_v22, %v1185_v15  ;;  %v4706_v45 = vld [vmem:[#allocation8 + $0x1a4] ss:$16 sps:$4 sm:$0xff]   ;;  %v4718_v60 = vld [vmem:[#allocation8 + $0x2c] ss:$16 sps:$4 sm:$0xff]  }
 0x21c   : > { %v4721_v10 = vld [vmem:[#allocation8 + $0x4c] ss:$16 sps:$4 sm:$0xff]  }
 0x21d   : > { %v4724_v22 = vld [vmem:[#allocation8 + $0x6c] ss:$16 sps:$4 sm:$0xff]  }
 0x21e   : > { %1876 = vmatmul.mubr.bf16.vlgmr.msra.gmra.mrb[64].mxu0 %v5423_v12  ;;  %v4691_v12 = vld [vmem:[#allocation8 + $0x104] ss:$16 sps:$4 sm:$0xff]  }
 0x21f   : > { %1885 = vmatprep.mubr.bf16.mxu0 %v5437_v54  ;;  %v1186_v54 = vmax.f32 %v1057_v13, 0.0  ;;  %2553 = vmatprep.subr.bf16.mxu1 %v4691_v12 }
 0x220   : > { %2554 = vmatpush1.bf16.msra.mxu1 %v4689_v30 }
 0x221   : > { %v1254_v36 = vpack.c.bf16 %v1190_v32, %v1186_v54  ;;  %2555 = vmatprep.subr.bf16.mxu1 %v4694_v33 }
 0x224   : > { %2556 = vmatpush1.bf16.msra.mxu1 %v4692_v37  ;;  %v4722_v37 = vld [vmem:[#allocation8 + $0x68] ss:$16 sps:$4 sm:$0xff]  }
 0x225   : > { %2557 = vmatprep.subr.bf16.mxu1 %v4697_v35 }
 0x226   : > { %1886 = vmatmul.mubr.bf16.gmra.mrb[68].mxu0 %v5435_v48  ;;  %v4698_v48 = vld [vmem:[#allocation8 + $0x160] ss:$16 sps:$4 sm:$0xff]  }
 0x227   : > { %1895 = vmatprep.mubr.bf16.mxu0 %v5449_v29  ;;  %v4701_v29 = vld [vmem:[#allocation8 + $0x180] ss:$16 sps:$4 sm:$0xff]  }
 0x228   : > { %2558 = vmatpush1.bf16.msra.mxu1 %v4695_v39 }
 0x229   : > { %2559 = vmatprep.subr.bf16.mxu1 %v4700_v38  ;;  %v4727_v38 = vld [vmem:[#allocation8 + $0x8c] ss:$16 sps:$4 sm:$0xff]  }
 0x22c   : > { %2560 = vmatpush1.bf16.msra.mxu1 %v4698_v48 }
 0x22d   : > { %2561 = vmatprep.subr.bf16.mxu1 %v4703_v43 }
 0x22e   : > { %1896 = vmatmul.mubr.bf16.gmra.mrb[72].mxu0 %v5447_v23  ;;  %v4709_v23 = vld [vmem:[#allocation8 + $0x1c4] ss:$16 sps:$4 sm:$0xff]  }
 0x22f   : > { %1905 = vmatprep.mubr.bf16.mxu0 %v5461_v6  ;;  %v4710_v6 = vld [vmem:[#allocation8 + $0x1e0] ss:$16 sps:$4 sm:$0xff]  }
 0x230   : > { %2562 = vmatpush1.bf16.msra.mxu1 %v4701_v29 }
 0x231   : > { %2563 = vmatprep.subr.bf16.mxu1 %v4706_v45 }
 0x234   : > { %2564 = vmatpush1.bf16.msra.mxu1 %v4704_v16 }
 0x235   : > { %2565 = vmatprep.subr.bf16.mxu1 %v4709_v23  ;;  %v4725_v23 = vld [vmem:[#allocation8 + $0x88] ss:$16 sps:$4 sm:$0xff]  }
 0x236   : > { %1906 = vmatmul.mubr.bf16.gmra.mrb[76].mxu0 %v5459_v2  ;;  %v4712_v2 = vld [vmem:[#allocation8 + $0x1e4] ss:$16 sps:$4 sm:$0xff]  }
 0x237   : > { %1915 = vmatprep.mubr.bf16.mxu0 %v5473_v46  ;;  %v461_v46 = vld [vmem:[%s6196_s4] sm:$0x3] }
 0x238   : > { %2566 = vmatpush1.bf16.msra.mxu1 %v4707_v49 }
 0x239   : > { %2567 = vmatprep.subr.bf16.mxu1 %v4712_v2 }
 0x23c   : > { %2568 = vmatpush1.bf16.msra.mxu1 %v4710_v6  ;;  %v4730_v6 = vld [vmem:[#allocation8 + $0xac] ss:$16 sps:$4 sm:$0xff]  }
 0x23e   : > { %1916 = vmatmul.mubr.bf16.gmra.mrb[80].mxu0 %v5471_v42  ;;  %v4715_v42 = vld [vmem:[#allocation8 + $0xc] ss:$16 sps:$4 sm:$0xff]  }
 0x23f   : > { %1925 = vmatprep.mubr.bf16.mxu0 %v5485_v27  ;;  %2730 = vmatprep.subr.bf16.mxu1 %v4715_v42  ;;  %v5628_v27 = vrot.slane %v461_v46, %v5385_v55 }
 0x246   : > { %1926 = vmatmul.mubr.bf16.gmra.mrb[84].mxu0 %v5483_v21  ;;  %v5625_v21 = vrot.slane %v461_v46, %v5379_v53 }
 0x247   : > { %1935 = vmatprep.mubr.bf16.mxu0 %v5497_v4 }
 0x24e   : > { %1936 = vmatmul.mubr.bf16.gmra.mrb[88].mxu0 %v5495_v63 }
 0x24f   : > { %1945 = vmatprep.mubr.bf16.mxu0 %v5509_v44 }
 0x256   : > { %1946 = vmatmul.mubr.bf16.gmra.mrb[92].mxu0 %v5507_v40 }
 0x257   : > { %1955 = vmatprep.mubr.bf16.mxu0 %v5521_v25 }
 0x25e   : > { %1956 = vmatmul.mubr.bf16.gmra.mrb[96].mxu0 %v5519_v19 }
 0x25f   : > { %1965 = vmatprep.mubr.bf16.mxu0 %v5533_v11 }
 0x266   : > { %1966 = vmatmul.mubr.bf16.gmra.mrb[100].mxu0 %v5531_v5 }
 0x267   : > { %1975 = vmatprep.mubr.bf16.mxu0 %v5545_v1 }
 0x26e   : > { %1976 = vmatmul.mubr.bf16.gmra.mrb[104].mxu0 %v5543_v58 }
 0x26f   : > { %1985 = vmatprep.mubr.bf16.mxu0 %v5557_v59 }
 0x276   : > { %1986 = vmatmul.mubr.bf16.gmra.mrb[108].mxu0 %v5555_v47 }
 0x277   : > { %1995 = vmatprep.mubr.bf16.mxu0 %v5569_v51 }
 0x27e   : > { %1996 = vmatmul.mubr.bf16.gmra.mrb[112].mxu0 %v5567_v41 }
 0x27f   : > { %2005 = vmatprep.mubr.bf16.mxu0 %v5578_v31  ;;  %v4713_v31 = vld [vmem:[#allocation8 + $0x8] ss:$16 sps:$4 sm:$0xff]  }
 0x286   : > { %2006 = vmatmul.mubr.bf16.gmra.mrb[116].mxu0 %v5576_v28 }
 0x287   : > { %2015 = vmatprep.mubr.bf16.mxu0 %v5588_v7 }
 0x28e   : > { %2016 = vmatmul.mubr.bf16.gmra.mrb[120].mxu0 %v5586_v56 }
 0x28f   : > { %2025 = vmatprep.mubr.bf16.mxu0 %v1254_v36 }
 0x296   : > { %2026 = vmatmul.mubr.bf16.gmra.mrb[124].mxu0 %v1253_v34 }
 0x2f1   : > { %v1877_v63 = vpop.f32.mrb[64].mxu0 }
 0x2f2   : > { %v4297_v4 = vadd.f32 %v1877_v63, %v5625_v21  ;;  %v1879_v40 = vpop.f32.mrb[65].mxu0 }
 0x2f3   : > { %v4298_v44 = vadd.f32 %v1879_v40, %v5628_v27  ;;  %v1881_v19 = vpop.f32.mrb[66].mxu0 }
 0x2f4   : > { %v4299_v25 = vadd.f32 %v1881_v19, %v5625_v21  ;;  %v1883_v5 = vpop.f32.mrb[67].mxu0  ;;  %v2036_v58 = vmax.f32 %v4297_v4, 0.0 }
 0x2f5   : > { %v4300_v11 = vadd.f32 %v1883_v5, %v5628_v27  ;;  %v2037_v47 = vmax.f32 %v4298_v44, 0.0  ;;  %v4728_v44 = vld [vmem:[#allocation8 + $0xa8] ss:$16 sps:$4 sm:$0xff]   ;;  %v4733_v5 = vld [vmem:[#allocation8 + $0xcc] ss:$16 sps:$4 sm:$0xff]  }
 0x2f6   : > { %v2038_v1 = vmax.f32 %v4299_v25, 0.0 }
 0x2f7   : > { %v2039_v59 = vmax.f32 %v4300_v11, 0.0 }
 0x2f8   : > { %v5634_v41 = vpack.c.bf16 %v2038_v1, %v2036_v58 }
 0x2f9   : > { %v5636_v51 = vpack.c.bf16 %v2039_v59, %v2037_v47  ;;  %v1887_v28 = vpop.f32.mrb[68].mxu0 }
 0x2fa   : > { %v4301_v50 = vadd.f32 %v1887_v28, %v5625_v21  ;;  %v1889_v0 = vpop.f32.mrb[69].mxu0  ;;  %v4731_v28 = vld [vmem:[#allocation8 + $0xc8] ss:$16 sps:$4 sm:$0xff]  }
 0x2fb   : > { %v4302_v61 = vadd.f32 %v1889_v0, %v5628_v27  ;;  %v1891_v62 = vpop.f32.mrb[70].mxu0  ;;  %2569 = vmatprep.mubr.bf16.mxu1 %v5636_v51  ;;  %v4736_v0 = vld [vmem:[#allocation8 + $0xec] ss:$16 sps:$4 sm:$0xff]  }
 0x2fc   : > { %v4303_v3 = vadd.f32 %v1891_v62, %v5625_v21  ;;  %v1893_v56 = vpop.f32.mrb[71].mxu0  ;;  %2570 = vmatmul.mubr.bf16.vlgmr.msra.gmra.mrb[64].mxu1 %v5634_v41  ;;  %v2040_v57 = vmax.f32 %v4301_v50, 0.0 }
 0x2fd   : > { %v4304_v7 = vadd.f32 %v1893_v56, %v5628_v27  ;;  %2731 = vmatpush1.bf16.msra.mxu1 %v4713_v31  ;;  %v2041_v13 = vmax.f32 %v4302_v61, 0.0 }
 0x2fe   : > { %v2042_v9 = vmax.f32 %v4303_v3, 0.0  ;;  %2732 = vmatprep.subr.bf16.mxu1 %v4718_v60 }
 0x2ff   : > { %v2043_v14 = vmax.f32 %v4304_v7, 0.0  ;;  %v4734_v7 = vld [vmem:[#allocation8 + $0xe8] ss:$16 sps:$4 sm:$0xff]  }
 0x300   : > { %v5644_v12 = vpack.c.bf16 %v2042_v9, %v2040_v57  ;;  %v4739_v9 = vld [vmem:[#allocation8 + $0x10c] ss:$16 sps:$4 sm:$0xff]  }
 0x301   : > { %v5646_v15 = vpack.c.bf16 %v2043_v14, %v2041_v13  ;;  %v1897_v17 = vpop.f32.mrb[72].mxu0  ;;  %2733 = vmatpush1.bf16.msra.mxu1 %v4716_v8 }
 0x302   : > { %v4305_v54 = vadd.f32 %v1897_v17, %v5625_v21  ;;  %v1899_v20 = vpop.f32.mrb[73].mxu0  ;;  %2734 = vmatprep.subr.bf16.mxu1 %v4721_v10 }
 0x303   : > { %v4306_v30 = vadd.f32 %v1899_v20, %v5628_v27  ;;  %v1901_v32 = vpop.f32.mrb[74].mxu0  ;;  %2579 = vmatprep.mubr.bf16.mxu1 %v5646_v15 }
 0x304   : > { %v4307_v33 = vadd.f32 %v1901_v32, %v5625_v21  ;;  %v1903_v34 = vpop.f32.mrb[75].mxu0  ;;  %2580 = vmatmul.mubr.bf16.gmra.mrb[68].mxu1 %v5644_v12  ;;  %v2044_v35 = vmax.f32 %v4305_v54, 0.0  ;;  %v4737_v54 = vld [vmem:[#allocation8 + $0x108] ss:$16 sps:$4 sm:$0xff]  }
 0x305   : > { %v4308_v36 = vadd.f32 %v1903_v34, %v5628_v27  ;;  %2735 = vmatpush1.bf16.msra.mxu1 %v4719_v18  ;;  %v2045_v48 = vmax.f32 %v4306_v30, 0.0  ;;  %v4742_v30 = vld [vmem:[#allocation8 + $0x12c] ss:$16 sps:$4 sm:$0xff]  }
 0x306   : > { %v2046_v39 = vmax.f32 %v4307_v33, 0.0  ;;  %2736 = vmatprep.subr.bf16.mxu1 %v4724_v22 }
 0x307   : > { %v2047_v43 = vmax.f32 %v4308_v36, 0.0 }
 0x308   : > { %v5654_v29 = vpack.c.bf16 %v2046_v39, %v2044_v35  ;;  %v4740_v35 = vld [vmem:[#allocation8 + $0x128] ss:$16 sps:$4 sm:$0xff]  }
 0x309   : > { %v5656_v45 = vpack.c.bf16 %v2047_v43, %v2045_v48  ;;  %v1907_v16 = vpop.f32.mrb[76].mxu0  ;;  %2737 = vmatpush1.bf16.msra.mxu1 %v4722_v37  ;;  %v4745_v48 = vld [vmem:[#allocation8 + $0x14c] ss:$16 sps:$4 sm:$0xff]  }
 0x30a   : > { %v4309_v49 = vadd.f32 %v1907_v16, %v5625_v21  ;;  %v1909_v2 = vpop.f32.mrb[77].mxu0  ;;  %2738 = vmatprep.subr.bf16.mxu1 %v4727_v38 }
 0x30b   : > { %v4310_v42 = vadd.f32 %v1909_v2, %v5628_v27  ;;  %v1911_v46 = vpop.f32.mrb[78].mxu0  ;;  %2589 = vmatprep.mubr.bf16.mxu1 %v5656_v45 }
 0x30c   : > { %v4311_v63 = vadd.f32 %v1911_v46, %v5625_v21  ;;  %v1913_v4 = vpop.f32.mrb[79].mxu0  ;;  %2590 = vmatmul.mubr.bf16.gmra.mrb[72].mxu1 %v5654_v29  ;;  %v2048_v19 = vmax.f32 %v4309_v49, 0.0 }
 0x30d   : > { %v4312_v40 = vadd.f32 %v1913_v4, %v5628_v27  ;;  %2739 = vmatpush1.bf16.msra.mxu1 %v4725_v23  ;;  %v2049_v11 = vmax.f32 %v4310_v42, 0.0 }
 0x30e   : > { %v2050_v25 = vmax.f32 %v4311_v63, 0.0  ;;  %2740 = vmatprep.subr.bf16.mxu1 %v4730_v6  ;;  %v4743_v6 = vld [vmem:[#allocation8 + $0x148] ss:$16 sps:$4 sm:$0xff]   ;;  %v4748_v63 = vld [vmem:[#allocation8 + $0x16c] ss:$16 sps:$4 sm:$0xff]  }
 0x30f   : > { %v2051_v58 = vmax.f32 %v4312_v40, 0.0 }
 0x310   : > { %v5664_v1 = vpack.c.bf16 %v2050_v25, %v2048_v19 }
 0x311   : > { %v5666_v47 = vpack.c.bf16 %v2051_v58, %v2049_v11  ;;  %v1917_v59 = vpop.f32.mrb[80].mxu0  ;;  %2741 = vmatpush1.bf16.msra.mxu1 %v4728_v44 }
 0x312   : > { %v4313_v31 = vadd.f32 %v1917_v59, %v5625_v21  ;;  %v1919_v50 = vpop.f32.mrb[81].mxu0  ;;  %2742 = vmatprep.subr.bf16.mxu1 %v4733_v5  ;;  %v4746_v5 = vld [vmem:[#allocation8 + $0x168] ss:$16 sps:$4 sm:$0xff]   ;;  %v4751_v59 = vld [vmem:[#allocation8 + $0x18c] ss:$16 sps:$4 sm:$0xff]  }
 0x313   : > { %v4314_v60 = vadd.f32 %v1919_v50, %v5628_v27  ;;  %v1921_v61 = vpop.f32.mrb[82].mxu0  ;;  %2599 = vmatprep.mubr.bf16.mxu1 %v5666_v47 }
 0x314   : > { %v4315_v62 = vadd.f32 %v1921_v61, %v5625_v21  ;;  %v1923_v3 = vpop.f32.mrb[83].mxu0  ;;  %2600 = vmatmul.mubr.bf16.gmra.mrb[76].mxu1 %v5664_v1  ;;  %v2052_v8 = vmax.f32 %v4313_v31, 0.0  ;;  %v4749_v61 = vld [vmem:[#allocation8 + $0x188] ss:$16 sps:$4 sm:$0xff]  }
 0x315   : > { %v4316_v56 = vadd.f32 %v1923_v3, %v5628_v27  ;;  %2743 = vmatpush1.bf16.msra.mxu1 %v4731_v28  ;;  %v2053_v10 = vmax.f32 %v4314_v60, 0.0 }
 0x316   : > { %v2054_v57 = vmax.f32 %v4315_v62, 0.0  ;;  %2744 = vmatprep.subr.bf16.mxu1 %v4736_v0 }
 0x317   : > { %v2055_v13 = vmax.f32 %v4316_v56, 0.0  ;;  %v4754_v56 = vld [vmem:[#allocation8 + $0x1ac] ss:$16 sps:$4 sm:$0xff]  }
 0x318   : > { %v5674_v14 = vpack.c.bf16 %v2054_v57, %v2052_v8 }
 0x319   : > { %v5676_v17 = vpack.c.bf16 %v2055_v13, %v2053_v10  ;;  %v1927_v18 = vpop.f32.mrb[84].mxu0  ;;  %2745 = vmatpush1.bf16.msra.mxu1 %v4734_v7  ;;  %v4752_v13 = vld [vmem:[#allocation8 + $0x1a8] ss:$16 sps:$4 sm:$0xff]  }
 0x31a   : > { %v4317_v20 = vadd.f32 %v1927_v18, %v5625_v21  ;;  %v1929_v22 = vpop.f32.mrb[85].mxu0  ;;  %2746 = vmatprep.subr.bf16.mxu1 %v4739_v9 }
 0x31b   : > { %v4318_v32 = vadd.f32 %v1929_v22, %v5628_v27  ;;  %v1931_v33 = vpop.f32.mrb[86].mxu0  ;;  %2609 = vmatprep.mubr.bf16.mxu1 %v5676_v17 }
 0x31c   : > { %v4319_v34 = vadd.f32 %v1931_v33, %v5625_v21  ;;  %v1933_v36 = vpop.f32.mrb[87].mxu0  ;;  %2610 = vmatmul.mubr.bf16.gmra.mrb[80].mxu1 %v5674_v14  ;;  %v2056_v39 = vmax.f32 %v4317_v20, 0.0  ;;  %v4757_v20 = vld [vmem:[#allocation8 + $0x1cc] ss:$16 sps:$4 sm:$0xff]  }
 0x31d   : > { %v4320_v37 = vadd.f32 %v1933_v36, %v5628_v27  ;;  %2747 = vmatpush1.bf16.msra.mxu1 %v4737_v54  ;;  %v2057_v43 = vmax.f32 %v4318_v32, 0.0  ;;  %v4755_v36 = vld [vmem:[#allocation8 + $0x1c8] ss:$16 sps:$4 sm:$0xff]  }
 0x31e   : > { %v2058_v38 = vmax.f32 %v4319_v34, 0.0  ;;  %2748 = vmatprep.subr.bf16.mxu1 %v4742_v30 }
 0x31f   : > { %v2059_v16 = vmax.f32 %v4320_v37, 0.0 }
 0x320   : > { %v5684_v23 = vpack.c.bf16 %v2058_v38, %v2056_v39  ;;  %v4760_v39 = vld [vmem:[#allocation8 + $0x1ec] ss:$16 sps:$4 sm:$0xff]  }
 0x321   : > { %v5686_v49 = vpack.c.bf16 %v2059_v16, %v2057_v43  ;;  %v1937_v2 = vpop.f32.mrb[88].mxu0  ;;  %2749 = vmatpush1.bf16.msra.mxu1 %v4740_v35 }
 0x322   : > { %v4321_v42 = vadd.f32 %v1937_v2, %v5625_v21  ;;  %v1939_v46 = vpop.f32.mrb[89].mxu0  ;;  %2750 = vmatprep.subr.bf16.mxu1 %v4745_v48 }
 0x323   : > { %v4322_v4 = vadd.f32 %v1939_v46, %v5628_v27  ;;  %v1941_v40 = vpop.f32.mrb[90].mxu0  ;;  %2619 = vmatprep.mubr.bf16.mxu1 %v5686_v49  ;;  %v4762_v46 = vld [vmem:[#allocation10] sm:$0xff]  }
 0x324   : > { %v4323_v44 = vadd.f32 %v1941_v40, %v5625_v21  ;;  %v1943_v19 = vpop.f32.mrb[91].mxu0  ;;  %2620 = vmatmul.mubr.bf16.gmra.mrb[84].mxu1 %v5684_v23  ;;  %v2060_v11 = vmax.f32 %v4321_v42, 0.0  ;;  %v4761_v42 = vld [vmem:[#allocation10 + $0x40] sm:$0xff]  }
 0x325   : > { %v4324_v25 = vadd.f32 %v1943_v19, %v5628_v27  ;;  %2751 = vmatpush1.bf16.msra.mxu1 %v4743_v6  ;;  %v2061_v28 = vmax.f32 %v4322_v4, 0.0  ;;  %v4758_v6 = vld [vmem:[#allocation8 + $0x1e8] ss:$16 sps:$4 sm:$0xff]   ;;  %4073 = vmatprep.subr.bf16.mxu0 %v4761_v42  ;;  %v4770_v42 = vld [vmem:[#allocation10 + $0x20] sm:$0xff]  }
 0x326   : > { %v2062_v58 = vmax.f32 %v4323_v44, 0.0  ;;  %2752 = vmatprep.subr.bf16.mxu1 %v4748_v63  ;;  %4074 = vmatpush3.bf16.msra.mxu0 %v4762_v46 }
 0x327   : > { %v2063_v31 = vmax.f32 %v4324_v25, 0.0 }
 0x328   : > { %v5694_v50 = vpack.c.bf16 %v2062_v58, %v2060_v11 }
 0x329   : > { %v5696_v0 = vpack.c.bf16 %v2063_v31, %v2061_v28  ;;  %v1947_v60 = vpop.f32.mrb[92].mxu0  ;;  %2753 = vmatpush1.bf16.msra.mxu1 %v4746_v5 }
 0x32a   : > { %v4325_v62 = vadd.f32 %v1947_v60, %v5625_v21  ;;  %v1949_v3 = vpop.f32.mrb[93].mxu0  ;;  %2754 = vmatprep.subr.bf16.mxu1 %v4751_v59 }
 0x32b   : > { %v4326_v7 = vadd.f32 %v1949_v3, %v5628_v27  ;;  %v1951_v8 = vpop.f32.mrb[94].mxu0  ;;  %2629 = vmatprep.mubr.bf16.mxu1 %v5696_v0  ;;  %v4764_v3 = vld [vmem:[#allocation10 + $0x8] sm:$0xff]  }
 0x32c   : > { %v4327_v57 = vadd.f32 %v1951_v8, %v5625_v21  ;;  %v1953_v9 = vpop.f32.mrb[95].mxu0  ;;  %2630 = vmatmul.mubr.bf16.gmra.mrb[88].mxu1 %v5694_v50  ;;  %v2064_v18 = vmax.f32 %v4325_v62, 0.0 }
 0x32d   : > { %v4328_v10 = vadd.f32 %v1953_v9, %v5628_v27  ;;  %2755 = vmatpush1.bf16.msra.mxu1 %v4749_v61  ;;  %v2065_v22 = vmax.f32 %v4326_v7, 0.0  ;;  %v4763_v61 = vld [vmem:[#allocation10 + $0x48] sm:$0xff]  }
 0x32e   : > { %v2066_v54 = vmax.f32 %v4327_v57, 0.0  ;;  %2756 = vmatprep.subr.bf16.mxu1 %v4754_v56  ;;  %v4765_v56 = vld [vmem:[#allocation10 + $0x50] sm:$0xff]   ;;  %4075 = vmatprep.subr.bf16.mxu0 %v4763_v61 }
 0x32f   : > { %v2067_v30 = vmax.f32 %v4328_v10, 0.0  ;;  %4076 = vmatpush3.bf16.msra.mxu0 %v4764_v3  ;;  %v4766_v10 = vld [vmem:[#allocation10 + $0x10] sm:$0xff]  }
 0x330   : > { %v5704_v32 = vpack.c.bf16 %v2066_v54, %v2064_v18  ;;  %4077 = vmatprep.subr.bf16.mxu0 %v4765_v56 }
 0x331   : > { %v5706_v33 = vpack.c.bf16 %v2067_v30, %v2065_v22  ;;  %v1957_v34 = vpop.f32.mrb[96].mxu0  ;;  %2757 = vmatpush1.bf16.msra.mxu1 %v4752_v13 }
 0x332   : > { %v4329_v37 = vadd.f32 %v1957_v34, %v5625_v21  ;;  %v1959_v35 = vpop.f32.mrb[97].mxu0  ;;  %2758 = vmatprep.subr.bf16.mxu1 %v4757_v20 }
 0x333   : > { %v4330_v38 = vadd.f32 %v1959_v35, %v5628_v27  ;;  %v1961_v48 = vpop.f32.mrb[98].mxu0  ;;  %2639 = vmatprep.mubr.bf16.mxu1 %v5706_v33  ;;  %4078 = vmatpush3.bf16.msra.mxu0 %v4766_v10  ;;  %v4767_v35 = vld [vmem:[#allocation10 + $0x58] sm:$0xff]   ;;  %v4774_v10 = vld [vmem:[#allocation10 + $0x30] sm:$0xff]  }
 0x334   : > { %v4331_v43 = vadd.f32 %v1961_v48, %v5625_v21  ;;  %v1963_v16 = vpop.f32.mrb[99].mxu0  ;;  %2640 = vmatmul.mubr.bf16.gmra.mrb[92].mxu1 %v5704_v32  ;;  %v2068_v63 = vmax.f32 %v4329_v37, 0.0  ;;  %v4769_v48 = vld [vmem:[#allocation10 + $0x60] sm:$0xff]   ;;  %4079 = vmatprep.subr.bf16.mxu0 %v4767_v35 }
 0x335   : > { %v4332_v2 = vadd.f32 %v1963_v16, %v5628_v27  ;;  %2759 = vmatpush1.bf16.msra.mxu1 %v4755_v36  ;;  %v2069_v40 = vmax.f32 %v4330_v38, 0.0  ;;  %v4768_v38 = vld [vmem:[#allocation10 + $0x18] sm:$0xff]  }
 0x336   : > { %v2070_v4 = vmax.f32 %v4331_v43, 0.0  ;;  %2760 = vmatprep.subr.bf16.mxu1 %v4760_v39 }
 0x337   : > { %v2071_v44 = vmax.f32 %v4332_v2, 0.0  ;;  %4080 = vmatpush3.bf16.msra.mxu0 %v4768_v38 }
 0x338   : > { %v5714_v19 = vpack.c.bf16 %v2070_v4, %v2068_v63  ;;  %4081 = vmatprep.subr.bf16.mxu0 %v4769_v48 }
 0x339   : > { %v5716_v25 = vpack.c.bf16 %v2071_v44, %v2069_v40  ;;  %v1967_v5 = vpop.f32.mrb[100].mxu0  ;;  %2761 = vmatpush1.bf16.msra.mxu1 %v4758_v6 }
 0x33a   : > { %v4333_v11 = vadd.f32 %v1967_v5, %v5625_v21  ;;  %v1969_v58 = vpop.f32.mrb[101].mxu0 }
 0x33b   : > { %v4334_v59 = vadd.f32 %v1969_v58, %v5628_v27  ;;  %v1971_v28 = vpop.f32.mrb[102].mxu0  ;;  %2649 = vmatprep.mubr.bf16.mxu1 %v5716_v25  ;;  %4082 = vmatpush3.bf16.msra.mxu0 %v4770_v42 }
 0x33c   : > { %v4335_v31 = vadd.f32 %v1971_v28, %v5625_v21  ;;  %v1973_v60 = vpop.f32.mrb[103].mxu0  ;;  %2650 = vmatmul.mubr.bf16.gmra.mrb[96].mxu1 %v5714_v19  ;;  %v2072_v7 = vmax.f32 %v4333_v11, 0.0  ;;  %v4771_v28 = vld [vmem:[#allocation10 + $0x68] sm:$0xff]  }
 0x33d   : > { %v4336_v62 = vadd.f32 %v1973_v60, %v5628_v27  ;;  %v2073_v57 = vmax.f32 %v4334_v59, 0.0  ;;  %v4772_v60 = vld [vmem:[#allocation10 + $0x28] sm:$0xff]   ;;  %4083 = vmatprep.subr.bf16.mxu0 %v4771_v28 }
 0x33e   : > { %v2074_v8 = vmax.f32 %v4335_v31, 0.0 }
 0x33f   : > { %v2075_v9 = vmax.f32 %v4336_v62, 0.0  ;;  %4084 = vmatpush3.bf16.msra.mxu0 %v4772_v60  ;;  %v4777_v60 = vld [vmem:[#allocation10 + $0xc0] sm:$0xff]  }
 0x340   : > { %v5724_v13 = vpack.c.bf16 %v2074_v8, %v2072_v7  ;;  %v4773_v8 = vld [vmem:[#allocation10 + $0x70] sm:$0xff]   ;;  %4185 = vmatprep.subr.bf16.mxu1 %v4777_v60 }
 0x341   : > { %v5726_v18 = vpack.c.bf16 %v2075_v9, %v2073_v57  ;;  %v1977_v54 = vpop.f32.mrb[104].mxu0  ;;  %4085 = vmatprep.subr.bf16.mxu0 %v4773_v8 }
 0x342   : > { %v4337_v20 = vadd.f32 %v1977_v54, %v5625_v21  ;;  %v1979_v22 = vpop.f32.mrb[105].mxu0 }
 0x343   : > { %v4338_v30 = vadd.f32 %v1979_v22, %v5628_v27  ;;  %v1981_v34 = vpop.f32.mrb[106].mxu0  ;;  %2659 = vmatprep.mubr.bf16.mxu1 %v5726_v18  ;;  %4086 = vmatpush3.bf16.msra.mxu0 %v4774_v10 }
 0x344   : > { %v4339_v36 = vadd.f32 %v1981_v34, %v5625_v21  ;;  %v1983_v37 = vpop.f32.mrb[107].mxu0  ;;  %2660 = vmatmul.mubr.bf16.gmra.mrb[100].mxu1 %v5724_v13  ;;  %v2076_v43 = vmax.f32 %v4337_v20, 0.0 }
 0x345   : > { %v4340_v39 = vadd.f32 %v1983_v37, %v5628_v27  ;;  %v2077_v2 = vmax.f32 %v4338_v30, 0.0  ;;  %v4775_v37 = vld [vmem:[#allocation10 + $0x78] sm:$0xff]  }
 0x346   : > { %v2078_v16 = vmax.f32 %v4339_v36, 0.0  ;;  %4087 = vmatprep.subr.bf16.mxu0 %v4775_v37 }
 0x347   : > { %v2079_v6 = vmax.f32 %v4340_v39, 0.0  ;;  %v4776_v39 = vld [vmem:[#allocation10 + $0x38] sm:$0xff]  }
 0x348   : > { %v5734_v46 = vpack.c.bf16 %v2078_v16, %v2076_v43  ;;  %4088 = vmatpush3.bf16.msra.mxu0 %v4776_v39 }
 0x349   : > { %v5736_v63 = vpack.c.bf16 %v2079_v6, %v2077_v2  ;;  %v1987_v4 = vpop.f32.mrb[108].mxu0 }
 0x34a   : > { %v4341_v40 = vadd.f32 %v1987_v4, %v5625_v21  ;;  %v1989_v44 = vpop.f32.mrb[109].mxu0 }
 0x34b   : > { %v4342_v5 = vadd.f32 %v1989_v44, %v5628_v27  ;;  %v1991_v11 = vpop.f32.mrb[110].mxu0  ;;  %2669 = vmatprep.mubr.bf16.mxu1 %v5736_v63 }
 0x34c   : > { %v4343_v58 = vadd.f32 %v1991_v11, %v5625_v21  ;;  %v1993_v59 = vpop.f32.mrb[111].mxu0  ;;  %2670 = vmatmul.mubr.bf16.gmra.mrb[104].mxu1 %v5734_v46  ;;  %v2080_v61 = vmax.f32 %v4341_v40, 0.0 }
 0x34d   : > { %v4344_v31 = vadd.f32 %v1993_v59, %v5628_v27  ;;  %v2081_v3 = vmax.f32 %v4342_v5, 0.0 }
 0x34e   : > { %v2082_v62 = vmax.f32 %v4343_v58, 0.0 }
 0x34f   : > { %v2083_v56 = vmax.f32 %v4344_v31, 0.0 }
 0x350   : > { %v5744_v7 = vpack.c.bf16 %v2082_v62, %v2080_v61 }
 0x351   : > { %v5746_v57 = vpack.c.bf16 %v2083_v56, %v2081_v3  ;;  %v1997_v9 = vpop.f32.mrb[112].mxu0 }
 0x352   : > { %v4345_v54 = vadd.f32 %v1997_v9, %v5625_v21  ;;  %v1999_v20 = vpop.f32.mrb[113].mxu0 }
 0x353   : > { %v4346_v22 = vadd.f32 %v1999_v20, %v5628_v27  ;;  %v2001_v30 = vpop.f32.mrb[114].mxu0  ;;  %2679 = vmatprep.mubr.bf16.mxu1 %v5746_v57 }
 0x354   : > { %v4347_v34 = vadd.f32 %v2001_v30, %v5625_v21  ;;  %v2003_v36 = vpop.f32.mrb[115].mxu0  ;;  %2680 = vmatmul.mubr.bf16.gmra.mrb[108].mxu1 %v5744_v7  ;;  %v2084_v38 = vmax.f32 %v4345_v54, 0.0 }
 0x355   : > { %v4348_v35 = vadd.f32 %v2003_v36, %v5628_v27  ;;  %v2085_v43 = vmax.f32 %v4346_v22, 0.0 }
 0x356   : > { %v2086_v48 = vmax.f32 %v4347_v34, 0.0 }
 0x357   : > { %v2087_v16 = vmax.f32 %v4348_v35, 0.0 }
 0x358   : > { %v5754_v2 = vpack.c.bf16 %v2086_v48, %v2084_v38 }
 0x359   : > { %v5756_v6 = vpack.c.bf16 %v2087_v16, %v2085_v43  ;;  %v2007_v42 = vpop.f32.mrb[116].mxu0 }
 0x35a   : > { %v4349_v4 = vadd.f32 %v2007_v42, %v5625_v21  ;;  %v2009_v40 = vpop.f32.mrb[117].mxu0 }
 0x35b   : > { %v4350_v44 = vadd.f32 %v2009_v40, %v5628_v27  ;;  %v2011_v5 = vpop.f32.mrb[118].mxu0  ;;  %2689 = vmatprep.mubr.bf16.mxu1 %v5756_v6 }
 0x35c   : > { %v4351_v11 = vadd.f32 %v2011_v5, %v5625_v21  ;;  %v2013_v58 = vpop.f32.mrb[119].mxu0  ;;  %2690 = vmatmul.mubr.bf16.gmra.mrb[112].mxu1 %v5754_v2  ;;  %v2088_v28 = vmax.f32 %v4349_v4, 0.0 }
 0x35d   : > { %v4352_v59 = vadd.f32 %v2013_v58, %v5628_v27  ;;  %v2089_v61 = vmax.f32 %v4350_v44, 0.0 }
 0x35e   : > { %v2090_v31 = vmax.f32 %v4351_v11, 0.0 }
 0x35f   : > { %v2091_v62 = vmax.f32 %v4352_v59, 0.0 }
 0x360   : > { %v5764_v3 = vpack.c.bf16 %v2090_v31, %v2088_v28 }
 0x361   : > { %v5766_v56 = vpack.c.bf16 %v2091_v62, %v2089_v61  ;;  %v2017_v8 = vpop.f32.mrb[120].mxu0  ;;  %v4779_v62 = vld [vmem:[#allocation10 + $0xc8] sm:$0xff]  }
 0x362   : > { %v4353_v9 = vadd.f32 %v2017_v8, %v5625_v21  ;;  %v2019_v10 = vpop.f32.mrb[121].mxu0  ;;  %v4781_v8 = vld [vmem:[#allocation10 + $0xd0] sm:$0xff]  }
 0x363   : > { %v4354_v54 = vadd.f32 %v2019_v10, %v5628_v27  ;;  %v2021_v20 = vpop.f32.mrb[122].mxu0  ;;  %2699 = vmatprep.mubr.bf16.mxu1 %v5766_v56 }
 0x364   : > { %v4355_v22 = vadd.f32 %v2021_v20, %v5625_v21  ;;  %v2023_v30 = vpop.f32.mrb[123].mxu0  ;;  %2700 = vmatmul.mubr.bf16.gmra.mrb[116].mxu1 %v5764_v3  ;;  %v2092_v36 = vmax.f32 %v4353_v9, 0.0  ;;  %v4782_v9 = vld [vmem:[#allocation10 + $0x90] sm:$0xff]  }
 0x365   : > { %v4356_v34 = vadd.f32 %v2023_v30, %v5628_v27  ;;  %v2093_v35 = vmax.f32 %v4354_v54, 0.0 }
 0x366   : > { %v2094_v37 = vmax.f32 %v4355_v22, 0.0 }
 0x367   : > { %v2095_v39 = vmax.f32 %v4356_v34, 0.0 }
 0x368   : > { %v5774_v38 = vpack.c.bf16 %v2094_v37, %v2092_v36 }
 0x369   : > { %v5776_v48 = vpack.c.bf16 %v2095_v39, %v2093_v35  ;;  %v2027_v43 = vpop.f32.mrb[124].mxu0 }
 0x36a   : > { %v4357_v16 = vadd.f32 %v2027_v43, %v5625_v21  ;;  %v2029_v42 = vpop.f32.mrb[125].mxu0 }
 0x36b   : > { %v4358_v4 = vadd.f32 %v2029_v42, %v5628_v27  ;;  %v2031_v40 = vpop.f32.mrb[126].mxu0  ;;  %2709 = vmatprep.mubr.bf16.mxu1 %v5776_v48 }
 0x36c   : > { %v4359_v44 = vadd.f32 %v2031_v40, %v5625_v21  ;;  %v2033_v5 = vpop.f32.mrb[127].mxu0  ;;  %2710 = vmatmul.mubr.bf16.gmra.mrb[120].mxu1 %v5774_v38  ;;  %v2096_v58 = vmax.f32 %v4357_v16, 0.0  ;;  %v4778_v21 = vld [vmem:[#allocation10 + $0x80] sm:$0xff]  }
 0x36d   : > { %v4360_v11 = vadd.f32 %v2033_v5, %v5628_v27  ;;  %v2097_v28 = vmax.f32 %v4358_v4, 0.0  ;;  %v4780_v27 = vld [vmem:[#allocation10 + $0x88] sm:$0xff]  }
 0x36e   : > { %v2098_v59 = vmax.f32 %v4359_v44, 0.0 }
 0x36f   : > { %v2099_v31 = vmax.f32 %v4360_v11, 0.0 }
 0x370   : > { %v5784_v60 = vpack.c.bf16 %v2098_v59, %v2096_v58 }
 0x371   : > { %v5786_v61 = vpack.c.bf16 %v2099_v31, %v2097_v28 }
 0x373   : > { %2719 = vmatprep.mubr.bf16.mxu1 %v5786_v61 }
 0x374   : > { %2720 = vmatmul.mubr.bf16.gmra.mrb[124].mxu1 %v5784_v60 }
 0x375   : > { %2762 = vmatprep.mubr.bf16.mxu1 %v5636_v51  ;;  %v4783_v51 = vld [vmem:[#allocation10 + $0xd8] sm:$0xff]  }
 0x37c   : > { %2763 = vmatmul.mubr.bf16.vlgmr.msra.gmra.mrb[128].mxu1 %v5634_v41  ;;  %v4784_v41 = vld [vmem:[#allocation10 + $0x98] sm:$0xff]  }
 0x37d   : > { %2772 = vmatprep.mubr.bf16.mxu1 %v5646_v15  ;;  %4186 = vmatpush3.bf16.msra.mxu1 %v4778_v21  ;;  %v4786_v15 = vld [vmem:[#allocation10 + $0xa0] sm:$0xff]  }
 0x37e   : > { %4187 = vmatprep.subr.bf16.mxu1 %v4779_v62 }
 0x381   : > { %4188 = vmatpush3.bf16.msra.mxu1 %v4780_v27 }
 0x382   : > { %4189 = vmatprep.subr.bf16.mxu1 %v4781_v8 }
 0x384   : > { %2773 = vmatmul.mubr.bf16.gmra.mrb[132].mxu1 %v5644_v12  ;;  %v4785_v12 = vld [vmem:[#allocation10 + $0xe0] sm:$0xff]  }
 0x385   : > { %2782 = vmatprep.mubr.bf16.mxu1 %v5656_v45  ;;  %4190 = vmatpush3.bf16.msra.mxu1 %v4782_v9  ;;  %v4788_v45 = vld [vmem:[#allocation10 + $0xa8] sm:$0xff]  }
 0x386   : > { %4191 = vmatprep.subr.bf16.mxu1 %v4783_v51 }
 0x389   : > { %4192 = vmatpush3.bf16.msra.mxu1 %v4784_v41 }
 0x38a   : > { %4193 = vmatprep.subr.bf16.mxu1 %v4785_v12 }
 0x38c   : > { %2783 = vmatmul.mubr.bf16.gmra.mrb[136].mxu1 %v5654_v29  ;;  %v4787_v29 = vld [vmem:[#allocation10 + $0xe8] sm:$0xff]  }
 0x38d   : > { %2792 = vmatprep.mubr.bf16.mxu1 %v5666_v47  ;;  %4194 = vmatpush3.bf16.msra.mxu1 %v4786_v15  ;;  %v4790_v47 = vld [vmem:[#allocation10 + $0xb0] sm:$0xff]  }
 0x38e   : > { %4195 = vmatprep.subr.bf16.mxu1 %v4787_v29 }
 0x391   : > { %4196 = vmatpush3.bf16.msra.mxu1 %v4788_v45 }
 0x394   : > { %2793 = vmatmul.mubr.bf16.gmra.mrb[140].mxu1 %v5664_v1  ;;  %v4789_v1 = vld [vmem:[#allocation10 + $0xf0] sm:$0xff]  }
 0x395   : > { %2802 = vmatprep.mubr.bf16.mxu1 %v5676_v17  ;;  %4197 = vmatprep.subr.bf16.mxu1 %v4789_v1 }
 0x396   : > { %4198 = vmatpush3.bf16.msra.mxu1 %v4790_v47 }
 0x39c   : > { %2803 = vmatmul.mubr.bf16.gmra.mrb[144].mxu1 %v5674_v14  ;;  %v5814_v14 = vld [vmem:[%s6198_s6] sm:$0xf] }
 0x39d   : > { %2812 = vmatprep.mubr.bf16.mxu1 %v5686_v49  ;;  %v5819_v17 = vrot.slane %v5814_v14, %v5379_v53  ;;  %v4791_v49 = vld [vmem:[#allocation10 + $0xf8] sm:$0xff]  }
 0x39e   : > { %4199 = vmatprep.subr.bf16.mxu1 %v4791_v49 }
 0x3a4   : > { %2813 = vmatmul.mubr.bf16.gmra.mrb[148].mxu1 %v5684_v23  ;;  %v5824_v23 = vrot.slane %v5814_v14, %v5385_v55 }
 0x3a5   : > { %2822 = vmatprep.mubr.bf16.mxu1 %v5696_v0  ;;  %v4792_v0 = vld [vmem:[#allocation10 + $0xb8] sm:$0xff]  }
 0x3a6   : > { %4200 = vmatpush3.bf16.msra.mxu1 %v4792_v0 }
 0x3ac   : > { %2823 = vmatmul.mubr.bf16.gmra.mrb[152].mxu1 %v5694_v50 }
 0x3ad   : > { %2832 = vmatprep.mubr.bf16.mxu1 %v5706_v33 }
 0x3b4   : > { %2833 = vmatmul.mubr.bf16.gmra.mrb[156].mxu1 %v5704_v32 }
 0x3b5   : > { %2842 = vmatprep.mubr.bf16.mxu1 %v5716_v25 }
 0x3bc   : > { %2843 = vmatmul.mubr.bf16.gmra.mrb[160].mxu1 %v5714_v19 }
 0x3bd   : > { %2852 = vmatprep.mubr.bf16.mxu1 %v5726_v18 }
 0x3c4   : > { %2853 = vmatmul.mubr.bf16.gmra.mrb[164].mxu1 %v5724_v13 }
 0x3c5   : > { %2862 = vmatprep.mubr.bf16.mxu1 %v5736_v63 }
 0x3cc   : > { %2863 = vmatmul.mubr.bf16.gmra.mrb[168].mxu1 %v5734_v46 }
 0x3cd   : > { %2872 = vmatprep.mubr.bf16.mxu1 %v5746_v57 }
 0x3cf   : > { %v2571_v50 = vpop.f32.mrb[64].mxu1 }
 0x3d0   : > { %v2572_v32 = vadd.f32 %v2571_v50, %v5819_v17  ;;  %v2573_v33 = vpop.f32.mrb[65].mxu1 }
 0x3d1   : > { %v2574_v19 = vadd.f32 %v2573_v33, %v5824_v23  ;;  %v2575_v25 = vpop.f32.mrb[66].mxu1 }
 0x3d2   : > { %v2576_v53 = vadd.f32 %v2575_v25, %v5819_v17  ;;  %v2577_v13 = vpop.f32.mrb[67].mxu1  ;;  %v2923_v46 = vmax.f32 %v2572_v32, 0.0 }
 0x3d3   : > { %v2578_v18 = vadd.f32 %v2577_v13, %v5824_v23  ;;  %v2924_v55 = vmax.f32 %v2574_v19, 0.0 }
 0x3d4   : > { %v2927_v63 = vmax.f32 %v2576_v53, 0.0  ;;  %2873 = vmatmul.mubr.bf16.gmra.mrb[172].mxu1 %v5744_v7 }
 0x3d5   : > { %v2928_v57 = vmax.f32 %v2578_v18, 0.0  ;;  %2882 = vmatprep.mubr.bf16.mxu1 %v5756_v6 }
 0x3d6   : > { %v3051_v10 = vpack.c.bf16 %v2927_v63, %v2923_v46 }
 0x3d7   : > { %v3052_v54 = vpack.c.bf16 %v2928_v57, %v2924_v55  ;;  %v2581_v20 = vpop.f32.mrb[68].mxu1 }
 0x3d8   : > { %v2582_v22 = vadd.f32 %v2581_v20, %v5819_v17  ;;  %v2583_v30 = vpop.f32.mrb[69].mxu1 }
 0x3d9   : > { %v2584_v34 = vadd.f32 %v2583_v30, %v5824_v23  ;;  %v2585_v36 = vpop.f32.mrb[70].mxu1  ;;  %3409 = vmatprep.mubr.bf16.mxu0 %v3052_v54 }
 0x3da   : > { %v2586_v37 = vadd.f32 %v2585_v36, %v5819_v17  ;;  %v2587_v35 = vpop.f32.mrb[71].mxu1  ;;  %3410 = vmatmul.mubr.bf16.vlgmr.msra.gmra.mrb[128].mxu0 %v3051_v10  ;;  %v2931_v39 = vmax.f32 %v2582_v22, 0.0 }
 0x3db   : > { %v2588_v7 = vadd.f32 %v2587_v35, %v5824_v23  ;;  %v2932_v6 = vmax.f32 %v2584_v34, 0.0 }
 0x3dc   : > { %v2935_v43 = vmax.f32 %v2586_v37, 0.0  ;;  %2883 = vmatmul.mubr.bf16.gmra.mrb[176].mxu1 %v5754_v2 }
 0x3dd   : > { %v2936_v16 = vmax.f32 %v2588_v7, 0.0  ;;  %2892 = vmatprep.mubr.bf16.mxu1 %v5766_v56 }
 0x3de   : > { %v3055_v42 = vpack.c.bf16 %v2935_v43, %v2931_v39 }
 0x3df   : > { %v3056_v4 = vpack.c.bf16 %v2936_v16, %v2932_v6  ;;  %v2591_v40 = vpop.f32.mrb[72].mxu1 }
 0x3e0   : > { %v2592_v44 = vadd.f32 %v2591_v40, %v5819_v17  ;;  %v2593_v5 = vpop.f32.mrb[73].mxu1 }
 0x3e1   : > { %v2594_v11 = vadd.f32 %v2593_v5, %v5824_v23  ;;  %v2595_v58 = vpop.f32.mrb[74].mxu1  ;;  %3417 = vmatprep.mubr.bf16.mxu0 %v3056_v4 }
 0x3e2   : > { %v2596_v59 = vadd.f32 %v2595_v58, %v5819_v17  ;;  %v2597_v28 = vpop.f32.mrb[75].mxu1  ;;  %3418 = vmatmul.mubr.bf16.gmra.mrb[132].mxu0 %v3055_v42  ;;  %v2939_v31 = vmax.f32 %v2592_v44, 0.0 }
 0x3e3   : > { %v2598_v2 = vadd.f32 %v2597_v28, %v5824_v23  ;;  %v2940_v56 = vmax.f32 %v2594_v11, 0.0 }
 0x3e4   : > { %v2943_v21 = vmax.f32 %v2596_v59, 0.0  ;;  %2893 = vmatmul.mubr.bf16.gmra.mrb[180].mxu1 %v5764_v3 }
 0x3e5   : > { %v2944_v62 = vmax.f32 %v2598_v2, 0.0  ;;  %2902 = vmatprep.mubr.bf16.mxu1 %v5776_v48 }
 0x3e6   : > { %v3059_v27 = vpack.c.bf16 %v2943_v21, %v2939_v31 }
 0x3e7   : > { %v3060_v8 = vpack.c.bf16 %v2944_v62, %v2940_v56  ;;  %v2601_v9 = vpop.f32.mrb[76].mxu1 }
 0x3e8   : > { %v2602_v51 = vadd.f32 %v2601_v9, %v5819_v17  ;;  %v2603_v41 = vpop.f32.mrb[77].mxu1 }
 0x3e9   : > { %v2604_v12 = vadd.f32 %v2603_v41, %v5824_v23  ;;  %v2605_v15 = vpop.f32.mrb[78].mxu1  ;;  %3425 = vmatprep.mubr.bf16.mxu0 %v3060_v8 }
 0x3ea   : > { %v2606_v29 = vadd.f32 %v2605_v15, %v5819_v17  ;;  %v2607_v45 = vpop.f32.mrb[79].mxu1  ;;  %3426 = vmatmul.mubr.bf16.gmra.mrb[136].mxu0 %v3059_v27  ;;  %v2947_v1 = vmax.f32 %v2602_v51, 0.0 }
 0x3eb   : > { %v2608_v3 = vadd.f32 %v2607_v45, %v5824_v23  ;;  %v2948_v48 = vmax.f32 %v2604_v12, 0.0 }
 0x3ec   : > { %v2951_v47 = vmax.f32 %v2606_v29, 0.0  ;;  %2903 = vmatmul.mubr.bf16.gmra.mrb[184].mxu1 %v5774_v38 }
 0x3ed   : > { %v2952_v49 = vmax.f32 %v2608_v3, 0.0  ;;  %2912 = vmatprep.mubr.bf16.mxu1 %v5786_v61 }
 0x3ee   : > { %v3063_v50 = vpack.c.bf16 %v2951_v47, %v2947_v1 }
 0x3ef   : > { %v3064_v0 = vpack.c.bf16 %v2952_v49, %v2948_v48  ;;  %v2611_v32 = vpop.f32.mrb[80].mxu1 }
 0x3f0   : > { %v2612_v33 = vadd.f32 %v2611_v32, %v5819_v17  ;;  %v2613_v19 = vpop.f32.mrb[81].mxu1 }
 0x3f1   : > { %v2614_v25 = vadd.f32 %v2613_v19, %v5824_v23  ;;  %v2615_v53 = vpop.f32.mrb[82].mxu1  ;;  %3433 = vmatprep.mubr.bf16.mxu0 %v3064_v0 }
 0x3f2   : > { %v2616_v13 = vadd.f32 %v2615_v53, %v5819_v17  ;;  %v2617_v18 = vpop.f32.mrb[83].mxu1  ;;  %3434 = vmatmul.mubr.bf16.gmra.mrb[140].mxu0 %v3063_v50  ;;  %v2955_v46 = vmax.f32 %v2612_v33, 0.0 }
 0x3f3   : > { %v2618_v38 = vadd.f32 %v2617_v18, %v5824_v23  ;;  %v2956_v61 = vmax.f32 %v2614_v25, 0.0 }
 0x3f4   : > { %v2959_v63 = vmax.f32 %v2616_v13, 0.0  ;;  %2913 = vmatmul.mubr.bf16.gmra.mrb[188].mxu1 %v5784_v60 }
 0x3f5   : > { %v2960_v55 = vmax.f32 %v2618_v38, 0.0 }
 0x3f6   : > { %v3067_v57 = vpack.c.bf16 %v2959_v63, %v2955_v46 }
 0x3f7   : > { %v3068_v10 = vpack.c.bf16 %v2960_v55, %v2956_v61  ;;  %v2621_v54 = vpop.f32.mrb[84].mxu1 }
 0x3f8   : > { %v2622_v20 = vadd.f32 %v2621_v54, %v5819_v17  ;;  %v2623_v22 = vpop.f32.mrb[85].mxu1 }
 0x3f9   : > { %v2624_v30 = vadd.f32 %v2623_v22, %v5824_v23  ;;  %v2625_v34 = vpop.f32.mrb[86].mxu1  ;;  %3441 = vmatprep.mubr.bf16.mxu0 %v3068_v10 }
 0x3fa   : > { %v2626_v36 = vadd.f32 %v2625_v34, %v5819_v17  ;;  %v2627_v37 = vpop.f32.mrb[87].mxu1  ;;  %3442 = vmatmul.mubr.bf16.gmra.mrb[144].mxu0 %v3067_v57  ;;  %v2963_v7 = vmax.f32 %v2622_v20, 0.0 }
 0x3fb   : > { %v2628_v35 = vadd.f32 %v2627_v37, %v5824_v23  ;;  %v2964_v39 = vmax.f32 %v2624_v30, 0.0 }
 0x3fc   : > { %v2967_v60 = vmax.f32 %v2626_v36, 0.0 }
 0x3fd   : > { %v2968_v43 = vmax.f32 %v2628_v35, 0.0 }
 0x3fe   : > { %v3071_v6 = vpack.c.bf16 %v2967_v60, %v2963_v7 }
 0x3ff   : > { %v3072_v16 = vpack.c.bf16 %v2968_v43, %v2964_v39  ;;  %v2631_v42 = vpop.f32.mrb[88].mxu1 }
 0x400   : > { %v2632_v4 = vadd.f32 %v2631_v42, %v5819_v17  ;;  %v2633_v40 = vpop.f32.mrb[89].mxu1 }
 0x401   : > { %v2634_v44 = vadd.f32 %v2633_v40, %v5824_v23  ;;  %v2635_v5 = vpop.f32.mrb[90].mxu1  ;;  %3449 = vmatprep.mubr.bf16.mxu0 %v3072_v16 }
 0x402   : > { %v2636_v11 = vadd.f32 %v2635_v5, %v5819_v17  ;;  %v2637_v58 = vpop.f32.mrb[91].mxu1  ;;  %3450 = vmatmul.mubr.bf16.gmra.mrb[148].mxu0 %v3071_v6  ;;  %v2971_v28 = vmax.f32 %v2632_v4, 0.0 }
 0x403   : > { %v2638_v59 = vadd.f32 %v2637_v58, %v5824_v23  ;;  %v2972_v31 = vmax.f32 %v2634_v44, 0.0 }
 0x404   : > { %v2975_v2 = vmax.f32 %v2636_v11, 0.0 }
 0x405   : > { %v2976_v21 = vmax.f32 %v2638_v59, 0.0 }
 0x406   : > { %v3075_v56 = vpack.c.bf16 %v2975_v2, %v2971_v28 }
 0x407   : > { %v3076_v62 = vpack.c.bf16 %v2976_v21, %v2972_v31  ;;  %v2641_v27 = vpop.f32.mrb[92].mxu1 }
 0x408   : > { %v2642_v8 = vadd.f32 %v2641_v27, %v5819_v17  ;;  %v2643_v9 = vpop.f32.mrb[93].mxu1 }
 0x409   : > { %v2644_v51 = vadd.f32 %v2643_v9, %v5824_v23  ;;  %v2645_v41 = vpop.f32.mrb[94].mxu1  ;;  %3457 = vmatprep.mubr.bf16.mxu0 %v3076_v62 }
 0x40a   : > { %v2646_v12 = vadd.f32 %v2645_v41, %v5819_v17  ;;  %v2647_v15 = vpop.f32.mrb[95].mxu1  ;;  %3458 = vmatmul.mubr.bf16.gmra.mrb[152].mxu0 %v3075_v56  ;;  %v2979_v45 = vmax.f32 %v2642_v8, 0.0 }
 0x40b   : > { %v2648_v29 = vadd.f32 %v2647_v15, %v5824_v23  ;;  %v2980_v1 = vmax.f32 %v2644_v51, 0.0 }
 0x40c   : > { %v2983_v3 = vmax.f32 %v2646_v12, 0.0 }
 0x40d   : > { %v2984_v47 = vmax.f32 %v2648_v29, 0.0 }
 0x40e   : > { %v3079_v48 = vpack.c.bf16 %v2983_v3, %v2979_v45 }
 0x40f   : > { %v3080_v49 = vpack.c.bf16 %v2984_v47, %v2980_v1  ;;  %v2651_v50 = vpop.f32.mrb[96].mxu1 }
 0x410   : > { %v2652_v0 = vadd.f32 %v2651_v50, %v5819_v17  ;;  %v2653_v32 = vpop.f32.mrb[97].mxu1 }
 0x411   : > { %v2654_v33 = vadd.f32 %v2653_v32, %v5824_v23  ;;  %v2655_v19 = vpop.f32.mrb[98].mxu1  ;;  %3465 = vmatprep.mubr.bf16.mxu0 %v3080_v49 }
 0x412   : > { %v2656_v25 = vadd.f32 %v2655_v19, %v5819_v17  ;;  %v2657_v53 = vpop.f32.mrb[99].mxu1  ;;  %3466 = vmatmul.mubr.bf16.gmra.mrb[156].mxu0 %v3079_v48  ;;  %v2987_v18 = vmax.f32 %v2652_v0, 0.0 }
 0x413   : > { %v2658_v13 = vadd.f32 %v2657_v53, %v5824_v23  ;;  %v2988_v46 = vmax.f32 %v2654_v33, 0.0 }
 0x414   : > { %v2991_v38 = vmax.f32 %v2656_v25, 0.0 }
 0x415   : > { %v2992_v63 = vmax.f32 %v2658_v13, 0.0 }
 0x416   : > { %v3083_v61 = vpack.c.bf16 %v2991_v38, %v2987_v18 }
 0x417   : > { %v3084_v55 = vpack.c.bf16 %v2992_v63, %v2988_v46  ;;  %v2661_v57 = vpop.f32.mrb[100].mxu1 }
 0x418   : > { %v2662_v10 = vadd.f32 %v2661_v57, %v5819_v17  ;;  %v2663_v54 = vpop.f32.mrb[101].mxu1 }
 0x419   : > { %v2664_v20 = vadd.f32 %v2663_v54, %v5824_v23  ;;  %v2665_v22 = vpop.f32.mrb[102].mxu1  ;;  %3473 = vmatprep.mubr.bf16.mxu0 %v3084_v55 }
 0x41a   : > { %v2666_v30 = vadd.f32 %v2665_v22, %v5819_v17  ;;  %v2667_v34 = vpop.f32.mrb[103].mxu1  ;;  %3474 = vmatmul.mubr.bf16.gmra.mrb[160].mxu0 %v3083_v61  ;;  %v2995_v37 = vmax.f32 %v2662_v10, 0.0 }
 0x41b   : > { %v2668_v36 = vadd.f32 %v2667_v34, %v5824_v23  ;;  %v2996_v7 = vmax.f32 %v2664_v20, 0.0 }
 0x41c   : > { %v2999_v35 = vmax.f32 %v2666_v30, 0.0 }
 0x41d   : > { %v3000_v60 = vmax.f32 %v2668_v36, 0.0 }
 0x41e   : > { %v3087_v39 = vpack.c.bf16 %v2999_v35, %v2995_v37 }
 0x41f   : > { %v3088_v43 = vpack.c.bf16 %v3000_v60, %v2996_v7  ;;  %v2671_v6 = vpop.f32.mrb[104].mxu1 }
 0x420   : > { %v2672_v16 = vadd.f32 %v2671_v6, %v5819_v17  ;;  %v2673_v42 = vpop.f32.mrb[105].mxu1 }
 0x421   : > { %v2674_v4 = vadd.f32 %v2673_v42, %v5824_v23  ;;  %v2675_v40 = vpop.f32.mrb[106].mxu1  ;;  %3481 = vmatprep.mubr.bf16.mxu0 %v3088_v43 }
 0x422   : > { %v2676_v44 = vadd.f32 %v2675_v40, %v5819_v17  ;;  %v2677_v5 = vpop.f32.mrb[107].mxu1  ;;  %3482 = vmatmul.mubr.bf16.gmra.mrb[164].mxu0 %v3087_v39  ;;  %v3003_v58 = vmax.f32 %v2672_v16, 0.0 }
 0x423   : > { %v2678_v11 = vadd.f32 %v2677_v5, %v5824_v23  ;;  %v3004_v28 = vmax.f32 %v2674_v4, 0.0 }
 0x424   : > { %v3007_v59 = vmax.f32 %v2676_v44, 0.0 }
 0x425   : > { %v3008_v2 = vmax.f32 %v2678_v11, 0.0 }
 0x426   : > { %v3091_v31 = vpack.c.bf16 %v3007_v59, %v3003_v58 }
 0x427   : > { %v3092_v21 = vpack.c.bf16 %v3008_v2, %v3004_v28  ;;  %v2681_v56 = vpop.f32.mrb[108].mxu1 }
 0x428   : > { %v2682_v62 = vadd.f32 %v2681_v56, %v5819_v17  ;;  %v2683_v27 = vpop.f32.mrb[109].mxu1 }
 0x429   : > { %v2684_v8 = vadd.f32 %v2683_v27, %v5824_v23  ;;  %v2685_v9 = vpop.f32.mrb[110].mxu1  ;;  %3489 = vmatprep.mubr.bf16.mxu0 %v3092_v21 }
 0x42a   : > { %v2686_v51 = vadd.f32 %v2685_v9, %v5819_v17  ;;  %v2687_v41 = vpop.f32.mrb[111].mxu1  ;;  %3490 = vmatmul.mubr.bf16.gmra.mrb[168].mxu0 %v3091_v31  ;;  %v3011_v15 = vmax.f32 %v2682_v62, 0.0 }
 0x42b   : > { %v2688_v12 = vadd.f32 %v2687_v41, %v5824_v23  ;;  %v3012_v45 = vmax.f32 %v2684_v8, 0.0 }
 0x42c   : > { %v3015_v29 = vmax.f32 %v2686_v51, 0.0 }
 0x42d   : > { %v3016_v3 = vmax.f32 %v2688_v12, 0.0 }
 0x42e   : > { %v3095_v1 = vpack.c.bf16 %v3015_v29, %v3011_v15  ;;  %v5902_v15 = vrot.slane %v5814_v14, %v507_v24 }
 0x42f   : > { %v3096_v47 = vpack.c.bf16 %v3016_v3, %v3012_v45  ;;  %v2691_v48 = vpop.f32.mrb[112].mxu1  ;;  %v5907_v3 = vrot.slane %v5814_v14, %v511_v26 }
 0x430   : > { %v2692_v49 = vadd.f32 %v2691_v48, %v5819_v17  ;;  %v2693_v50 = vpop.f32.mrb[113].mxu1 }
 0x431   : > { %v2694_v0 = vadd.f32 %v2693_v50, %v5824_v23  ;;  %v2695_v32 = vpop.f32.mrb[114].mxu1  ;;  %3497 = vmatprep.mubr.bf16.mxu0 %v3096_v47 }
 0x432   : > { %v2696_v33 = vadd.f32 %v2695_v32, %v5819_v17  ;;  %v2697_v19 = vpop.f32.mrb[115].mxu1  ;;  %3498 = vmatmul.mubr.bf16.gmra.mrb[172].mxu0 %v3095_v1  ;;  %v3019_v53 = vmax.f32 %v2692_v49, 0.0 }
 0x433   : > { %v2698_v25 = vadd.f32 %v2697_v19, %v5824_v23  ;;  %v3020_v18 = vmax.f32 %v2694_v0, 0.0 }
 0x434   : > { %v3023_v13 = vmax.f32 %v2696_v33, 0.0 }
 0x435   : > { %v3024_v38 = vmax.f32 %v2698_v25, 0.0 }
 0x436   : > { %v3099_v46 = vpack.c.bf16 %v3023_v13, %v3019_v53 }
 0x437   : > { %v3100_v63 = vpack.c.bf16 %v3024_v38, %v3020_v18  ;;  %v2701_v61 = vpop.f32.mrb[116].mxu1 }
 0x438   : > { %v2702_v55 = vadd.f32 %v2701_v61, %v5819_v17  ;;  %v2703_v57 = vpop.f32.mrb[117].mxu1 }
 0x439   : > { %v2704_v10 = vadd.f32 %v2703_v57, %v5824_v23  ;;  %v2705_v54 = vpop.f32.mrb[118].mxu1  ;;  %3505 = vmatprep.mubr.bf16.mxu0 %v3100_v63 }
 0x43a   : > { %v2706_v20 = vadd.f32 %v2705_v54, %v5819_v17  ;;  %v2707_v22 = vpop.f32.mrb[119].mxu1  ;;  %3506 = vmatmul.mubr.bf16.gmra.mrb[176].mxu0 %v3099_v46  ;;  %v3027_v34 = vmax.f32 %v2702_v55, 0.0 }
 0x43b   : > { %v2708_v30 = vadd.f32 %v2707_v22, %v5824_v23  ;;  %v3028_v37 = vmax.f32 %v2704_v10, 0.0 }
 0x43c   : > { %v3031_v36 = vmax.f32 %v2706_v20, 0.0 }
 0x43d   : > { %v3032_v35 = vmax.f32 %v2708_v30, 0.0 }
 0x43e   : > { %v3103_v7 = vpack.c.bf16 %v3031_v36, %v3027_v34 }
 0x43f   : > { %v3104_v60 = vpack.c.bf16 %v3032_v35, %v3028_v37  ;;  %v2711_v39 = vpop.f32.mrb[120].mxu1 }
 0x440   : > { %v2712_v43 = vadd.f32 %v2711_v39, %v5819_v17  ;;  %v2713_v6 = vpop.f32.mrb[121].mxu1 }
 0x441   : > { %v2714_v16 = vadd.f32 %v2713_v6, %v5824_v23  ;;  %v2715_v42 = vpop.f32.mrb[122].mxu1  ;;  %3513 = vmatprep.mubr.bf16.mxu0 %v3104_v60 }
 0x442   : > { %v2716_v4 = vadd.f32 %v2715_v42, %v5819_v17  ;;  %v2717_v40 = vpop.f32.mrb[123].mxu1  ;;  %3514 = vmatmul.mubr.bf16.gmra.mrb[180].mxu0 %v3103_v7  ;;  %v3035_v5 = vmax.f32 %v2712_v43, 0.0 }
 0x443   : > { %v2718_v44 = vadd.f32 %v2717_v40, %v5824_v23  ;;  %v3036_v58 = vmax.f32 %v2714_v16, 0.0 }
 0x444   : > { %v3039_v11 = vmax.f32 %v2716_v4, 0.0 }
 0x445   : > { %v3040_v59 = vmax.f32 %v2718_v44, 0.0 }
 0x446   : > { %v3107_v28 = vpack.c.bf16 %v3039_v11, %v3035_v5 }
 0x447   : > { %v3108_v2 = vpack.c.bf16 %v3040_v59, %v3036_v58  ;;  %v2721_v31 = vpop.f32.mrb[124].mxu1 }
 0x448   : > { %v2722_v21 = vadd.f32 %v2721_v31, %v5819_v17  ;;  %v2723_v56 = vpop.f32.mrb[125].mxu1 }
 0x449   : > { %v2724_v62 = vadd.f32 %v2723_v56, %v5824_v23  ;;  %v2725_v27 = vpop.f32.mrb[126].mxu1  ;;  %3521 = vmatprep.mubr.bf16.mxu0 %v3108_v2 }
 0x44a   : > { %v2726_v8 = vadd.f32 %v2725_v27, %v5819_v17  ;;  %v2727_v9 = vpop.f32.mrb[127].mxu1  ;;  %3522 = vmatmul.mubr.bf16.gmra.mrb[184].mxu0 %v3107_v28  ;;  %v3043_v41 = vmax.f32 %v2722_v21, 0.0 }
 0x44b   : > { %v2728_v51 = vadd.f32 %v2727_v9, %v5824_v23  ;;  %v3044_v29 = vmax.f32 %v2724_v62, 0.0 }
 0x44c   : > { %v3047_v12 = vmax.f32 %v2726_v8, 0.0 }
 0x44d   : > { %v3048_v45 = vmax.f32 %v2728_v51, 0.0 }
 0x44e   : > { %v3111_v1 = vpack.c.bf16 %v3047_v12, %v3043_v41 }
 0x44f   : > { %v3112_v17 = vpack.c.bf16 %v3048_v45, %v3044_v29  ;;  %v2764_v47 = vpop.f32.mrb[128].mxu1 }
 0x450   : > { %v2765_v48 = vadd.f32 %v2764_v47, %v5902_v15  ;;  %v2766_v23 = vpop.f32.mrb[129].mxu1 }
 0x451   : > { %v2767_v49 = vadd.f32 %v2766_v23, %v5907_v3  ;;  %v2768_v50 = vpop.f32.mrb[130].mxu1  ;;  %3529 = vmatprep.mubr.bf16.mxu0 %v3112_v17 }
 0x452   : > { %v2769_v24 = vadd.f32 %v2768_v50, %v5902_v15  ;;  %v2770_v0 = vpop.f32.mrb[131].mxu1  ;;  %3530 = vmatmul.mubr.bf16.gmra.mrb[188].mxu0 %v3111_v1  ;;  %v2925_v52 = vmax.f32 %v2765_v48, 0.0 }
 0x453   : > { %v2771_v32 = vadd.f32 %v2770_v0, %v5907_v3  ;;  %v2926_v26 = vmax.f32 %v2767_v49, 0.0 }
 0x454   : > { %v2929_v33 = vmax.f32 %v2769_v24, 0.0 }
 0x455   : > { %v2930_v14 = vmax.f32 %v2771_v32, 0.0 }
 0x456   : > { %v3053_v19 = vpack.c.bf16 %v2929_v33, %v2925_v52 }
 0x457   : > { %v3054_v25 = vpack.c.bf16 %v2930_v14, %v2926_v26  ;;  %v2774_v53 = vpop.f32.mrb[132].mxu1 }
 0x458   : > { %v2775_v13 = vadd.f32 %v2774_v53, %v5902_v15  ;;  %v2776_v18 = vpop.f32.mrb[133].mxu1 }
 0x459   : > { %v2777_v38 = vadd.f32 %v2776_v18, %v5907_v3  ;;  %v2778_v46 = vpop.f32.mrb[134].mxu1  ;;  %3570 = vmatprep.mubr.bf16.mxu1 %v3054_v25 }
 0x45a   : > { %v2779_v63 = vadd.f32 %v2778_v46, %v5902_v15  ;;  %v2780_v61 = vpop.f32.mrb[135].mxu1  ;;  %3571 = vmatmul.mubr.bf16.vlgmr.msra.gmra.mrb[192].mxu1 %v3053_v19  ;;  %v2933_v57 = vmax.f32 %v2775_v13, 0.0 }
 0x45b   : > { %v2781_v55 = vadd.f32 %v2780_v61, %v5907_v3  ;;  %v2934_v54 = vmax.f32 %v2777_v38, 0.0 }
 0x45c   : > { %v2937_v10 = vmax.f32 %v2779_v63, 0.0 }
 0x45d   : > { %v2938_v20 = vmax.f32 %v2781_v55, 0.0 }
 0x45e   : > { %v3057_v22 = vpack.c.bf16 %v2937_v10, %v2933_v57 }
 0x45f   : > { %v3058_v30 = vpack.c.bf16 %v2938_v20, %v2934_v54  ;;  %v2784_v34 = vpop.f32.mrb[136].mxu1 }
 0x460   : > { %v2785_v36 = vadd.f32 %v2784_v34, %v5902_v15  ;;  %v2786_v37 = vpop.f32.mrb[137].mxu1 }
 0x461   : > { %v2787_v35 = vadd.f32 %v2786_v37, %v5907_v3  ;;  %v2788_v7 = vpop.f32.mrb[138].mxu1  ;;  %3578 = vmatprep.mubr.bf16.mxu1 %v3058_v30 }
 0x462   : > { %v2789_v60 = vadd.f32 %v2788_v7, %v5902_v15  ;;  %v2790_v39 = vpop.f32.mrb[139].mxu1  ;;  %3579 = vmatmul.mubr.bf16.gmra.mrb[196].mxu1 %v3057_v22  ;;  %v2941_v6 = vmax.f32 %v2785_v36, 0.0 }
 0x463   : > { %v2791_v43 = vadd.f32 %v2790_v39, %v5907_v3  ;;  %v2942_v42 = vmax.f32 %v2787_v35, 0.0 }
 0x464   : > { %v2945_v16 = vmax.f32 %v2789_v60, 0.0 }
 0x465   : > { %v2946_v4 = vmax.f32 %v2791_v43, 0.0 }
 0x466   : > { %v3061_v40 = vpack.c.bf16 %v2945_v16, %v2941_v6 }
 0x467   : > { %v3062_v44 = vpack.c.bf16 %v2946_v4, %v2942_v42  ;;  %v2794_v5 = vpop.f32.mrb[140].mxu1 }
 0x468   : > { %v2795_v11 = vadd.f32 %v2794_v5, %v5902_v15  ;;  %v2796_v58 = vpop.f32.mrb[141].mxu1 }
 0x469   : > { %v2797_v59 = vadd.f32 %v2796_v58, %v5907_v3  ;;  %v2798_v28 = vpop.f32.mrb[142].mxu1  ;;  %3586 = vmatprep.mubr.bf16.mxu1 %v3062_v44 }
 0x46a   : > { %v2799_v2 = vadd.f32 %v2798_v28, %v5902_v15  ;;  %v2800_v31 = vpop.f32.mrb[143].mxu1  ;;  %3587 = vmatmul.mubr.bf16.gmra.mrb[200].mxu1 %v3061_v40  ;;  %v2949_v56 = vmax.f32 %v2795_v11, 0.0 }
 0x46b   : > { %v2801_v21 = vadd.f32 %v2800_v31, %v5907_v3  ;;  %v2950_v27 = vmax.f32 %v2797_v59, 0.0 }
 0x46c   : > { %v2953_v62 = vmax.f32 %v2799_v2, 0.0 }
 0x46d   : > { %v2954_v8 = vmax.f32 %v2801_v21, 0.0 }
 0x46e   : > { %v3065_v9 = vpack.c.bf16 %v2953_v62, %v2949_v56 }
 0x46f   : > { %v3066_v51 = vpack.c.bf16 %v2954_v8, %v2950_v27  ;;  %v2804_v41 = vpop.f32.mrb[144].mxu1 }
 0x470   : > { %v2805_v12 = vadd.f32 %v2804_v41, %v5902_v15  ;;  %v2806_v29 = vpop.f32.mrb[145].mxu1 }
 0x471   : > { %v2807_v45 = vadd.f32 %v2806_v29, %v5907_v3  ;;  %v2808_v1 = vpop.f32.mrb[146].mxu1  ;;  %3594 = vmatprep.mubr.bf16.mxu1 %v3066_v51 }
 0x472   : > { %v2809_v17 = vadd.f32 %v2808_v1, %v5902_v15  ;;  %v2810_v47 = vpop.f32.mrb[147].mxu1  ;;  %3595 = vmatmul.mubr.bf16.gmra.mrb[204].mxu1 %v3065_v9  ;;  %v2957_v23 = vmax.f32 %v2805_v12, 0.0 }
 0x473   : > { %v2811_v48 = vadd.f32 %v2810_v47, %v5907_v3  ;;  %v2958_v50 = vmax.f32 %v2807_v45, 0.0 }
 0x474   : > { %v2961_v49 = vmax.f32 %v2809_v17, 0.0 }
 0x475   : > { %v2962_v24 = vmax.f32 %v2811_v48, 0.0 }
 0x476   : > { %v3069_v0 = vpack.c.bf16 %v2961_v49, %v2957_v23 }
 0x477   : > { %v3070_v32 = vpack.c.bf16 %v2962_v24, %v2958_v50  ;;  %v2814_v52 = vpop.f32.mrb[148].mxu1 }
 0x478   : > { %v2815_v33 = vadd.f32 %v2814_v52, %v5902_v15  ;;  %v2816_v26 = vpop.f32.mrb[149].mxu1 }
 0x479   : > { %v2817_v14 = vadd.f32 %v2816_v26, %v5907_v3  ;;  %v2818_v19 = vpop.f32.mrb[150].mxu1  ;;  %3602 = vmatprep.mubr.bf16.mxu1 %v3070_v32 }
 0x47a   : > { %v2819_v25 = vadd.f32 %v2818_v19, %v5902_v15  ;;  %v2820_v53 = vpop.f32.mrb[151].mxu1  ;;  %3603 = vmatmul.mubr.bf16.gmra.mrb[208].mxu1 %v3069_v0  ;;  %v2965_v18 = vmax.f32 %v2815_v33, 0.0 }
 0x47b   : > { %v2821_v13 = vadd.f32 %v2820_v53, %v5907_v3  ;;  %v2966_v46 = vmax.f32 %v2817_v14, 0.0 }
 0x47c   : > { %v2969_v38 = vmax.f32 %v2819_v25, 0.0 }
 0x47d   : > { %v2970_v63 = vmax.f32 %v2821_v13, 0.0 }
 0x47e   : > { %v3073_v61 = vpack.c.bf16 %v2969_v38, %v2965_v18 }
 0x47f   : > { %v3074_v55 = vpack.c.bf16 %v2970_v63, %v2966_v46  ;;  %v2824_v57 = vpop.f32.mrb[152].mxu1 }
 0x480   : > { %v2825_v10 = vadd.f32 %v2824_v57, %v5902_v15  ;;  %v2826_v54 = vpop.f32.mrb[153].mxu1 }
 0x481   : > { %v2827_v20 = vadd.f32 %v2826_v54, %v5907_v3  ;;  %v2828_v22 = vpop.f32.mrb[154].mxu1  ;;  %3610 = vmatprep.mubr.bf16.mxu1 %v3074_v55 }
 0x482   : > { %v2829_v30 = vadd.f32 %v2828_v22, %v5902_v15  ;;  %v2830_v34 = vpop.f32.mrb[155].mxu1  ;;  %3611 = vmatmul.mubr.bf16.gmra.mrb[212].mxu1 %v3073_v61  ;;  %v2973_v37 = vmax.f32 %v2825_v10, 0.0 }
 0x483   : > { %v2831_v36 = vadd.f32 %v2830_v34, %v5907_v3  ;;  %v2974_v7 = vmax.f32 %v2827_v20, 0.0 }
 0x484   : > { %v2977_v35 = vmax.f32 %v2829_v30, 0.0 }
 0x485   : > { %v2978_v60 = vmax.f32 %v2831_v36, 0.0 }
 0x486   : > { %v3077_v39 = vpack.c.bf16 %v2977_v35, %v2973_v37 }
 0x487   : > { %v3078_v43 = vpack.c.bf16 %v2978_v60, %v2974_v7  ;;  %v2834_v6 = vpop.f32.mrb[156].mxu1 }
 0x488   : > { %v2835_v16 = vadd.f32 %v2834_v6, %v5902_v15  ;;  %v2836_v42 = vpop.f32.mrb[157].mxu1 }
 0x489   : > { %v2837_v4 = vadd.f32 %v2836_v42, %v5907_v3  ;;  %v2838_v40 = vpop.f32.mrb[158].mxu1  ;;  %3618 = vmatprep.mubr.bf16.mxu1 %v3078_v43 }
 0x48a   : > { %v2839_v44 = vadd.f32 %v2838_v40, %v5902_v15  ;;  %v2840_v5 = vpop.f32.mrb[159].mxu1  ;;  %3619 = vmatmul.mubr.bf16.gmra.mrb[216].mxu1 %v3077_v39  ;;  %v2981_v58 = vmax.f32 %v2835_v16, 0.0 }
 0x48b   : > { %v2841_v11 = vadd.f32 %v2840_v5, %v5907_v3  ;;  %v2982_v28 = vmax.f32 %v2837_v4, 0.0 }
 0x48c   : > { %v2985_v59 = vmax.f32 %v2839_v44, 0.0 }
 0x48d   : > { %v2986_v2 = vmax.f32 %v2841_v11, 0.0 }
 0x48e   : > { %v3081_v31 = vpack.c.bf16 %v2985_v59, %v2981_v58 }
 0x48f   : > { %v3082_v21 = vpack.c.bf16 %v2986_v2, %v2982_v28  ;;  %v2844_v56 = vpop.f32.mrb[160].mxu1 }
 0x490   : > { %v2845_v62 = vadd.f32 %v2844_v56, %v5902_v15  ;;  %v2846_v27 = vpop.f32.mrb[161].mxu1 }
 0x491   : > { %v2847_v8 = vadd.f32 %v2846_v27, %v5907_v3  ;;  %v2848_v9 = vpop.f32.mrb[162].mxu1  ;;  %3626 = vmatprep.mubr.bf16.mxu1 %v3082_v21 }
 0x492   : > { %v2849_v51 = vadd.f32 %v2848_v9, %v5902_v15  ;;  %v2850_v41 = vpop.f32.mrb[163].mxu1  ;;  %3627 = vmatmul.mubr.bf16.gmra.mrb[220].mxu1 %v3081_v31  ;;  %v2989_v29 = vmax.f32 %v2845_v62, 0.0 }
 0x493   : > { %v2851_v12 = vadd.f32 %v2850_v41, %v5907_v3  ;;  %v2990_v1 = vmax.f32 %v2847_v8, 0.0 }
 0x494   : > { %v2993_v45 = vmax.f32 %v2849_v51, 0.0 }
 0x495   : > { %v2994_v17 = vmax.f32 %v2851_v12, 0.0 }
 0x496   : > { %v3085_v47 = vpack.c.bf16 %v2993_v45, %v2989_v29 }
 0x497   : > { %v3086_v48 = vpack.c.bf16 %v2994_v17, %v2990_v1  ;;  %v2854_v23 = vpop.f32.mrb[164].mxu1 }
 0x498   : > { %v2855_v49 = vadd.f32 %v2854_v23, %v5902_v15  ;;  %v2856_v50 = vpop.f32.mrb[165].mxu1 }
 0x499   : > { %v2857_v24 = vadd.f32 %v2856_v50, %v5907_v3  ;;  %v2858_v0 = vpop.f32.mrb[166].mxu1  ;;  %3634 = vmatprep.mubr.bf16.mxu1 %v3086_v48 }
 0x49a   : > { %v2859_v32 = vadd.f32 %v2858_v0, %v5902_v15  ;;  %v2860_v52 = vpop.f32.mrb[167].mxu1  ;;  %3635 = vmatmul.mubr.bf16.gmra.mrb[224].mxu1 %v3085_v47  ;;  %v2997_v26 = vmax.f32 %v2855_v49, 0.0 }
 0x49b   : > { %v2861_v33 = vadd.f32 %v2860_v52, %v5907_v3  ;;  %v2998_v19 = vmax.f32 %v2857_v24, 0.0 }
 0x49c   : > { %v3001_v14 = vmax.f32 %v2859_v32, 0.0 }
 0x49d   : > { %v3002_v25 = vmax.f32 %v2861_v33, 0.0 }
 0x49e   : > { %v3089_v53 = vpack.c.bf16 %v3001_v14, %v2997_v26 }
 0x49f   : > { %v3090_v13 = vpack.c.bf16 %v3002_v25, %v2998_v19  ;;  %v2864_v18 = vpop.f32.mrb[168].mxu1 }
 0x4a0   : > { %v2865_v38 = vadd.f32 %v2864_v18, %v5902_v15  ;;  %v2866_v46 = vpop.f32.mrb[169].mxu1 }
 0x4a1   : > { %v2867_v63 = vadd.f32 %v2866_v46, %v5907_v3  ;;  %v2868_v61 = vpop.f32.mrb[170].mxu1  ;;  %3642 = vmatprep.mubr.bf16.mxu1 %v3090_v13 }
 0x4a2   : > { %v2869_v55 = vadd.f32 %v2868_v61, %v5902_v15  ;;  %v2870_v57 = vpop.f32.mrb[171].mxu1  ;;  %3643 = vmatmul.mubr.bf16.gmra.mrb[228].mxu1 %v3089_v53  ;;  %v3005_v54 = vmax.f32 %v2865_v38, 0.0 }
 0x4a3   : > { %v2871_v10 = vadd.f32 %v2870_v57, %v5907_v3  ;;  %v3006_v22 = vmax.f32 %v2867_v63, 0.0 }
 0x4a4   : > { %v3009_v20 = vmax.f32 %v2869_v55, 0.0 }
 0x4a5   : > { %v3010_v30 = vmax.f32 %v2871_v10, 0.0 }
 0x4a6   : > { %v3093_v34 = vpack.c.bf16 %v3009_v20, %v3005_v54 }
 0x4a7   : > { %v3094_v36 = vpack.c.bf16 %v3010_v30, %v3006_v22  ;;  %v2874_v37 = vpop.f32.mrb[172].mxu1 }
 0x4a8   : > { %v2875_v35 = vadd.f32 %v2874_v37, %v5902_v15  ;;  %v2876_v7 = vpop.f32.mrb[173].mxu1 }
 0x4a9   : > { %v2877_v60 = vadd.f32 %v2876_v7, %v5907_v3  ;;  %v2878_v39 = vpop.f32.mrb[174].mxu1  ;;  %3650 = vmatprep.mubr.bf16.mxu1 %v3094_v36 }
 0x4aa   : > { %v2879_v43 = vadd.f32 %v2878_v39, %v5902_v15  ;;  %v2880_v6 = vpop.f32.mrb[175].mxu1  ;;  %3651 = vmatmul.mubr.bf16.gmra.mrb[232].mxu1 %v3093_v34  ;;  %v3013_v42 = vmax.f32 %v2875_v35, 0.0 }
 0x4ab   : > { %v2881_v16 = vadd.f32 %v2880_v6, %v5907_v3  ;;  %v3014_v40 = vmax.f32 %v2877_v60, 0.0 }
 0x4ac   : > { %v3017_v4 = vmax.f32 %v2879_v43, 0.0 }
 0x4ad   : > { %v3018_v44 = vmax.f32 %v2881_v16, 0.0  ;;  %v4089_v5 = vpop.f32.mrb[128].mxu0 }
 0x4ae   : > { %v3097_v11 = vpack.c.bf16 %v3017_v4, %v3013_v42  ;;  %v4090_v58 = vpop.f32.mrb[129].mxu0 }
 0x4af   : > { %v3098_v59 = vpack.c.bf16 %v3018_v44, %v3014_v40  ;;  %v5957_v28 = vadd.f32 %v4090_v58, %v4089_v5  ;;  %v2884_v2 = vpop.f32.mrb[176].mxu1  ;;  %v4092_v31 = vpop.f32.mrb[130].mxu0 }
 0x4b0   : > { %v2885_v21 = vadd.f32 %v2884_v2, %v5902_v15  ;;  %v2886_v56 = vpop.f32.mrb[177].mxu1  ;;  %v4093_v62 = vpop.f32.mrb[131].mxu0 }
 0x4b1   : > { %v2887_v27 = vadd.f32 %v2886_v56, %v5907_v3  ;;  %v5961_v8 = vadd.f32 %v4093_v62, %v4092_v31  ;;  %v2888_v9 = vpop.f32.mrb[178].mxu1  ;;  %3658 = vmatprep.mubr.bf16.mxu1 %v3098_v59 }
 0x4b2   : > { %v2889_v51 = vadd.f32 %v2888_v9, %v5902_v15  ;;  %v2890_v41 = vpop.f32.mrb[179].mxu1  ;;  %3659 = vmatmul.mubr.bf16.gmra.mrb[236].mxu1 %v3097_v11  ;;  %v3021_v29 = vmax.f32 %v2885_v21, 0.0 }
 0x4b3   : > { %v2891_v12 = vadd.f32 %v2890_v41, %v5907_v3  ;;  %v3022_v1 = vmax.f32 %v2887_v27, 0.0 }
 0x4b4   : > { %v3025_v45 = vmax.f32 %v2889_v51, 0.0 }
 0x4b5   : > { %v3026_v17 = vmax.f32 %v2891_v12, 0.0  ;;  %v4095_v47 = vpop.f32.mrb[132].mxu0 }
 0x4b6   : > { %v3101_v48 = vpack.c.bf16 %v3025_v45, %v3021_v29  ;;  %v4096_v23 = vpop.f32.mrb[133].mxu0 }
 0x4b7   : > { %v3102_v49 = vpack.c.bf16 %v3026_v17, %v3022_v1  ;;  %v5965_v50 = vadd.f32 %v4096_v23, %v4095_v47  ;;  %v2894_v24 = vpop.f32.mrb[180].mxu1  ;;  %v4098_v0 = vpop.f32.mrb[134].mxu0 }
 0x4b8   : > { %v2895_v32 = vadd.f32 %v2894_v24, %v5902_v15  ;;  %v2896_v52 = vpop.f32.mrb[181].mxu1  ;;  %v4099_v33 = vpop.f32.mrb[135].mxu0 }
 0x4b9   : > { %v2897_v26 = vadd.f32 %v2896_v52, %v5907_v3  ;;  %v5969_v14 = vadd.f32 %v4099_v33, %v4098_v0  ;;  %v2898_v19 = vpop.f32.mrb[182].mxu1  ;;  %3666 = vmatprep.mubr.bf16.mxu1 %v3102_v49 }
 0x4ba   : > { %v2899_v25 = vadd.f32 %v2898_v19, %v5902_v15  ;;  %v2900_v53 = vpop.f32.mrb[183].mxu1  ;;  %3667 = vmatmul.mubr.bf16.gmra.mrb[240].mxu1 %v3101_v48  ;;  %v3029_v18 = vmax.f32 %v2895_v32, 0.0 }
 0x4bb   : > { %v2901_v13 = vadd.f32 %v2900_v53, %v5907_v3  ;;  %v3030_v46 = vmax.f32 %v2897_v26, 0.0 }
 0x4bc   : > { %v3033_v38 = vmax.f32 %v2899_v25, 0.0 }
 0x4bd   : > { %v3034_v63 = vmax.f32 %v2901_v13, 0.0  ;;  %v4101_v61 = vpop.f32.mrb[136].mxu0 }
 0x4be   : > { %v3105_v55 = vpack.c.bf16 %v3033_v38, %v3029_v18  ;;  %v4102_v57 = vpop.f32.mrb[137].mxu0 }
 0x4bf   : > { %v3106_v10 = vpack.c.bf16 %v3034_v63, %v3030_v46  ;;  %v5973_v54 = vadd.f32 %v4102_v57, %v4101_v61  ;;  %v2904_v20 = vpop.f32.mrb[184].mxu1  ;;  %v4104_v22 = vpop.f32.mrb[138].mxu0 }
 0x4c0   : > { %v2905_v30 = vadd.f32 %v2904_v20, %v5902_v15  ;;  %v2906_v34 = vpop.f32.mrb[185].mxu1  ;;  %v4105_v36 = vpop.f32.mrb[139].mxu0 }
 0x4c1   : > { %v2907_v37 = vadd.f32 %v2906_v34, %v5907_v3  ;;  %v5977_v35 = vadd.f32 %v4105_v36, %v4104_v22  ;;  %v2908_v7 = vpop.f32.mrb[186].mxu1  ;;  %3674 = vmatprep.mubr.bf16.mxu1 %v3106_v10 }
 0x4c2   : > { %v2909_v60 = vadd.f32 %v2908_v7, %v5902_v15  ;;  %v2910_v39 = vpop.f32.mrb[187].mxu1  ;;  %3675 = vmatmul.mubr.bf16.gmra.mrb[244].mxu1 %v3105_v55  ;;  %v3037_v6 = vmax.f32 %v2905_v30, 0.0 }
 0x4c3   : > { %v2911_v43 = vadd.f32 %v2910_v39, %v5907_v3  ;;  %v3038_v42 = vmax.f32 %v2907_v37, 0.0 }
 0x4c4   : > { %v3041_v16 = vmax.f32 %v2909_v60, 0.0 }
 0x4c5   : > { %v3042_v4 = vmax.f32 %v2911_v43, 0.0  ;;  %v4107_v40 = vpop.f32.mrb[140].mxu0 }
 0x4c6   : > { %v3109_v44 = vpack.c.bf16 %v3041_v16, %v3037_v6  ;;  %v4108_v5 = vpop.f32.mrb[141].mxu0 }
 0x4c7   : > { %v3110_v11 = vpack.c.bf16 %v3042_v4, %v3038_v42  ;;  %v5981_v58 = vadd.f32 %v4108_v5, %v4107_v40  ;;  %v2914_v59 = vpop.f32.mrb[188].mxu1  ;;  %v4110_v2 = vpop.f32.mrb[142].mxu0 }
 0x4c8   : > { %v2915_v31 = vadd.f32 %v2914_v59, %v5902_v15  ;;  %v2916_v21 = vpop.f32.mrb[189].mxu1  ;;  %v4111_v56 = vpop.f32.mrb[143].mxu0 }
 0x4c9   : > { %v2917_v62 = vadd.f32 %v2916_v21, %v5907_v3  ;;  %v5985_v27 = vadd.f32 %v4111_v56, %v4110_v2  ;;  %v2918_v9 = vpop.f32.mrb[190].mxu1  ;;  %3682 = vmatprep.mubr.bf16.mxu1 %v3110_v11 }
 0x4ca   : > { %v2919_v51 = vadd.f32 %v2918_v9, %v5902_v15  ;;  %v2920_v41 = vpop.f32.mrb[191].mxu1  ;;  %3683 = vmatmul.mubr.bf16.gmra.mrb[248].mxu1 %v3109_v44  ;;  %v3045_v29 = vmax.f32 %v2915_v31, 0.0 }
 0x4cb   : > { %v2921_v12 = vadd.f32 %v2920_v41, %v5907_v3  ;;  %v3046_v1 = vmax.f32 %v2917_v62, 0.0 }
 0x4cc   : > { %v3049_v45 = vmax.f32 %v2919_v51, 0.0 }
 0x4cd   : > { %v3050_v17 = vmax.f32 %v2921_v12, 0.0  ;;  %v4113_v47 = vpop.f32.mrb[144].mxu0 }
 0x4ce   : > { %v3113_v48 = vpack.c.bf16 %v3049_v45, %v3045_v29  ;;  %v4114_v23 = vpop.f32.mrb[145].mxu0 }
 0x4cf   : > { %v3114_v49 = vpack.c.bf16 %v3050_v17, %v3046_v1  ;;  %v5989_v24 = vadd.f32 %v4114_v23, %v4113_v47  ;;  %v4116_v0 = vpop.f32.mrb[146].mxu0 }
 0x4d0   : > { %v4117_v32 = vpop.f32.mrb[147].mxu0 }
 0x4d1   : > { %v5991_v52 = vadd.f32 %v4117_v32, %v4116_v0  ;;  %3690 = vmatprep.mubr.bf16.mxu1 %v3114_v49 }
 0x4d2   : > { %3691 = vmatmul.mubr.bf16.gmra.mrb[252].mxu1 %v3113_v48 }
 0x4d5   : > { %v4119_v15 = vpop.f32.mrb[148].mxu0 }
 0x4d6   : > { %v4120_v33 = vpop.f32.mrb[149].mxu0 }
 0x4d7   : > { %v5993_v26 = vadd.f32 %v4120_v33, %v4119_v15  ;;  %v4122_v3 = vpop.f32.mrb[150].mxu0 }
 0x4d8   : > { %v4123_v19 = vpop.f32.mrb[151].mxu0 }
 0x4d9   : > { %v5995_v25 = vadd.f32 %v4123_v19, %v4122_v3 }
 0x4dd   : > { %v4125_v53 = vpop.f32.mrb[152].mxu0 }
 0x4de   : > { %v4126_v13 = vpop.f32.mrb[153].mxu0 }
 0x4df   : > { %v5997_v18 = vadd.f32 %v4126_v13, %v4125_v53  ;;  %v4128_v38 = vpop.f32.mrb[154].mxu0 }
 0x4e0   : > { %v4129_v46 = vpop.f32.mrb[155].mxu0 }
 0x4e1   : > { %v5999_v63 = vadd.f32 %v4129_v46, %v4128_v38 }
 0x4e5   : > { %v4131_v61 = vpop.f32.mrb[156].mxu0 }
 0x4e6   : > { %v4132_v55 = vpop.f32.mrb[157].mxu0 }
 0x4e7   : > { %v6001_v57 = vadd.f32 %v4132_v55, %v4131_v61  ;;  %v4134_v10 = vpop.f32.mrb[158].mxu0 }
 0x4e8   : > { %v4135_v20 = vpop.f32.mrb[159].mxu0 }
 0x4e9   : > { %v6003_v22 = vadd.f32 %v4135_v20, %v4134_v10 }
 0x4ed   : > { %v4137_v30 = vpop.f32.mrb[160].mxu0 }
 0x4ee   : > { %v4138_v34 = vpop.f32.mrb[161].mxu0 }
 0x4ef   : > { %v6005_v36 = vadd.f32 %v4138_v34, %v4137_v30  ;;  %v4140_v37 = vpop.f32.mrb[162].mxu0  ;;  %v6040_v30 = vld [vmem:[%s6200_s8] ss:$0 sm:$0xff] }
 0x4f0   : > { %v4141_v7 = vpop.f32.mrb[163].mxu0 }
 0x4f1   : > { %v6007_v60 = vadd.f32 %v4141_v7, %v4140_v37  ;;  %v3412_v7 = vadd.f32 %v5957_v28, %v6040_v30 }
 0x4f5   : > { %v4143_v39 = vpop.f32.mrb[164].mxu0 }
 0x4f6   : > { %v4144_v43 = vpop.f32.mrb[165].mxu0 }
 0x4f7   : > { %v6009_v6 = vadd.f32 %v4144_v43, %v4143_v39  ;;  %v4146_v16 = vpop.f32.mrb[166].mxu0 }
 0x4f8   : > { %v4147_v42 = vpop.f32.mrb[167].mxu0 }
 0x4f9   : > { %v6011_v4 = vadd.f32 %v4147_v42, %v4146_v16  ;;  %v3415_v42 = vadd.f32 %v5961_v8, %v6040_v30 }
 0x4fd   : > { %v4149_v40 = vpop.f32.mrb[168].mxu0 }
 0x4fe   : > { %v4150_v44 = vpop.f32.mrb[169].mxu0 }
 0x4ff   : > { %v6013_v5 = vadd.f32 %v4150_v44, %v4149_v40  ;;  %v4152_v11 = vpop.f32.mrb[170].mxu0 }
 0x500   : > { %v4153_v59 = vpop.f32.mrb[171].mxu0 }
 0x501   : > { %v6015_v2 = vadd.f32 %v4153_v59, %v4152_v11 }
 0x505   : > { %v4155_v31 = vpop.f32.mrb[172].mxu0 }
 0x506   : > { %v4156_v21 = vpop.f32.mrb[173].mxu0 }
 0x507   : > { %v6017_v56 = vadd.f32 %v4156_v21, %v4155_v31  ;;  %v4158_v62 = vpop.f32.mrb[174].mxu0  ;;  %v3420_v31 = vadd.f32 %v5965_v50, %v6040_v30 }
 0x508   : > { %v4159_v9 = vpop.f32.mrb[175].mxu0 }
 0x509   : > { %v6019_v51 = vadd.f32 %v4159_v9, %v4158_v62  ;;  %v3423_v9 = vadd.f32 %v5969_v14, %v6040_v30 }
 0x50d   : > { %v4161_v41 = vpop.f32.mrb[176].mxu0 }
 0x50e   : > { %v4162_v12 = vpop.f32.mrb[177].mxu0 }
 0x50f   : > { %v6021_v29 = vadd.f32 %v4162_v12, %v4161_v41  ;;  %v4164_v45 = vpop.f32.mrb[178].mxu0 }
 0x510   : > { %v4165_v1 = vpop.f32.mrb[179].mxu0 }
 0x511   : > { %v6023_v17 = vadd.f32 %v4165_v1, %v4164_v45 }
 0x515   : > { %v4167_v47 = vpop.f32.mrb[180].mxu0 }
 0x516   : > { %v4168_v48 = vpop.f32.mrb[181].mxu0 }
 0x517   : > { %v6025_v23 = vadd.f32 %v4168_v48, %v4167_v47  ;;  %v4170_v49 = vpop.f32.mrb[182].mxu0  ;;  %v3428_v48 = vadd.f32 %v5973_v54, %v6040_v30 }
 0x518   : > { %v4171_v0 = vpop.f32.mrb[183].mxu0 }
 0x519   : > { %v6027_v32 = vadd.f32 %v4171_v0, %v4170_v49 }
 0x51d   : > { %v4173_v15 = vpop.f32.mrb[184].mxu0 }
 0x51e   : > { %v4174_v33 = vpop.f32.mrb[185].mxu0 }
 0x51f   : > { %v6029_v3 = vadd.f32 %v4174_v33, %v4173_v15  ;;  %v4176_v19 = vpop.f32.mrb[186].mxu0  ;;  %v3431_v15 = vadd.f32 %v5977_v35, %v6040_v30 }
 0x520   : > { %v4177_v53 = vpop.f32.mrb[187].mxu0 }
 0x521   : > { %v6031_v13 = vadd.f32 %v4177_v53, %v4176_v19 }
 0x525   : > { %v4179_v38 = vpop.f32.mrb[188].mxu0 }
 0x526   : > { %v4180_v46 = vpop.f32.mrb[189].mxu0 }
 0x527   : > { %v6033_v61 = vadd.f32 %v4180_v46, %v4179_v38  ;;  %v4182_v55 = vpop.f32.mrb[190].mxu0  ;;  %v3436_v46 = vadd.f32 %v5981_v58, %v6040_v30 }
 0x528   : > { %v4183_v10 = vpop.f32.mrb[191].mxu0 }
 0x529   : > { %v6035_v20 = vadd.f32 %v4183_v10, %v4182_v55 }
 0x52d   : > { %v4201_v34 = vpop.f32.mrb[192].mxu1 }
 0x52e   : > { %v4202_v37 = vpop.f32.mrb[193].mxu1 }
 0x52f   : > { %v4203_v39 = vadd.f32 %v4202_v37, %v4201_v34  ;;  %v4204_v43 = vpop.f32.mrb[194].mxu1  ;;  %v3439_v34 = vadd.f32 %v5985_v27, %v6040_v30 }
 0x530   : > { %v4205_v16 = vpop.f32.mrb[195].mxu1 }
 0x531   : > { %v3573_v40 = vadd.f32 %v4203_v39, %v3412_v7  ;;  %v4206_v44 = vadd.f32 %v4205_v16, %v4204_v43  ;;  %v3444_v16 = vadd.f32 %v5989_v24, %v6040_v30 }
 0x533   : > { %3699 = vst [vmem:[%s6048_s23] sm:$0xff] %v3573_v40  ;;  %v3576_v11 = vadd.f32 %v4206_v44, %v3415_v42  ;;  %v3447_v44 = vadd.f32 %v5991_v52, %v6040_v30 }
 0x535   : > { %3700 = vst [vmem:[%s6048_s23 + $0x8] sm:$0xff] %v3576_v11  ;;  %v4207_v59 = vpop.f32.mrb[196].mxu1 }
 0x536   : > { %v4208_v28 = vpop.f32.mrb[197].mxu1 }
 0x537   : > { %v4209_v21 = vadd.f32 %v4208_v28, %v4207_v59  ;;  %v4210_v62 = vpop.f32.mrb[198].mxu1 }
 0x538   : > { %v4211_v8 = vpop.f32.mrb[199].mxu1 }
 0x539   : > { %v3581_v41 = vadd.f32 %v4209_v21, %v3420_v31  ;;  %v4212_v12 = vadd.f32 %v4211_v8, %v4210_v62  ;;  %v3452_v21 = vadd.f32 %v5993_v26, %v6040_v30 }
 0x53b   : > { %3701 = vst [vmem:[%s6048_s23 + $0x10] sm:$0xff] %v3581_v41  ;;  %v3584_v45 = vadd.f32 %v4212_v12, %v3423_v9  ;;  %v3455_v9 = vadd.f32 %v5995_v25, %v6040_v30 }
 0x53d   : > { %3702 = vst [vmem:[%s6048_s23 + $0x18] sm:$0xff] %v3584_v45  ;;  %v4213_v1 = vpop.f32.mrb[200].mxu1 }
 0x53e   : > { %v4214_v47 = vpop.f32.mrb[201].mxu1 }
 0x53f   : > { %v4215_v49 = vadd.f32 %v4214_v47, %v4213_v1  ;;  %v4216_v50 = vpop.f32.mrb[202].mxu1  ;;  %v3460_v47 = vadd.f32 %v5997_v18, %v6040_v30 }
 0x540   : > { %v4217_v0 = vpop.f32.mrb[203].mxu1 }
 0x541   : > { %v3589_v33 = vadd.f32 %v4215_v49, %v3428_v48  ;;  %v4218_v14 = vadd.f32 %v4217_v0, %v4216_v50  ;;  %v3463_v50 = vadd.f32 %v5999_v63, %v6040_v30 }
 0x543   : > { %3703 = vst [vmem:[%s6048_s23 + $0x20] sm:$0xff] %v3589_v33  ;;  %v3592_v19 = vadd.f32 %v4218_v14, %v3431_v15 }
 0x545   : > { %3704 = vst [vmem:[%s6048_s23 + $0x28] sm:$0xff] %v3592_v19  ;;  %v4219_v53 = vpop.f32.mrb[204].mxu1  ;;  %v3468_v19 = vadd.f32 %v6001_v57, %v6040_v30 }
 0x546   : > { %v4220_v38 = vpop.f32.mrb[205].mxu1 }
 0x547   : > { %v4221_v55 = vadd.f32 %v4220_v38, %v4219_v53  ;;  %v4222_v54 = vpop.f32.mrb[206].mxu1 }
 0x548   : > { %v4223_v10 = vpop.f32.mrb[207].mxu1 }
 0x549   : > { %v3597_v37 = vadd.f32 %v4221_v55, %v3436_v46  ;;  %v4224_v35 = vadd.f32 %v4223_v10, %v4222_v54  ;;  %v3471_v46 = vadd.f32 %v6003_v22, %v6040_v30 }
 0x54b   : > { %3705 = vst [vmem:[%s6048_s23 + $0x30] sm:$0xff] %v3597_v37  ;;  %v3600_v7 = vadd.f32 %v4224_v35, %v3439_v34  ;;  %v3476_v37 = vadd.f32 %v6005_v36, %v6040_v30 }
 0x54d   : > { %3706 = vst [vmem:[%s6048_s23 + $0x38] sm:$0xff] %v3600_v7  ;;  %v4225_v39 = vpop.f32.mrb[208].mxu1 }
 0x54e   : > { %v4226_v43 = vpop.f32.mrb[209].mxu1 }
 0x54f   : > { %v4227_v42 = vadd.f32 %v4226_v43, %v4225_v39  ;;  %v4228_v58 = vpop.f32.mrb[210].mxu1  ;;  %v3479_v39 = vadd.f32 %v6007_v60, %v6040_v30 }
 0x550   : > { %v4229_v40 = vpop.f32.mrb[211].mxu1 }
 0x551   : > { %v3605_v11 = vadd.f32 %v4227_v42, %v3444_v16  ;;  %v4230_v27 = vadd.f32 %v4229_v40, %v4228_v58  ;;  %v3484_v40 = vadd.f32 %v6009_v6, %v6040_v30 }
 0x553   : > { %3707 = vst [vmem:[%s6048_s23 + $0x40] sm:$0xff] %v3605_v11  ;;  %v3608_v59 = vadd.f32 %v4230_v27, %v3447_v44  ;;  %v3487_v27 = vadd.f32 %v6011_v4, %v6040_v30 }
 0x555   : > { %3708 = vst [vmem:[%s6048_s23 + $0x48] sm:$0xff] %v3608_v59  ;;  %v4231_v28 = vpop.f32.mrb[212].mxu1 }
 0x556   : > { %v4232_v31 = vpop.f32.mrb[213].mxu1 }
 0x557   : > { %v4233_v62 = vadd.f32 %v4232_v31, %v4231_v28  ;;  %v4234_v24 = vpop.f32.mrb[214].mxu1 }
 0x558   : > { %v4235_v8 = vpop.f32.mrb[215].mxu1 }
 0x559   : > { %v3613_v41 = vadd.f32 %v4233_v62, %v3452_v21  ;;  %v4236_v52 = vadd.f32 %v4235_v8, %v4234_v24  ;;  %v3492_v62 = vadd.f32 %v6013_v5, %v6040_v30 }
 0x55b   : > { %3709 = vst [vmem:[%s6048_s23 + $0x50] sm:$0xff] %v3613_v41  ;;  %v3616_v12 = vadd.f32 %v4236_v52, %v3455_v9  ;;  %v3495_v9 = vadd.f32 %v6015_v2, %v6040_v30 }
 0x55d   : > { %3710 = vst [vmem:[%s6048_s23 + $0x58] sm:$0xff] %v3616_v12  ;;  %v4237_v45 = vpop.f32.mrb[216].mxu1 }
 0x55e   : > { %v4238_v1 = vpop.f32.mrb[217].mxu1 }
 0x55f   : > { %v4239_v48 = vadd.f32 %v4238_v1, %v4237_v45  ;;  %v4240_v26 = vpop.f32.mrb[218].mxu1  ;;  %v3500_v1 = vadd.f32 %v6017_v56, %v6040_v30 }
 0x560   : > { %v4241_v49 = vpop.f32.mrb[219].mxu1 }
 0x561   : > { %v3621_v0 = vadd.f32 %v4239_v48, %v3460_v47  ;;  %v4242_v25 = vadd.f32 %v4241_v49, %v4240_v26  ;;  %v3503_v26 = vadd.f32 %v6019_v51, %v6040_v30 }
 0x563   : > { %3711 = vst [vmem:[%s6048_s23 + $0x60] sm:$0xff] %v3621_v0  ;;  %v3624_v15 = vadd.f32 %v4242_v25, %v3463_v50 }
 0x565   : > { %3712 = vst [vmem:[%s6048_s23 + $0x68] sm:$0xff] %v3624_v15  ;;  %v4243_v33 = vpop.f32.mrb[220].mxu1  ;;  %v3508_v15 = vadd.f32 %v6021_v29, %v6040_v30 }
 0x566   : > { %v4244_v14 = vpop.f32.mrb[221].mxu1 }
 0x567   : > { %v4245_v53 = vadd.f32 %v4244_v14, %v4243_v33  ;;  %v4246_v18 = vpop.f32.mrb[222].mxu1 }
 0x568   : > { %v4247_v38 = vpop.f32.mrb[223].mxu1 }
 0x569   : > { %v3629_v55 = vadd.f32 %v4245_v53, %v3468_v19  ;;  %v4248_v63 = vadd.f32 %v4247_v38, %v4246_v18  ;;  %v3511_v19 = vadd.f32 %v6023_v17, %v6040_v30 }
 0x56b   : > { %3713 = vst [vmem:[%s6048_s23 + $0x70] sm:$0xff] %v3629_v55  ;;  %v3632_v54 = vadd.f32 %v4248_v63, %v3471_v46  ;;  %v3516_v55 = vadd.f32 %v6025_v23, %v6040_v30 }
 0x56d   : > { %3714 = vst [vmem:[%s6048_s23 + $0x78] sm:$0xff] %v3632_v54  ;;  %v4249_v10 = vpop.f32.mrb[224].mxu1 }
 0x56e   : > { %v4250_v34 = vpop.f32.mrb[225].mxu1 }
 0x56f   : > { %v4251_v35 = vadd.f32 %v4250_v34, %v4249_v10  ;;  %v4252_v57 = vpop.f32.mrb[226].mxu1  ;;  %v3519_v10 = vadd.f32 %v6027_v32, %v6040_v30 }
 0x570   : > { %v4253_v7 = vpop.f32.mrb[227].mxu1 }
 0x571   : > { %v3637_v43 = vadd.f32 %v4251_v35, %v3476_v37  ;;  %v4254_v22 = vadd.f32 %v4253_v7, %v4252_v57  ;;  %v3524_v7 = vadd.f32 %v6029_v3, %v6040_v30  ;;  %v3532_v3 = vadd.f32 %v6033_v61, %v6040_v30 }
 0x573   : > { %3715 = vst [vmem:[%s6048_s23 + $0x80] sm:$0xff] %v3637_v43  ;;  %v3640_v16 = vadd.f32 %v4254_v22, %v3479_v39  ;;  %v3527_v22 = vadd.f32 %v6031_v13, %v6040_v30  ;;  %v3535_v13 = vadd.f32 %v6035_v20, %v6040_v30 }
 0x575   : > { %3716 = vst [vmem:[%s6048_s23 + $0x88] sm:$0xff] %v3640_v16  ;;  %v4255_v42 = vpop.f32.mrb[228].mxu1 }
 0x576   : > { %v4256_v58 = vpop.f32.mrb[229].mxu1 }
 0x577   : > { %v4257_v44 = vadd.f32 %v4256_v58, %v4255_v42  ;;  %v4258_v36 = vpop.f32.mrb[230].mxu1 }
 0x578   : > { %v4259_v11 = vpop.f32.mrb[231].mxu1 }
 0x579   : > { %v3645_v59 = vadd.f32 %v4257_v44, %v3484_v40  ;;  %v4260_v60 = vadd.f32 %v4259_v11, %v4258_v36 }
 0x57b   : > { %3717 = vst [vmem:[%s6048_s23 + $0x90] sm:$0xff] %v3645_v59  ;;  %v3648_v28 = vadd.f32 %v4260_v60, %v3487_v27 }
 0x57d   : > { %3718 = vst [vmem:[%s6048_s23 + $0x98] sm:$0xff] %v3648_v28  ;;  %v4261_v31 = vpop.f32.mrb[232].mxu1 }
 0x57e   : > { %v4262_v21 = vpop.f32.mrb[233].mxu1 }
 0x57f   : > { %v4263_v24 = vadd.f32 %v4262_v21, %v4261_v31  ;;  %v4264_v6 = vpop.f32.mrb[234].mxu1 }
 0x580   : > { %v4265_v8 = vpop.f32.mrb[235].mxu1 }
 0x581   : > { %v3653_v41 = vadd.f32 %v4263_v24, %v3492_v62  ;;  %v4266_v4 = vadd.f32 %v4265_v8, %v4264_v6 }
 0x583   : > { %3719 = vst [vmem:[%s6048_s23 + $0xa0] sm:$0xff] %v3653_v41  ;;  %v3656_v52 = vadd.f32 %v4266_v4, %v3495_v9 }
 0x585   : > { %3720 = vst [vmem:[%s6048_s23 + $0xa8] sm:$0xff] %v3656_v52  ;;  %v4267_v12 = vpop.f32.mrb[236].mxu1 }
 0x586   : > { %v4268_v45 = vpop.f32.mrb[237].mxu1 }
 0x587   : > { %v4269_v47 = vadd.f32 %v4268_v45, %v4267_v12  ;;  %v4270_v5 = vpop.f32.mrb[238].mxu1 }
 0x588   : > { %v4271_v48 = vpop.f32.mrb[239].mxu1 }
 0x589   : > { %v3661_v49 = vadd.f32 %v4269_v47, %v3500_v1  ;;  %v4272_v2 = vadd.f32 %v4271_v48, %v4270_v5 }
 0x58b   : > { %3721 = vst [vmem:[%s6048_s23 + $0xb0] sm:$0xff] %v3661_v49  ;;  %v3664_v50 = vadd.f32 %v4272_v2, %v3503_v26 }
 0x58d   : > { %3722 = vst [vmem:[%s6048_s23 + $0xb8] sm:$0xff] %v3664_v50  ;;  %v4273_v0 = vpop.f32.mrb[240].mxu1 }
 0x58e   : > { %v4274_v25 = vpop.f32.mrb[241].mxu1 }
 0x58f   : > { %v4275_v33 = vadd.f32 %v4274_v25, %v4273_v0  ;;  %v4276_v56 = vpop.f32.mrb[242].mxu1 }
 0x590   : > { %v4277_v14 = vpop.f32.mrb[243].mxu1 }
 0x591   : > { %v3669_v53 = vadd.f32 %v4275_v33, %v3508_v15  ;;  %v4278_v51 = vadd.f32 %v4277_v14, %v4276_v56 }
 0x593   : > { %3723 = vst [vmem:[%s6048_s23 + $0xc0] sm:$0xff] %v3669_v53  ;;  %v3672_v18 = vadd.f32 %v4278_v51, %v3511_v19 }
 0x595   : > { %3724 = vst [vmem:[%s6048_s23 + $0xc8] sm:$0xff] %v3672_v18  ;;  %v4279_v38 = vpop.f32.mrb[244].mxu1 }
 0x596   : > { %v4280_v46 = vpop.f32.mrb[245].mxu1 }
 0x597   : > { %v4281_v63 = vadd.f32 %v4280_v46, %v4279_v38  ;;  %v4282_v29 = vpop.f32.mrb[246].mxu1 }
 0x598   : > { %v4283_v54 = vpop.f32.mrb[247].mxu1 }
 0x599   : > { %v3677_v34 = vadd.f32 %v4281_v63, %v3516_v55  ;;  %v4284_v17 = vadd.f32 %v4283_v54, %v4282_v29 }
 0x59b   : > { %3725 = vst [vmem:[%s6048_s23 + $0xd0] sm:$0xff] %v3677_v34  ;;  %v3680_v37 = vadd.f32 %v4284_v17, %v3519_v10 }
 0x59d   : > { %3726 = vst [vmem:[%s6048_s23 + $0xd8] sm:$0xff] %v3680_v37  ;;  %v4285_v35 = vpop.f32.mrb[248].mxu1 }
 0x59e   : > { %v4286_v57 = vpop.f32.mrb[249].mxu1 }
 0x59f   : > { %v4287_v23 = vadd.f32 %v4286_v57, %v4285_v35  ;;  %v4288_v39 = vpop.f32.mrb[250].mxu1 }
 0x5a0   : > { %v4289_v43 = vpop.f32.mrb[251].mxu1 }
 0x5a1   : > { %v3685_v32 = vadd.f32 %v4287_v23, %v3524_v7  ;;  %v4290_v16 = vadd.f32 %v4289_v43, %v4288_v39 }
 0x5a3   : > { %3727 = vst [vmem:[%s6048_s23 + $0xe0] sm:$0xff] %v3685_v32  ;;  %v3688_v42 = vadd.f32 %v4290_v16, %v3527_v22 }
 0x5a5   : > { %3728 = vst [vmem:[%s6048_s23 + $0xe8] sm:$0xff] %v3688_v42  ;;  %v4291_v58 = vpop.f32.mrb[252].mxu1 }
 0x5a6   : > { %v4292_v40 = vpop.f32.mrb[253].mxu1 }
 0x5a7   : > { %v4293_v44 = vadd.f32 %v4292_v40, %v4291_v58  ;;  %v4294_v36 = vpop.f32.mrb[254].mxu1 }
 0x5a8   : > { %v4295_v11 = vpop.f32.mrb[255].mxu1 }
 0x5a9   : > { %v3693_v27 = vadd.f32 %v4293_v44, %v3532_v3  ;;  %v4296_v59 = vadd.f32 %v4295_v11, %v4294_v36 }
 0x5ab   : > { %3729 = vst [vmem:[%s6048_s23 + $0xf0] sm:$0xff] %v3693_v27  ;;  %v3696_v61 = vadd.f32 %v4296_v59, %v3535_v13 }
 0x5ad   : > { %3730 = vst [vmem:[%s6048_s23 + $0xf8] sm:$0xff] %v3696_v61 }
 0x5ae   : > { %4948 = shalt.err (!%p4945_p12)
}
 0x5af   : > { %s4949_s28 = scalar_lea.hbm %s6145_s17, 4096  ;;  %s4953_s16 = scalar_lea.hbm %s6226_s15, 16384 }
 0x5b0   : > { %p4950_p9 = scmp.ne.s32.totalorder %s6145_s17, %s4949_s28  ;;  %p4954_p4 = scmp.lt.u32.totalorder %s6145_s17, %s6226_s15 }
 0x5b1   : > { %p4955_p8 = scmp.lt.u32.totalorder %s4953_s16, %s4949_s28  ;;  %p4957_p0 = scmp.lt.u32.totalorder %s4949_s28, %s6145_s17 }
 0x5b2   : > { %p4951_p13 = pnand %p4950_p9, %p5240_p3 }
 0x5b3   : > { %p4956_p6 = por %p4955_p8, %p4954_p4 }
 0x5b4   : > { %p4952_p10 = pneg %p4951_p13 }
 0x5b5   : > { %p4958_p5 = por %p4957_p0, %p4956_p6 }
 0x5b7   : > { %p4959_p7 = pnand %p4958_p5, %p4952_p10 }
 0x5b9   : > { %4962 = shalt.err (!%p4959_p7)
}
 0x5ba   : > { %s5024_s30 = smov 128   ;;  %s5025_s22 = smov 8  }
 0x5bb   : > { %4443 = dma.vmem_to_hbm [thread:$0]  (%p5240_p3), %s6147_s24, 4096, %s6145_s17, %s3732_s13, %s5024_s30, %s5024_s30, %s5025_s22  }
 0x5bc PF: > { %s6227_s25 = sld [smem:[#allocation16_spill]]  ;;  %s6228_s26 = sld [smem:[#allocation17_spill]] }
 0x5bd   : > { %p4475_p11 = scmp.ge.s32.totalorder %s5009_s12, 2 }
 0x5c2   : > { %s3760_s9 = sand.u32 1, %s6227_s25   ;;  %p6229_p2 = scmp.ne.s32.totalorder %s6228_s26, 0 }
 0x5c3   : > { %s3761_s28 = scalar_lea.sflag [#allocation4], %s3760_s9 }
 0x5c4   : > { %p4463_p1 = pnand %p4475_p11, %p6229_p2 }
 0x5c6   : > { %4992 = dma.done.wait (!%p4463_p1), %s3761_s28, 4096  }
 0x5c7   : > { %4994 = vsyncadd (!%p4463_p1), %s3761_s28, 4294963200  ;;  %p24_p12 = scmp.ge.s32.totalorder %s5227_s27, 6   ;;  %s6230_s30 = smov %s5001_s10 }
 0x5c8   : > { %s6231_s10 = smov %s5005_s11  ;;  %s6232_s11 = smov %s5236_s18 }
 0x5c9   : > { %s6233_s12 = smov %s5227_s27  ;;  %26 = sbr.rel (!%p24_p12) target bundleno = 9 (0x9), region = 117 }
 0x5d0   :  { %3766 = vsyncpa [#allocation3], 1 }
 0x5d1   :  { %3768 = vsyncpa [#allocation3 + $0x1], 1 }
 0x5d2   :  { %3769 = vsyncpa [#allocation6], 1 }
 0x5d3   :  { %3770 = vsyncpa [#allocation9], 1 }
 0x5d4   :  { %3771 = vsyncpa [#allocation4], 1 }
 0x5d5   :  { %3773 = vsyncpa [#allocation4 + $0x1], 1 }

// kernel: tpu_custom_call.1
= control target key start
LH: loop header
LB: loop body
LE: loop exit
PB: predicated region body
PF: predicated region fallthrough
CT: control target
= control target key end

     0   :  { %s6192_s0 = inlined_call_operand.hbm [shape: f32[1024,128], index: 0, kind: input, shape index: {}]   ;;  %s6193_s1 = inlined_call_operand.hbm [shape: bf16[128,512], index: 1, kind: input, shape index: {}]   ;;  %s6194_s2 = inlined_call_operand.vmem [shape: f32[1,512], index: 2, kind: input, shape index: {}]   ;;  %s6195_s3 = inlined_call_operand.hbm [shape: bf16[512,256], index: 3, kind: input, shape index: {}]   ;;  %s6196_s4 = inlined_call_operand.vmem [shape: f32[1,256], index: 4, kind: input, shape index: {}]   ;;  %s6197_s5 = inlined_call_operand.hbm [shape: bf16[256,512], index: 5, kind: input, shape index: {}]   ;;  %s6198_s6 = inlined_call_operand.vmem [shape: f32[1,512], index: 6, kind: input, shape index: {}]   ;;  %s6199_s7 = inlined_call_operand.hbm [shape: bf16[512,128], index: 7, kind: input, shape index: {}]   ;;  %s6200_s8 = inlined_call_operand.vmem [shape: f32[1,128], index: 8, kind: input, shape index: {}]   ;;  %s6201_s9 = inlined_call_operand.hbm [shape: f32[1024,128], index: 9, kind: output, shape index: {}]  }
   0x1   :  { %6208 = sst [smem:[#allocation18_spill]] %s6201_s9 }
   0x2   :  { %14 = vsyncpa [#allocation3], 0 }
   0x3   :  { %16 = vsyncpa [#allocation3 + $0x1], 0 }
   0x4   :  { %17 = vsyncpa [#allocation6], 0 }
   0x5   :  { %18 = vsyncpa [#allocation9], 0 }
   0x6   :  { %19 = vsyncpa [#allocation4], 0 }
   0x7   :  { %21 = vsyncpa [#allocation4 + $0x1], 0  ;;  %s5076_s30 = smov 0   ;;  %s5078_s10 = smov 0  }
   0x8   :  { %s5080_s11 = smov 0   ;;  %s5082_s12 = smov 0  }
   0x9 LB: > { %6209 = sst [smem:[#allocation16_spill]] %s4997_s30  ;;  %s5097_s13 = sadd.s32 4294967295, %s5009_s12   ;;  %s5009_s12 = sphi %s5082_s12, %s6233_s12   ;;  %s5005_s11 = sphi %s5080_s11, %s6232_s11   ;;  %s5001_s10 = sphi %s5078_s10, %s6231_s10   ;;  %s4997_s30 = sphi %s5076_s30, %s6230_s30  }
   0xa   : > { %s3856_s14 = sadd.s32 4294967294, %s5009_s12   ;;  %p47_p0 = scmp.ne.s32.totalorder %s5001_s10, %s4997_s30 }
   0xb   : > { %p6202_p1 = scmp.eq.s32.totalorder %s5097_s13, 0  ;;  %p245_p3 = scmp.eq.s32.totalorder %s3856_s14, 3 }
   0xc   : > { %p3857_p5 = scmp.ge.s32.totalorder %s5009_s12, 1  ;;  %p252_p7 = scmp.lt.s32.totalorder %s5009_s12, 5 }
   0xd   : > { %p5106_p4 = por %p6202_p1, %p47_p0  ;;  %p5111_p6 = por %p245_p3, %p47_p0 }
   0xe   : > { %p5116_p8 = pnand %p3857_p5, %p252_p7  ;;  %s5011_s18 = smov [#allocation5]  }
   0xf   : > { %s6210_s15 = scalar_select %p5106_p4, 1, 0 }
  0x10   : > { %s6211_s16 = scalar_select %p5111_p6, 1, 0 }
  0x11   : > { %s6213_s17 = scalar_select %p5116_p8, 1, 0 }
  0x12   : > { %6212 = sst [smem:[#allocation17_spill]] %s6211_s16  ;;  %s264_s19 = sshll.u32 %s5011_s18, 4  ;;  %s5120_s19 = int_to_ptr.vmem [resolvable:$true] %s264_s19 }
  0x13   : > { %p4445_p9 = pneg %p5116_p8  ;;  %s5012_s21 = smov [#allocation8]  }
  0x14   : > { %s296_s22 = sshll.u32 %s5012_s21, 4  ;;  %s5013_s23 = smov [#allocation7]   ;;  %s5130_s22 = int_to_ptr.vmem [resolvable:$true] %s296_s22 }
  0x15   : > { %p5126_p10 = pnand %p4445_p9, %p6202_p1  ;;  %s5132_s24 = sshll.u32 %s5013_s23, 4  ;;  %s281_s24 = int_to_ptr.vmem [resolvable:$true] %s5132_s24 }
  0x16   : > { %s4793_s27 = scalar_lea.hbm %s6193_s1, 4096 }
  0x17   : > { %p4794_p11 = scmp.ne.s32.totalorder %s6193_s1, %s4793_s27  ;;  %p5142_p12 = pneg %p5126_p10 }
  0x18   : > { %p4800_p3 = scmp.lt.u32.totalorder %s4793_s27, %s6193_s1 }
  0x19   : > { %p4796_p13 = pnand %p5142_p12, %p4794_p11 }
  0x1b   : > { %p4797_p0 = pneg %p4796_p13 }
  0x1d   : > { %p4802_p5 = pnand %p4800_p3, %p4797_p0 }
  0x1f   : > { %4805 = shalt.err (!%p4802_p5)
}
  0x20   : > { %s4806_s23 = scalar_lea.vmem %s5120_s19, 4096  ;;  %p4814_p2 = scmp.lt.s32.totalorder %s5120_s19, %s5120_s19 }
  0x21   : > { %p4807_p7 = scmp.ne.s32.totalorder %s5120_s19, %s4806_s23  ;;  %p4815_p6 = scmp.lt.s32.totalorder %s4806_s23, %s4806_s23 }
  0x23   : > { %p4809_p9 = pnand %p4807_p7, %p5142_p12  ;;  %p4816_p11 = por %p4815_p6, %p4814_p2 }
  0x25   : > { %p4810_p1 = pneg %p4809_p9 }
  0x27   : > { %p4817_p13 = pnand %p4816_p11, %p4810_p1 }
  0x29   : > { %4820 = shalt.err (!%p4817_p13)
}
  0x2a   : > { %s5014_s25 = smov 256   ;;  %s5015_s26 = smov 16  }
  0x2b   : > { %4448 = dma.hbm_to_vmem [thread:$0]  (!%p5126_p10), %s6193_s1, 4096, %s5120_s19, [#allocation6], %s5014_s25, %s5014_s25, %s5015_s26  }
  0x2c   : > { %s4821_s21 = scalar_lea.hbm %s6197_s5, 8192 }
  0x2d   : > { %p4822_p2 = scmp.ne.s32.totalorder %s6197_s5, %s4821_s21  ;;  %p4828_p0 = scmp.lt.u32.totalorder %s4821_s21, %s6197_s5 }
  0x2f   : > { %p4824_p1 = pnand %p4822_p2, %p5142_p12 }
  0x31   : > { %p4825_p6 = pneg %p4824_p1 }
  0x33   : > { %p4830_p3 = pnand %p4828_p0, %p4825_p6 }
  0x35   : > { %4833 = shalt.err (!%p4830_p3)
}
  0x36   : > { %s4834_s19 = scalar_lea.vmem %s5130_s22, 8192  ;;  %p4842_p11 = scmp.lt.s32.totalorder %s5130_s22, %s5130_s22 }
  0x37   : > { %p4835_p5 = scmp.ne.s32.totalorder %s5130_s22, %s4834_s19  ;;  %p4843_p13 = scmp.lt.s32.totalorder %s4834_s19, %s4834_s19 }
  0x39   : > { %p4837_p7 = pnand %p4835_p5, %p5142_p12  ;;  %p4844_p2 = por %p4843_p13, %p4842_p11 }
  0x3b   : > { %p4838_p9 = pneg %p4837_p7 }
  0x3d   : > { %p4845_p1 = pnand %p4844_p2, %p4838_p9 }
  0x3f   : > { %4848 = shalt.err (!%p4845_p1)
}
  0x40   : > { %4454 = dma.hbm_to_vmem [thread:$0]  (!%p5126_p10), %s6197_s5, 8192, %s5130_s22, [#allocation9], %s5014_s25, %s5014_s25, %s5015_s26  }
  0x41   : > { %s4849_s28 = scalar_lea.hbm %s6195_s3, 8192 }
  0x42   : > { %p4850_p6 = scmp.ne.s32.totalorder %s6195_s3, %s4849_s28  ;;  %p4856_p5 = scmp.lt.u32.totalorder %s4849_s28, %s6195_s3 }
  0x44   : > { %p4852_p0 = pnand %p4850_p6, %p5142_p12 }
  0x46   : > { %p4853_p3 = pneg %p4852_p0 }
  0x48   : > { %p4858_p7 = pnand %p4856_p5, %p4853_p3 }
  0x4a   : > { %4861 = shalt.err (!%p4858_p7)
}
  0x4b   : > { %s4862_s19 = scalar_lea.vmem %s281_s24, 8192  ;;  %p4870_p2 = scmp.lt.s32.totalorder %s281_s24, %s281_s24 }
  0x4c   : > { %p4863_p9 = scmp.ne.s32.totalorder %s281_s24, %s4862_s19  ;;  %p4871_p1 = scmp.lt.s32.totalorder %s4862_s19, %s4862_s19 }
  0x4e   : > { %p4865_p11 = pnand %p4863_p9, %p5142_p12  ;;  %p4872_p4 = por %p4871_p1, %p4870_p2 }
  0x50   : > { %p4866_p13 = pneg %p4865_p11 }
  0x52   : > { %p4873_p8 = pnand %p4872_p4, %p4866_p13 }
  0x54   : > { %4876 = shalt.err (!%p4873_p8)
}
  0x55   : > { %s5016_s22 = smov 128   ;;  %s5017_s25 = smov 8  }
  0x56   : > { %4451 = dma.hbm_to_vmem [thread:$0]  (!%p5126_p10), %s6195_s3, 8192, %s281_s24, [#allocation6], %s5016_s22, %s5016_s22, %s5017_s25  }
  0x57   : > { %s5018_s30 = smov [#allocation10]   ;;  %s4877_s29 = scalar_lea.hbm %s6199_s7, 4096 }
  0x58   : > { %s312_s16 = sshll.u32 %s5018_s30, 4  ;;  %p4878_p4 = scmp.ne.s32.totalorder %s6199_s7, %s4877_s29  ;;  %s313_s16 = int_to_ptr.vmem [resolvable:$true] %s312_s16 }
  0x59   : > { %p4884_p0 = scmp.lt.u32.totalorder %s4877_s29, %s6199_s7 }
  0x5a   : > { %p4880_p8 = pnand %p4878_p4, %p5142_p12 }
  0x5c   : > { %p4881_p6 = pneg %p4880_p8 }
  0x5e   : > { %p4886_p3 = pnand %p4884_p0, %p4881_p6 }
  0x60   : > { %4889 = shalt.err (!%p4886_p3)
}
  0x61   : > { %s4890_s24 = scalar_lea.vmem %s313_s16, 4096  ;;  %p4898_p11 = scmp.lt.s32.totalorder %s313_s16, %s313_s16 }
  0x62   : > { %p4891_p5 = scmp.ne.s32.totalorder %s313_s16, %s4890_s24  ;;  %p4899_p13 = scmp.lt.s32.totalorder %s4890_s24, %s4890_s24 }
  0x64   : > { %p4893_p7 = pnand %p4891_p5, %p5142_p12  ;;  %p4900_p2 = por %p4899_p13, %p4898_p11 }
  0x66   : > { %p4894_p9 = pneg %p4893_p7 }
  0x68   : > { %p4901_p1 = pnand %p4900_p2, %p4894_p9 }
  0x6a   : > { %4904 = shalt.err (!%p4901_p1)
}
  0x6b   : > { %s5019_s26 = smov 64   ;;  %s5020_s14 = smov 4  }
  0x6c   : > { %4457 = dma.hbm_to_vmem [thread:$0]  (!%p5126_p10), %s6199_s7, 4096, %s313_s16, [#allocation9], %s5019_s26, %s5019_s26, %s5020_s14  }
  0x6d   : > { %s5227_s27 = sadd.s32 1, %s5009_s12   ;;  %s34_s29 = sadd.s32 1, %s5005_s11 }
  0x6e   : > { %s31_s28 = ssub.s32 %s5009_s12, %s5227_s27  ;;  %p41_p4 = scmp.ne.s32.totalorder %s5005_s11, %s5001_s10 }
  0x6f   : > { %p32_p12 = scmp.eq.s32.totalorder %s31_s28, 0  ;;  %p42_p8 = scmp.eq.s32.totalorder %s5009_s12, 0 }
  0x70   : > { %p6216_p0 = scmp.eq.s32.totalorder %s5097_s13, 3  ;;  %p4470_p5 = scmp.lt.s32.totalorder %s5009_s12, 4 }
  0x71   : > { %s5236_s18 = scalar_select %p32_p12, %s5005_s11, %s34_s29  }
  0x72   : > { %p43_p6 = por %p42_p8, %p41_p4  ;;  %p5240_p3 = por %p6216_p0, %p41_p4 }
  0x73   : > { %s329_s20 = sand.u32 1, %s5005_s11   ;;  %s4071_s16 = sshll.u32 %s5009_s12, 12 }
  0x74   : > { %s3863_s23 = sshll.u32 %s329_s20, 8  ;;  %s5250_s26 = scalar_lea.hbm %s6192_s0, %s4071_s16 }
  0x75   : > { %s333_s14 = scalar_lea.vmem [#allocation2], %s3863_s23  ;;  %p5254_p10 = pnand %p4470_p5, %p43_p6 }
  0x76   : > { %s340_s9 = sshll.u32 %s333_s14, 4  ;;  %s5258_s28 = scalar_lea.sflag [#allocation3], %s329_s20  ;;  %s5252_s9 = int_to_ptr.vmem [resolvable:$true] %s340_s9 }
  0x77   : > { %s4905_s29 = scalar_lea.hbm %s5250_s26, 4096  ;;  %p4907_p9 = pneg %p5254_p10 }
  0x78   : > { %p4906_p7 = scmp.ne.s32.totalorder %s5250_s26, %s4905_s29  ;;  %s4910_s19 = scalar_lea.hbm %s6192_s0, 16384 }
  0x79   : > { %p4911_p2 = scmp.lt.u32.totalorder %s5250_s26, %s6192_s0  ;;  %p4912_p1 = scmp.lt.u32.totalorder %s4910_s19, %s4905_s29 }
  0x7a   : > { %p4908_p11 = pnand %p4907_p9, %p4906_p7  ;;  %p4914_p4 = scmp.lt.u32.totalorder %s4905_s29, %s5250_s26 }
  0x7b   : > { %p4913_p12 = por %p4912_p1, %p4911_p2 }
  0x7c   : > { %p4909_p13 = pneg %p4908_p11 }
  0x7d   : > { %p4915_p8 = por %p4914_p4, %p4913_p12 }
  0x7f   : > { %p4916_p6 = pnand %p4915_p8, %p4909_p13 }
  0x81   : > { %4919 = shalt.err (!%p4916_p6)
}
  0x82   : > { %s4920_s20 = scalar_lea.vmem %s5252_s9, 4096  ;;  %s5021_s23 = smov [#allocation2]  }
  0x83   : > { %p4921_p0 = scmp.ne.s32.totalorder %s5252_s9, %s4920_s20  ;;  %s4925_s16 = sshll.u32 %s5021_s23, 4  ;;  %s4926_s16 = int_to_ptr.vmem [resolvable:$false] %s4925_s16 }
  0x84   : > { %s4927_s24 = scalar_lea.vmem %s4926_s16, 8192  ;;  %p4928_p11 = scmp.lt.s32.totalorder %s5252_s9, %s4926_s16 }
  0x85   : > { %p4923_p5 = pnand %p4921_p0, %p4907_p9  ;;  %p4929_p2 = scmp.lt.s32.totalorder %s4927_s24, %s4920_s20 }
  0x87   : > { %p4924_p7 = pneg %p4923_p5  ;;  %p4930_p1 = por %p4929_p2, %p4928_p11 }
  0x89   : > { %p4931_p12 = pnand %p4930_p1, %p4924_p7 }
  0x8b   : > { %4934 = shalt.err (!%p4931_p12)
}
  0x8c   : > { %4461 = dma.hbm_to_vmem [thread:$0]  (!%p5254_p10), %s5250_s26, 4096, %s5252_s9, %s5258_s28, %s5016_s22, %s5016_s22, %s5017_s25  }
  0x8d   : > { %p6219_p9 = scmp.ne.s32.totalorder %s6213_s17, 0 }
  0x8e   : > { %s5292_s29 = sand.u32 (!%p6219_p9), 1, %s5001_s10   ;;  %p6220_p13 = scmp.ne.s32.totalorder (!%p6219_p9), %s6210_s15, 0 }
  0x8f   : > { %352 = sbr.rel (%p6219_p9) target bundleno = 1468 (0x5bc), region = 56  ;;  %s3867_s19 = sshll.u32 (!%p6219_p9), %s5292_s29, 8 }
  0x90   : > { %s355_s14 = scalar_lea.sflag (!%p6219_p9), [#allocation3], %s5292_s29  ;;  %s5298_s30 = scalar_lea.vmem (!%p6219_p9), [#allocation2], %s3867_s19 }
  0x96   : > { %4980 = dma.done.wait (%p6220_p13), %s355_s14, 4096  }
  0x97   : > { %4982 = vsyncadd (%p6220_p13), %s355_s14, 4294963200  ;;  %p6221_p10 = scmp.eq.s32.totalorder %s5097_s13, 0 }
  0x99   : > { %4984 = dma.done.wait (%p6221_p10), [#allocation6], 12288   ;;  %p6222_p4 = pmov %p6221_p10 }
  0x9b   : > { %4986 = vsyncadd (%p6222_p4), [#allocation6], 4294955008  ;;  %p6223_p8 = pmov %p6222_p4 }
  0x9c   : > { %p6224_p6 = pmov %p6222_p4 }
  0x9d   : > { %4988 = dma.done.wait (%p6223_p8), [#allocation9], 12288  }
  0x9e   : > { %4990 = vsyncadd (%p6224_p6), [#allocation9], 4294955008  ;;  %v5022_v0 = vmov 0   ;;  %v4521_v1 = vld [vmem:[#allocation5 + $0x4] ss:$16 sps:$4 sm:$0xff]   ;;  %v413_v23 = vld [vmem:[%s5298_s30 + $0x8] sm:$0xff] }
  0x9f   : > { %709 = vmatprep.mubr.bf16.mxu0 %v5022_v0  ;;  %902 = vmatprep.mubr.bf16.mxu1 %v5022_v0  ;;  %v4523_v2 = vld [vmem:[#allocation5] ss:$16 sps:$4 sm:$0xff]   ;;  %v4524_v3 = vld [vmem:[#allocation5 + $0x24] ss:$16 sps:$4 sm:$0xff]   ;;  %v4545_v13 = vld [vmem:[#allocation5 + $0xc] ss:$16 sps:$4 sm:$0xff]  }
  0xa0   : > { %677 = vmatprep.subr.bf16.mxu0 %v4521_v1  ;;  %v4526_v4 = vld [vmem:[#allocation5 + $0x20] ss:$16 sps:$4 sm:$0xff]   ;;  %v4527_v5 = vld [vmem:[#allocation5 + $0x44] ss:$16 sps:$4 sm:$0xff]   ;;  %870 = vmatprep.subr.bf16.mxu1 %v4545_v13  ;;  %v4550_v16 = vld [vmem:[#allocation5 + $0x8] ss:$16 sps:$4 sm:$0xff]  }
  0xa1   : > { %678 = vmatpush1.bf16.msra.mxu0 %v4523_v2  ;;  %v4529_v6 = vld [vmem:[#allocation5 + $0x40] ss:$16 sps:$4 sm:$0xff]   ;;  %v4530_v7 = vld [vmem:[#allocation5 + $0x64] ss:$16 sps:$4 sm:$0xff]   ;;  %v4551_v18 = vld [vmem:[#allocation5 + $0x2c] ss:$16 sps:$4 sm:$0xff]   ;;  %871 = vmatpush1.bf16.msra.mxu1 %v4550_v16 }
  0xa2   : > { %679 = vmatprep.subr.bf16.mxu0 %v4524_v3  ;;  %v4532_v8 = vld [vmem:[#allocation5 + $0x60] ss:$16 sps:$4 sm:$0xff]   ;;  %v4533_v9 = vld [vmem:[#allocation5 + $0x84] ss:$16 sps:$4 sm:$0xff]   ;;  %v4553_v19 = vld [vmem:[#allocation5 + $0x28] ss:$16 sps:$4 sm:$0xff]   ;;  %872 = vmatprep.subr.bf16.mxu1 %v4551_v18 }
  0xa3   : > { %v4535_v10 = vld [vmem:[#allocation5 + $0x80] ss:$16 sps:$4 sm:$0xff]   ;;  %v4536_v11 = vld [vmem:[#allocation5 + $0xa4] ss:$16 sps:$4 sm:$0xff]   ;;  %v4554_v20 = vld [vmem:[#allocation5 + $0x4c] ss:$16 sps:$4 sm:$0xff]  }
  0xa4   : > { %v4538_v12 = vld [vmem:[#allocation5 + $0xa0] ss:$16 sps:$4 sm:$0xff]   ;;  %v4539_v14 = vld [vmem:[#allocation5 + $0xc4] ss:$16 sps:$4 sm:$0xff]   ;;  %v4559_v25 = vld [vmem:[#allocation5 + $0x48] ss:$16 sps:$4 sm:$0xff]  }
  0xa5   : > { %680 = vmatpush1.bf16.msra.mxu0 %v4526_v4  ;;  %v4541_v15 = vld [vmem:[#allocation5 + $0xc0] ss:$16 sps:$4 sm:$0xff]   ;;  %v4542_v17 = vld [vmem:[#allocation5 + $0xe4] ss:$16 sps:$4 sm:$0xff]   ;;  %873 = vmatpush1.bf16.msra.mxu1 %v4553_v19  ;;  %v4560_v26 = vld [vmem:[#allocation5 + $0x6c] ss:$16 sps:$4 sm:$0xff]  }
  0xa6   : > { %681 = vmatprep.subr.bf16.mxu0 %v4527_v5  ;;  %v4544_v21 = vld [vmem:[#allocation5 + $0xe0] ss:$16 sps:$4 sm:$0xff]   ;;  %v4549_v24 = vld [vmem:[#allocation7 + $0x4] ss:$8 sps:$4 sm:$0xff]   ;;  %874 = vmatprep.subr.bf16.mxu1 %v4554_v20  ;;  %v4558_v29 = vld [vmem:[#allocation7 + $0x14] ss:$8 sps:$4 sm:$0xff]  }
  0xa7   : > { %v412_v22 = vld [vmem:[%s5298_s30] sm:$0xff]  ;;  %v4562_v30 = vld [vmem:[#allocation5 + $0x68] ss:$16 sps:$4 sm:$0xff]   ;;  %v4563_v31 = vld [vmem:[#allocation5 + $0x8c] ss:$16 sps:$4 sm:$0xff]   ;;  %s6048_s23 = scalar_lea.vmem [#allocation11], %s3867_s19 }
  0xa8   : > { %v444_v27 = vpack.c.bf16 %v413_v23, %v412_v22  ;;  %v4547_v28 = vld [vmem:[#allocation7] ss:$8 sps:$4 sm:$0xff]   ;;  %v414_v32 = vld [vmem:[%s5298_s30 + $0x10] sm:$0xff]  ;;  %v415_v33 = vld [vmem:[%s5298_s30 + $0x18] sm:$0xff]  ;;  %s4072_s16 = sshll.u32 %s5097_s13, 12  ;;  %s3745_s24 = sshll.u32 %s6048_s23, 4  ;;  %s6147_s24 = int_to_ptr.vmem [resolvable:$true] %s3745_s24 }
  0xa9   : > { %682 = vmatpush1.bf16.msra.mxu0 %v4529_v6  ;;  %875 = vmatpush1.bf16.msra.mxu1 %v4559_v25  ;;  %v4556_v34 = vld [vmem:[#allocation7 + $0x10] ss:$8 sps:$4 sm:$0xff]   ;;  %v4567_v35 = vld [vmem:[#allocation7 + $0x24] ss:$8 sps:$4 sm:$0xff]   ;;  %v445_v38 = vpack.c.bf16 %v415_v33, %v414_v32  ;;  %v4565_v39 = vld [vmem:[#allocation7 + $0x20] ss:$8 sps:$4 sm:$0xff]  }
  0xaa   : > { %683 = vmatprep.subr.bf16.mxu0 %v4530_v7  ;;  %876 = vmatprep.subr.bf16.mxu1 %v4560_v26  ;;  %v4568_v36 = vld [vmem:[#allocation5 + $0x88] ss:$16 sps:$4 sm:$0xff]   ;;  %v4569_v37 = vld [vmem:[#allocation5 + $0xac] ss:$16 sps:$4 sm:$0xff]   ;;  %v416_v43 = vld [vmem:[%s5298_s30 + $0x20] sm:$0xff]  ;;  %s3732_s13 = scalar_lea.sflag [#allocation4], %s5292_s29 }
  0xab   : > { %v4571_v40 = vld [vmem:[#allocation5 + $0xa8] ss:$16 sps:$4 sm:$0xff]   ;;  %v4576_v41 = vld [vmem:[#allocation7 + $0x34] ss:$8 sps:$4 sm:$0xff]   ;;  %v4583_v47 = vld [vmem:[#allocation7 + $0x44] ss:$8 sps:$4 sm:$0xff]  }
  0xac   : > { %v4572_v42 = vld [vmem:[#allocation5 + $0xcc] ss:$16 sps:$4 sm:$0xff]   ;;  %v4574_v45 = vld [vmem:[#allocation7 + $0x30] ss:$8 sps:$4 sm:$0xff]   ;;  %v4581_v51 = vld [vmem:[#allocation7 + $0x40] ss:$8 sps:$4 sm:$0xff]  }
  0xad   : > { %684 = vmatpush1.bf16.msra.mxu0 %v4532_v8  ;;  %877 = vmatpush1.bf16.msra.mxu1 %v4562_v30  ;;  %v417_v44 = vld [vmem:[%s5298_s30 + $0x28] sm:$0xff]  ;;  %v4586_v52 = vld [vmem:[#allocation7 + $0x54] ss:$8 sps:$4 sm:$0xff]   ;;  %v4584_v55 = vld [vmem:[#allocation7 + $0x50] ss:$8 sps:$4 sm:$0xff]   ;;  %s4935_s22 = scalar_lea.vmem %s6147_s24, 4096 }
  0xae   : > { %685 = vmatprep.subr.bf16.mxu0 %v4533_v9  ;;  %878 = vmatprep.subr.bf16.mxu1 %v4563_v31  ;;  %v4577_v46 = vld [vmem:[#allocation5 + $0xc8] ss:$16 sps:$4 sm:$0xff]   ;;  %v4578_v48 = vld [vmem:[#allocation5 + $0xec] ss:$16 sps:$4 sm:$0xff]   ;;  %v446_v49 = vpack.c.bf16 %v417_v44, %v416_v43  ;;  %v418_v53 = vld [vmem:[%s5298_s30 + $0x30] sm:$0xff]  ;;  %p4936_p0 = scmp.ne.s32.totalorder %s6147_s24, %s4935_s22  ;;  %s5023_s25 = smov [#allocation11]  }
  0xaf   : > { %v4580_v50 = vld [vmem:[#allocation5 + $0xe8] ss:$16 sps:$4 sm:$0xff]   ;;  %v4589_v56 = vld [vmem:[#allocation7 + $0x64] ss:$8 sps:$4 sm:$0xff]   ;;  %v4592_v59 = vld [vmem:[#allocation7 + $0x74] ss:$8 sps:$4 sm:$0xff]  }
  0xb0   : > { %v419_v54 = vld [vmem:[%s5298_s30 + $0x38] sm:$0xff]  ;;  %v4587_v57 = vld [vmem:[#allocation7 + $0x60] ss:$8 sps:$4 sm:$0xff]   ;;  %v4595_v63 = vld [vmem:[#allocation7 + $0x84] ss:$8 sps:$4 sm:$0xff]   ;;  %p4937_p5 = pnand %p4936_p0, %p5240_p3  ;;  %s4939_s26 = sshll.u32 %s5023_s25, 4  ;;  %s4940_s26 = int_to_ptr.vmem [resolvable:$false] %s4939_s26 }
  0xb1   : > { %686 = vmatpush1.bf16.msra.mxu0 %v4535_v10  ;;  %879 = vmatpush1.bf16.msra.mxu1 %v4568_v36  ;;  %v447_v58 = vpack.c.bf16 %v419_v54, %v418_v53  ;;  %v420_v60 = vld [vmem:[%s5298_s30 + $0x40] sm:$0xff]  ;;  %v421_v61 = vld [vmem:[%s5298_s30 + $0x48] sm:$0xff]  ;;  %v4590_v62 = vld [vmem:[#allocation7 + $0x70] ss:$8 sps:$4 sm:$0xff]   ;;  %s4941_s9 = scalar_lea.vmem %s4940_s26, 8192  ;;  %p4942_p11 = scmp.lt.s32.totalorder %s6147_s24, %s4940_s26 }
  0xb2   : > { %687 = vmatprep.subr.bf16.mxu0 %v4536_v11  ;;  %880 = vmatprep.subr.bf16.mxu1 %v4569_v37  ;;  %v4593_v1 = vld [vmem:[#allocation7 + $0x80] ss:$8 sps:$4 sm:$0xff]   ;;  %v448_v2 = vpack.c.bf16 %v421_v61, %v420_v60  ;;  %v4598_v3 = vld [vmem:[#allocation7 + $0x94] ss:$8 sps:$4 sm:$0xff]   ;;  %v4596_v6 = vld [vmem:[#allocation7 + $0x90] ss:$8 sps:$4 sm:$0xff]   ;;  %p4938_p7 = pneg %p4937_p5  ;;  %p4943_p2 = scmp.lt.s32.totalorder %s4941_s9, %s4935_s22 }
  0xb3   : > { %v422_v4 = vld [vmem:[%s5298_s30 + $0x50] sm:$0xff]  ;;  %v423_v5 = vld [vmem:[%s5298_s30 + $0x58] sm:$0xff]  ;;  %v4601_v7 = vld [vmem:[#allocation7 + $0xa4] ss:$8 sps:$4 sm:$0xff]  }
  0xb4   : > { %v4599_v8 = vld [vmem:[#allocation7 + $0xa0] ss:$8 sps:$4 sm:$0xff]   ;;  %v449_v9 = vpack.c.bf16 %v423_v5, %v422_v4  ;;  %v4604_v10 = vld [vmem:[#allocation7 + $0xb4] ss:$8 sps:$4 sm:$0xff]   ;;  %v4602_v13 = vld [vmem:[#allocation7 + $0xb0] ss:$8 sps:$4 sm:$0xff]   ;;  %p4944_p1 = por %p4943_p2, %p4942_p11 }
  0xb5   : > { %688 = vmatpush1.bf16.msra.mxu0 %v4538_v12  ;;  %881 = vmatpush1.bf16.msra.mxu1 %v4571_v40  ;;  %v424_v11 = vld [vmem:[%s5298_s30 + $0x60] sm:$0xff]  ;;  %v425_v12 = vld [vmem:[%s5298_s30 + $0x68] sm:$0xff]  ;;  %v426_v18 = vld [vmem:[%s5298_s30 + $0x70] sm:$0xff] }
  0xb6   : > { %689 = vmatprep.subr.bf16.mxu0 %v4539_v14  ;;  %882 = vmatprep.subr.bf16.mxu1 %v4572_v42  ;;  %v4607_v14 = vld [vmem:[#allocation7 + $0xc4] ss:$8 sps:$4 sm:$0xff]   ;;  %v450_v16 = vpack.c.bf16 %v425_v12, %v424_v11  ;;  %v427_v19 = vld [vmem:[%s5298_s30 + $0x78] sm:$0xff]  ;;  %v4611_v22 = vld [vmem:[#allocation7 + $0xe0] ss:$8 sps:$4 sm:$0xff]   ;;  %p4945_p12 = pnand %p4944_p1, %p4938_p7 }
  0xb7   : > { %v4608_v20 = vld [vmem:[#allocation7 + $0xd0] ss:$8 sps:$4 sm:$0xff]   ;;  %v451_v23 = vpack.c.bf16 %v427_v19, %v426_v18  ;;  %v429_v25 = vld [vmem:[%s5298_s30 + $0x88] sm:$0xff]  ;;  %v432_v30 = vld [vmem:[%s5298_s30 + $0xa0] sm:$0xff] }
  0xb8   : > { %v433_v31 = vld [vmem:[%s5298_s30 + $0xa8] sm:$0xff]  ;;  %v434_v33 = vld [vmem:[%s5298_s30 + $0xb0] sm:$0xff]  ;;  %v436_v37 = vld [vmem:[%s5298_s30 + $0xc0] sm:$0xff] }
  0xb9   : > { %690 = vmatpush1.bf16.msra.mxu0 %v4541_v15  ;;  %883 = vmatpush1.bf16.msra.mxu1 %v4577_v46  ;;  %v4605_v15 = vld [vmem:[#allocation7 + $0xc0] ss:$8 sps:$4 sm:$0xff]   ;;  %v454_v32 = vpack.c.bf16 %v433_v31, %v432_v30  ;;  %v4616_v36 = vld [vmem:[#allocation7 + $0xf4] ss:$8 sps:$4 sm:$0xff]   ;;  %v4619_v43 = vld [vmem:[#allocation7 + $0x104] ss:$8 sps:$4 sm:$0xff]  }
  0xba   : > { %691 = vmatprep.subr.bf16.mxu0 %v4542_v17  ;;  %884 = vmatprep.subr.bf16.mxu1 %v4578_v48  ;;  %v4610_v17 = vld [vmem:[#allocation7 + $0xd4] ss:$8 sps:$4 sm:$0xff]   ;;  %v441_v46 = vld [vmem:[%s5298_s30 + $0xe8] sm:$0xff]  ;;  %v460_v54 = vld [vmem:[%s6194_s2] sm:$0xf] }
  0xbb   : > { %v439_v42 = vld [vmem:[%s5298_s30 + $0xd8] sm:$0xff]  ;;  %v442_v48 = vld [vmem:[%s5298_s30 + $0xf0] sm:$0xff] }
  0xbc   : > { %v4622_v12 = vld [vmem:[#allocation7 + $0x114] ss:$8 sps:$4 sm:$0xff]   ;;  %v4620_v18 = vld [vmem:[#allocation7 + $0x110] ss:$8 sps:$4 sm:$0xff]  }
  0xbd   : > { %692 = vmatpush1.bf16.msra.mxu0 %v4544_v21  ;;  %885 = vmatpush1.bf16.msra.mxu1 %v4580_v50  ;;  %v4613_v21 = vld [vmem:[#allocation7 + $0xe4] ss:$8 sps:$4 sm:$0xff]  }
  0xbe   : > { %1650 = vmatprep.subr.bf16.mxu0 %v4549_v24  ;;  %v428_v24 = vld [vmem:[%s5298_s30 + $0x80] sm:$0xff] }
  0xbf   : > { %v452_v26 = vpack.c.bf16 %v429_v25, %v428_v24 }
  0xc0   : > { %710 = vmatmul.mubr.bf16.vlgmr.msra.gmra.mrb[0].mxu0 %v444_v27  ;;  %903 = vmatmul.mubr.bf16.vlgmr.msra.gmra.mrb[0].mxu1 %v444_v27  ;;  %v430_v27 = vld [vmem:[%s5298_s30 + $0x90] sm:$0xff] }
  0xc1   : > { %719 = vmatprep.mubr.bf16.mxu0 %v5022_v0  ;;  %1651 = vmatpush1.bf16.msra.mxu0 %v4547_v28  ;;  %v431_v28 = vld [vmem:[%s5298_s30 + $0x98] sm:$0xff] }
  0xc2   : > { %1652 = vmatprep.subr.bf16.mxu0 %v4558_v29  ;;  %912 = vmatprep.mubr.bf16.mxu1 %v5022_v0  ;;  %v453_v29 = vpack.c.bf16 %v431_v28, %v430_v27 }
  0xc5   : > { %1653 = vmatpush1.bf16.msra.mxu0 %v4556_v34  ;;  %v435_v34 = vld [vmem:[%s5298_s30 + $0xb8] sm:$0xff] }
  0xc6   : > { %1654 = vmatprep.subr.bf16.mxu0 %v4567_v35  ;;  %v455_v35 = vpack.c.bf16 %v435_v34, %v434_v33 }
  0xc8   : > { %720 = vmatmul.mubr.bf16.gmra.mrb[4].mxu0 %v445_v38  ;;  %913 = vmatmul.mubr.bf16.gmra.mrb[4].mxu1 %v445_v38  ;;  %v437_v38 = vld [vmem:[%s5298_s30 + $0xc8] sm:$0xff] }
  0xc9   : > { %729 = vmatprep.mubr.bf16.mxu0 %v5022_v0  ;;  %1655 = vmatpush1.bf16.msra.mxu0 %v4565_v39  ;;  %v4614_v39 = vld [vmem:[#allocation7 + $0xf0] ss:$8 sps:$4 sm:$0xff]   ;;  %v456_v40 = vpack.c.bf16 %v437_v38, %v436_v37 }
  0xca   : > { %1656 = vmatprep.subr.bf16.mxu0 %v4576_v41  ;;  %922 = vmatprep.mubr.bf16.mxu1 %v5022_v0  ;;  %v438_v41 = vld [vmem:[%s5298_s30 + $0xd0] sm:$0xff] }
  0xcb   : > { %v457_v44 = vpack.c.bf16 %v439_v42, %v438_v41 }
  0xcd   : > { %1657 = vmatpush1.bf16.msra.mxu0 %v4574_v45  ;;  %v440_v45 = vld [vmem:[%s5298_s30 + $0xe0] sm:$0xff] }
  0xce   : > { %1658 = vmatprep.subr.bf16.mxu0 %v4583_v47  ;;  %v458_v47 = vpack.c.bf16 %v441_v46, %v440_v45 }
  0xd0   : > { %730 = vmatmul.mubr.bf16.gmra.mrb[8].mxu0 %v446_v49  ;;  %923 = vmatmul.mubr.bf16.gmra.mrb[8].mxu1 %v446_v49  ;;  %v443_v49 = vld [vmem:[%s5298_s30 + $0xf8] sm:$0xff]  ;;  %s6225_s30 = sld [smem:[#allocation18_spill]] }
  0xd1   : > { %739 = vmatprep.mubr.bf16.mxu0 %v5022_v0  ;;  %1659 = vmatpush1.bf16.msra.mxu0 %v4581_v51  ;;  %v459_v50 = vpack.c.bf16 %v443_v49, %v442_v48  ;;  %v497_v51 = vlaneseq }
  0xd2   : > { %1660 = vmatprep.subr.bf16.mxu0 %v4586_v52  ;;  %932 = vmatprep.mubr.bf16.mxu1 %v5022_v0 }
  0xd3   : > { %v5376_v52 = vshrl.u32 %v497_v51, 7 }
  0xd5   : > { %1661 = vmatpush1.bf16.msra.mxu0 %v4584_v55  ;;  %v5379_v53 = vsub.s32 0, %v5376_v52  ;;  %v5385_v55 = vsub.s32 1, %v5376_v52  ;;  %v507_v24 = vsub.s32 2, %v5376_v52 }
  0xd6   : > { %1662 = vmatprep.subr.bf16.mxu0 %v4589_v56  ;;  %s6226_s15 = smov %s6225_s30  ;;  %s6145_s17 = scalar_lea.hbm %s6225_s30, %s4072_s16 }
  0xd7   : > { %v5388_v56 = vrot.slane %v460_v54, %v5379_v53 }
  0xd8   : > { %740 = vmatmul.mubr.bf16.gmra.mrb[12].mxu0 %v447_v58  ;;  %933 = vmatmul.mubr.bf16.gmra.mrb[12].mxu1 %v447_v58 }
  0xd9   : > { %749 = vmatprep.mubr.bf16.mxu0 %v5022_v0  ;;  %1663 = vmatpush1.bf16.msra.mxu0 %v4587_v57  ;;  %v5391_v57 = vrot.slane %v460_v54, %v5385_v55 }
  0xda   : > { %1664 = vmatprep.subr.bf16.mxu0 %v4592_v59  ;;  %942 = vmatprep.mubr.bf16.mxu1 %v5022_v0 }
  0xdd   : > { %1665 = vmatpush1.bf16.msra.mxu0 %v4590_v62 }
  0xde   : > { %1666 = vmatprep.subr.bf16.mxu0 %v4595_v63 }
  0xe0   : > { %750 = vmatmul.mubr.bf16.gmra.mrb[16].mxu0 %v448_v2  ;;  %943 = vmatmul.mubr.bf16.gmra.mrb[16].mxu1 %v448_v2 }
  0xe1   : > { %759 = vmatprep.mubr.bf16.mxu0 %v5022_v0  ;;  %1667 = vmatpush1.bf16.msra.mxu0 %v4593_v1 }
  0xe2   : > { %1668 = vmatprep.subr.bf16.mxu0 %v4598_v3  ;;  %952 = vmatprep.mubr.bf16.mxu1 %v5022_v0 }
  0xe5   : > { %1669 = vmatpush1.bf16.msra.mxu0 %v4596_v6 }
  0xe6   : > { %1670 = vmatprep.subr.bf16.mxu0 %v4601_v7 }
  0xe8   : > { %760 = vmatmul.mubr.bf16.gmra.mrb[20].mxu0 %v449_v9  ;;  %953 = vmatmul.mubr.bf16.gmra.mrb[20].mxu1 %v449_v9  ;;  %v4617_v9 = vld [vmem:[#allocation7 + $0x100] ss:$8 sps:$4 sm:$0xff]  }
  0xe9   : > { %769 = vmatprep.mubr.bf16.mxu0 %v5022_v0  ;;  %1671 = vmatpush1.bf16.msra.mxu0 %v4599_v8 }
  0xea   : > { %1672 = vmatprep.subr.bf16.mxu0 %v4604_v10  ;;  %962 = vmatprep.mubr.bf16.mxu1 %v5022_v0 }
  0xed   : > { %1673 = vmatpush1.bf16.msra.mxu0 %v4602_v13 }
  0xee   : > { %1674 = vmatprep.subr.bf16.mxu0 %v4607_v14 }
  0xf0   : > { %770 = vmatmul.mubr.bf16.gmra.mrb[24].mxu0 %v450_v16  ;;  %963 = vmatmul.mubr.bf16.gmra.mrb[24].mxu1 %v450_v16 }
  0xf1   : > { %779 = vmatprep.mubr.bf16.mxu0 %v5022_v0  ;;  %1675 = vmatpush1.bf16.msra.mxu0 %v4605_v15 }
  0xf2   : > { %1676 = vmatprep.subr.bf16.mxu0 %v4610_v17  ;;  %972 = vmatprep.mubr.bf16.mxu1 %v5022_v0 }
  0xf5   : > { %1677 = vmatpush1.bf16.msra.mxu0 %v4608_v20 }
  0xf6   : > { %1678 = vmatprep.subr.bf16.mxu0 %v4613_v21  ;;  %v4625_v21 = vld [vmem:[#allocation7 + $0x124] ss:$8 sps:$4 sm:$0xff]  }
  0xf8   : > { %780 = vmatmul.mubr.bf16.gmra.mrb[28].mxu0 %v451_v23  ;;  %973 = vmatmul.mubr.bf16.gmra.mrb[28].mxu1 %v451_v23 }
  0xf9   : > { %789 = vmatprep.mubr.bf16.mxu0 %v5022_v0  ;;  %1679 = vmatpush1.bf16.msra.mxu0 %v4611_v22 }
  0xfa   : > { %982 = vmatprep.mubr.bf16.mxu1 %v5022_v0  ;;  %1680 = vmatprep.subr.bf16.mxu0 %v4616_v36 }
  0xfd   : > { %1681 = vmatpush1.bf16.msra.mxu0 %v4614_v39 }
  0xfe   : > { %1843 = vmatprep.subr.bf16.mxu0 %v4619_v43  ;;  %v4631_v43 = vld [vmem:[#allocation7 + $0x144] ss:$8 sps:$4 sm:$0xff]  }
 0x100   : > { %790 = vmatmul.mubr.bf16.gmra.mrb[32].mxu0 %v452_v26  ;;  %983 = vmatmul.mubr.bf16.gmra.mrb[32].mxu1 %v452_v26  ;;  %v511_v26 = vsub.s32 3, %v5376_v52 }
 0x101   : > { %799 = vmatprep.mubr.bf16.mxu0 %v5022_v0  ;;  %992 = vmatprep.mubr.bf16.mxu1 %v5022_v0 }
 0x102   : > { %v5412_v38 = vrot.slane %v460_v54, %v511_v26 }
 0x108   : > { %800 = vmatmul.mubr.bf16.gmra.mrb[36].mxu0 %v453_v29  ;;  %993 = vmatmul.mubr.bf16.gmra.mrb[36].mxu1 %v453_v29  ;;  %v4623_v29 = vld [vmem:[#allocation7 + $0x120] ss:$8 sps:$4 sm:$0xff]  }
 0x109   : > { %809 = vmatprep.mubr.bf16.mxu0 %v5022_v0  ;;  %1002 = vmatprep.mubr.bf16.mxu1 %v5022_v0 }
 0x110   : > { %810 = vmatmul.mubr.bf16.gmra.mrb[40].mxu0 %v454_v32  ;;  %1003 = vmatmul.mubr.bf16.gmra.mrb[40].mxu1 %v454_v32  ;;  %v4628_v32 = vld [vmem:[#allocation7 + $0x134] ss:$8 sps:$4 sm:$0xff]  }
 0x111   : > { %819 = vmatprep.mubr.bf16.mxu0 %v5022_v0  ;;  %1012 = vmatprep.mubr.bf16.mxu1 %v5022_v0 }
 0x118   : > { %820 = vmatmul.mubr.bf16.gmra.mrb[44].mxu0 %v455_v35  ;;  %1013 = vmatmul.mubr.bf16.gmra.mrb[44].mxu1 %v455_v35  ;;  %v5407_v35 = vrot.slane %v460_v54, %v507_v24 }
 0x119   : > { %829 = vmatprep.mubr.bf16.mxu0 %v5022_v0  ;;  %1022 = vmatprep.mubr.bf16.mxu1 %v5022_v0 }
 0x120   : > { %830 = vmatmul.mubr.bf16.gmra.mrb[48].mxu0 %v456_v40  ;;  %1023 = vmatmul.mubr.bf16.gmra.mrb[48].mxu1 %v456_v40  ;;  %v4626_v40 = vld [vmem:[#allocation7 + $0x130] ss:$8 sps:$4 sm:$0xff]  }
 0x121   : > { %839 = vmatprep.mubr.bf16.mxu0 %v5022_v0  ;;  %1032 = vmatprep.mubr.bf16.mxu1 %v5022_v0 }
 0x128   : > { %840 = vmatmul.mubr.bf16.gmra.mrb[52].mxu0 %v457_v44  ;;  %1033 = vmatmul.mubr.bf16.gmra.mrb[52].mxu1 %v457_v44 }
 0x129   : > { %849 = vmatprep.mubr.bf16.mxu0 %v5022_v0  ;;  %1042 = vmatprep.mubr.bf16.mxu1 %v5022_v0 }
 0x130   : > { %850 = vmatmul.mubr.bf16.gmra.mrb[56].mxu0 %v458_v47  ;;  %1043 = vmatmul.mubr.bf16.gmra.mrb[56].mxu1 %v458_v47 }
 0x131   : > { %859 = vmatprep.mubr.bf16.mxu0 %v5022_v0  ;;  %1052 = vmatprep.mubr.bf16.mxu1 %v5022_v0 }
 0x138   : > { %860 = vmatmul.mubr.bf16.gmra.mrb[60].mxu0 %v459_v50  ;;  %1053 = vmatmul.mubr.bf16.gmra.mrb[60].mxu1 %v459_v50 }
 0x193   : > { %v711_v0 = vpop.f32.mrb[0].mxu0  ;;  %v904_v44 = vpop.f32.mrb[0].mxu1 }
 0x194   : > { %v712_v58 = vadd.f32 %v711_v0, %v5388_v56  ;;  %v713_v59 = vpop.f32.mrb[1].mxu0  ;;  %v905_v47 = vadd.f32 %v904_v44, %v5407_v35  ;;  %v906_v48 = vpop.f32.mrb[1].mxu1 }
 0x195   : > { %v714_v60 = vadd.f32 %v713_v59, %v5391_v57  ;;  %v715_v61 = vpop.f32.mrb[2].mxu0  ;;  %v907_v50 = vadd.f32 %v906_v48, %v5412_v38  ;;  %v908_v51 = vpop.f32.mrb[2].mxu1 }
 0x196   : > { %v716_v62 = vadd.f32 %v715_v61, %v5388_v56  ;;  %v717_v63 = vpop.f32.mrb[3].mxu0  ;;  %v1063_v2 = vmax.f32 %v712_v58, 0.0  ;;  %v4629_v58 = vld [vmem:[#allocation7 + $0x140] ss:$8 sps:$4 sm:$0xff]   ;;  %v1065_v59 = vmax.f32 %v905_v47, 0.0  ;;  %v910_v61 = vpop.f32.mrb[3].mxu1 }
 0x197   : > { %v718_v1 = vadd.f32 %v717_v63, %v5391_v57  ;;  %v1064_v4 = vmax.f32 %v714_v60, 0.0  ;;  %v909_v60 = vadd.f32 %v908_v51, %v5407_v35  ;;  %v4638_v47 = vld [vmem:[#allocation7 + $0x170] ss:$8 sps:$4 sm:$0xff]   ;;  %v4643_v51 = vld [vmem:[#allocation7 + $0x184] ss:$8 sps:$4 sm:$0xff]  }
 0x198   : > { %v1067_v3 = vmax.f32 %v716_v62, 0.0 }
 0x199   : > { %v1068_v5 = vmax.f32 %v718_v1, 0.0  ;;  %v4634_v1 = vld [vmem:[#allocation7 + $0x154] ss:$8 sps:$4 sm:$0xff]  }
 0x19a   : > { %v1191_v6 = vpack.c.bf16 %v1067_v3, %v1063_v2  ;;  %v1066_v2 = vmax.f32 %v907_v50, 0.0  ;;  %v911_v3 = vadd.f32 %v910_v61, %v5412_v38 }
 0x19b   : > { %v1192_v7 = vpack.c.bf16 %v1068_v5, %v1064_v4  ;;  %v721_v8 = vpop.f32.mrb[4].mxu0 }
 0x19c   : > { %v722_v10 = vadd.f32 %v721_v8, %v5388_v56  ;;  %v723_v11 = vpop.f32.mrb[5].mxu0 }
 0x19d   : > { %v724_v13 = vadd.f32 %v723_v11, %v5391_v57  ;;  %v725_v14 = vpop.f32.mrb[6].mxu0  ;;  %1682 = vmatprep.mubr.bf16.mxu0 %v1192_v7  ;;  %v4632_v11 = vld [vmem:[#allocation7 + $0x150] ss:$8 sps:$4 sm:$0xff]  }
 0x19e   : > { %v726_v15 = vadd.f32 %v725_v14, %v5388_v56  ;;  %v727_v16 = vpop.f32.mrb[7].mxu0  ;;  %1683 = vmatmul.mubr.bf16.vlgmr.msra.gmra.mrb[64].mxu0 %v1191_v6  ;;  %v1071_v19 = vmax.f32 %v722_v10, 0.0  ;;  %v1069_v6 = vmax.f32 %v909_v60, 0.0 }
 0x19f   : > { %v728_v17 = vadd.f32 %v727_v16, %v5391_v57  ;;  %1844 = vmatpush1.bf16.msra.mxu0 %v4617_v9  ;;  %v1072_v22 = vmax.f32 %v724_v13, 0.0  ;;  %v1070_v9 = vmax.f32 %v911_v3, 0.0 }
 0x1a0   : > { %v1075_v20 = vmax.f32 %v726_v15, 0.0  ;;  %1845 = vmatprep.subr.bf16.mxu0 %v4622_v12  ;;  %v5423_v12 = vpack.c.bf16 %v1069_v6, %v1065_v59  ;;  %v4637_v15 = vld [vmem:[#allocation7 + $0x164] ss:$8 sps:$4 sm:$0xff]  }
 0x1a1   : > { %v1076_v23 = vmax.f32 %v728_v17, 0.0  ;;  %v5425_v16 = vpack.c.bf16 %v1070_v9, %v1066_v2  ;;  %v914_v17 = vpop.f32.mrb[4].mxu1 }
 0x1a2   : > { %v1195_v25 = vpack.c.bf16 %v1075_v20, %v1071_v19  ;;  %v915_v20 = vadd.f32 %v914_v17, %v5407_v35 }
 0x1a3   : > { %v1196_v27 = vpack.c.bf16 %v1076_v23, %v1072_v22  ;;  %v731_v28 = vpop.f32.mrb[8].mxu0  ;;  %1846 = vmatpush1.bf16.msra.mxu0 %v4620_v18 }
 0x1a4   : > { %v732_v30 = vadd.f32 %v731_v28, %v5388_v56  ;;  %v733_v31 = vpop.f32.mrb[9].mxu0  ;;  %1847 = vmatprep.subr.bf16.mxu0 %v4625_v21  ;;  %v916_v21 = vpop.f32.mrb[5].mxu1 }
 0x1a5   : > { %v734_v33 = vadd.f32 %v733_v31, %v5391_v57  ;;  %v735_v34 = vpop.f32.mrb[10].mxu0  ;;  %1692 = vmatprep.mubr.bf16.mxu0 %v1196_v27  ;;  %v917_v23 = vadd.f32 %v916_v21, %v5412_v38 }
 0x1a6   : > { %v736_v36 = vadd.f32 %v735_v34, %v5388_v56  ;;  %v737_v37 = vpop.f32.mrb[11].mxu0  ;;  %1693 = vmatmul.mubr.bf16.gmra.mrb[68].mxu0 %v1195_v25  ;;  %v1079_v41 = vmax.f32 %v732_v30, 0.0  ;;  %v918_v25 = vpop.f32.mrb[6].mxu1  ;;  %v1073_v30 = vmax.f32 %v915_v20, 0.0 }
 0x1a7   : > { %v738_v39 = vadd.f32 %v737_v37, %v5391_v57  ;;  %1848 = vmatpush1.bf16.msra.mxu0 %v4623_v29  ;;  %v1080_v45 = vmax.f32 %v734_v33, 0.0  ;;  %v4635_v29 = vld [vmem:[#allocation7 + $0x160] ss:$8 sps:$4 sm:$0xff]   ;;  %v919_v31 = vadd.f32 %v918_v25, %v5407_v35  ;;  %v1074_v37 = vmax.f32 %v917_v23, 0.0 }
 0x1a8   : > { %v1083_v42 = vmax.f32 %v736_v36, 0.0  ;;  %1849 = vmatprep.subr.bf16.mxu0 %v4628_v32  ;;  %v920_v32 = vpop.f32.mrb[7].mxu1  ;;  %v4640_v36 = vld [vmem:[#allocation7 + $0x174] ss:$8 sps:$4 sm:$0xff]  }
 0x1a9   : > { %v1084_v46 = vmax.f32 %v738_v39, 0.0  ;;  %v921_v39 = vadd.f32 %v920_v32, %v5412_v38 }
 0x1aa   : > { %v1199_v49 = vpack.c.bf16 %v1083_v42, %v1079_v41  ;;  %v1077_v42 = vmax.f32 %v919_v31, 0.0 }
 0x1ab   : > { %v1200_v54 = vpack.c.bf16 %v1084_v46, %v1080_v45  ;;  %v741_v0 = vpop.f32.mrb[12].mxu0  ;;  %1850 = vmatpush1.bf16.msra.mxu0 %v4626_v40  ;;  %v1078_v45 = vmax.f32 %v921_v39, 0.0 }
 0x1ac   : > { %v742_v62 = vadd.f32 %v741_v0, %v5388_v56  ;;  %v743_v63 = vpop.f32.mrb[13].mxu0  ;;  %1851 = vmatprep.subr.bf16.mxu0 %v4631_v43  ;;  %v5435_v48 = vpack.c.bf16 %v1077_v42, %v1073_v30  ;;  %v924_v0 = vpop.f32.mrb[8].mxu1  ;;  %v4647_v42 = vld [vmem:[#allocation7 + $0x1a0] ss:$8 sps:$4 sm:$0xff]  }
 0x1ad   : > { %v744_v4 = vadd.f32 %v743_v63, %v5391_v57  ;;  %v745_v5 = vpop.f32.mrb[14].mxu0  ;;  %1702 = vmatprep.mubr.bf16.mxu0 %v1200_v54  ;;  %v5437_v54 = vpack.c.bf16 %v1078_v45, %v1074_v37  ;;  %v925_v60 = vadd.f32 %v924_v0, %v5407_v35  ;;  %v926_v61 = vpop.f32.mrb[9].mxu1 }
 0x1ae   : > { %v746_v7 = vadd.f32 %v745_v5, %v5388_v56  ;;  %v747_v8 = vpop.f32.mrb[15].mxu0  ;;  %1703 = vmatmul.mubr.bf16.gmra.mrb[72].mxu0 %v1199_v49  ;;  %v1087_v13 = vmax.f32 %v742_v62, 0.0  ;;  %v927_v63 = vadd.f32 %v926_v61, %v5412_v38 }
 0x1af   : > { %v748_v10 = vadd.f32 %v747_v8, %v5391_v57  ;;  %1852 = vmatpush1.bf16.msra.mxu0 %v4629_v58  ;;  %v1088_v18 = vmax.f32 %v744_v4, 0.0  ;;  %v4641_v4 = vld [vmem:[#allocation7 + $0x180] ss:$8 sps:$4 sm:$0xff]   ;;  %v1081_v5 = vmax.f32 %v925_v60, 0.0 }
 0x1b0   : > { %v1091_v14 = vmax.f32 %v746_v7, 0.0  ;;  %1853 = vmatprep.subr.bf16.mxu0 %v4634_v1  ;;  %v928_v1 = vpop.f32.mrb[10].mxu1 }
 0x1b1   : > { %v1092_v19 = vmax.f32 %v748_v10, 0.0  ;;  %v929_v6 = vadd.f32 %v928_v1, %v5407_v35  ;;  %v930_v7 = vpop.f32.mrb[11].mxu1  ;;  %v4646_v10 = vld [vmem:[#allocation7 + $0x194] ss:$8 sps:$4 sm:$0xff]   ;;  %v4650_v1 = vld [vmem:[#allocation7 + $0x1b0] ss:$8 sps:$4 sm:$0xff]  }
 0x1b2   : > { %v1203_v22 = vpack.c.bf16 %v1091_v14, %v1087_v13  ;;  %v931_v13 = vadd.f32 %v930_v7, %v5412_v38  ;;  %v934_v30 = vpop.f32.mrb[12].mxu1 }
 0x1b3   : > { %v1204_v27 = vpack.c.bf16 %v1092_v19, %v1088_v18  ;;  %v751_v28 = vpop.f32.mrb[16].mxu0  ;;  %1854 = vmatpush1.bf16.msra.mxu0 %v4632_v11  ;;  %v1082_v11 = vmax.f32 %v927_v63, 0.0  ;;  %v1085_v17 = vmax.f32 %v929_v6, 0.0 }
 0x1b4   : > { %v752_v33 = vadd.f32 %v751_v28, %v5388_v56  ;;  %v753_v34 = vpop.f32.mrb[17].mxu0  ;;  %1855 = vmatprep.subr.bf16.mxu0 %v4637_v15  ;;  %v1086_v20 = vmax.f32 %v931_v13, 0.0  ;;  %v4649_v28 = vld [vmem:[#allocation7 + $0x1a4] ss:$8 sps:$4 sm:$0xff]  }
 0x1b5   : > { %v754_v40 = vadd.f32 %v753_v34, %v5391_v57  ;;  %v755_v41 = vpop.f32.mrb[18].mxu0  ;;  %1712 = vmatprep.mubr.bf16.mxu0 %v1204_v27  ;;  %v5447_v23 = vpack.c.bf16 %v1085_v17, %v1081_v5  ;;  %v936_v34 = vpop.f32.mrb[13].mxu1  ;;  %v4655_v5 = vld [vmem:[#allocation7 + $0x1c4] ss:$8 sps:$4 sm:$0xff]  }
 0x1b6   : > { %v756_v43 = vadd.f32 %v755_v41, %v5388_v56  ;;  %v757_v44 = vpop.f32.mrb[19].mxu0  ;;  %1713 = vmatmul.mubr.bf16.gmra.mrb[76].mxu0 %v1203_v22  ;;  %v1095_v49 = vmax.f32 %v752_v33, 0.0  ;;  %v4644_v22 = vld [vmem:[#allocation7 + $0x190] ss:$8 sps:$4 sm:$0xff]   ;;  %v935_v33 = vadd.f32 %v934_v30, %v5407_v35  ;;  %v937_v37 = vadd.f32 %v936_v34, %v5412_v38  ;;  %v938_v39 = vpop.f32.mrb[14].mxu1 }
 0x1b7   : > { %v758_v46 = vadd.f32 %v757_v44, %v5391_v57  ;;  %1856 = vmatpush1.bf16.msra.mxu0 %v4635_v29  ;;  %v1096_v58 = vmax.f32 %v754_v40, 0.0  ;;  %v5449_v29 = vpack.c.bf16 %v1086_v20, %v1082_v11  ;;  %v939_v44 = vadd.f32 %v938_v39, %v5407_v35  ;;  %v940_v45 = vpop.f32.mrb[15].mxu1 }
 0x1b8   : > { %v1099_v50 = vmax.f32 %v756_v43, 0.0  ;;  %1857 = vmatprep.subr.bf16.mxu0 %v4640_v36  ;;  %v1089_v43 = vmax.f32 %v935_v33, 0.0  ;;  %v944_v7 = vpop.f32.mrb[16].mxu1 }
 0x1b9   : > { %v1100_v59 = vmax.f32 %v758_v46, 0.0  ;;  %v946_v11 = vpop.f32.mrb[17].mxu1 }
 0x1ba   : > { %v1207_v62 = vpack.c.bf16 %v1099_v50, %v1095_v49  ;;  %v4652_v49 = vld [vmem:[#allocation7 + $0x1b4] ss:$8 sps:$4 sm:$0xff]   ;;  %v1090_v50 = vmax.f32 %v937_v37, 0.0 }
 0x1bb   : > { %v1208_v2 = vpack.c.bf16 %v1100_v59, %v1096_v58  ;;  %v761_v3 = vpop.f32.mrb[20].mxu0  ;;  %1858 = vmatpush1.bf16.msra.mxu0 %v4638_v47  ;;  %v1093_v59 = vmax.f32 %v939_v44, 0.0 }
 0x1bc   : > { %v762_v8 = vadd.f32 %v761_v3, %v5388_v56  ;;  %v763_v9 = vpop.f32.mrb[21].mxu0  ;;  %1859 = vmatprep.subr.bf16.mxu0 %v4643_v51  ;;  %v941_v51 = vadd.f32 %v940_v45, %v5412_v38  ;;  %v4661_v45 = vld [vmem:[#allocation7 + $0x1e4] ss:$8 sps:$4 sm:$0xff]  }
 0x1bd   : > { %v764_v14 = vadd.f32 %v763_v9, %v5391_v57  ;;  %v765_v15 = vpop.f32.mrb[22].mxu0  ;;  %1722 = vmatprep.mubr.bf16.mxu0 %v1208_v2  ;;  %v5459_v2 = vpack.c.bf16 %v1093_v59, %v1089_v43 }
 0x1be   : > { %v766_v18 = vadd.f32 %v765_v15, %v5388_v56  ;;  %v767_v19 = vpop.f32.mrb[23].mxu0  ;;  %1723 = vmatmul.mubr.bf16.gmra.mrb[80].mxu0 %v1207_v62  ;;  %v1103_v25 = vmax.f32 %v762_v8, 0.0  ;;  %v1094_v62 = vmax.f32 %v941_v51, 0.0  ;;  %v948_v15 = vpop.f32.mrb[18].mxu1 }
 0x1bf   : > { %v768_v21 = vadd.f32 %v767_v19, %v5391_v57  ;;  %1860 = vmatpush1.bf16.msra.mxu0 %v4641_v4  ;;  %v1104_v31 = vmax.f32 %v764_v14, 0.0  ;;  %v947_v14 = vadd.f32 %v946_v11, %v5412_v38  ;;  %v4653_v19 = vld [vmem:[#allocation7 + $0x1c0] ss:$8 sps:$4 sm:$0xff]  }
 0x1c0   : > { %v1107_v27 = vmax.f32 %v766_v18, 0.0  ;;  %1861 = vmatprep.subr.bf16.mxu0 %v4646_v10  ;;  %v5461_v6 = vpack.c.bf16 %v1094_v62, %v1090_v50  ;;  %v945_v10 = vadd.f32 %v944_v7, %v5407_v35 }
 0x1c1   : > { %v1108_v32 = vmax.f32 %v768_v21, 0.0  ;;  %v949_v21 = vadd.f32 %v948_v15, %v5407_v35  ;;  %v1098_v30 = vmax.f32 %v947_v14, 0.0 }
 0x1c2   : > { %v1211_v36 = vpack.c.bf16 %v1107_v27, %v1103_v25  ;;  %v1097_v20 = vmax.f32 %v945_v10, 0.0 }
 0x1c3   : > { %v1212_v40 = vpack.c.bf16 %v1108_v32, %v1104_v31  ;;  %v771_v41 = vpop.f32.mrb[24].mxu0  ;;  %1862 = vmatpush1.bf16.msra.mxu0 %v4644_v22  ;;  %v950_v22 = vpop.f32.mrb[19].mxu1  ;;  %v1101_v34 = vmax.f32 %v949_v21, 0.0 }
 0x1c4   : > { %v772_v46 = vadd.f32 %v771_v41, %v5388_v56  ;;  %v773_v47 = vpop.f32.mrb[25].mxu0  ;;  %1863 = vmatprep.subr.bf16.mxu0 %v4649_v28  ;;  %v4658_v28 = vld [vmem:[#allocation7 + $0x1d4] ss:$8 sps:$4 sm:$0xff]   ;;  %v951_v31 = vadd.f32 %v950_v22, %v5412_v38  ;;  %v4656_v41 = vld [vmem:[#allocation7 + $0x1d0] ss:$8 sps:$4 sm:$0xff]  }
 0x1c5   : > { %v774_v0 = vadd.f32 %v773_v47, %v5391_v57  ;;  %v775_v58 = vpop.f32.mrb[26].mxu0  ;;  %1732 = vmatprep.mubr.bf16.mxu0 %v1212_v40  ;;  %v954_v47 = vpop.f32.mrb[20].mxu1 }
 0x1c6   : > { %v776_v60 = vadd.f32 %v775_v58, %v5388_v56  ;;  %v777_v61 = vpop.f32.mrb[27].mxu0  ;;  %1733 = vmatmul.mubr.bf16.gmra.mrb[84].mxu0 %v1211_v36  ;;  %v1111_v3 = vmax.f32 %v772_v46, 0.0  ;;  %v1102_v39 = vmax.f32 %v951_v31, 0.0  ;;  %v955_v51 = vadd.f32 %v954_v47, %v5407_v35 }
 0x1c7   : > { %v778_v63 = vadd.f32 %v777_v61, %v5391_v57  ;;  %1864 = vmatpush1.bf16.msra.mxu0 %v4647_v42  ;;  %v1112_v8 = vmax.f32 %v774_v0, 0.0  ;;  %v5471_v42 = vpack.c.bf16 %v1101_v34, %v1097_v20  ;;  %v956_v0 = vpop.f32.mrb[21].mxu1  ;;  %v4662_v20 = vld [vmem:[#allocation7 + $0x1f0] ss:$8 sps:$4 sm:$0xff]  }
 0x1c8   : > { %v1115_v4 = vmax.f32 %v776_v60, 0.0  ;;  %1865 = vmatprep.subr.bf16.mxu0 %v4652_v49  ;;  %v5473_v46 = vpack.c.bf16 %v1102_v39, %v1098_v30  ;;  %v957_v59 = vadd.f32 %v956_v0, %v5412_v38  ;;  %v958_v60 = vpop.f32.mrb[22].mxu1 }
 0x1c9   : > { %v1116_v9 = vmax.f32 %v778_v63, 0.0  ;;  %v4659_v63 = vld [vmem:[#allocation7 + $0x1e0] ss:$8 sps:$4 sm:$0xff]  }
 0x1ca   : > { %v1215_v13 = vpack.c.bf16 %v1115_v4, %v1111_v3  ;;  %v959_v3 = vadd.f32 %v958_v60, %v5407_v35  ;;  %v960_v4 = vpop.f32.mrb[23].mxu1 }
 0x1cb   : > { %v1216_v17 = vpack.c.bf16 %v1116_v9, %v1112_v8  ;;  %v781_v18 = vpop.f32.mrb[28].mxu0  ;;  %1866 = vmatpush1.bf16.msra.mxu0 %v4650_v1  ;;  %v1105_v1 = vmax.f32 %v955_v51, 0.0  ;;  %v4664_v8 = vld [vmem:[#allocation7 + $0x1f4] ss:$8 sps:$4 sm:$0xff]   ;;  %v1106_v9 = vmax.f32 %v957_v59, 0.0  ;;  %v961_v10 = vadd.f32 %v960_v4, %v5412_v38 }
 0x1cc   : > { %v782_v25 = vadd.f32 %v781_v18, %v5388_v56  ;;  %v783_v27 = vpop.f32.mrb[29].mxu0  ;;  %1867 = vmatprep.subr.bf16.mxu0 %v4655_v5  ;;  %v1109_v14 = vmax.f32 %v959_v3, 0.0 }
 0x1cd   : > { %v784_v32 = vadd.f32 %v783_v27, %v5391_v57  ;;  %v785_v33 = vpop.f32.mrb[30].mxu0  ;;  %1742 = vmatprep.mubr.bf16.mxu0 %v1216_v17  ;;  %v1110_v18 = vmax.f32 %v961_v10, 0.0 }
 0x1ce   : > { %v786_v36 = vadd.f32 %v785_v33, %v5388_v56  ;;  %v787_v37 = vpop.f32.mrb[31].mxu0  ;;  %1743 = vmatmul.mubr.bf16.gmra.mrb[88].mxu0 %v1215_v13  ;;  %v1119_v43 = vmax.f32 %v782_v25, 0.0  ;;  %v5483_v21 = vpack.c.bf16 %v1109_v14, %v1105_v1 }
 0x1cf   : > { %v788_v40 = vadd.f32 %v787_v37, %v5391_v57  ;;  %1868 = vmatpush1.bf16.msra.mxu0 %v4653_v19  ;;  %v1120_v49 = vmax.f32 %v784_v32, 0.0  ;;  %v5485_v27 = vpack.c.bf16 %v1110_v18, %v1106_v9 }
 0x1d0   : > { %v1123_v44 = vmax.f32 %v786_v36, 0.0  ;;  %1869 = vmatprep.subr.bf16.mxu0 %v4658_v28  ;;  %v964_v28 = vpop.f32.mrb[24].mxu1 }
 0x1d1   : > { %v1124_v50 = vmax.f32 %v788_v40, 0.0  ;;  %v965_v32 = vadd.f32 %v964_v28, %v5407_v35  ;;  %v966_v33 = vpop.f32.mrb[25].mxu1 }
 0x1d2   : > { %v1219_v58 = vpack.c.bf16 %v1123_v44, %v1119_v43  ;;  %v967_v36 = vadd.f32 %v966_v33, %v5412_v38  ;;  %v968_v37 = vpop.f32.mrb[26].mxu1 }
 0x1d3   : > { %v1220_v61 = vpack.c.bf16 %v1124_v50, %v1120_v49  ;;  %v791_v62 = vpop.f32.mrb[32].mxu0  ;;  %1870 = vmatpush1.bf16.msra.mxu0 %v4656_v41  ;;  %v1113_v41 = vmax.f32 %v965_v32, 0.0  ;;  %v969_v43 = vadd.f32 %v968_v37, %v5407_v35  ;;  %v970_v44 = vpop.f32.mrb[27].mxu1 }
 0x1d4   : > { %v792_v5 = vadd.f32 %v791_v62, %v5388_v56  ;;  %v793_v7 = vpop.f32.mrb[33].mxu0  ;;  %1871 = vmatprep.subr.bf16.mxu0 %v4661_v45  ;;  %v1114_v49 = vmax.f32 %v967_v36, 0.0  ;;  %v971_v50 = vadd.f32 %v970_v44, %v5412_v38 }
 0x1d5   : > { %v794_v11 = vadd.f32 %v793_v7, %v5391_v57  ;;  %v795_v13 = vpop.f32.mrb[34].mxu0  ;;  %1752 = vmatprep.mubr.bf16.mxu0 %v1220_v61 }
 0x1d6   : > { %v796_v15 = vadd.f32 %v795_v13, %v5388_v56  ;;  %v797_v17 = vpop.f32.mrb[35].mxu0  ;;  %1753 = vmatmul.mubr.bf16.gmra.mrb[92].mxu0 %v1219_v58  ;;  %v1127_v22 = vmax.f32 %v792_v5, 0.0  ;;  %v1117_v58 = vmax.f32 %v969_v43, 0.0  ;;  %v1118_v61 = vmax.f32 %v971_v50, 0.0  ;;  %v974_v5 = vpop.f32.mrb[28].mxu1 }
 0x1d7   : > { %v798_v19 = vadd.f32 %v797_v17, %v5391_v57  ;;  %1872 = vmatpush1.bf16.msra.mxu0 %v4659_v63  ;;  %v1128_v30 = vmax.f32 %v794_v11, 0.0  ;;  %v975_v9 = vadd.f32 %v974_v5, %v5407_v35  ;;  %v976_v10 = vpop.f32.mrb[29].mxu1 }
 0x1d8   : > { %v1131_v25 = vmax.f32 %v796_v15, 0.0  ;;  %1873 = vmatprep.subr.bf16.mxu0 %v4664_v8  ;;  %v5495_v63 = vpack.c.bf16 %v1117_v58, %v1113_v41  ;;  %v5497_v4 = vpack.c.bf16 %v1118_v61, %v1114_v49  ;;  %v977_v13 = vadd.f32 %v976_v10, %v5412_v38  ;;  %v978_v14 = vpop.f32.mrb[30].mxu1 }
 0x1d9   : > { %v1132_v31 = vmax.f32 %v798_v19, 0.0  ;;  %v1121_v18 = vmax.f32 %v975_v9, 0.0  ;;  %v979_v19 = vadd.f32 %v978_v14, %v5407_v35 }
 0x1da   : > { %v1223_v34 = vpack.c.bf16 %v1131_v25, %v1127_v22  ;;  %v1122_v28 = vmax.f32 %v977_v13, 0.0 }
 0x1db   : > { %v1224_v39 = vpack.c.bf16 %v1132_v31, %v1128_v30  ;;  %v801_v40 = vpop.f32.mrb[36].mxu0  ;;  %1874 = vmatpush1.bf16.msra.mxu0 %v4662_v20  ;;  %v980_v20 = vpop.f32.mrb[31].mxu1  ;;  %v1125_v33 = vmax.f32 %v979_v19, 0.0 }
 0x1dc   : > { %v802_v45 = vadd.f32 %v801_v40, %v5388_v56  ;;  %v803_v47 = vpop.f32.mrb[37].mxu0  ;;  %v981_v30 = vadd.f32 %v980_v20, %v5412_v38 }
 0x1dd   : > { %v804_v51 = vadd.f32 %v803_v47, %v5391_v57  ;;  %v805_v0 = vpop.f32.mrb[38].mxu0  ;;  %1762 = vmatprep.mubr.bf16.mxu0 %v1224_v39  ;;  %v5507_v40 = vpack.c.bf16 %v1125_v33, %v1121_v18 }
 0x1de   : > { %v806_v59 = vadd.f32 %v805_v0, %v5388_v56  ;;  %v807_v60 = vpop.f32.mrb[39].mxu0  ;;  %1763 = vmatmul.mubr.bf16.gmra.mrb[96].mxu0 %v1223_v34  ;;  %v1135_v1 = vmax.f32 %v802_v45, 0.0  ;;  %v1126_v37 = vmax.f32 %v981_v30, 0.0  ;;  %v984_v45 = vpop.f32.mrb[32].mxu1 }
 0x1df   : > { %v808_v62 = vadd.f32 %v807_v60, %v5391_v57  ;;  %v1136_v7 = vmax.f32 %v804_v51, 0.0  ;;  %v985_v50 = vadd.f32 %v984_v45, %v5407_v35  ;;  %v986_v51 = vpop.f32.mrb[33].mxu1 }
 0x1e0   : > { %v1139_v3 = vmax.f32 %v806_v59, 0.0  ;;  %v5509_v44 = vpack.c.bf16 %v1126_v37, %v1122_v28  ;;  %v987_v58 = vadd.f32 %v986_v51, %v5412_v38  ;;  %v988_v59 = vpop.f32.mrb[34].mxu1 }
 0x1e1   : > { %v1140_v8 = vmax.f32 %v808_v62, 0.0  ;;  %v1129_v62 = vmax.f32 %v985_v50, 0.0 }
 0x1e2   : > { %v1227_v11 = vpack.c.bf16 %v1139_v3, %v1135_v1  ;;  %v989_v1 = vadd.f32 %v988_v59, %v5407_v35  ;;  %v990_v3 = vpop.f32.mrb[35].mxu1 }
 0x1e3   : > { %v1228_v15 = vpack.c.bf16 %v1140_v8, %v1136_v7  ;;  %v811_v17 = vpop.f32.mrb[40].mxu0  ;;  %v1130_v8 = vmax.f32 %v987_v58, 0.0  ;;  %v991_v9 = vadd.f32 %v990_v3, %v5412_v38  ;;  %v994_v28 = vpop.f32.mrb[36].mxu1 }
 0x1e4   : > { %v812_v22 = vadd.f32 %v811_v17, %v5388_v56  ;;  %v813_v25 = vpop.f32.mrb[41].mxu0  ;;  %v1133_v13 = vmax.f32 %v989_v1, 0.0  ;;  %v996_v33 = vpop.f32.mrb[37].mxu1 }
 0x1e5   : > { %v814_v31 = vadd.f32 %v813_v25, %v5391_v57  ;;  %v815_v32 = vpop.f32.mrb[42].mxu0  ;;  %1772 = vmatprep.mubr.bf16.mxu0 %v1228_v15  ;;  %v1134_v17 = vmax.f32 %v991_v9, 0.0  ;;  %v998_v37 = vpop.f32.mrb[38].mxu1 }
 0x1e6   : > { %v816_v34 = vadd.f32 %v815_v32, %v5388_v56  ;;  %v817_v36 = vpop.f32.mrb[43].mxu0  ;;  %1773 = vmatmul.mubr.bf16.gmra.mrb[100].mxu0 %v1227_v11  ;;  %v1143_v41 = vmax.f32 %v812_v22, 0.0  ;;  %v5519_v19 = vpack.c.bf16 %v1133_v13, %v1129_v62  ;;  %v995_v32 = vadd.f32 %v994_v28, %v5407_v35 }
 0x1e7   : > { %v818_v39 = vadd.f32 %v817_v36, %v5391_v57  ;;  %v1144_v47 = vmax.f32 %v814_v31, 0.0  ;;  %v5521_v25 = vpack.c.bf16 %v1134_v17, %v1130_v8  ;;  %v997_v36 = vadd.f32 %v996_v33, %v5412_v38  ;;  %v4667_v8 = vld [vmem:[#allocation8 + $0x4] ss:$16 sps:$4 sm:$0xff]  }
 0x1e8   : > { %v1147_v43 = vmax.f32 %v816_v34, 0.0  ;;  %v999_v45 = vadd.f32 %v998_v37, %v5407_v35  ;;  %2537 = vmatprep.subr.bf16.mxu1 %v4667_v8 }
 0x1e9   : > { %v1148_v49 = vmax.f32 %v818_v39, 0.0  ;;  %v1138_v51 = vmax.f32 %v997_v36, 0.0 }
 0x1ea   : > { %v1231_v0 = vpack.c.bf16 %v1147_v43, %v1143_v41  ;;  %v1137_v43 = vmax.f32 %v995_v32, 0.0 }
 0x1eb   : > { %v1232_v60 = vpack.c.bf16 %v1148_v49, %v1144_v47  ;;  %v821_v61 = vpop.f32.mrb[44].mxu0  ;;  %v1000_v47 = vpop.f32.mrb[39].mxu1 }
 0x1ec   : > { %v822_v5 = vadd.f32 %v821_v61, %v5388_v56  ;;  %v823_v7 = vpop.f32.mrb[45].mxu0  ;;  %v1004_v13 = vpop.f32.mrb[40].mxu1 }
 0x1ed   : > { %v824_v10 = vadd.f32 %v823_v7, %v5391_v57  ;;  %v825_v11 = vpop.f32.mrb[46].mxu0  ;;  %1782 = vmatprep.mubr.bf16.mxu0 %v1232_v60  ;;  %v1141_v60 = vmax.f32 %v999_v45, 0.0  ;;  %v4665_v7 = vld [vmem:[#allocation8] ss:$16 sps:$4 sm:$0xff]   ;;  %v1005_v17 = vadd.f32 %v1004_v13, %v5407_v35 }
 0x1ee   : > { %v826_v14 = vadd.f32 %v825_v11, %v5388_v56  ;;  %v827_v15 = vpop.f32.mrb[47].mxu0  ;;  %1783 = vmatmul.mubr.bf16.gmra.mrb[104].mxu0 %v1231_v0  ;;  %v1151_v20 = vmax.f32 %v822_v5, 0.0  ;;  %v1001_v0 = vadd.f32 %v1000_v47, %v5412_v38  ;;  %2538 = vmatpush1.bf16.msra.mxu1 %v4665_v7 }
 0x1ef   : > { %v828_v18 = vadd.f32 %v827_v15, %v5391_v57  ;;  %v1152_v30 = vmax.f32 %v824_v10, 0.0  ;;  %v5531_v5 = vpack.c.bf16 %v1141_v60, %v1137_v43  ;;  %v1145_v32 = vmax.f32 %v1005_v17, 0.0  ;;  %v4670_v60 = vld [vmem:[#allocation8 + $0x24] ss:$16 sps:$4 sm:$0xff]  }
 0x1f0   : > { %v1155_v22 = vmax.f32 %v826_v14, 0.0  ;;  %v1142_v1 = vmax.f32 %v1001_v0, 0.0  ;;  %2539 = vmatprep.subr.bf16.mxu1 %v4670_v60 }
 0x1f1   : > { %v1156_v31 = vmax.f32 %v828_v18, 0.0  ;;  %v1006_v18 = vpop.f32.mrb[41].mxu1 }
 0x1f2   : > { %v1235_v34 = vpack.c.bf16 %v1155_v22, %v1151_v20  ;;  %v5533_v11 = vpack.c.bf16 %v1142_v1, %v1138_v51  ;;  %v1007_v22 = vadd.f32 %v1006_v18, %v5412_v38  ;;  %v1008_v28 = vpop.f32.mrb[42].mxu1 }
 0x1f3   : > { %v1236_v39 = vpack.c.bf16 %v1156_v31, %v1152_v30  ;;  %v831_v41 = vpop.f32.mrb[48].mxu0  ;;  %v1009_v33 = vadd.f32 %v1008_v28, %v5407_v35 }
 0x1f4   : > { %v832_v49 = vadd.f32 %v831_v41, %v5388_v56  ;;  %v833_v50 = vpop.f32.mrb[49].mxu0 }
 0x1f5   : > { %v834_v58 = vadd.f32 %v833_v50, %v5391_v57  ;;  %v835_v59 = vpop.f32.mrb[50].mxu0  ;;  %1792 = vmatprep.mubr.bf16.mxu0 %v1236_v39  ;;  %v1146_v39 = vmax.f32 %v1007_v22, 0.0  ;;  %v1149_v47 = vmax.f32 %v1009_v33, 0.0 }
 0x1f6   : > { %v836_v61 = vadd.f32 %v835_v59, %v5388_v56  ;;  %v837_v62 = vpop.f32.mrb[51].mxu0  ;;  %1793 = vmatmul.mubr.bf16.gmra.mrb[108].mxu0 %v1235_v34  ;;  %v1159_v9 = vmax.f32 %v832_v49, 0.0  ;;  %v1010_v34 = vpop.f32.mrb[43].mxu1  ;;  %v4668_v59 = vld [vmem:[#allocation8 + $0x20] ss:$16 sps:$4 sm:$0xff]  }
 0x1f7   : > { %v838_v3 = vadd.f32 %v837_v62, %v5391_v57  ;;  %v1160_v14 = vmax.f32 %v834_v58, 0.0  ;;  %v1011_v41 = vadd.f32 %v1010_v34, %v5412_v38  ;;  %v5543_v58 = vpack.c.bf16 %v1149_v47, %v1145_v32  ;;  %2540 = vmatpush1.bf16.msra.mxu1 %v4668_v59 }
 0x1f8   : > { %v1163_v10 = vmax.f32 %v836_v61, 0.0 }
 0x1f9   : > { %v1164_v15 = vmax.f32 %v838_v3, 0.0  ;;  %v1150_v51 = vmax.f32 %v1011_v41, 0.0  ;;  %v1014_v3 = vpop.f32.mrb[44].mxu1 }
 0x1fa   : > { %v1239_v20 = vpack.c.bf16 %v1163_v10, %v1159_v9  ;;  %v1015_v9 = vadd.f32 %v1014_v3, %v5407_v35  ;;  %v1016_v10 = vpop.f32.mrb[45].mxu1 }
 0x1fb   : > { %v1240_v30 = vpack.c.bf16 %v1164_v15, %v1160_v14  ;;  %v841_v31 = vpop.f32.mrb[52].mxu0  ;;  %v5545_v1 = vpack.c.bf16 %v1150_v51, %v1146_v39  ;;  %v1017_v14 = vadd.f32 %v1016_v10, %v5412_v38  ;;  %v1018_v15 = vpop.f32.mrb[46].mxu1 }
 0x1fc   : > { %v842_v36 = vadd.f32 %v841_v31, %v5388_v56  ;;  %v843_v37 = vpop.f32.mrb[53].mxu0  ;;  %v1019_v22 = vadd.f32 %v1018_v15, %v5407_v35  ;;  %v1020_v28 = vpop.f32.mrb[47].mxu1 }
 0x1fd   : > { %v844_v43 = vadd.f32 %v843_v37, %v5391_v57  ;;  %v845_v45 = vpop.f32.mrb[54].mxu0  ;;  %1802 = vmatprep.mubr.bf16.mxu0 %v1240_v30  ;;  %v1154_v32 = vmax.f32 %v1017_v14, 0.0  ;;  %v1021_v33 = vadd.f32 %v1020_v28, %v5412_v38  ;;  %v1024_v60 = vpop.f32.mrb[48].mxu1 }
 0x1fe   : > { %v846_v49 = vadd.f32 %v845_v45, %v5388_v56  ;;  %v847_v50 = vpop.f32.mrb[55].mxu0  ;;  %1803 = vmatmul.mubr.bf16.gmra.mrb[112].mxu0 %v1239_v20  ;;  %v1167_v61 = vmax.f32 %v842_v36, 0.0  ;;  %v1153_v20 = vmax.f32 %v1015_v9, 0.0  ;;  %v1157_v37 = vmax.f32 %v1019_v22, 0.0 }
 0x1ff   : > { %v848_v0 = vadd.f32 %v847_v50, %v5391_v57  ;;  %v1168_v7 = vmax.f32 %v844_v43, 0.0  ;;  %v1158_v43 = vmax.f32 %v1021_v33, 0.0  ;;  %v4673_v50 = vld [vmem:[#allocation8 + $0x44] ss:$16 sps:$4 sm:$0xff]   ;;  %v1025_v3 = vadd.f32 %v1024_v60, %v5407_v35 }
 0x200   : > { %v1171_v62 = vmax.f32 %v846_v49, 0.0  ;;  %v5555_v47 = vpack.c.bf16 %v1157_v37, %v1153_v20  ;;  %v4671_v49 = vld [vmem:[#allocation8 + $0x40] ss:$16 sps:$4 sm:$0xff]   ;;  %2541 = vmatprep.subr.bf16.mxu1 %v4673_v50 }
 0x201   : > { %v1172_v8 = vmax.f32 %v848_v0, 0.0  ;;  %v5557_v59 = vpack.c.bf16 %v1158_v43, %v1154_v32  ;;  %2542 = vmatpush1.bf16.msra.mxu1 %v4671_v49  ;;  %v1161_v15 = vmax.f32 %v1025_v3, 0.0  ;;  %v4674_v43 = vld [vmem:[#allocation8 + $0x60] ss:$16 sps:$4 sm:$0xff]  }
 0x202   : > { %v1243_v13 = vpack.c.bf16 %v1171_v62, %v1167_v61 }
 0x203   : > { %v1244_v17 = vpack.c.bf16 %v1172_v8, %v1168_v7  ;;  %v851_v18 = vpop.f32.mrb[56].mxu0  ;;  %v1026_v7 = vpop.f32.mrb[49].mxu1 }
 0x204   : > { %v852_v30 = vadd.f32 %v851_v18, %v5388_v56  ;;  %v853_v31 = vpop.f32.mrb[57].mxu0  ;;  %v1027_v9 = vadd.f32 %v1026_v7, %v5412_v38  ;;  %v1028_v10 = vpop.f32.mrb[50].mxu1 }
 0x205   : > { %v854_v34 = vadd.f32 %v853_v31, %v5391_v57  ;;  %v855_v36 = vpop.f32.mrb[58].mxu0  ;;  %1812 = vmatprep.mubr.bf16.mxu0 %v1244_v17  ;;  %v1029_v17 = vadd.f32 %v1028_v10, %v5407_v35  ;;  %v1030_v18 = vpop.f32.mrb[51].mxu1 }
 0x206   : > { %v856_v39 = vadd.f32 %v855_v36, %v5388_v56  ;;  %v857_v41 = vpop.f32.mrb[59].mxu0  ;;  %1813 = vmatmul.mubr.bf16.gmra.mrb[116].mxu0 %v1243_v13  ;;  %v1175_v51 = vmax.f32 %v852_v30, 0.0  ;;  %v1162_v28 = vmax.f32 %v1027_v9, 0.0  ;;  %v1031_v30 = vadd.f32 %v1030_v18, %v5412_v38 }
 0x207   : > { %v858_v45 = vadd.f32 %v857_v41, %v5391_v57  ;;  %v1176_v61 = vmax.f32 %v854_v34, 0.0  ;;  %v1165_v33 = vmax.f32 %v1029_v17, 0.0 }
 0x208   : > { %v1179_v0 = vmax.f32 %v856_v39, 0.0  ;;  %v1166_v37 = vmax.f32 %v1031_v30, 0.0  ;;  %v4682_v30 = vld [vmem:[#allocation8 + $0xa4] ss:$16 sps:$4 sm:$0xff]  }
 0x209   : > { %v1180_v62 = vmax.f32 %v858_v45, 0.0  ;;  %v5567_v41 = vpack.c.bf16 %v1165_v33, %v1161_v15  ;;  %v4676_v45 = vld [vmem:[#allocation8 + $0x64] ss:$16 sps:$4 sm:$0xff]  }
 0x20a   : > { %v1247_v8 = vpack.c.bf16 %v1179_v0, %v1175_v51  ;;  %v5569_v51 = vpack.c.bf16 %v1166_v37, %v1162_v28  ;;  %v1034_v0 = vpop.f32.mrb[52].mxu1  ;;  %2543 = vmatprep.subr.bf16.mxu1 %v4676_v45 }
 0x20b   : > { %v1248_v13 = vpack.c.bf16 %v1180_v62, %v1176_v61  ;;  %v861_v14 = vpop.f32.mrb[60].mxu0  ;;  %v1035_v62 = vadd.f32 %v1034_v0, %v5407_v35  ;;  %v1036_v3 = vpop.f32.mrb[53].mxu1  ;;  %2544 = vmatpush1.bf16.msra.mxu1 %v4674_v43  ;;  %v4685_v43 = vld [vmem:[#allocation8 + $0xc4] ss:$16 sps:$4 sm:$0xff]  }
 0x20c   : > { %v862_v20 = vadd.f32 %v861_v14, %v5388_v56  ;;  %v863_v22 = vpop.f32.mrb[61].mxu0  ;;  %v1037_v7 = vadd.f32 %v1036_v3, %v5412_v38  ;;  %v4688_v3 = vld [vmem:[#allocation8 + $0xe4] ss:$16 sps:$4 sm:$0xff]  }
 0x20d   : > { %v864_v31 = vadd.f32 %v863_v22, %v5391_v57  ;;  %v865_v32 = vpop.f32.mrb[62].mxu0  ;;  %1822 = vmatprep.mubr.bf16.mxu0 %v1248_v13  ;;  %v1169_v9 = vmax.f32 %v1035_v62, 0.0  ;;  %v4679_v22 = vld [vmem:[#allocation8 + $0x84] ss:$16 sps:$4 sm:$0xff]  }
 0x20e   : > { %v866_v34 = vadd.f32 %v865_v32, %v5388_v56  ;;  %v867_v36 = vpop.f32.mrb[63].mxu0  ;;  %1823 = vmatmul.mubr.bf16.gmra.mrb[120].mxu0 %v1247_v8  ;;  %v1183_v49 = vmax.f32 %v862_v20, 0.0  ;;  %v1038_v8 = vpop.f32.mrb[54].mxu1  ;;  %v1170_v14 = vmax.f32 %v1037_v7, 0.0  ;;  %v4677_v20 = vld [vmem:[#allocation8 + $0x80] ss:$16 sps:$4 sm:$0xff]   ;;  %2545 = vmatprep.subr.bf16.mxu1 %v4679_v22 }
 0x20f   : > { %v868_v39 = vadd.f32 %v867_v36, %v5391_v57  ;;  %v1184_v60 = vmax.f32 %v864_v31, 0.0  ;;  %v1039_v10 = vadd.f32 %v1038_v8, %v5407_v35  ;;  %v1040_v13 = vpop.f32.mrb[55].mxu1  ;;  %2546 = vmatpush1.bf16.msra.mxu1 %v4677_v20  ;;  %v4680_v36 = vld [vmem:[#allocation8 + $0xa0] ss:$16 sps:$4 sm:$0xff]  }
 0x210   : > { %v1187_v50 = vmax.f32 %v866_v34, 0.0  ;;  %v1041_v15 = vadd.f32 %v1040_v13, %v5412_v38  ;;  %v1044_v32 = vpop.f32.mrb[56].mxu1  ;;  %2547 = vmatprep.subr.bf16.mxu1 %v4682_v30  ;;  %v4689_v30 = vld [vmem:[#allocation8 + $0x100] ss:$16 sps:$4 sm:$0xff]  }
 0x211   : > { %v1188_v61 = vmax.f32 %v868_v39, 0.0  ;;  %v1173_v17 = vmax.f32 %v1039_v10, 0.0  ;;  %v1045_v33 = vadd.f32 %v1044_v32, %v5407_v35  ;;  %v1046_v34 = vpop.f32.mrb[57].mxu1  ;;  %v4686_v10 = vld [vmem:[#allocation8 + $0xe0] ss:$16 sps:$4 sm:$0xff]  }
 0x212   : > { %v1251_v56 = vpack.c.bf16 %v1187_v50, %v1183_v49  ;;  %v1174_v18 = vmax.f32 %v1041_v15, 0.0  ;;  %v1047_v37 = vadd.f32 %v1046_v34, %v5412_v38  ;;  %v1048_v39 = vpop.f32.mrb[58].mxu1 }
 0x213   : > { %v1252_v57 = vpack.c.bf16 %v1188_v61, %v1184_v60  ;;  %v5576_v28 = vpack.c.bf16 %v1173_v17, %v1169_v9  ;;  %v1177_v45 = vmax.f32 %v1045_v33, 0.0  ;;  %v1050_v49 = vpop.f32.mrb[59].mxu1  ;;  %2548 = vmatpush1.bf16.msra.mxu1 %v4680_v36  ;;  %v4683_v61 = vld [vmem:[#allocation8 + $0xc0] ss:$16 sps:$4 sm:$0xff]   ;;  %v4694_v33 = vld [vmem:[#allocation8 + $0x124] ss:$16 sps:$4 sm:$0xff]  }
 0x214   : > { %v5578_v31 = vpack.c.bf16 %v1174_v18, %v1170_v14  ;;  %v1178_v50 = vmax.f32 %v1047_v37, 0.0  ;;  %v1051_v0 = vadd.f32 %v1050_v49, %v5412_v38  ;;  %2549 = vmatprep.subr.bf16.mxu1 %v4685_v43  ;;  %v1054_v8 = vpop.f32.mrb[60].mxu1  ;;  %v4692_v37 = vld [vmem:[#allocation8 + $0x120] ss:$16 sps:$4 sm:$0xff]   ;;  %v4703_v43 = vld [vmem:[#allocation8 + $0x184] ss:$16 sps:$4 sm:$0xff]  }
 0x215   : > { %1832 = vmatprep.mubr.bf16.mxu0 %v1252_v57  ;;  %v1055_v57 = vadd.f32 %v1054_v8, %v5407_v35  ;;  %v1056_v9 = vpop.f32.mrb[61].mxu1  ;;  %v4707_v49 = vld [vmem:[#allocation8 + $0x1c0] ss:$16 sps:$4 sm:$0xff]   ;;  %v4716_v8 = vld [vmem:[#allocation8 + $0x28] ss:$16 sps:$4 sm:$0xff]  }
 0x216   : > { %1833 = vmatmul.mubr.bf16.gmra.mrb[124].mxu0 %v1251_v56  ;;  %v1182_v62 = vmax.f32 %v1051_v0, 0.0  ;;  %v1057_v13 = vadd.f32 %v1056_v9, %v5412_v38  ;;  %v1058_v14 = vpop.f32.mrb[62].mxu1 }
 0x217   : > { %1875 = vmatprep.mubr.bf16.mxu0 %v5425_v16  ;;  %v1049_v16 = vadd.f32 %v1048_v39, %v5407_v35  ;;  %2550 = vmatpush1.bf16.msra.mxu1 %v4683_v61  ;;  %v1185_v15 = vmax.f32 %v1055_v57, 0.0  ;;  %v1059_v17 = vadd.f32 %v1058_v14, %v5407_v35  ;;  %v1060_v18 = vpop.f32.mrb[63].mxu1  ;;  %v4697_v35 = vld [vmem:[#allocation8 + $0x144] ss:$16 sps:$4 sm:$0xff]   ;;  %v4695_v39 = vld [vmem:[#allocation8 + $0x140] ss:$16 sps:$4 sm:$0xff]  }
 0x218   : > { %v5588_v7 = vpack.c.bf16 %v1182_v62, %v1178_v50  ;;  %2551 = vmatprep.subr.bf16.mxu1 %v4688_v3  ;;  %v1061_v20 = vadd.f32 %v1060_v18, %v5412_v38  ;;  %v4700_v38 = vld [vmem:[#allocation8 + $0x164] ss:$16 sps:$4 sm:$0xff]   ;;  %v4719_v18 = vld [vmem:[#allocation8 + $0x48] ss:$16 sps:$4 sm:$0xff]  }
 0x219   : > { %v1181_v60 = vmax.f32 %v1049_v16, 0.0  ;;  %v1189_v22 = vmax.f32 %v1059_v17, 0.0  ;;  %v4704_v16 = vld [vmem:[#allocation8 + $0x1a0] ss:$16 sps:$4 sm:$0xff]  }
 0x21a   : > { %v1190_v32 = vmax.f32 %v1061_v20, 0.0 }
 0x21b   : > { %v5586_v56 = vpack.c.bf16 %v1181_v60, %v1177_v45  ;;  %2552 = vmatpush1.bf16.msra.mxu1 %v4686_v10  ;;  %v1253_v34 = vpack.c.bf16 %v1189_v22, %v1185_v15  ;;  %v4706_v45 = vld [vmem:[#allocation8 + $0x1a4] ss:$16 sps:$4 sm:$0xff]   ;;  %v4718_v60 = vld [vmem:[#allocation8 + $0x2c] ss:$16 sps:$4 sm:$0xff]  }
 0x21c   : > { %v4721_v10 = vld [vmem:[#allocation8 + $0x4c] ss:$16 sps:$4 sm:$0xff]  }
 0x21d   : > { %v4724_v22 = vld [vmem:[#allocation8 + $0x6c] ss:$16 sps:$4 sm:$0xff]  }
 0x21e   : > { %1876 = vmatmul.mubr.bf16.vlgmr.msra.gmra.mrb[64].mxu0 %v5423_v12  ;;  %v4691_v12 = vld [vmem:[#allocation8 + $0x104] ss:$16 sps:$4 sm:$0xff]  }
 0x21f   : > { %1885 = vmatprep.mubr.bf16.mxu0 %v5437_v54  ;;  %v1186_v54 = vmax.f32 %v1057_v13, 0.0  ;;  %2553 = vmatprep.subr.bf16.mxu1 %v4691_v12 }
 0x220   : > { %2554 = vmatpush1.bf16.msra.mxu1 %v4689_v30 }
 0x221   : > { %v1254_v36 = vpack.c.bf16 %v1190_v32, %v1186_v54  ;;  %2555 = vmatprep.subr.bf16.mxu1 %v4694_v33 }
 0x224   : > { %2556 = vmatpush1.bf16.msra.mxu1 %v4692_v37  ;;  %v4722_v37 = vld [vmem:[#allocation8 + $0x68] ss:$16 sps:$4 sm:$0xff]  }
 0x225   : > { %2557 = vmatprep.subr.bf16.mxu1 %v4697_v35 }
 0x226   : > { %1886 = vmatmul.mubr.bf16.gmra.mrb[68].mxu0 %v5435_v48  ;;  %v4698_v48 = vld [vmem:[#allocation8 + $0x160] ss:$16 sps:$4 sm:$0xff]  }
 0x227   : > { %1895 = vmatprep.mubr.bf16.mxu0 %v5449_v29  ;;  %v4701_v29 = vld [vmem:[#allocation8 + $0x180] ss:$16 sps:$4 sm:$0xff]  }
 0x228   : > { %2558 = vmatpush1.bf16.msra.mxu1 %v4695_v39 }
 0x229   : > { %2559 = vmatprep.subr.bf16.mxu1 %v4700_v38  ;;  %v4727_v38 = vld [vmem:[#allocation8 + $0x8c] ss:$16 sps:$4 sm:$0xff]  }
 0x22c   : > { %2560 = vmatpush1.bf16.msra.mxu1 %v4698_v48 }
 0x22d   : > { %2561 = vmatprep.subr.bf16.mxu1 %v4703_v43 }
 0x22e   : > { %1896 = vmatmul.mubr.bf16.gmra.mrb[72].mxu0 %v5447_v23  ;;  %v4709_v23 = vld [vmem:[#allocation8 + $0x1c4] ss:$16 sps:$4 sm:$0xff]  }
 0x22f   : > { %1905 = vmatprep.mubr.bf16.mxu0 %v5461_v6  ;;  %v4710_v6 = vld [vmem:[#allocation8 + $0x1e0] ss:$16 sps:$4 sm:$0xff]  }
 0x230   : > { %2562 = vmatpush1.bf16.msra.mxu1 %v4701_v29 }
 0x231   : > { %2563 = vmatprep.subr.bf16.mxu1 %v4706_v45 }
 0x234   : > { %2564 = vmatpush1.bf16.msra.mxu1 %v4704_v16 }
 0x235   : > { %2565 = vmatprep.subr.bf16.mxu1 %v4709_v23  ;;  %v4725_v23 = vld [vmem:[#allocation8 + $0x88] ss:$16 sps:$4 sm:$0xff]  }
 0x236   : > { %1906 = vmatmul.mubr.bf16.gmra.mrb[76].mxu0 %v5459_v2  ;;  %v4712_v2 = vld [vmem:[#allocation8 + $0x1e4] ss:$16 sps:$4 sm:$0xff]  }
 0x237   : > { %1915 = vmatprep.mubr.bf16.mxu0 %v5473_v46  ;;  %v461_v46 = vld [vmem:[%s6196_s4] sm:$0x3] }
 0x238   : > { %2566 = vmatpush1.bf16.msra.mxu1 %v4707_v49 }
 0x239   : > { %2567 = vmatprep.subr.bf16.mxu1 %v4712_v2 }
 0x23c   : > { %2568 = vmatpush1.bf16.msra.mxu1 %v4710_v6  ;;  %v4730_v6 = vld [vmem:[#allocation8 + $0xac] ss:$16 sps:$4 sm:$0xff]  }
 0x23e   : > { %1916 = vmatmul.mubr.bf16.gmra.mrb[80].mxu0 %v5471_v42  ;;  %v4715_v42 = vld [vmem:[#allocation8 + $0xc] ss:$16 sps:$4 sm:$0xff]  }
 0x23f   : > { %1925 = vmatprep.mubr.bf16.mxu0 %v5485_v27  ;;  %2730 = vmatprep.subr.bf16.mxu1 %v4715_v42  ;;  %v5628_v27 = vrot.slane %v461_v46, %v5385_v55 }
 0x246   : > { %1926 = vmatmul.mubr.bf16.gmra.mrb[84].mxu0 %v5483_v21  ;;  %v5625_v21 = vrot.slane %v461_v46, %v5379_v53 }
 0x247   : > { %1935 = vmatprep.mubr.bf16.mxu0 %v5497_v4 }
 0x24e   : > { %1936 = vmatmul.mubr.bf16.gmra.mrb[88].mxu0 %v5495_v63 }
 0x24f   : > { %1945 = vmatprep.mubr.bf16.mxu0 %v5509_v44 }
 0x256   : > { %1946 = vmatmul.mubr.bf16.gmra.mrb[92].mxu0 %v5507_v40 }
 0x257   : > { %1955 = vmatprep.mubr.bf16.mxu0 %v5521_v25 }
 0x25e   : > { %1956 = vmatmul.mubr.bf16.gmra.mrb[96].mxu0 %v5519_v19 }
 0x25f   : > { %1965 = vmatprep.mubr.bf16.mxu0 %v5533_v11 }
 0x266   : > { %1966 = vmatmul.mubr.bf16.gmra.mrb[100].mxu0 %v5531_v5 }
 0x267   : > { %1975 = vmatprep.mubr.bf16.mxu0 %v5545_v1 }
 0x26e   : > { %1976 = vmatmul.mubr.bf16.gmra.mrb[104].mxu0 %v5543_v58 }
 0x26f   : > { %1985 = vmatprep.mubr.bf16.mxu0 %v5557_v59 }
 0x276   : > { %1986 = vmatmul.mubr.bf16.gmra.mrb[108].mxu0 %v5555_v47 }
 0x277   : > { %1995 = vmatprep.mubr.bf16.mxu0 %v5569_v51 }
 0x27e   : > { %1996 = vmatmul.mubr.bf16.gmra.mrb[112].mxu0 %v5567_v41 }
 0x27f   : > { %2005 = vmatprep.mubr.bf16.mxu0 %v5578_v31  ;;  %v4713_v31 = vld [vmem:[#allocation8 + $0x8] ss:$16 sps:$4 sm:$0xff]  }
 0x286   : > { %2006 = vmatmul.mubr.bf16.gmra.mrb[116].mxu0 %v5576_v28 }
 0x287   : > { %2015 = vmatprep.mubr.bf16.mxu0 %v5588_v7 }
 0x28e   : > { %2016 = vmatmul.mubr.bf16.gmra.mrb[120].mxu0 %v5586_v56 }
 0x28f   : > { %2025 = vmatprep.mubr.bf16.mxu0 %v1254_v36 }
 0x296   : > { %2026 = vmatmul.mubr.bf16.gmra.mrb[124].mxu0 %v1253_v34 }
 0x2f1   : > { %v1877_v63 = vpop.f32.mrb[64].mxu0 }
 0x2f2   : > { %v4297_v4 = vadd.f32 %v1877_v63, %v5625_v21  ;;  %v1879_v40 = vpop.f32.mrb[65].mxu0 }
 0x2f3   : > { %v4298_v44 = vadd.f32 %v1879_v40, %v5628_v27  ;;  %v1881_v19 = vpop.f32.mrb[66].mxu0 }
 0x2f4   : > { %v4299_v25 = vadd.f32 %v1881_v19, %v5625_v21  ;;  %v1883_v5 = vpop.f32.mrb[67].mxu0  ;;  %v2036_v58 = vmax.f32 %v4297_v4, 0.0 }
 0x2f5   : > { %v4300_v11 = vadd.f32 %v1883_v5, %v5628_v27  ;;  %v2037_v47 = vmax.f32 %v4298_v44, 0.0  ;;  %v4728_v44 = vld [vmem:[#allocation8 + $0xa8] ss:$16 sps:$4 sm:$0xff]   ;;  %v4733_v5 = vld [vmem:[#allocation8 + $0xcc] ss:$16 sps:$4 sm:$0xff]  }
 0x2f6   : > { %v2038_v1 = vmax.f32 %v4299_v25, 0.0 }
 0x2f7   : > { %v2039_v59 = vmax.f32 %v4300_v11, 0.0 }
 0x2f8   : > { %v5634_v41 = vpack.c.bf16 %v2038_v1, %v2036_v58 }
 0x2f9   : > { %v5636_v51 = vpack.c.bf16 %v2039_v59, %v2037_v47  ;;  %v1887_v28 = vpop.f32.mrb[68].mxu0 }
 0x2fa   : > { %v4301_v50 = vadd.f32 %v1887_v28, %v5625_v21  ;;  %v1889_v0 = vpop.f32.mrb[69].mxu0  ;;  %v4731_v28 = vld [vmem:[#allocation8 + $0xc8] ss:$16 sps:$4 sm:$0xff]  }
 0x2fb   : > { %v4302_v61 = vadd.f32 %v1889_v0, %v5628_v27  ;;  %v1891_v62 = vpop.f32.mrb[70].mxu0  ;;  %2569 = vmatprep.mubr.bf16.mxu1 %v5636_v51  ;;  %v4736_v0 = vld [vmem:[#allocation8 + $0xec] ss:$16 sps:$4 sm:$0xff]  }
 0x2fc   : > { %v4303_v3 = vadd.f32 %v1891_v62, %v5625_v21  ;;  %v1893_v56 = vpop.f32.mrb[71].mxu0  ;;  %2570 = vmatmul.mubr.bf16.vlgmr.msra.gmra.mrb[64].mxu1 %v5634_v41  ;;  %v2040_v57 = vmax.f32 %v4301_v50, 0.0 }
 0x2fd   : > { %v4304_v7 = vadd.f32 %v1893_v56, %v5628_v27  ;;  %2731 = vmatpush1.bf16.msra.mxu1 %v4713_v31  ;;  %v2041_v13 = vmax.f32 %v4302_v61, 0.0 }
 0x2fe   : > { %v2042_v9 = vmax.f32 %v4303_v3, 0.0  ;;  %2732 = vmatprep.subr.bf16.mxu1 %v4718_v60 }
 0x2ff   : > { %v2043_v14 = vmax.f32 %v4304_v7, 0.0  ;;  %v4734_v7 = vld [vmem:[#allocation8 + $0xe8] ss:$16 sps:$4 sm:$0xff]  }
 0x300   : > { %v5644_v12 = vpack.c.bf16 %v2042_v9, %v2040_v57  ;;  %v4739_v9 = vld [vmem:[#allocation8 + $0x10c] ss:$16 sps:$4 sm:$0xff]  }
 0x301   : > { %v5646_v15 = vpack.c.bf16 %v2043_v14, %v2041_v13  ;;  %v1897_v17 = vpop.f32.mrb[72].mxu0  ;;  %2733 = vmatpush1.bf16.msra.mxu1 %v4716_v8 }
 0x302   : > { %v4305_v54 = vadd.f32 %v1897_v17, %v5625_v21  ;;  %v1899_v20 = vpop.f32.mrb[73].mxu0  ;;  %2734 = vmatprep.subr.bf16.mxu1 %v4721_v10 }
 0x303   : > { %v4306_v30 = vadd.f32 %v1899_v20, %v5628_v27  ;;  %v1901_v32 = vpop.f32.mrb[74].mxu0  ;;  %2579 = vmatprep.mubr.bf16.mxu1 %v5646_v15 }
 0x304   : > { %v4307_v33 = vadd.f32 %v1901_v32, %v5625_v21  ;;  %v1903_v34 = vpop.f32.mrb[75].mxu0  ;;  %2580 = vmatmul.mubr.bf16.gmra.mrb[68].mxu1 %v5644_v12  ;;  %v2044_v35 = vmax.f32 %v4305_v54, 0.0  ;;  %v4737_v54 = vld [vmem:[#allocation8 + $0x108] ss:$16 sps:$4 sm:$0xff]  }
 0x305   : > { %v4308_v36 = vadd.f32 %v1903_v34, %v5628_v27  ;;  %2735 = vmatpush1.bf16.msra.mxu1 %v4719_v18  ;;  %v2045_v48 = vmax.f32 %v4306_v30, 0.0  ;;  %v4742_v30 = vld [vmem:[#allocation8 + $0x12c] ss:$16 sps:$4 sm:$0xff]  }
 0x306   : > { %v2046_v39 = vmax.f32 %v4307_v33, 0.0  ;;  %2736 = vmatprep.subr.bf16.mxu1 %v4724_v22 }
 0x307   : > { %v2047_v43 = vmax.f32 %v4308_v36, 0.0 }
 0x308   : > { %v5654_v29 = vpack.c.bf16 %v2046_v39, %v2044_v35  ;;  %v4740_v35 = vld [vmem:[#allocation8 + $0x128] ss:$16 sps:$4 sm:$0xff]  }
 0x309   : > { %v5656_v45 = vpack.c.bf16 %v2047_v43, %v2045_v48  ;;  %v1907_v16 = vpop.f32.mrb[76].mxu0  ;;  %2737 = vmatpush1.bf16.msra.mxu1 %v4722_v37  ;;  %v4745_v48 = vld [vmem:[#allocation8 + $0x14c] ss:$16 sps:$4 sm:$0xff]  }
 0x30a   : > { %v4309_v49 = vadd.f32 %v1907_v16, %v5625_v21  ;;  %v1909_v2 = vpop.f32.mrb[77].mxu0  ;;  %2738 = vmatprep.subr.bf16.mxu1 %v4727_v38 }
 0x30b   : > { %v4310_v42 = vadd.f32 %v1909_v2, %v5628_v27  ;;  %v1911_v46 = vpop.f32.mrb[78].mxu0  ;;  %2589 = vmatprep.mubr.bf16.mxu1 %v5656_v45 }
 0x30c   : > { %v4311_v63 = vadd.f32 %v1911_v46, %v5625_v21  ;;  %v1913_v4 = vpop.f32.mrb[79].mxu0  ;;  %2590 = vmatmul.mubr.bf16.gmra.mrb[72].mxu1 %v5654_v29  ;;  %v2048_v19 = vmax.f32 %v4309_v49, 0.0 }
 0x30d   : > { %v4312_v40 = vadd.f32 %v1913_v4, %v5628_v27  ;;  %2739 = vmatpush1.bf16.msra.mxu1 %v4725_v23  ;;  %v2049_v11 = vmax.f32 %v4310_v42, 0.0 }
 0x30e   : > { %v2050_v25 = vmax.f32 %v4311_v63, 0.0  ;;  %2740 = vmatprep.subr.bf16.mxu1 %v4730_v6  ;;  %v4743_v6 = vld [vmem:[#allocation8 + $0x148] ss:$16 sps:$4 sm:$0xff]   ;;  %v4748_v63 = vld [vmem:[#allocation8 + $0x16c] ss:$16 sps:$4 sm:$0xff]  }
 0x30f   : > { %v2051_v58 = vmax.f32 %v4312_v40, 0.0 }
 0x310   : > { %v5664_v1 = vpack.c.bf16 %v2050_v25, %v2048_v19 }
 0x311   : > { %v5666_v47 = vpack.c.bf16 %v2051_v58, %v2049_v11  ;;  %v1917_v59 = vpop.f32.mrb[80].mxu0  ;;  %2741 = vmatpush1.bf16.msra.mxu1 %v4728_v44 }
 0x312   : > { %v4313_v31 = vadd.f32 %v1917_v59, %v5625_v21  ;;  %v1919_v50 = vpop.f32.mrb[81].mxu0  ;;  %2742 = vmatprep.subr.bf16.mxu1 %v4733_v5  ;;  %v4746_v5 = vld [vmem:[#allocation8 + $0x168] ss:$16 sps:$4 sm:$0xff]   ;;  %v4751_v59 = vld [vmem:[#allocation8 + $0x18c] ss:$16 sps:$4 sm:$0xff]  }
 0x313   : > { %v4314_v60 = vadd.f32 %v1919_v50, %v5628_v27  ;;  %v1921_v61 = vpop.f32.mrb[82].mxu0  ;;  %2599 = vmatprep.mubr.bf16.mxu1 %v5666_v47 }
 0x314   : > { %v4315_v62 = vadd.f32 %v1921_v61, %v5625_v21  ;;  %v1923_v3 = vpop.f32.mrb[83].mxu0  ;;  %2600 = vmatmul.mubr.bf16.gmra.mrb[76].mxu1 %v5664_v1  ;;  %v2052_v8 = vmax.f32 %v4313_v31, 0.0  ;;  %v4749_v61 = vld [vmem:[#allocation8 + $0x188] ss:$16 sps:$4 sm:$0xff]  }
 0x315   : > { %v4316_v56 = vadd.f32 %v1923_v3, %v5628_v27  ;;  %2743 = vmatpush1.bf16.msra.mxu1 %v4731_v28  ;;  %v2053_v10 = vmax.f32 %v4314_v60, 0.0 }
 0x316   : > { %v2054_v57 = vmax.f32 %v4315_v62, 0.0  ;;  %2744 = vmatprep.subr.bf16.mxu1 %v4736_v0 }
 0x317   : > { %v2055_v13 = vmax.f32 %v4316_v56, 0.0  ;;  %v4754_v56 = vld [vmem:[#allocation8 + $0x1ac] ss:$16 sps:$4 sm:$0xff]  }
 0x318   : > { %v5674_v14 = vpack.c.bf16 %v2054_v57, %v2052_v8 }
 0x319   : > { %v5676_v17 = vpack.c.bf16 %v2055_v13, %v2053_v10  ;;  %v1927_v18 = vpop.f32.mrb[84].mxu0  ;;  %2745 = vmatpush1.bf16.msra.mxu1 %v4734_v7  ;;  %v4752_v13 = vld [vmem:[#allocation8 + $0x1a8] ss:$16 sps:$4 sm:$0xff]  }
 0x31a   : > { %v4317_v20 = vadd.f32 %v1927_v18, %v5625_v21  ;;  %v1929_v22 = vpop.f32.mrb[85].mxu0  ;;  %2746 = vmatprep.subr.bf16.mxu1 %v4739_v9 }
 0x31b   : > { %v4318_v32 = vadd.f32 %v1929_v22, %v5628_v27  ;;  %v1931_v33 = vpop.f32.mrb[86].mxu0  ;;  %2609 = vmatprep.mubr.bf16.mxu1 %v5676_v17 }
 0x31c   : > { %v4319_v34 = vadd.f32 %v1931_v33, %v5625_v21  ;;  %v1933_v36 = vpop.f32.mrb[87].mxu0  ;;  %2610 = vmatmul.mubr.bf16.gmra.mrb[80].mxu1 %v5674_v14  ;;  %v2056_v39 = vmax.f32 %v4317_v20, 0.0  ;;  %v4757_v20 = vld [vmem:[#allocation8 + $0x1cc] ss:$16 sps:$4 sm:$0xff]  }
 0x31d   : > { %v4320_v37 = vadd.f32 %v1933_v36, %v5628_v27  ;;  %2747 = vmatpush1.bf16.msra.mxu1 %v4737_v54  ;;  %v2057_v43 = vmax.f32 %v4318_v32, 0.0  ;;  %v4755_v36 = vld [vmem:[#allocation8 + $0x1c8] ss:$16 sps:$4 sm:$0xff]  }
 0x31e   : > { %v2058_v38 = vmax.f32 %v4319_v34, 0.0  ;;  %2748 = vmatprep.subr.bf16.mxu1 %v4742_v30 }
 0x31f   : > { %v2059_v16 = vmax.f32 %v4320_v37, 0.0 }
 0x320   : > { %v5684_v23 = vpack.c.bf16 %v2058_v38, %v2056_v39  ;;  %v4760_v39 = vld [vmem:[#allocation8 + $0x1ec] ss:$16 sps:$4 sm:$0xff]  }
 0x321   : > { %v5686_v49 = vpack.c.bf16 %v2059_v16, %v2057_v43  ;;  %v1937_v2 = vpop.f32.mrb[88].mxu0  ;;  %2749 = vmatpush1.bf16.msra.mxu1 %v4740_v35 }
 0x322   : > { %v4321_v42 = vadd.f32 %v1937_v2, %v5625_v21  ;;  %v1939_v46 = vpop.f32.mrb[89].mxu0  ;;  %2750 = vmatprep.subr.bf16.mxu1 %v4745_v48 }
 0x323   : > { %v4322_v4 = vadd.f32 %v1939_v46, %v5628_v27  ;;  %v1941_v40 = vpop.f32.mrb[90].mxu0  ;;  %2619 = vmatprep.mubr.bf16.mxu1 %v5686_v49  ;;  %v4762_v46 = vld [vmem:[#allocation10] sm:$0xff]  }
 0x324   : > { %v4323_v44 = vadd.f32 %v1941_v40, %v5625_v21  ;;  %v1943_v19 = vpop.f32.mrb[91].mxu0  ;;  %2620 = vmatmul.mubr.bf16.gmra.mrb[84].mxu1 %v5684_v23  ;;  %v2060_v11 = vmax.f32 %v4321_v42, 0.0  ;;  %v4761_v42 = vld [vmem:[#allocation10 + $0x40] sm:$0xff]  }
 0x325   : > { %v4324_v25 = vadd.f32 %v1943_v19, %v5628_v27  ;;  %2751 = vmatpush1.bf16.msra.mxu1 %v4743_v6  ;;  %v2061_v28 = vmax.f32 %v4322_v4, 0.0  ;;  %v4758_v6 = vld [vmem:[#allocation8 + $0x1e8] ss:$16 sps:$4 sm:$0xff]   ;;  %4073 = vmatprep.subr.bf16.mxu0 %v4761_v42  ;;  %v4770_v42 = vld [vmem:[#allocation10 + $0x20] sm:$0xff]  }
 0x326   : > { %v2062_v58 = vmax.f32 %v4323_v44, 0.0  ;;  %2752 = vmatprep.subr.bf16.mxu1 %v4748_v63  ;;  %4074 = vmatpush3.bf16.msra.mxu0 %v4762_v46 }
 0x327   : > { %v2063_v31 = vmax.f32 %v4324_v25, 0.0 }
 0x328   : > { %v5694_v50 = vpack.c.bf16 %v2062_v58, %v2060_v11 }
 0x329   : > { %v5696_v0 = vpack.c.bf16 %v2063_v31, %v2061_v28  ;;  %v1947_v60 = vpop.f32.mrb[92].mxu0  ;;  %2753 = vmatpush1.bf16.msra.mxu1 %v4746_v5 }
 0x32a   : > { %v4325_v62 = vadd.f32 %v1947_v60, %v5625_v21  ;;  %v1949_v3 = vpop.f32.mrb[93].mxu0  ;;  %2754 = vmatprep.subr.bf16.mxu1 %v4751_v59 }
 0x32b   : > { %v4326_v7 = vadd.f32 %v1949_v3, %v5628_v27  ;;  %v1951_v8 = vpop.f32.mrb[94].mxu0  ;;  %2629 = vmatprep.mubr.bf16.mxu1 %v5696_v0  ;;  %v4764_v3 = vld [vmem:[#allocation10 + $0x8] sm:$0xff]  }
 0x32c   : > { %v4327_v57 = vadd.f32 %v1951_v8, %v5625_v21  ;;  %v1953_v9 = vpop.f32.mrb[95].mxu0  ;;  %2630 = vmatmul.mubr.bf16.gmra.mrb[88].mxu1 %v5694_v50  ;;  %v2064_v18 = vmax.f32 %v4325_v62, 0.0 }
 0x32d   : > { %v4328_v10 = vadd.f32 %v1953_v9, %v5628_v27  ;;  %2755 = vmatpush1.bf16.msra.mxu1 %v4749_v61  ;;  %v2065_v22 = vmax.f32 %v4326_v7, 0.0  ;;  %v4763_v61 = vld [vmem:[#allocation10 + $0x48] sm:$0xff]  }
 0x32e   : > { %v2066_v54 = vmax.f32 %v4327_v57, 0.0  ;;  %2756 = vmatprep.subr.bf16.mxu1 %v4754_v56  ;;  %v4765_v56 = vld [vmem:[#allocation10 + $0x50] sm:$0xff]   ;;  %4075 = vmatprep.subr.bf16.mxu0 %v4763_v61 }
 0x32f   : > { %v2067_v30 = vmax.f32 %v4328_v10, 0.0  ;;  %4076 = vmatpush3.bf16.msra.mxu0 %v4764_v3  ;;  %v4766_v10 = vld [vmem:[#allocation10 + $0x10] sm:$0xff]  }
 0x330   : > { %v5704_v32 = vpack.c.bf16 %v2066_v54, %v2064_v18  ;;  %4077 = vmatprep.subr.bf16.mxu0 %v4765_v56 }
 0x331   : > { %v5706_v33 = vpack.c.bf16 %v2067_v30, %v2065_v22  ;;  %v1957_v34 = vpop.f32.mrb[96].mxu0  ;;  %2757 = vmatpush1.bf16.msra.mxu1 %v4752_v13 }
 0x332   : > { %v4329_v37 = vadd.f32 %v1957_v34, %v5625_v21  ;;  %v1959_v35 = vpop.f32.mrb[97].mxu0  ;;  %2758 = vmatprep.subr.bf16.mxu1 %v4757_v20 }
 0x333   : > { %v4330_v38 = vadd.f32 %v1959_v35, %v5628_v27  ;;  %v1961_v48 = vpop.f32.mrb[98].mxu0  ;;  %2639 = vmatprep.mubr.bf16.mxu1 %v5706_v33  ;;  %4078 = vmatpush3.bf16.msra.mxu0 %v4766_v10  ;;  %v4767_v35 = vld [vmem:[#allocation10 + $0x58] sm:$0xff]   ;;  %v4774_v10 = vld [vmem:[#allocation10 + $0x30] sm:$0xff]  }
 0x334   : > { %v4331_v43 = vadd.f32 %v1961_v48, %v5625_v21  ;;  %v1963_v16 = vpop.f32.mrb[99].mxu0  ;;  %2640 = vmatmul.mubr.bf16.gmra.mrb[92].mxu1 %v5704_v32  ;;  %v2068_v63 = vmax.f32 %v4329_v37, 0.0  ;;  %v4769_v48 = vld [vmem:[#allocation10 + $0x60] sm:$0xff]   ;;  %4079 = vmatprep.subr.bf16.mxu0 %v4767_v35 }
 0x335   : > { %v4332_v2 = vadd.f32 %v1963_v16, %v5628_v27  ;;  %2759 = vmatpush1.bf16.msra.mxu1 %v4755_v36  ;;  %v2069_v40 = vmax.f32 %v4330_v38, 0.0  ;;  %v4768_v38 = vld [vmem:[#allocation10 + $0x18] sm:$0xff]  }
 0x336   : > { %v2070_v4 = vmax.f32 %v4331_v43, 0.0  ;;  %2760 = vmatprep.subr.bf16.mxu1 %v4760_v39 }
 0x337   : > { %v2071_v44 = vmax.f32 %v4332_v2, 0.0  ;;  %4080 = vmatpush3.bf16.msra.mxu0 %v4768_v38 }
 0x338   : > { %v5714_v19 = vpack.c.bf16 %v2070_v4, %v2068_v63  ;;  %4081 = vmatprep.subr.bf16.mxu0 %v4769_v48 }
 0x339   : > { %v5716_v25 = vpack.c.bf16 %v2071_v44, %v2069_v40  ;;  %v1967_v5 = vpop.f32.mrb[100].mxu0  ;;  %2761 = vmatpush1.bf16.msra.mxu1 %v4758_v6 }
 0x33a   : > { %v4333_v11 = vadd.f32 %v1967_v5, %v5625_v21  ;;  %v1969_v58 = vpop.f32.mrb[101].mxu0 }
 0x33b   : > { %v4334_v59 = vadd.f32 %v1969_v58, %v5628_v27  ;;  %v1971_v28 = vpop.f32.mrb[102].mxu0  ;;  %2649 = vmatprep.mubr.bf16.mxu1 %v5716_v25  ;;  %4082 = vmatpush3.bf16.msra.mxu0 %v4770_v42 }
 0x33c   : > { %v4335_v31 = vadd.f32 %v1971_v28, %v5625_v21  ;;  %v1973_v60 = vpop.f32.mrb[103].mxu0  ;;  %2650 = vmatmul.mubr.bf16.gmra.mrb[96].mxu1 %v5714_v19  ;;  %v2072_v7 = vmax.f32 %v4333_v11, 0.0  ;;  %v4771_v28 = vld [vmem:[#allocation10 + $0x68] sm:$0xff]  }
 0x33d   : > { %v4336_v62 = vadd.f32 %v1973_v60, %v5628_v27  ;;  %v2073_v57 = vmax.f32 %v4334_v59, 0.0  ;;  %v4772_v60 = vld [vmem:[#allocation10 + $0x28] sm:$0xff]   ;;  %4083 = vmatprep.subr.bf16.mxu0 %v4771_v28 }
 0x33e   : > { %v2074_v8 = vmax.f32 %v4335_v31, 0.0 }
 0x33f   : > { %v2075_v9 = vmax.f32 %v4336_v62, 0.0  ;;  %4084 = vmatpush3.bf16.msra.mxu0 %v4772_v60  ;;  %v4777_v60 = vld [vmem:[#allocation10 + $0xc0] sm:$0xff]  }
 0x340   : > { %v5724_v13 = vpack.c.bf16 %v2074_v8, %v2072_v7  ;;  %v4773_v8 = vld [vmem:[#allocation10 + $0x70] sm:$0xff]   ;;  %4185 = vmatprep.subr.bf16.mxu1 %v4777_v60 }
 0x341   : > { %v5726_v18 = vpack.c.bf16 %v2075_v9, %v2073_v57  ;;  %v1977_v54 = vpop.f32.mrb[104].mxu0  ;;  %4085 = vmatprep.subr.bf16.mxu0 %v4773_v8 }
 0x342   : > { %v4337_v20 = vadd.f32 %v1977_v54, %v5625_v21  ;;  %v1979_v22 = vpop.f32.mrb[105].mxu0 }
 0x343   : > { %v4338_v30 = vadd.f32 %v1979_v22, %v5628_v27  ;;  %v1981_v34 = vpop.f32.mrb[106].mxu0  ;;  %2659 = vmatprep.mubr.bf16.mxu1 %v5726_v18  ;;  %4086 = vmatpush3.bf16.msra.mxu0 %v4774_v10 }
 0x344   : > { %v4339_v36 = vadd.f32 %v1981_v34, %v5625_v21  ;;  %v1983_v37 = vpop.f32.mrb[107].mxu0  ;;  %2660 = vmatmul.mubr.bf16.gmra.mrb[100].mxu1 %v5724_v13  ;;  %v2076_v43 = vmax.f32 %v4337_v20, 0.0 }
 0x345   : > { %v4340_v39 = vadd.f32 %v1983_v37, %v5628_v27  ;;  %v2077_v2 = vmax.f32 %v4338_v30, 0.0  ;;  %v4775_v37 = vld [vmem:[#allocation10 + $0x78] sm:$0xff]  }
 0x346   : > { %v2078_v16 = vmax.f32 %v4339_v36, 0.0  ;;  %4087 = vmatprep.subr.bf16.mxu0 %v4775_v37 }
 0x347   : > { %v2079_v6 = vmax.f32 %v4340_v39, 0.0  ;;  %v4776_v39 = vld [vmem:[#allocation10 + $0x38] sm:$0xff]  }
 0x348   : > { %v5734_v46 = vpack.c.bf16 %v2078_v16, %v2076_v43  ;;  %4088 = vmatpush3.bf16.msra.mxu0 %v4776_v39 }
 0x349   : > { %v5736_v63 = vpack.c.bf16 %v2079_v6, %v2077_v2  ;;  %v1987_v4 = vpop.f32.mrb[108].mxu0 }
 0x34a   : > { %v4341_v40 = vadd.f32 %v1987_v4, %v5625_v21  ;;  %v1989_v44 = vpop.f32.mrb[109].mxu0 }
 0x34b   : > { %v4342_v5 = vadd.f32 %v1989_v44, %v5628_v27  ;;  %v1991_v11 = vpop.f32.mrb[110].mxu0  ;;  %2669 = vmatprep.mubr.bf16.mxu1 %v5736_v63 }
 0x34c   : > { %v4343_v58 = vadd.f32 %v1991_v11, %v5625_v21  ;;  %v1993_v59 = vpop.f32.mrb[111].mxu0  ;;  %2670 = vmatmul.mubr.bf16.gmra.mrb[104].mxu1 %v5734_v46  ;;  %v2080_v61 = vmax.f32 %v4341_v40, 0.0 }
 0x34d   : > { %v4344_v31 = vadd.f32 %v1993_v59, %v5628_v27  ;;  %v2081_v3 = vmax.f32 %v4342_v5, 0.0 }
 0x34e   : > { %v2082_v62 = vmax.f32 %v4343_v58, 0.0 }
 0x34f   : > { %v2083_v56 = vmax.f32 %v4344_v31, 0.0 }
 0x350   : > { %v5744_v7 = vpack.c.bf16 %v2082_v62, %v2080_v61 }
 0x351   : > { %v5746_v57 = vpack.c.bf16 %v2083_v56, %v2081_v3  ;;  %v1997_v9 = vpop.f32.mrb[112].mxu0 }
 0x352   : > { %v4345_v54 = vadd.f32 %v1997_v9, %v5625_v21  ;;  %v1999_v20 = vpop.f32.mrb[113].mxu0 }
 0x353   : > { %v4346_v22 = vadd.f32 %v1999_v20, %v5628_v27  ;;  %v2001_v30 = vpop.f32.mrb[114].mxu0  ;;  %2679 = vmatprep.mubr.bf16.mxu1 %v5746_v57 }
 0x354   : > { %v4347_v34 = vadd.f32 %v2001_v30, %v5625_v21  ;;  %v2003_v36 = vpop.f32.mrb[115].mxu0  ;;  %2680 = vmatmul.mubr.bf16.gmra.mrb[108].mxu1 %v5744_v7  ;;  %v2084_v38 = vmax.f32 %v4345_v54, 0.0 }
 0x355   : > { %v4348_v35 = vadd.f32 %v2003_v36, %v5628_v27  ;;  %v2085_v43 = vmax.f32 %v4346_v22, 0.0 }
 0x356   : > { %v2086_v48 = vmax.f32 %v4347_v34, 0.0 }
 0x357   : > { %v2087_v16 = vmax.f32 %v4348_v35, 0.0 }
 0x358   : > { %v5754_v2 = vpack.c.bf16 %v2086_v48, %v2084_v38 }
 0x359   : > { %v5756_v6 = vpack.c.bf16 %v2087_v16, %v2085_v43  ;;  %v2007_v42 = vpop.f32.mrb[116].mxu0 }
 0x35a   : > { %v4349_v4 = vadd.f32 %v2007_v42, %v5625_v21  ;;  %v2009_v40 = vpop.f32.mrb[117].mxu0 }
 0x35b   : > { %v4350_v44 = vadd.f32 %v2009_v40, %v5628_v27  ;;  %v2011_v5 = vpop.f32.mrb[118].mxu0  ;;  %2689 = vmatprep.mubr.bf16.mxu1 %v5756_v6 }
 0x35c   : > { %v4351_v11 = vadd.f32 %v2011_v5, %v5625_v21  ;;  %v2013_v58 = vpop.f32.mrb[119].mxu0  ;;  %2690 = vmatmul.mubr.bf16.gmra.mrb[112].mxu1 %v5754_v2  ;;  %v2088_v28 = vmax.f32 %v4349_v4, 0.0 }
 0x35d   : > { %v4352_v59 = vadd.f32 %v2013_v58, %v5628_v27  ;;  %v2089_v61 = vmax.f32 %v4350_v44, 0.0 }
 0x35e   : > { %v2090_v31 = vmax.f32 %v4351_v11, 0.0 }
 0x35f   : > { %v2091_v62 = vmax.f32 %v4352_v59, 0.0 }
 0x360   : > { %v5764_v3 = vpack.c.bf16 %v2090_v31, %v2088_v28 }
 0x361   : > { %v5766_v56 = vpack.c.bf16 %v2091_v62, %v2089_v61  ;;  %v2017_v8 = vpop.f32.mrb[120].mxu0  ;;  %v4779_v62 = vld [vmem:[#allocation10 + $0xc8] sm:$0xff]  }
 0x362   : > { %v4353_v9 = vadd.f32 %v2017_v8, %v5625_v21  ;;  %v2019_v10 = vpop.f32.mrb[121].mxu0  ;;  %v4781_v8 = vld [vmem:[#allocation10 + $0xd0] sm:$0xff]  }
 0x363   : > { %v4354_v54 = vadd.f32 %v2019_v10, %v5628_v27  ;;  %v2021_v20 = vpop.f32.mrb[122].mxu0  ;;  %2699 = vmatprep.mubr.bf16.mxu1 %v5766_v56 }
 0x364   : > { %v4355_v22 = vadd.f32 %v2021_v20, %v5625_v21  ;;  %v2023_v30 = vpop.f32.mrb[123].mxu0  ;;  %2700 = vmatmul.mubr.bf16.gmra.mrb[116].mxu1 %v5764_v3  ;;  %v2092_v36 = vmax.f32 %v4353_v9, 0.0  ;;  %v4782_v9 = vld [vmem:[#allocation10 + $0x90] sm:$0xff]  }
 0x365   : > { %v4356_v34 = vadd.f32 %v2023_v30, %v5628_v27  ;;  %v2093_v35 = vmax.f32 %v4354_v54, 0.0 }
 0x366   : > { %v2094_v37 = vmax.f32 %v4355_v22, 0.0 }
 0x367   : > { %v2095_v39 = vmax.f32 %v4356_v34, 0.0 }
 0x368   : > { %v5774_v38 = vpack.c.bf16 %v2094_v37, %v2092_v36 }
 0x369   : > { %v5776_v48 = vpack.c.bf16 %v2095_v39, %v2093_v35  ;;  %v2027_v43 = vpop.f32.mrb[124].mxu0 }
 0x36a   : > { %v4357_v16 = vadd.f32 %v2027_v43, %v5625_v21  ;;  %v2029_v42 = vpop.f32.mrb[125].mxu0 }
 0x36b   : > { %v4358_v4 = vadd.f32 %v2029_v42, %v5628_v27  ;;  %v2031_v40 = vpop.f32.mrb[126].mxu0  ;;  %2709 = vmatprep.mubr.bf16.mxu1 %v5776_v48 }
 0x36c   : > { %v4359_v44 = vadd.f32 %v2031_v40, %v5625_v21  ;;  %v2033_v5 = vpop.f32.mrb[127].mxu0  ;;  %2710 = vmatmul.mubr.bf16.gmra.mrb[120].mxu1 %v5774_v38  ;;  %v2096_v58 = vmax.f32 %v4357_v16, 0.0  ;;  %v4778_v21 = vld [vmem:[#allocation10 + $0x80] sm:$0xff]  }
 0x36d   : > { %v4360_v11 = vadd.f32 %v2033_v5, %v5628_v27  ;;  %v2097_v28 = vmax.f32 %v4358_v4, 0.0  ;;  %v4780_v27 = vld [vmem:[#allocation10 + $0x88] sm:$0xff]  }
 0x36e   : > { %v2098_v59 = vmax.f32 %v4359_v44, 0.0 }
 0x36f   : > { %v2099_v31 = vmax.f32 %v4360_v11, 0.0 }
 0x370   : > { %v5784_v60 = vpack.c.bf16 %v2098_v59, %v2096_v58 }
 0x371   : > { %v5786_v61 = vpack.c.bf16 %v2099_v31, %v2097_v28 }
 0x373   : > { %2719 = vmatprep.mubr.bf16.mxu1 %v5786_v61 }
 0x374   : > { %2720 = vmatmul.mubr.bf16.gmra.mrb[124].mxu1 %v5784_v60 }
 0x375   : > { %2762 = vmatprep.mubr.bf16.mxu1 %v5636_v51  ;;  %v4783_v51 = vld [vmem:[#allocation10 + $0xd8] sm:$0xff]  }
 0x37c   : > { %2763 = vmatmul.mubr.bf16.vlgmr.msra.gmra.mrb[128].mxu1 %v5634_v41  ;;  %v4784_v41 = vld [vmem:[#allocation10 + $0x98] sm:$0xff]  }
 0x37d   : > { %2772 = vmatprep.mubr.bf16.mxu1 %v5646_v15  ;;  %4186 = vmatpush3.bf16.msra.mxu1 %v4778_v21  ;;  %v4786_v15 = vld [vmem:[#allocation10 + $0xa0] sm:$0xff]  }
 0x37e   : > { %4187 = vmatprep.subr.bf16.mxu1 %v4779_v62 }
 0x381   : > { %4188 = vmatpush3.bf16.msra.mxu1 %v4780_v27 }
 0x382   : > { %4189 = vmatprep.subr.bf16.mxu1 %v4781_v8 }
 0x384   : > { %2773 = vmatmul.mubr.bf16.gmra.mrb[132].mxu1 %v5644_v12  ;;  %v4785_v12 = vld [vmem:[#allocation10 + $0xe0] sm:$0xff]  }
 0x385   : > { %2782 = vmatprep.mubr.bf16.mxu1 %v5656_v45  ;;  %4190 = vmatpush3.bf16.msra.mxu1 %v4782_v9  ;;  %v4788_v45 = vld [vmem:[#allocation10 + $0xa8] sm:$0xff]  }
 0x386   : > { %4191 = vmatprep.subr.bf16.mxu1 %v4783_v51 }
 0x389   : > { %4192 = vmatpush3.bf16.msra.mxu1 %v4784_v41 }
 0x38a   : > { %4193 = vmatprep.subr.bf16.mxu1 %v4785_v12 }
 0x38c   : > { %2783 = vmatmul.mubr.bf16.gmra.mrb[136].mxu1 %v5654_v29  ;;  %v4787_v29 = vld [vmem:[#allocation10 + $0xe8] sm:$0xff]  }
 0x38d   : > { %2792 = vmatprep.mubr.bf16.mxu1 %v5666_v47  ;;  %4194 = vmatpush3.bf16.msra.mxu1 %v4786_v15  ;;  %v4790_v47 = vld [vmem:[#allocation10 + $0xb0] sm:$0xff]  }
 0x38e   : > { %4195 = vmatprep.subr.bf16.mxu1 %v4787_v29 }
 0x391   : > { %4196 = vmatpush3.bf16.msra.mxu1 %v4788_v45 }
 0x394   : > { %2793 = vmatmul.mubr.bf16.gmra.mrb[140].mxu1 %v5664_v1  ;;  %v4789_v1 = vld [vmem:[#allocation10 + $0xf0] sm:$0xff]  }
 0x395   : > { %2802 = vmatprep.mubr.bf16.mxu1 %v5676_v17  ;;  %4197 = vmatprep.subr.bf16.mxu1 %v4789_v1 }
 0x396   : > { %4198 = vmatpush3.bf16.msra.mxu1 %v4790_v47 }
 0x39c   : > { %2803 = vmatmul.mubr.bf16.gmra.mrb[144].mxu1 %v5674_v14  ;;  %v5814_v14 = vld [vmem:[%s6198_s6] sm:$0xf] }
 0x39d   : > { %2812 = vmatprep.mubr.bf16.mxu1 %v5686_v49  ;;  %v5819_v17 = vrot.slane %v5814_v14, %v5379_v53  ;;  %v4791_v49 = vld [vmem:[#allocation10 + $0xf8] sm:$0xff]  }
 0x39e   : > { %4199 = vmatprep.subr.bf16.mxu1 %v4791_v49 }
 0x3a4   : > { %2813 = vmatmul.mubr.bf16.gmra.mrb[148].mxu1 %v5684_v23  ;;  %v5824_v23 = vrot.slane %v5814_v14, %v5385_v55 }
 0x3a5   : > { %2822 = vmatprep.mubr.bf16.mxu1 %v5696_v0  ;;  %v4792_v0 = vld [vmem:[#allocation10 + $0xb8] sm:$0xff]  }
 0x3a6   : > { %4200 = vmatpush3.bf16.msra.mxu1 %v4792_v0 }
 0x3ac   : > { %2823 = vmatmul.mubr.bf16.gmra.mrb[152].mxu1 %v5694_v50 }
 0x3ad   : > { %2832 = vmatprep.mubr.bf16.mxu1 %v5706_v33 }
 0x3b4   : > { %2833 = vmatmul.mubr.bf16.gmra.mrb[156].mxu1 %v5704_v32 }
 0x3b5   : > { %2842 = vmatprep.mubr.bf16.mxu1 %v5716_v25 }
 0x3bc   : > { %2843 = vmatmul.mubr.bf16.gmra.mrb[160].mxu1 %v5714_v19 }
 0x3bd   : > { %2852 = vmatprep.mubr.bf16.mxu1 %v5726_v18 }
 0x3c4   : > { %2853 = vmatmul.mubr.bf16.gmra.mrb[164].mxu1 %v5724_v13 }
 0x3c5   : > { %2862 = vmatprep.mubr.bf16.mxu1 %v5736_v63 }
 0x3cc   : > { %2863 = vmatmul.mubr.bf16.gmra.mrb[168].mxu1 %v5734_v46 }
 0x3cd   : > { %2872 = vmatprep.mubr.bf16.mxu1 %v5746_v57 }
 0x3cf   : > { %v2571_v50 = vpop.f32.mrb[64].mxu1 }
 0x3d0   : > { %v2572_v32 = vadd.f32 %v2571_v50, %v5819_v17  ;;  %v2573_v33 = vpop.f32.mrb[65].mxu1 }
 0x3d1   : > { %v2574_v19 = vadd.f32 %v2573_v33, %v5824_v23  ;;  %v2575_v25 = vpop.f32.mrb[66].mxu1 }
 0x3d2   : > { %v2576_v53 = vadd.f32 %v2575_v25, %v5819_v17  ;;  %v2577_v13 = vpop.f32.mrb[67].mxu1  ;;  %v2923_v46 = vmax.f32 %v2572_v32, 0.0 }
 0x3d3   : > { %v2578_v18 = vadd.f32 %v2577_v13, %v5824_v23  ;;  %v2924_v55 = vmax.f32 %v2574_v19, 0.0 }
 0x3d4   : > { %v2927_v63 = vmax.f32 %v2576_v53, 0.0  ;;  %2873 = vmatmul.mubr.bf16.gmra.mrb[172].mxu1 %v5744_v7 }
 0x3d5   : > { %v2928_v57 = vmax.f32 %v2578_v18, 0.0  ;;  %2882 = vmatprep.mubr.bf16.mxu1 %v5756_v6 }
 0x3d6   : > { %v3051_v10 = vpack.c.bf16 %v2927_v63, %v2923_v46 }
 0x3d7   : > { %v3052_v54 = vpack.c.bf16 %v2928_v57, %v2924_v55  ;;  %v2581_v20 = vpop.f32.mrb[68].mxu1 }
 0x3d8   : > { %v2582_v22 = vadd.f32 %v2581_v20, %v5819_v17  ;;  %v2583_v30 = vpop.f32.mrb[69].mxu1 }
 0x3d9   : > { %v2584_v34 = vadd.f32 %v2583_v30, %v5824_v23  ;;  %v2585_v36 = vpop.f32.mrb[70].mxu1  ;;  %3409 = vmatprep.mubr.bf16.mxu0 %v3052_v54 }
 0x3da   : > { %v2586_v37 = vadd.f32 %v2585_v36, %v5819_v17  ;;  %v2587_v35 = vpop.f32.mrb[71].mxu1  ;;  %3410 = vmatmul.mubr.bf16.vlgmr.msra.gmra.mrb[128].mxu0 %v3051_v10  ;;  %v2931_v39 = vmax.f32 %v2582_v22, 0.0 }
 0x3db   : > { %v2588_v7 = vadd.f32 %v2587_v35, %v5824_v23  ;;  %v2932_v6 = vmax.f32 %v2584_v34, 0.0 }
 0x3dc   : > { %v2935_v43 = vmax.f32 %v2586_v37, 0.0  ;;  %2883 = vmatmul.mubr.bf16.gmra.mrb[176].mxu1 %v5754_v2 }
 0x3dd   : > { %v2936_v16 = vmax.f32 %v2588_v7, 0.0  ;;  %2892 = vmatprep.mubr.bf16.mxu1 %v5766_v56 }
 0x3de   : > { %v3055_v42 = vpack.c.bf16 %v2935_v43, %v2931_v39 }
 0x3df   : > { %v3056_v4 = vpack.c.bf16 %v2936_v16, %v2932_v6  ;;  %v2591_v40 = vpop.f32.mrb[72].mxu1 }
 0x3e0   : > { %v2592_v44 = vadd.f32 %v2591_v40, %v5819_v17  ;;  %v2593_v5 = vpop.f32.mrb[73].mxu1 }
 0x3e1   : > { %v2594_v11 = vadd.f32 %v2593_v5, %v5824_v23  ;;  %v2595_v58 = vpop.f32.mrb[74].mxu1  ;;  %3417 = vmatprep.mubr.bf16.mxu0 %v3056_v4 }
 0x3e2   : > { %v2596_v59 = vadd.f32 %v2595_v58, %v5819_v17  ;;  %v2597_v28 = vpop.f32.mrb[75].mxu1  ;;  %3418 = vmatmul.mubr.bf16.gmra.mrb[132].mxu0 %v3055_v42  ;;  %v2939_v31 = vmax.f32 %v2592_v44, 0.0 }
 0x3e3   : > { %v2598_v2 = vadd.f32 %v2597_v28, %v5824_v23  ;;  %v2940_v56 = vmax.f32 %v2594_v11, 0.0 }
 0x3e4   : > { %v2943_v21 = vmax.f32 %v2596_v59, 0.0  ;;  %2893 = vmatmul.mubr.bf16.gmra.mrb[180].mxu1 %v5764_v3 }
 0x3e5   : > { %v2944_v62 = vmax.f32 %v2598_v2, 0.0  ;;  %2902 = vmatprep.mubr.bf16.mxu1 %v5776_v48 }
 0x3e6   : > { %v3059_v27 = vpack.c.bf16 %v2943_v21, %v2939_v31 }
 0x3e7   : > { %v3060_v8 = vpack.c.bf16 %v2944_v62, %v2940_v56  ;;  %v2601_v9 = vpop.f32.mrb[76].mxu1 }
 0x3e8   : > { %v2602_v51 = vadd.f32 %v2601_v9, %v5819_v17  ;;  %v2603_v41 = vpop.f32.mrb[77].mxu1 }
 0x3e9   : > { %v2604_v12 = vadd.f32 %v2603_v41, %v5824_v23  ;;  %v2605_v15 = vpop.f32.mrb[78].mxu1  ;;  %3425 = vmatprep.mubr.bf16.mxu0 %v3060_v8 }
 0x3ea   : > { %v2606_v29 = vadd.f32 %v2605_v15, %v5819_v17  ;;  %v2607_v45 = vpop.f32.mrb[79].mxu1  ;;  %3426 = vmatmul.mubr.bf16.gmra.mrb[136].mxu0 %v3059_v27  ;;  %v2947_v1 = vmax.f32 %v2602_v51, 0.0 }
 0x3eb   : > { %v2608_v3 = vadd.f32 %v2607_v45, %v5824_v23  ;;  %v2948_v48 = vmax.f32 %v2604_v12, 0.0 }
 0x3ec   : > { %v2951_v47 = vmax.f32 %v2606_v29, 0.0  ;;  %2903 = vmatmul.mubr.bf16.gmra.mrb[184].mxu1 %v5774_v38 }
 0x3ed   : > { %v2952_v49 = vmax.f32 %v2608_v3, 0.0  ;;  %2912 = vmatprep.mubr.bf16.mxu1 %v5786_v61 }
 0x3ee   : > { %v3063_v50 = vpack.c.bf16 %v2951_v47, %v2947_v1 }
 0x3ef   : > { %v3064_v0 = vpack.c.bf16 %v2952_v49, %v2948_v48  ;;  %v2611_v32 = vpop.f32.mrb[80].mxu1 }
 0x3f0   : > { %v2612_v33 = vadd.f32 %v2611_v32, %v5819_v17  ;;  %v2613_v19 = vpop.f32.mrb[81].mxu1 }
 0x3f1   : > { %v2614_v25 = vadd.f32 %v2613_v19, %v5824_v23  ;;  %v2615_v53 = vpop.f32.mrb[82].mxu1  ;;  %3433 = vmatprep.mubr.bf16.mxu0 %v3064_v0 }
 0x3f2   : > { %v2616_v13 = vadd.f32 %v2615_v53, %v5819_v17  ;;  %v2617_v18 = vpop.f32.mrb[83].mxu1  ;;  %3434 = vmatmul.mubr.bf16.gmra.mrb[140].mxu0 %v3063_v50  ;;  %v2955_v46 = vmax.f32 %v2612_v33, 0.0 }
 0x3f3   : > { %v2618_v38 = vadd.f32 %v2617_v18, %v5824_v23  ;;  %v2956_v61 = vmax.f32 %v2614_v25, 0.0 }
 0x3f4   : > { %v2959_v63 = vmax.f32 %v2616_v13, 0.0  ;;  %2913 = vmatmul.mubr.bf16.gmra.mrb[188].mxu1 %v5784_v60 }
 0x3f5   : > { %v2960_v55 = vmax.f32 %v2618_v38, 0.0 }
 0x3f6   : > { %v3067_v57 = vpack.c.bf16 %v2959_v63, %v2955_v46 }
 0x3f7   : > { %v3068_v10 = vpack.c.bf16 %v2960_v55, %v2956_v61  ;;  %v2621_v54 = vpop.f32.mrb[84].mxu1 }
 0x3f8   : > { %v2622_v20 = vadd.f32 %v2621_v54, %v5819_v17  ;;  %v2623_v22 = vpop.f32.mrb[85].mxu1 }
 0x3f9   : > { %v2624_v30 = vadd.f32 %v2623_v22, %v5824_v23  ;;  %v2625_v34 = vpop.f32.mrb[86].mxu1  ;;  %3441 = vmatprep.mubr.bf16.mxu0 %v3068_v10 }
 0x3fa   : > { %v2626_v36 = vadd.f32 %v2625_v34, %v5819_v17  ;;  %v2627_v37 = vpop.f32.mrb[87].mxu1  ;;  %3442 = vmatmul.mubr.bf16.gmra.mrb[144].mxu0 %v3067_v57  ;;  %v2963_v7 = vmax.f32 %v2622_v20, 0.0 }
 0x3fb   : > { %v2628_v35 = vadd.f32 %v2627_v37, %v5824_v23  ;;  %v2964_v39 = vmax.f32 %v2624_v30, 0.0 }
 0x3fc   : > { %v2967_v60 = vmax.f32 %v2626_v36, 0.0 }
 0x3fd   : > { %v2968_v43 = vmax.f32 %v2628_v35, 0.0 }
 0x3fe   : > { %v3071_v6 = vpack.c.bf16 %v2967_v60, %v2963_v7 }
 0x3ff   : > { %v3072_v16 = vpack.c.bf16 %v2968_v43, %v2964_v39  ;;  %v2631_v42 = vpop.f32.mrb[88].mxu1 }
 0x400   : > { %v2632_v4 = vadd.f32 %v2631_v42, %v5819_v17  ;;  %v2633_v40 = vpop.f32.mrb[89].mxu1 }
 0x401   : > { %v2634_v44 = vadd.f32 %v2633_v40, %v5824_v23  ;;  %v2635_v5 = vpop.f32.mrb[90].mxu1  ;;  %3449 = vmatprep.mubr.bf16.mxu0 %v3072_v16 }
 0x402   : > { %v2636_v11 = vadd.f32 %v2635_v5, %v5819_v17  ;;  %v2637_v58 = vpop.f32.mrb[91].mxu1  ;;  %3450 = vmatmul.mubr.bf16.gmra.mrb[148].mxu0 %v3071_v6  ;;  %v2971_v28 = vmax.f32 %v2632_v4, 0.0 }
 0x403   : > { %v2638_v59 = vadd.f32 %v2637_v58, %v5824_v23  ;;  %v2972_v31 = vmax.f32 %v2634_v44, 0.0 }
 0x404   : > { %v2975_v2 = vmax.f32 %v2636_v11, 0.0 }
 0x405   : > { %v2976_v21 = vmax.f32 %v2638_v59, 0.0 }
 0x406   : > { %v3075_v56 = vpack.c.bf16 %v2975_v2, %v2971_v28 }
 0x407   : > { %v3076_v62 = vpack.c.bf16 %v2976_v21, %v2972_v31  ;;  %v2641_v27 = vpop.f32.mrb[92].mxu1 }
 0x408   : > { %v2642_v8 = vadd.f32 %v2641_v27, %v5819_v17  ;;  %v2643_v9 = vpop.f32.mrb[93].mxu1 }
 0x409   : > { %v2644_v51 = vadd.f32 %v2643_v9, %v5824_v23  ;;  %v2645_v41 = vpop.f32.mrb[94].mxu1  ;;  %3457 = vmatprep.mubr.bf16.mxu0 %v3076_v62 }
 0x40a   : > { %v2646_v12 = vadd.f32 %v2645_v41, %v5819_v17  ;;  %v2647_v15 = vpop.f32.mrb[95].mxu1  ;;  %3458 = vmatmul.mubr.bf16.gmra.mrb[152].mxu0 %v3075_v56  ;;  %v2979_v45 = vmax.f32 %v2642_v8, 0.0 }
 0x40b   : > { %v2648_v29 = vadd.f32 %v2647_v15, %v5824_v23  ;;  %v2980_v1 = vmax.f32 %v2644_v51, 0.0 }
 0x40c   : > { %v2983_v3 = vmax.f32 %v2646_v12, 0.0 }
 0x40d   : > { %v2984_v47 = vmax.f32 %v2648_v29, 0.0 }
 0x40e   : > { %v3079_v48 = vpack.c.bf16 %v2983_v3, %v2979_v45 }
 0x40f   : > { %v3080_v49 = vpack.c.bf16 %v2984_v47, %v2980_v1  ;;  %v2651_v50 = vpop.f32.mrb[96].mxu1 }
 0x410   : > { %v2652_v0 = vadd.f32 %v2651_v50, %v5819_v17  ;;  %v2653_v32 = vpop.f32.mrb[97].mxu1 }
 0x411   : > { %v2654_v33 = vadd.f32 %v2653_v32, %v5824_v23  ;;  %v2655_v19 = vpop.f32.mrb[98].mxu1  ;;  %3465 = vmatprep.mubr.bf16.mxu0 %v3080_v49 }
 0x412   : > { %v2656_v25 = vadd.f32 %v2655_v19, %v5819_v17  ;;  %v2657_v53 = vpop.f32.mrb[99].mxu1  ;;  %3466 = vmatmul.mubr.bf16.gmra.mrb[156].mxu0 %v3079_v48  ;;  %v2987_v18 = vmax.f32 %v2652_v0, 0.0 }
 0x413   : > { %v2658_v13 = vadd.f32 %v2657_v53, %v5824_v23  ;;  %v2988_v46 = vmax.f32 %v2654_v33, 0.0 }
 0x414   : > { %v2991_v38 = vmax.f32 %v2656_v25, 0.0 }
 0x415   : > { %v2992_v63 = vmax.f32 %v2658_v13, 0.0 }
 0x416   : > { %v3083_v61 = vpack.c.bf16 %v2991_v38, %v2987_v18 }
 0x417   : > { %v3084_v55 = vpack.c.bf16 %v2992_v63, %v2988_v46  ;;  %v2661_v57 = vpop.f32.mrb[100].mxu1 }
 0x418   : > { %v2662_v10 = vadd.f32 %v2661_v57, %v5819_v17  ;;  %v2663_v54 = vpop.f32.mrb[101].mxu1 }
 0x419   : > { %v2664_v20 = vadd.f32 %v2663_v54, %v5824_v23  ;;  %v2665_v22 = vpop.f32.mrb[102].mxu1  ;;  %3473 = vmatprep.mubr.bf16.mxu0 %v3084_v55 }
 0x41a   : > { %v2666_v30 = vadd.f32 %v2665_v22, %v5819_v17  ;;  %v2667_v34 = vpop.f32.mrb[103].mxu1  ;;  %3474 = vmatmul.mubr.bf16.gmra.mrb[160].mxu0 %v3083_v61  ;;  %v2995_v37 = vmax.f32 %v2662_v10, 0.0 }
 0x41b   : > { %v2668_v36 = vadd.f32 %v2667_v34, %v5824_v23  ;;  %v2996_v7 = vmax.f32 %v2664_v20, 0.0 }
 0x41c   : > { %v2999_v35 = vmax.f32 %v2666_v30, 0.0 }
 0x41d   : > { %v3000_v60 = vmax.f32 %v2668_v36, 0.0 }
 0x41e   : > { %v3087_v39 = vpack.c.bf16 %v2999_v35, %v2995_v37 }
 0x41f   : > { %v3088_v43 = vpack.c.bf16 %v3000_v60, %v2996_v7  ;;  %v2671_v6 = vpop.f32.mrb[104].mxu1 }
 0x420   : > { %v2672_v16 = vadd.f32 %v2671_v6, %v5819_v17  ;;  %v2673_v42 = vpop.f32.mrb[105].mxu1 }
 0x421   : > { %v2674_v4 = vadd.f32 %v2673_v42, %v5824_v23  ;;  %v2675_v40 = vpop.f32.mrb[106].mxu1  ;;  %3481 = vmatprep.mubr.bf16.mxu0 %v3088_v43 }
 0x422   : > { %v2676_v44 = vadd.f32 %v2675_v40, %v5819_v17  ;;  %v2677_v5 = vpop.f32.mrb[107].mxu1  ;;  %3482 = vmatmul.mubr.bf16.gmra.mrb[164].mxu0 %v3087_v39  ;;  %v3003_v58 = vmax.f32 %v2672_v16, 0.0 }
 0x423   : > { %v2678_v11 = vadd.f32 %v2677_v5, %v5824_v23  ;;  %v3004_v28 = vmax.f32 %v2674_v4, 0.0 }
 0x424   : > { %v3007_v59 = vmax.f32 %v2676_v44, 0.0 }
 0x425   : > { %v3008_v2 = vmax.f32 %v2678_v11, 0.0 }
 0x426   : > { %v3091_v31 = vpack.c.bf16 %v3007_v59, %v3003_v58 }
 0x427   : > { %v3092_v21 = vpack.c.bf16 %v3008_v2, %v3004_v28  ;;  %v2681_v56 = vpop.f32.mrb[108].mxu1 }
 0x428   : > { %v2682_v62 = vadd.f32 %v2681_v56, %v5819_v17  ;;  %v2683_v27 = vpop.f32.mrb[109].mxu1 }
 0x429   : > { %v2684_v8 = vadd.f32 %v2683_v27, %v5824_v23  ;;  %v2685_v9 = vpop.f32.mrb[110].mxu1  ;;  %3489 = vmatprep.mubr.bf16.mxu0 %v3092_v21 }
 0x42a   : > { %v2686_v51 = vadd.f32 %v2685_v9, %v5819_v17  ;;  %v2687_v41 = vpop.f32.mrb[111].mxu1  ;;  %3490 = vmatmul.mubr.bf16.gmra.mrb[168].mxu0 %v3091_v31  ;;  %v3011_v15 = vmax.f32 %v2682_v62, 0.0 }
 0x42b   : > { %v2688_v12 = vadd.f32 %v2687_v41, %v5824_v23  ;;  %v3012_v45 = vmax.f32 %v2684_v8, 0.0 }
 0x42c   : > { %v3015_v29 = vmax.f32 %v2686_v51, 0.0 }
 0x42d   : > { %v3016_v3 = vmax.f32 %v2688_v12, 0.0 }
 0x42e   : > { %v3095_v1 = vpack.c.bf16 %v3015_v29, %v3011_v15  ;;  %v5902_v15 = vrot.slane %v5814_v14, %v507_v24 }
 0x42f   : > { %v3096_v47 = vpack.c.bf16 %v3016_v3, %v3012_v45  ;;  %v2691_v48 = vpop.f32.mrb[112].mxu1  ;;  %v5907_v3 = vrot.slane %v5814_v14, %v511_v26 }
 0x430   : > { %v2692_v49 = vadd.f32 %v2691_v48, %v5819_v17  ;;  %v2693_v50 = vpop.f32.mrb[113].mxu1 }
 0x431   : > { %v2694_v0 = vadd.f32 %v2693_v50, %v5824_v23  ;;  %v2695_v32 = vpop.f32.mrb[114].mxu1  ;;  %3497 = vmatprep.mubr.bf16.mxu0 %v3096_v47 }
 0x432   : > { %v2696_v33 = vadd.f32 %v2695_v32, %v5819_v17  ;;  %v2697_v19 = vpop.f32.mrb[115].mxu1  ;;  %3498 = vmatmul.mubr.bf16.gmra.mrb[172].mxu0 %v3095_v1  ;;  %v3019_v53 = vmax.f32 %v2692_v49, 0.0 }
 0x433   : > { %v2698_v25 = vadd.f32 %v2697_v19, %v5824_v23  ;;  %v3020_v18 = vmax.f32 %v2694_v0, 0.0 }
 0x434   : > { %v3023_v13 = vmax.f32 %v2696_v33, 0.0 }
 0x435   : > { %v3024_v38 = vmax.f32 %v2698_v25, 0.0 }
 0x436   : > { %v3099_v46 = vpack.c.bf16 %v3023_v13, %v3019_v53 }
 0x437   : > { %v3100_v63 = vpack.c.bf16 %v3024_v38, %v3020_v18  ;;  %v2701_v61 = vpop.f32.mrb[116].mxu1 }
 0x438   : > { %v2702_v55 = vadd.f32 %v2701_v61, %v5819_v17  ;;  %v2703_v57 = vpop.f32.mrb[117].mxu1 }
 0x439   : > { %v2704_v10 = vadd.f32 %v2703_v57, %v5824_v23  ;;  %v2705_v54 = vpop.f32.mrb[118].mxu1  ;;  %3505 = vmatprep.mubr.bf16.mxu0 %v3100_v63 }
 0x43a   : > { %v2706_v20 = vadd.f32 %v2705_v54, %v5819_v17  ;;  %v2707_v22 = vpop.f32.mrb[119].mxu1  ;;  %3506 = vmatmul.mubr.bf16.gmra.mrb[176].mxu0 %v3099_v46  ;;  %v3027_v34 = vmax.f32 %v2702_v55, 0.0 }
 0x43b   : > { %v2708_v30 = vadd.f32 %v2707_v22, %v5824_v23  ;;  %v3028_v37 = vmax.f32 %v2704_v10, 0.0 }
 0x43c   : > { %v3031_v36 = vmax.f32 %v2706_v20, 0.0 }
 0x43d   : > { %v3032_v35 = vmax.f32 %v2708_v30, 0.0 }
 0x43e   : > { %v3103_v7 = vpack.c.bf16 %v3031_v36, %v3027_v34 }
 0x43f   : > { %v3104_v60 = vpack.c.bf16 %v3032_v35, %v3028_v37  ;;  %v2711_v39 = vpop.f32.mrb[120].mxu1 }
 0x440   : > { %v2712_v43 = vadd.f32 %v2711_v39, %v5819_v17  ;;  %v2713_v6 = vpop.f32.mrb[121].mxu1 }
 0x441   : > { %v2714_v16 = vadd.f32 %v2713_v6, %v5824_v23  ;;  %v2715_v42 = vpop.f32.mrb[122].mxu1  ;;  %3513 = vmatprep.mubr.bf16.mxu0 %v3104_v60 }
 0x442   : > { %v2716_v4 = vadd.f32 %v2715_v42, %v5819_v17  ;;  %v2717_v40 = vpop.f32.mrb[123].mxu1  ;;  %3514 = vmatmul.mubr.bf16.gmra.mrb[180].mxu0 %v3103_v7  ;;  %v3035_v5 = vmax.f32 %v2712_v43, 0.0 }
 0x443   : > { %v2718_v44 = vadd.f32 %v2717_v40, %v5824_v23  ;;  %v3036_v58 = vmax.f32 %v2714_v16, 0.0 }
 0x444   : > { %v3039_v11 = vmax.f32 %v2716_v4, 0.0 }
 0x445   : > { %v3040_v59 = vmax.f32 %v2718_v44, 0.0 }
 0x446   : > { %v3107_v28 = vpack.c.bf16 %v3039_v11, %v3035_v5 }
 0x447   : > { %v3108_v2 = vpack.c.bf16 %v3040_v59, %v3036_v58  ;;  %v2721_v31 = vpop.f32.mrb[124].mxu1 }
 0x448   : > { %v2722_v21 = vadd.f32 %v2721_v31, %v5819_v17  ;;  %v2723_v56 = vpop.f32.mrb[125].mxu1 }
 0x449   : > { %v2724_v62 = vadd.f32 %v2723_v56, %v5824_v23  ;;  %v2725_v27 = vpop.f32.mrb[126].mxu1  ;;  %3521 = vmatprep.mubr.bf16.mxu0 %v3108_v2 }
 0x44a   : > { %v2726_v8 = vadd.f32 %v2725_v27, %v5819_v17  ;;  %v2727_v9 = vpop.f32.mrb[127].mxu1  ;;  %3522 = vmatmul.mubr.bf16.gmra.mrb[184].mxu0 %v3107_v28  ;;  %v3043_v41 = vmax.f32 %v2722_v21, 0.0 }
 0x44b   : > { %v2728_v51 = vadd.f32 %v2727_v9, %v5824_v23  ;;  %v3044_v29 = vmax.f32 %v2724_v62, 0.0 }
 0x44c   : > { %v3047_v12 = vmax.f32 %v2726_v8, 0.0 }
 0x44d   : > { %v3048_v45 = vmax.f32 %v2728_v51, 0.0 }
 0x44e   : > { %v3111_v1 = vpack.c.bf16 %v3047_v12, %v3043_v41 }
 0x44f   : > { %v3112_v17 = vpack.c.bf16 %v3048_v45, %v3044_v29  ;;  %v2764_v47 = vpop.f32.mrb[128].mxu1 }
 0x450   : > { %v2765_v48 = vadd.f32 %v2764_v47, %v5902_v15  ;;  %v2766_v23 = vpop.f32.mrb[129].mxu1 }
 0x451   : > { %v2767_v49 = vadd.f32 %v2766_v23, %v5907_v3  ;;  %v2768_v50 = vpop.f32.mrb[130].mxu1  ;;  %3529 = vmatprep.mubr.bf16.mxu0 %v3112_v17 }
 0x452   : > { %v2769_v24 = vadd.f32 %v2768_v50, %v5902_v15  ;;  %v2770_v0 = vpop.f32.mrb[131].mxu1  ;;  %3530 = vmatmul.mubr.bf16.gmra.mrb[188].mxu0 %v3111_v1  ;;  %v2925_v52 = vmax.f32 %v2765_v48, 0.0 }
 0x453   : > { %v2771_v32 = vadd.f32 %v2770_v0, %v5907_v3  ;;  %v2926_v26 = vmax.f32 %v2767_v49, 0.0 }
 0x454   : > { %v2929_v33 = vmax.f32 %v2769_v24, 0.0 }
 0x455   : > { %v2930_v14 = vmax.f32 %v2771_v32, 0.0 }
 0x456   : > { %v3053_v19 = vpack.c.bf16 %v2929_v33, %v2925_v52 }
 0x457   : > { %v3054_v25 = vpack.c.bf16 %v2930_v14, %v2926_v26  ;;  %v2774_v53 = vpop.f32.mrb[132].mxu1 }
 0x458   : > { %v2775_v13 = vadd.f32 %v2774_v53, %v5902_v15  ;;  %v2776_v18 = vpop.f32.mrb[133].mxu1 }
 0x459   : > { %v2777_v38 = vadd.f32 %v2776_v18, %v5907_v3  ;;  %v2778_v46 = vpop.f32.mrb[134].mxu1  ;;  %3570 = vmatprep.mubr.bf16.mxu1 %v3054_v25 }
 0x45a   : > { %v2779_v63 = vadd.f32 %v2778_v46, %v5902_v15  ;;  %v2780_v61 = vpop.f32.mrb[135].mxu1  ;;  %3571 = vmatmul.mubr.bf16.vlgmr.msra.gmra.mrb[192].mxu1 %v3053_v19  ;;  %v2933_v57 = vmax.f32 %v2775_v13, 0.0 }
 0x45b   : > { %v2781_v55 = vadd.f32 %v2780_v61, %v5907_v3  ;;  %v2934_v54 = vmax.f32 %v2777_v38, 0.0 }
 0x45c   : > { %v2937_v10 = vmax.f32 %v2779_v63, 0.0 }
 0x45d   : > { %v2938_v20 = vmax.f32 %v2781_v55, 0.0 }
 0x45e   : > { %v3057_v22 = vpack.c.bf16 %v2937_v10, %v2933_v57 }
 0x45f   : > { %v3058_v30 = vpack.c.bf16 %v2938_v20, %v2934_v54  ;;  %v2784_v34 = vpop.f32.mrb[136].mxu1 }
 0x460   : > { %v2785_v36 = vadd.f32 %v2784_v34, %v5902_v15  ;;  %v2786_v37 = vpop.f32.mrb[137].mxu1 }
 0x461   : > { %v2787_v35 = vadd.f32 %v2786_v37, %v5907_v3  ;;  %v2788_v7 = vpop.f32.mrb[138].mxu1  ;;  %3578 = vmatprep.mubr.bf16.mxu1 %v3058_v30 }
 0x462   : > { %v2789_v60 = vadd.f32 %v2788_v7, %v5902_v15  ;;  %v2790_v39 = vpop.f32.mrb[139].mxu1  ;;  %3579 = vmatmul.mubr.bf16.gmra.mrb[196].mxu1 %v3057_v22  ;;  %v2941_v6 = vmax.f32 %v2785_v36, 0.0 }
 0x463   : > { %v2791_v43 = vadd.f32 %v2790_v39, %v5907_v3  ;;  %v2942_v42 = vmax.f32 %v2787_v35, 0.0 }
 0x464   : > { %v2945_v16 = vmax.f32 %v2789_v60, 0.0 }
 0x465   : > { %v2946_v4 = vmax.f32 %v2791_v43, 0.0 }
 0x466   : > { %v3061_v40 = vpack.c.bf16 %v2945_v16, %v2941_v6 }
 0x467   : > { %v3062_v44 = vpack.c.bf16 %v2946_v4, %v2942_v42  ;;  %v2794_v5 = vpop.f32.mrb[140].mxu1 }
 0x468   : > { %v2795_v11 = vadd.f32 %v2794_v5, %v5902_v15  ;;  %v2796_v58 = vpop.f32.mrb[141].mxu1 }
 0x469   : > { %v2797_v59 = vadd.f32 %v2796_v58, %v5907_v3  ;;  %v2798_v28 = vpop.f32.mrb[142].mxu1  ;;  %3586 = vmatprep.mubr.bf16.mxu1 %v3062_v44 }
 0x46a   : > { %v2799_v2 = vadd.f32 %v2798_v28, %v5902_v15  ;;  %v2800_v31 = vpop.f32.mrb[143].mxu1  ;;  %3587 = vmatmul.mubr.bf16.gmra.mrb[200].mxu1 %v3061_v40  ;;  %v2949_v56 = vmax.f32 %v2795_v11, 0.0 }
 0x46b   : > { %v2801_v21 = vadd.f32 %v2800_v31, %v5907_v3  ;;  %v2950_v27 = vmax.f32 %v2797_v59, 0.0 }
 0x46c   : > { %v2953_v62 = vmax.f32 %v2799_v2, 0.0 }
 0x46d   : > { %v2954_v8 = vmax.f32 %v2801_v21, 0.0 }
 0x46e   : > { %v3065_v9 = vpack.c.bf16 %v2953_v62, %v2949_v56 }
 0x46f   : > { %v3066_v51 = vpack.c.bf16 %v2954_v8, %v2950_v27  ;;  %v2804_v41 = vpop.f32.mrb[144].mxu1 }
 0x470   : > { %v2805_v12 = vadd.f32 %v2804_v41, %v5902_v15  ;;  %v2806_v29 = vpop.f32.mrb[145].mxu1 }
 0x471   : > { %v2807_v45 = vadd.f32 %v2806_v29, %v5907_v3  ;;  %v2808_v1 = vpop.f32.mrb[146].mxu1  ;;  %3594 = vmatprep.mubr.bf16.mxu1 %v3066_v51 }
 0x472   : > { %v2809_v17 = vadd.f32 %v2808_v1, %v5902_v15  ;;  %v2810_v47 = vpop.f32.mrb[147].mxu1  ;;  %3595 = vmatmul.mubr.bf16.gmra.mrb[204].mxu1 %v3065_v9  ;;  %v2957_v23 = vmax.f32 %v2805_v12, 0.0 }
 0x473   : > { %v2811_v48 = vadd.f32 %v2810_v47, %v5907_v3  ;;  %v2958_v50 = vmax.f32 %v2807_v45, 0.0 }
 0x474   : > { %v2961_v49 = vmax.f32 %v2809_v17, 0.0 }
 0x475   : > { %v2962_v24 = vmax.f32 %v2811_v48, 0.0 }
 0x476   : > { %v3069_v0 = vpack.c.bf16 %v2961_v49, %v2957_v23 }
 0x477   : > { %v3070_v32 = vpack.c.bf16 %v2962_v24, %v2958_v50  ;;  %v2814_v52 = vpop.f32.mrb[148].mxu1 }
 0x478   : > { %v2815_v33 = vadd.f32 %v2814_v52, %v5902_v15  ;;  %v2816_v26 = vpop.f32.mrb[149].mxu1 }
 0x479   : > { %v2817_v14 = vadd.f32 %v2816_v26, %v5907_v3  ;;  %v2818_v19 = vpop.f32.mrb[150].mxu1  ;;  %3602 = vmatprep.mubr.bf16.mxu1 %v3070_v32 }
 0x47a   : > { %v2819_v25 = vadd.f32 %v2818_v19, %v5902_v15  ;;  %v2820_v53 = vpop.f32.mrb[151].mxu1  ;;  %3603 = vmatmul.mubr.bf16.gmra.mrb[208].mxu1 %v3069_v0  ;;  %v2965_v18 = vmax.f32 %v2815_v33, 0.0 }
 0x47b   : > { %v2821_v13 = vadd.f32 %v2820_v53, %v5907_v3  ;;  %v2966_v46 = vmax.f32 %v2817_v14, 0.0 }
 0x47c   : > { %v2969_v38 = vmax.f32 %v2819_v25, 0.0 }
 0x47d   : > { %v2970_v63 = vmax.f32 %v2821_v13, 0.0 }
 0x47e   : > { %v3073_v61 = vpack.c.bf16 %v2969_v38, %v2965_v18 }
 0x47f   : > { %v3074_v55 = vpack.c.bf16 %v2970_v63, %v2966_v46  ;;  %v2824_v57 = vpop.f32.mrb[152].mxu1 }
 0x480   : > { %v2825_v10 = vadd.f32 %v2824_v57, %v5902_v15  ;;  %v2826_v54 = vpop.f32.mrb[153].mxu1 }
 0x481   : > { %v2827_v20 = vadd.f32 %v2826_v54, %v5907_v3  ;;  %v2828_v22 = vpop.f32.mrb[154].mxu1  ;;  %3610 = vmatprep.mubr.bf16.mxu1 %v3074_v55 }
 0x482   : > { %v2829_v30 = vadd.f32 %v2828_v22, %v5902_v15  ;;  %v2830_v34 = vpop.f32.mrb[155].mxu1  ;;  %3611 = vmatmul.mubr.bf16.gmra.mrb[212].mxu1 %v3073_v61  ;;  %v2973_v37 = vmax.f32 %v2825_v10, 0.0 }
 0x483   : > { %v2831_v36 = vadd.f32 %v2830_v34, %v5907_v3  ;;  %v2974_v7 = vmax.f32 %v2827_v20, 0.0 }
 0x484   : > { %v2977_v35 = vmax.f32 %v2829_v30, 0.0 }
 0x485   : > { %v2978_v60 = vmax.f32 %v2831_v36, 0.0 }
 0x486   : > { %v3077_v39 = vpack.c.bf16 %v2977_v35, %v2973_v37 }
 0x487   : > { %v3078_v43 = vpack.c.bf16 %v2978_v60, %v2974_v7  ;;  %v2834_v6 = vpop.f32.mrb[156].mxu1 }
 0x488   : > { %v2835_v16 = vadd.f32 %v2834_v6, %v5902_v15  ;;  %v2836_v42 = vpop.f32.mrb[157].mxu1 }
 0x489   : > { %v2837_v4 = vadd.f32 %v2836_v42, %v5907_v3  ;;  %v2838_v40 = vpop.f32.mrb[158].mxu1  ;;  %3618 = vmatprep.mubr.bf16.mxu1 %v3078_v43 }
 0x48a   : > { %v2839_v44 = vadd.f32 %v2838_v40, %v5902_v15  ;;  %v2840_v5 = vpop.f32.mrb[159].mxu1  ;;  %3619 = vmatmul.mubr.bf16.gmra.mrb[216].mxu1 %v3077_v39  ;;  %v2981_v58 = vmax.f32 %v2835_v16, 0.0 }
 0x48b   : > { %v2841_v11 = vadd.f32 %v2840_v5, %v5907_v3  ;;  %v2982_v28 = vmax.f32 %v2837_v4, 0.0 }
 0x48c   : > { %v2985_v59 = vmax.f32 %v2839_v44, 0.0 }
 0x48d   : > { %v2986_v2 = vmax.f32 %v2841_v11, 0.0 }
 0x48e   : > { %v3081_v31 = vpack.c.bf16 %v2985_v59, %v2981_v58 }
 0x48f   : > { %v3082_v21 = vpack.c.bf16 %v2986_v2, %v2982_v28  ;;  %v2844_v56 = vpop.f32.mrb[160].mxu1 }
 0x490   : > { %v2845_v62 = vadd.f32 %v2844_v56, %v5902_v15  ;;  %v2846_v27 = vpop.f32.mrb[161].mxu1 }
 0x491   : > { %v2847_v8 = vadd.f32 %v2846_v27, %v5907_v3  ;;  %v2848_v9 = vpop.f32.mrb[162].mxu1  ;;  %3626 = vmatprep.mubr.bf16.mxu1 %v3082_v21 }
 0x492   : > { %v2849_v51 = vadd.f32 %v2848_v9, %v5902_v15  ;;  %v2850_v41 = vpop.f32.mrb[163].mxu1  ;;  %3627 = vmatmul.mubr.bf16.gmra.mrb[220].mxu1 %v3081_v31  ;;  %v2989_v29 = vmax.f32 %v2845_v62, 0.0 }
 0x493   : > { %v2851_v12 = vadd.f32 %v2850_v41, %v5907_v3  ;;  %v2990_v1 = vmax.f32 %v2847_v8, 0.0 }
 0x494   : > { %v2993_v45 = vmax.f32 %v2849_v51, 0.0 }
 0x495   : > { %v2994_v17 = vmax.f32 %v2851_v12, 0.0 }
 0x496   : > { %v3085_v47 = vpack.c.bf16 %v2993_v45, %v2989_v29 }
 0x497   : > { %v3086_v48 = vpack.c.bf16 %v2994_v17, %v2990_v1  ;;  %v2854_v23 = vpop.f32.mrb[164].mxu1 }
 0x498   : > { %v2855_v49 = vadd.f32 %v2854_v23, %v5902_v15  ;;  %v2856_v50 = vpop.f32.mrb[165].mxu1 }
 0x499   : > { %v2857_v24 = vadd.f32 %v2856_v50, %v5907_v3  ;;  %v2858_v0 = vpop.f32.mrb[166].mxu1  ;;  %3634 = vmatprep.mubr.bf16.mxu1 %v3086_v48 }
 0x49a   : > { %v2859_v32 = vadd.f32 %v2858_v0, %v5902_v15  ;;  %v2860_v52 = vpop.f32.mrb[167].mxu1  ;;  %3635 = vmatmul.mubr.bf16.gmra.mrb[224].mxu1 %v3085_v47  ;;  %v2997_v26 = vmax.f32 %v2855_v49, 0.0 }
 0x49b   : > { %v2861_v33 = vadd.f32 %v2860_v52, %v5907_v3  ;;  %v2998_v19 = vmax.f32 %v2857_v24, 0.0 }
 0x49c   : > { %v3001_v14 = vmax.f32 %v2859_v32, 0.0 }
 0x49d   : > { %v3002_v25 = vmax.f32 %v2861_v33, 0.0 }
 0x49e   : > { %v3089_v53 = vpack.c.bf16 %v3001_v14, %v2997_v26 }
 0x49f   : > { %v3090_v13 = vpack.c.bf16 %v3002_v25, %v2998_v19  ;;  %v2864_v18 = vpop.f32.mrb[168].mxu1 }
 0x4a0   : > { %v2865_v38 = vadd.f32 %v2864_v18, %v5902_v15  ;;  %v2866_v46 = vpop.f32.mrb[169].mxu1 }
 0x4a1   : > { %v2867_v63 = vadd.f32 %v2866_v46, %v5907_v3  ;;  %v2868_v61 = vpop.f32.mrb[170].mxu1  ;;  %3642 = vmatprep.mubr.bf16.mxu1 %v3090_v13 }
 0x4a2   : > { %v2869_v55 = vadd.f32 %v2868_v61, %v5902_v15  ;;  %v2870_v57 = vpop.f32.mrb[171].mxu1  ;;  %3643 = vmatmul.mubr.bf16.gmra.mrb[228].mxu1 %v3089_v53  ;;  %v3005_v54 = vmax.f32 %v2865_v38, 0.0 }
 0x4a3   : > { %v2871_v10 = vadd.f32 %v2870_v57, %v5907_v3  ;;  %v3006_v22 = vmax.f32 %v2867_v63, 0.0 }
 0x4a4   : > { %v3009_v20 = vmax.f32 %v2869_v55, 0.0 }
 0x4a5   : > { %v3010_v30 = vmax.f32 %v2871_v10, 0.0 }
 0x4a6   : > { %v3093_v34 = vpack.c.bf16 %v3009_v20, %v3005_v54 }
 0x4a7   : > { %v3094_v36 = vpack.c.bf16 %v3010_v30, %v3006_v22  ;;  %v2874_v37 = vpop.f32.mrb[172].mxu1 }
 0x4a8   : > { %v2875_v35 = vadd.f32 %v2874_v37, %v5902_v15  ;;  %v2876_v7 = vpop.f32.mrb[173].mxu1 }
 0x4a9   : > { %v2877_v60 = vadd.f32 %v2876_v7, %v5907_v3  ;;  %v2878_v39 = vpop.f32.mrb[174].mxu1  ;;  %3650 = vmatprep.mubr.bf16.mxu1 %v3094_v36 }
 0x4aa   : > { %v2879_v43 = vadd.f32 %v2878_v39, %v5902_v15  ;;  %v2880_v6 = vpop.f32.mrb[175].mxu1  ;;  %3651 = vmatmul.mubr.bf16.gmra.mrb[232].mxu1 %v3093_v34  ;;  %v3013_v42 = vmax.f32 %v2875_v35, 0.0 }
 0x4ab   : > { %v2881_v16 = vadd.f32 %v2880_v6, %v5907_v3  ;;  %v3014_v40 = vmax.f32 %v2877_v60, 0.0 }
 0x4ac   : > { %v3017_v4 = vmax.f32 %v2879_v43, 0.0 }
 0x4ad   : > { %v3018_v44 = vmax.f32 %v2881_v16, 0.0  ;;  %v4089_v5 = vpop.f32.mrb[128].mxu0 }
 0x4ae   : > { %v3097_v11 = vpack.c.bf16 %v3017_v4, %v3013_v42  ;;  %v4090_v58 = vpop.f32.mrb[129].mxu0 }
 0x4af   : > { %v3098_v59 = vpack.c.bf16 %v3018_v44, %v3014_v40  ;;  %v5957_v28 = vadd.f32 %v4090_v58, %v4089_v5  ;;  %v2884_v2 = vpop.f32.mrb[176].mxu1  ;;  %v4092_v31 = vpop.f32.mrb[130].mxu0 }
 0x4b0   : > { %v2885_v21 = vadd.f32 %v2884_v2, %v5902_v15  ;;  %v2886_v56 = vpop.f32.mrb[177].mxu1  ;;  %v4093_v62 = vpop.f32.mrb[131].mxu0 }
 0x4b1   : > { %v2887_v27 = vadd.f32 %v2886_v56, %v5907_v3  ;;  %v5961_v8 = vadd.f32 %v4093_v62, %v4092_v31  ;;  %v2888_v9 = vpop.f32.mrb[178].mxu1  ;;  %3658 = vmatprep.mubr.bf16.mxu1 %v3098_v59 }
 0x4b2   : > { %v2889_v51 = vadd.f32 %v2888_v9, %v5902_v15  ;;  %v2890_v41 = vpop.f32.mrb[179].mxu1  ;;  %3659 = vmatmul.mubr.bf16.gmra.mrb[236].mxu1 %v3097_v11  ;;  %v3021_v29 = vmax.f32 %v2885_v21, 0.0 }
 0x4b3   : > { %v2891_v12 = vadd.f32 %v2890_v41, %v5907_v3  ;;  %v3022_v1 = vmax.f32 %v2887_v27, 0.0 }
 0x4b4   : > { %v3025_v45 = vmax.f32 %v2889_v51, 0.0 }
 0x4b5   : > { %v3026_v17 = vmax.f32 %v2891_v12, 0.0  ;;  %v4095_v47 = vpop.f32.mrb[132].mxu0 }
 0x4b6   : > { %v3101_v48 = vpack.c.bf16 %v3025_v45, %v3021_v29  ;;  %v4096_v23 = vpop.f32.mrb[133].mxu0 }
 0x4b7   : > { %v3102_v49 = vpack.c.bf16 %v3026_v17, %v3022_v1  ;;  %v5965_v50 = vadd.f32 %v4096_v23, %v4095_v47  ;;  %v2894_v24 = vpop.f32.mrb[180].mxu1  ;;  %v4098_v0 = vpop.f32.mrb[134].mxu0 }
 0x4b8   : > { %v2895_v32 = vadd.f32 %v2894_v24, %v5902_v15  ;;  %v2896_v52 = vpop.f32.mrb[181].mxu1  ;;  %v4099_v33 = vpop.f32.mrb[135].mxu0 }
 0x4b9   : > { %v2897_v26 = vadd.f32 %v2896_v52, %v5907_v3  ;;  %v5969_v14 = vadd.f32 %v4099_v33, %v4098_v0  ;;  %v2898_v19 = vpop.f32.mrb[182].mxu1  ;;  %3666 = vmatprep.mubr.bf16.mxu1 %v3102_v49 }
 0x4ba   : > { %v2899_v25 = vadd.f32 %v2898_v19, %v5902_v15  ;;  %v2900_v53 = vpop.f32.mrb[183].mxu1  ;;  %3667 = vmatmul.mubr.bf16.gmra.mrb[240].mxu1 %v3101_v48  ;;  %v3029_v18 = vmax.f32 %v2895_v32, 0.0 }
 0x4bb   : > { %v2901_v13 = vadd.f32 %v2900_v53, %v5907_v3  ;;  %v3030_v46 = vmax.f32 %v2897_v26, 0.0 }
 0x4bc   : > { %v3033_v38 = vmax.f32 %v2899_v25, 0.0 }
 0x4bd   : > { %v3034_v63 = vmax.f32 %v2901_v13, 0.0  ;;  %v4101_v61 = vpop.f32.mrb[136].mxu0 }
 0x4be   : > { %v3105_v55 = vpack.c.bf16 %v3033_v38, %v3029_v18  ;;  %v4102_v57 = vpop.f32.mrb[137].mxu0 }
 0x4bf   : > { %v3106_v10 = vpack.c.bf16 %v3034_v63, %v3030_v46  ;;  %v5973_v54 = vadd.f32 %v4102_v57, %v4101_v61  ;;  %v2904_v20 = vpop.f32.mrb[184].mxu1  ;;  %v4104_v22 = vpop.f32.mrb[138].mxu0 }
 0x4c0   : > { %v2905_v30 = vadd.f32 %v2904_v20, %v5902_v15  ;;  %v2906_v34 = vpop.f32.mrb[185].mxu1  ;;  %v4105_v36 = vpop.f32.mrb[139].mxu0 }
 0x4c1   : > { %v2907_v37 = vadd.f32 %v2906_v34, %v5907_v3  ;;  %v5977_v35 = vadd.f32 %v4105_v36, %v4104_v22  ;;  %v2908_v7 = vpop.f32.mrb[186].mxu1  ;;  %3674 = vmatprep.mubr.bf16.mxu1 %v3106_v10 }
 0x4c2   : > { %v2909_v60 = vadd.f32 %v2908_v7, %v5902_v15  ;;  %v2910_v39 = vpop.f32.mrb[187].mxu1  ;;  %3675 = vmatmul.mubr.bf16.gmra.mrb[244].mxu1 %v3105_v55  ;;  %v3037_v6 = vmax.f32 %v2905_v30, 0.0 }
 0x4c3   : > { %v2911_v43 = vadd.f32 %v2910_v39, %v5907_v3  ;;  %v3038_v42 = vmax.f32 %v2907_v37, 0.0 }
 0x4c4   : > { %v3041_v16 = vmax.f32 %v2909_v60, 0.0 }
 0x4c5   : > { %v3042_v4 = vmax.f32 %v2911_v43, 0.0  ;;  %v4107_v40 = vpop.f32.mrb[140].mxu0 }
 0x4c6   : > { %v3109_v44 = vpack.c.bf16 %v3041_v16, %v3037_v6  ;;  %v4108_v5 = vpop.f32.mrb[141].mxu0 }
 0x4c7   : > { %v3110_v11 = vpack.c.bf16 %v3042_v4, %v3038_v42  ;;  %v5981_v58 = vadd.f32 %v4108_v5, %v4107_v40  ;;  %v2914_v59 = vpop.f32.mrb[188].mxu1  ;;  %v4110_v2 = vpop.f32.mrb[142].mxu0 }
 0x4c8   : > { %v2915_v31 = vadd.f32 %v2914_v59, %v5902_v15  ;;  %v2916_v21 = vpop.f32.mrb[189].mxu1  ;;  %v4111_v56 = vpop.f32.mrb[143].mxu0 }
 0x4c9   : > { %v2917_v62 = vadd.f32 %v2916_v21, %v5907_v3  ;;  %v5985_v27 = vadd.f32 %v4111_v56, %v4110_v2  ;;  %v2918_v9 = vpop.f32.mrb[190].mxu1  ;;  %3682 = vmatprep.mubr.bf16.mxu1 %v3110_v11 }
 0x4ca   : > { %v2919_v51 = vadd.f32 %v2918_v9, %v5902_v15  ;;  %v2920_v41 = vpop.f32.mrb[191].mxu1  ;;  %3683 = vmatmul.mubr.bf16.gmra.mrb[248].mxu1 %v3109_v44  ;;  %v3045_v29 = vmax.f32 %v2915_v31, 0.0 }
 0x4cb   : > { %v2921_v12 = vadd.f32 %v2920_v41, %v5907_v3  ;;  %v3046_v1 = vmax.f32 %v2917_v62, 0.0 }
 0x4cc   : > { %v3049_v45 = vmax.f32 %v2919_v51, 0.0 }
 0x4cd   : > { %v3050_v17 = vmax.f32 %v2921_v12, 0.0  ;;  %v4113_v47 = vpop.f32.mrb[144].mxu0 }
 0x4ce   : > { %v3113_v48 = vpack.c.bf16 %v3049_v45, %v3045_v29  ;;  %v4114_v23 = vpop.f32.mrb[145].mxu0 }
 0x4cf   : > { %v3114_v49 = vpack.c.bf16 %v3050_v17, %v3046_v1  ;;  %v5989_v24 = vadd.f32 %v4114_v23, %v4113_v47  ;;  %v4116_v0 = vpop.f32.mrb[146].mxu0 }
 0x4d0   : > { %v4117_v32 = vpop.f32.mrb[147].mxu0 }
 0x4d1   : > { %v5991_v52 = vadd.f32 %v4117_v32, %v4116_v0  ;;  %3690 = vmatprep.mubr.bf16.mxu1 %v3114_v49 }
 0x4d2   : > { %3691 = vmatmul.mubr.bf16.gmra.mrb[252].mxu1 %v3113_v48 }
 0x4d5   : > { %v4119_v15 = vpop.f32.mrb[148].mxu0 }
 0x4d6   : > { %v4120_v33 = vpop.f32.mrb[149].mxu0 }
 0x4d7   : > { %v5993_v26 = vadd.f32 %v4120_v33, %v4119_v15  ;;  %v4122_v3 = vpop.f32.mrb[150].mxu0 }
 0x4d8   : > { %v4123_v19 = vpop.f32.mrb[151].mxu0 }
 0x4d9   : > { %v5995_v25 = vadd.f32 %v4123_v19, %v4122_v3 }
 0x4dd   : > { %v4125_v53 = vpop.f32.mrb[152].mxu0 }
 0x4de   : > { %v4126_v13 = vpop.f32.mrb[153].mxu0 }
 0x4df   : > { %v5997_v18 = vadd.f32 %v4126_v13, %v4125_v53  ;;  %v4128_v38 = vpop.f32.mrb[154].mxu0 }
 0x4e0   : > { %v4129_v46 = vpop.f32.mrb[155].mxu0 }
 0x4e1   : > { %v5999_v63 = vadd.f32 %v4129_v46, %v4128_v38 }
 0x4e5   : > { %v4131_v61 = vpop.f32.mrb[156].mxu0 }
 0x4e6   : > { %v4132_v55 = vpop.f32.mrb[157].mxu0 }
 0x4e7   : > { %v6001_v57 = vadd.f32 %v4132_v55, %v4131_v61  ;;  %v4134_v10 = vpop.f32.mrb[158].mxu0 }
 0x4e8   : > { %v4135_v20 = vpop.f32.mrb[159].mxu0 }
 0x4e9   : > { %v6003_v22 = vadd.f32 %v4135_v20, %v4134_v10 }
 0x4ed   : > { %v4137_v30 = vpop.f32.mrb[160].mxu0 }
 0x4ee   : > { %v4138_v34 = vpop.f32.mrb[161].mxu0 }
 0x4ef   : > { %v6005_v36 = vadd.f32 %v4138_v34, %v4137_v30  ;;  %v4140_v37 = vpop.f32.mrb[162].mxu0  ;;  %v6040_v30 = vld [vmem:[%s6200_s8] ss:$0 sm:$0xff] }
 0x4f0   : > { %v4141_v7 = vpop.f32.mrb[163].mxu0 }
 0x4f1   : > { %v6007_v60 = vadd.f32 %v4141_v7, %v4140_v37  ;;  %v3412_v7 = vadd.f32 %v5957_v28, %v6040_v30 }
 0x4f5   : > { %v4143_v39 = vpop.f32.mrb[164].mxu0 }
 0x4f6   : > { %v4144_v43 = vpop.f32.mrb[165].mxu0 }
 0x4f7   : > { %v6009_v6 = vadd.f32 %v4144_v43, %v4143_v39  ;;  %v4146_v16 = vpop.f32.mrb[166].mxu0 }
 0x4f8   : > { %v4147_v42 = vpop.f32.mrb[167].mxu0 }
 0x4f9   : > { %v6011_v4 = vadd.f32 %v4147_v42, %v4146_v16  ;;  %v3415_v42 = vadd.f32 %v5961_v8, %v6040_v30 }
 0x4fd   : > { %v4149_v40 = vpop.f32.mrb[168].mxu0 }
 0x4fe   : > { %v4150_v44 = vpop.f32.mrb[169].mxu0 }
 0x4ff   : > { %v6013_v5 = vadd.f32 %v4150_v44, %v4149_v40  ;;  %v4152_v11 = vpop.f32.mrb[170].mxu0 }
 0x500   : > { %v4153_v59 = vpop.f32.mrb[171].mxu0 }
 0x501   : > { %v6015_v2 = vadd.f32 %v4153_v59, %v4152_v11 }
 0x505   : > { %v4155_v31 = vpop.f32.mrb[172].mxu0 }
 0x506   : > { %v4156_v21 = vpop.f32.mrb[173].mxu0 }
 0x507   : > { %v6017_v56 = vadd.f32 %v4156_v21, %v4155_v31  ;;  %v4158_v62 = vpop.f32.mrb[174].mxu0  ;;  %v3420_v31 = vadd.f32 %v5965_v50, %v6040_v30 }
 0x508   : > { %v4159_v9 = vpop.f32.mrb[175].mxu0 }
 0x509   : > { %v6019_v51 = vadd.f32 %v4159_v9, %v4158_v62  ;;  %v3423_v9 = vadd.f32 %v5969_v14, %v6040_v30 }
 0x50d   : > { %v4161_v41 = vpop.f32.mrb[176].mxu0 }
 0x50e   : > { %v4162_v12 = vpop.f32.mrb[177].mxu0 }
 0x50f   : > { %v6021_v29 = vadd.f32 %v4162_v12, %v4161_v41  ;;  %v4164_v45 = vpop.f32.mrb[178].mxu0 }
 0x510   : > { %v4165_v1 = vpop.f32.mrb[179].mxu0 }
 0x511   : > { %v6023_v17 = vadd.f32 %v4165_v1, %v4164_v45 }
 0x515   : > { %v4167_v47 = vpop.f32.mrb[180].mxu0 }
 0x516   : > { %v4168_v48 = vpop.f32.mrb[181].mxu0 }
 0x517   : > { %v6025_v23 = vadd.f32 %v4168_v48, %v4167_v47  ;;  %v4170_v49 = vpop.f32.mrb[182].mxu0  ;;  %v3428_v48 = vadd.f32 %v5973_v54, %v6040_v30 }
 0x518   : > { %v4171_v0 = vpop.f32.mrb[183].mxu0 }
 0x519   : > { %v6027_v32 = vadd.f32 %v4171_v0, %v4170_v49 }
 0x51d   : > { %v4173_v15 = vpop.f32.mrb[184].mxu0 }
 0x51e   : > { %v4174_v33 = vpop.f32.mrb[185].mxu0 }
 0x51f   : > { %v6029_v3 = vadd.f32 %v4174_v33, %v4173_v15  ;;  %v4176_v19 = vpop.f32.mrb[186].mxu0  ;;  %v3431_v15 = vadd.f32 %v5977_v35, %v6040_v30 }
 0x520   : > { %v4177_v53 = vpop.f32.mrb[187].mxu0 }
 0x521   : > { %v6031_v13 = vadd.f32 %v4177_v53, %v4176_v19 }
 0x525   : > { %v4179_v38 = vpop.f32.mrb[188].mxu0 }
 0x526   : > { %v4180_v46 = vpop.f32.mrb[189].mxu0 }
 0x527   : > { %v6033_v61 = vadd.f32 %v4180_v46, %v4179_v38  ;;  %v4182_v55 = vpop.f32.mrb[190].mxu0  ;;  %v3436_v46 = vadd.f32 %v5981_v58, %v6040_v30 }
 0x528   : > { %v4183_v10 = vpop.f32.mrb[191].mxu0 }
 0x529   : > { %v6035_v20 = vadd.f32 %v4183_v10, %v4182_v55 }
 0x52d   : > { %v4201_v34 = vpop.f32.mrb[192].mxu1 }
 0x52e   : > { %v4202_v37 = vpop.f32.mrb[193].mxu1 }
 0x52f   : > { %v4203_v39 = vadd.f32 %v4202_v37, %v4201_v34  ;;  %v4204_v43 = vpop.f32.mrb[194].mxu1  ;;  %v3439_v34 = vadd.f32 %v5985_v27, %v6040_v30 }
 0x530   : > { %v4205_v16 = vpop.f32.mrb[195].mxu1 }
 0x531   : > { %v3573_v40 = vadd.f32 %v4203_v39, %v3412_v7  ;;  %v4206_v44 = vadd.f32 %v4205_v16, %v4204_v43  ;;  %v3444_v16 = vadd.f32 %v5989_v24, %v6040_v30 }
 0x533   : > { %3699 = vst [vmem:[%s6048_s23] sm:$0xff] %v3573_v40  ;;  %v3576_v11 = vadd.f32 %v4206_v44, %v3415_v42  ;;  %v3447_v44 = vadd.f32 %v5991_v52, %v6040_v30 }
 0x535   : > { %3700 = vst [vmem:[%s6048_s23 + $0x8] sm:$0xff] %v3576_v11  ;;  %v4207_v59 = vpop.f32.mrb[196].mxu1 }
 0x536   : > { %v4208_v28 = vpop.f32.mrb[197].mxu1 }
 0x537   : > { %v4209_v21 = vadd.f32 %v4208_v28, %v4207_v59  ;;  %v4210_v62 = vpop.f32.mrb[198].mxu1 }
 0x538   : > { %v4211_v8 = vpop.f32.mrb[199].mxu1 }
 0x539   : > { %v3581_v41 = vadd.f32 %v4209_v21, %v3420_v31  ;;  %v4212_v12 = vadd.f32 %v4211_v8, %v4210_v62  ;;  %v3452_v21 = vadd.f32 %v5993_v26, %v6040_v30 }
 0x53b   : > { %3701 = vst [vmem:[%s6048_s23 + $0x10] sm:$0xff] %v3581_v41  ;;  %v3584_v45 = vadd.f32 %v4212_v12, %v3423_v9  ;;  %v3455_v9 = vadd.f32 %v5995_v25, %v6040_v30 }
 0x53d   : > { %3702 = vst [vmem:[%s6048_s23 + $0x18] sm:$0xff] %v3584_v45  ;;  %v4213_v1 = vpop.f32.mrb[200].mxu1 }
 0x53e   : > { %v4214_v47 = vpop.f32.mrb[201].mxu1 }
 0x53f   : > { %v4215_v49 = vadd.f32 %v4214_v47, %v4213_v1  ;;  %v4216_v50 = vpop.f32.mrb[202].mxu1  ;;  %v3460_v47 = vadd.f32 %v5997_v18, %v6040_v30 }
 0x540   : > { %v4217_v0 = vpop.f32.mrb[203].mxu1 }
 0x541   : > { %v3589_v33 = vadd.f32 %v4215_v49, %v3428_v48  ;;  %v4218_v14 = vadd.f32 %v4217_v0, %v4216_v50  ;;  %v3463_v50 = vadd.f32 %v5999_v63, %v6040_v30 }
 0x543   : > { %3703 = vst [vmem:[%s6048_s23 + $0x20] sm:$0xff] %v3589_v33  ;;  %v3592_v19 = vadd.f32 %v4218_v14, %v3431_v15 }
 0x545   : > { %3704 = vst [vmem:[%s6048_s23 + $0x28] sm:$0xff] %v3592_v19  ;;  %v4219_v53 = vpop.f32.mrb[204].mxu1  ;;  %v3468_v19 = vadd.f32 %v6001_v57, %v6040_v30 }
 0x546   : > { %v4220_v38 = vpop.f32.mrb[205].mxu1 }
 0x547   : > { %v4221_v55 = vadd.f32 %v4220_v38, %v4219_v53  ;;  %v4222_v54 = vpop.f32.mrb[206].mxu1 }
 0x548   : > { %v4223_v10 = vpop.f32.mrb[207].mxu1 }
 0x549   : > { %v3597_v37 = vadd.f32 %v4221_v55, %v3436_v46  ;;  %v4224_v35 = vadd.f32 %v4223_v10, %v4222_v54  ;;  %v3471_v46 = vadd.f32 %v6003_v22, %v6040_v30 }
 0x54b   : > { %3705 = vst [vmem:[%s6048_s23 + $0x30] sm:$0xff] %v3597_v37  ;;  %v3600_v7 = vadd.f32 %v4224_v35, %v3439_v34  ;;  %v3476_v37 = vadd.f32 %v6005_v36, %v6040_v30 }
 0x54d   : > { %3706 = vst [vmem:[%s6048_s23 + $0x38] sm:$0xff] %v3600_v7  ;;  %v4225_v39 = vpop.f32.mrb[208].mxu1 }
 0x54e   : > { %v4226_v43 = vpop.f32.mrb[209].mxu1 }
 0x54f   : > { %v4227_v42 = vadd.f32 %v4226_v43, %v4225_v39  ;;  %v4228_v58 = vpop.f32.mrb[210].mxu1  ;;  %v3479_v39 = vadd.f32 %v6007_v60, %v6040_v30 }
 0x550   : > { %v4229_v40 = vpop.f32.mrb[211].mxu1 }
 0x551   : > { %v3605_v11 = vadd.f32 %v4227_v42, %v3444_v16  ;;  %v4230_v27 = vadd.f32 %v4229_v40, %v4228_v58  ;;  %v3484_v40 = vadd.f32 %v6009_v6, %v6040_v30 }
 0x553   : > { %3707 = vst [vmem:[%s6048_s23 + $0x40] sm:$0xff] %v3605_v11  ;;  %v3608_v59 = vadd.f32 %v4230_v27, %v3447_v44  ;;  %v3487_v27 = vadd.f32 %v6011_v4, %v6040_v30 }
 0x555   : > { %3708 = vst [vmem:[%s6048_s23 + $0x48] sm:$0xff] %v3608_v59  ;;  %v4231_v28 = vpop.f32.mrb[212].mxu1 }
 0x556   : > { %v4232_v31 = vpop.f32.mrb[213].mxu1 }
 0x557   : > { %v4233_v62 = vadd.f32 %v4232_v31, %v4231_v28  ;;  %v4234_v24 = vpop.f32.mrb[214].mxu1 }
 0x558   : > { %v4235_v8 = vpop.f32.mrb[215].mxu1 }
 0x559   : > { %v3613_v41 = vadd.f32 %v4233_v62, %v3452_v21  ;;  %v4236_v52 = vadd.f32 %v4235_v8, %v4234_v24  ;;  %v3492_v62 = vadd.f32 %v6013_v5, %v6040_v30 }
 0x55b   : > { %3709 = vst [vmem:[%s6048_s23 + $0x50] sm:$0xff] %v3613_v41  ;;  %v3616_v12 = vadd.f32 %v4236_v52, %v3455_v9  ;;  %v3495_v9 = vadd.f32 %v6015_v2, %v6040_v30 }
 0x55d   : > { %3710 = vst [vmem:[%s6048_s23 + $0x58] sm:$0xff] %v3616_v12  ;;  %v4237_v45 = vpop.f32.mrb[216].mxu1 }
 0x55e   : > { %v4238_v1 = vpop.f32.mrb[217].mxu1 }
 0x55f   : > { %v4239_v48 = vadd.f32 %v4238_v1, %v4237_v45  ;;  %v4240_v26 = vpop.f32.mrb[218].mxu1  ;;  %v3500_v1 = vadd.f32 %v6017_v56, %v6040_v30 }
 0x560   : > { %v4241_v49 = vpop.f32.mrb[219].mxu1 }
 0x561   : > { %v3621_v0 = vadd.f32 %v4239_v48, %v3460_v47  ;;  %v4242_v25 = vadd.f32 %v4241_v49, %v4240_v26  ;;  %v3503_v26 = vadd.f32 %v6019_v51, %v6040_v30 }
 0x563   : > { %3711 = vst [vmem:[%s6048_s23 + $0x60] sm:$0xff] %v3621_v0  ;;  %v3624_v15 = vadd.f32 %v4242_v25, %v3463_v50 }
 0x565   : > { %3712 = vst [vmem:[%s6048_s23 + $0x68] sm:$0xff] %v3624_v15  ;;  %v4243_v33 = vpop.f32.mrb[220].mxu1  ;;  %v3508_v15 = vadd.f32 %v6021_v29, %v6040_v30 }
 0x566   : > { %v4244_v14 = vpop.f32.mrb[221].mxu1 }
 0x567   : > { %v4245_v53 = vadd.f32 %v4244_v14, %v4243_v33  ;;  %v4246_v18 = vpop.f32.mrb[222].mxu1 }
 0x568   : > { %v4247_v38 = vpop.f32.mrb[223].mxu1 }
 0x569   : > { %v3629_v55 = vadd.f32 %v4245_v53, %v3468_v19  ;;  %v4248_v63 = vadd.f32 %v4247_v38, %v4246_v18  ;;  %v3511_v19 = vadd.f32 %v6023_v17, %v6040_v30 }
 0x56b   : > { %3713 = vst [vmem:[%s6048_s23 + $0x70] sm:$0xff] %v3629_v55  ;;  %v3632_v54 = vadd.f32 %v4248_v63, %v3471_v46  ;;  %v3516_v55 = vadd.f32 %v6025_v23, %v6040_v30 }
 0x56d   : > { %3714 = vst [vmem:[%s6048_s23 + $0x78] sm:$0xff] %v3632_v54  ;;  %v4249_v10 = vpop.f32.mrb[224].mxu1 }
 0x56e   : > { %v4250_v34 = vpop.f32.mrb[225].mxu1 }
 0x56f   : > { %v4251_v35 = vadd.f32 %v4250_v34, %v4249_v10  ;;  %v4252_v57 = vpop.f32.mrb[226].mxu1  ;;  %v3519_v10 = vadd.f32 %v6027_v32, %v6040_v30 }
 0x570   : > { %v4253_v7 = vpop.f32.mrb[227].mxu1 }
 0x571   : > { %v3637_v43 = vadd.f32 %v4251_v35, %v3476_v37  ;;  %v4254_v22 = vadd.f32 %v4253_v7, %v4252_v57  ;;  %v3524_v7 = vadd.f32 %v6029_v3, %v6040_v30  ;;  %v3532_v3 = vadd.f32 %v6033_v61, %v6040_v30 }
 0x573   : > { %3715 = vst [vmem:[%s6048_s23 + $0x80] sm:$0xff] %v3637_v43  ;;  %v3640_v16 = vadd.f32 %v4254_v22, %v3479_v39  ;;  %v3527_v22 = vadd.f32 %v6031_v13, %v6040_v30  ;;  %v3535_v13 = vadd.f32 %v6035_v20, %v6040_v30 }
 0x575   : > { %3716 = vst [vmem:[%s6048_s23 + $0x88] sm:$0xff] %v3640_v16  ;;  %v4255_v42 = vpop.f32.mrb[228].mxu1 }
 0x576   : > { %v4256_v58 = vpop.f32.mrb[229].mxu1 }
 0x577   : > { %v4257_v44 = vadd.f32 %v4256_v58, %v4255_v42  ;;  %v4258_v36 = vpop.f32.mrb[230].mxu1 }
 0x578   : > { %v4259_v11 = vpop.f32.mrb[231].mxu1 }
 0x579   : > { %v3645_v59 = vadd.f32 %v4257_v44, %v3484_v40  ;;  %v4260_v60 = vadd.f32 %v4259_v11, %v4258_v36 }
 0x57b   : > { %3717 = vst [vmem:[%s6048_s23 + $0x90] sm:$0xff] %v3645_v59  ;;  %v3648_v28 = vadd.f32 %v4260_v60, %v3487_v27 }
 0x57d   : > { %3718 = vst [vmem:[%s6048_s23 + $0x98] sm:$0xff] %v3648_v28  ;;  %v4261_v31 = vpop.f32.mrb[232].mxu1 }
 0x57e   : > { %v4262_v21 = vpop.f32.mrb[233].mxu1 }
 0x57f   : > { %v4263_v24 = vadd.f32 %v4262_v21, %v4261_v31  ;;  %v4264_v6 = vpop.f32.mrb[234].mxu1 }
 0x580   : > { %v4265_v8 = vpop.f32.mrb[235].mxu1 }
 0x581   : > { %v3653_v41 = vadd.f32 %v4263_v24, %v3492_v62  ;;  %v4266_v4 = vadd.f32 %v4265_v8, %v4264_v6 }
 0x583   : > { %3719 = vst [vmem:[%s6048_s23 + $0xa0] sm:$0xff] %v3653_v41  ;;  %v3656_v52 = vadd.f32 %v4266_v4, %v3495_v9 }
 0x585   : > { %3720 = vst [vmem:[%s6048_s23 + $0xa8] sm:$0xff] %v3656_v52  ;;  %v4267_v12 = vpop.f32.mrb[236].mxu1 }
 0x586   : > { %v4268_v45 = vpop.f32.mrb[237].mxu1 }
 0x587   : > { %v4269_v47 = vadd.f32 %v4268_v45, %v4267_v12  ;;  %v4270_v5 = vpop.f32.mrb[238].mxu1 }
 0x588   : > { %v4271_v48 = vpop.f32.mrb[239].mxu1 }
 0x589   : > { %v3661_v49 = vadd.f32 %v4269_v47, %v3500_v1  ;;  %v4272_v2 = vadd.f32 %v4271_v48, %v4270_v5 }
 0x58b   : > { %3721 = vst [vmem:[%s6048_s23 + $0xb0] sm:$0xff] %v3661_v49  ;;  %v3664_v50 = vadd.f32 %v4272_v2, %v3503_v26 }
 0x58d   : > { %3722 = vst [vmem:[%s6048_s23 + $0xb8] sm:$0xff] %v3664_v50  ;;  %v4273_v0 = vpop.f32.mrb[240].mxu1 }
 0x58e   : > { %v4274_v25 = vpop.f32.mrb[241].mxu1 }
 0x58f   : > { %v4275_v33 = vadd.f32 %v4274_v25, %v4273_v0  ;;  %v4276_v56 = vpop.f32.mrb[242].mxu1 }
 0x590   : > { %v4277_v14 = vpop.f32.mrb[243].mxu1 }
 0x591   : > { %v3669_v53 = vadd.f32 %v4275_v33, %v3508_v15  ;;  %v4278_v51 = vadd.f32 %v4277_v14, %v4276_v56 }
 0x593   : > { %3723 = vst [vmem:[%s6048_s23 + $0xc0] sm:$0xff] %v3669_v53  ;;  %v3672_v18 = vadd.f32 %v4278_v51, %v3511_v19 }
 0x595   : > { %3724 = vst [vmem:[%s6048_s23 + $0xc8] sm:$0xff] %v3672_v18  ;;  %v4279_v38 = vpop.f32.mrb[244].mxu1 }
 0x596   : > { %v4280_v46 = vpop.f32.mrb[245].mxu1 }
 0x597   : > { %v4281_v63 = vadd.f32 %v4280_v46, %v4279_v38  ;;  %v4282_v29 = vpop.f32.mrb[246].mxu1 }
 0x598   : > { %v4283_v54 = vpop.f32.mrb[247].mxu1 }
 0x599   : > { %v3677_v34 = vadd.f32 %v4281_v63, %v3516_v55  ;;  %v4284_v17 = vadd.f32 %v4283_v54, %v4282_v29 }
 0x59b   : > { %3725 = vst [vmem:[%s6048_s23 + $0xd0] sm:$0xff] %v3677_v34  ;;  %v3680_v37 = vadd.f32 %v4284_v17, %v3519_v10 }
 0x59d   : > { %3726 = vst [vmem:[%s6048_s23 + $0xd8] sm:$0xff] %v3680_v37  ;;  %v4285_v35 = vpop.f32.mrb[248].mxu1 }
 0x59e   : > { %v4286_v57 = vpop.f32.mrb[249].mxu1 }
 0x59f   : > { %v4287_v23 = vadd.f32 %v4286_v57, %v4285_v35  ;;  %v4288_v39 = vpop.f32.mrb[250].mxu1 }
 0x5a0   : > { %v4289_v43 = vpop.f32.mrb[251].mxu1 }
 0x5a1   : > { %v3685_v32 = vadd.f32 %v4287_v23, %v3524_v7  ;;  %v4290_v16 = vadd.f32 %v4289_v43, %v4288_v39 }
 0x5a3   : > { %3727 = vst [vmem:[%s6048_s23 + $0xe0] sm:$0xff] %v3685_v32  ;;  %v3688_v42 = vadd.f32 %v4290_v16, %v3527_v22 }
 0x5a5   : > { %3728 = vst [vmem:[%s6048_s23 + $0xe8] sm:$0xff] %v3688_v42  ;;  %v4291_v58 = vpop.f32.mrb[252].mxu1 }
 0x5a6   : > { %v4292_v40 = vpop.f32.mrb[253].mxu1 }
 0x5a7   : > { %v4293_v44 = vadd.f32 %v4292_v40, %v4291_v58  ;;  %v4294_v36 = vpop.f32.mrb[254].mxu1 }
 0x5a8   : > { %v4295_v11 = vpop.f32.mrb[255].mxu1 }
 0x5a9   : > { %v3693_v27 = vadd.f32 %v4293_v44, %v3532_v3  ;;  %v4296_v59 = vadd.f32 %v4295_v11, %v4294_v36 }
 0x5ab   : > { %3729 = vst [vmem:[%s6048_s23 + $0xf0] sm:$0xff] %v3693_v27  ;;  %v3696_v61 = vadd.f32 %v4296_v59, %v3535_v13 }
 0x5ad   : > { %3730 = vst [vmem:[%s6048_s23 + $0xf8] sm:$0xff] %v3696_v61 }
 0x5ae   : > { %4948 = shalt.err (!%p4945_p12)
}
 0x5af   : > { %s4949_s28 = scalar_lea.hbm %s6145_s17, 4096  ;;  %s4953_s16 = scalar_lea.hbm %s6226_s15, 16384 }
 0x5b0   : > { %p4950_p9 = scmp.ne.s32.totalorder %s6145_s17, %s4949_s28  ;;  %p4954_p4 = scmp.lt.u32.totalorder %s6145_s17, %s6226_s15 }
 0x5b1   : > { %p4955_p8 = scmp.lt.u32.totalorder %s4953_s16, %s4949_s28  ;;  %p4957_p0 = scmp.lt.u32.totalorder %s4949_s28, %s6145_s17 }
 0x5b2   : > { %p4951_p13 = pnand %p4950_p9, %p5240_p3 }
 0x5b3   : > { %p4956_p6 = por %p4955_p8, %p4954_p4 }
 0x5b4   : > { %p4952_p10 = pneg %p4951_p13 }
 0x5b5   : > { %p4958_p5 = por %p4957_p0, %p4956_p6 }
 0x5b7   : > { %p4959_p7 = pnand %p4958_p5, %p4952_p10 }
 0x5b9   : > { %4962 = shalt.err (!%p4959_p7)
}
 0x5ba   : > { %s5024_s30 = smov 128   ;;  %s5025_s22 = smov 8  }
 0x5bb   : > { %4443 = dma.vmem_to_hbm [thread:$0]  (%p5240_p3), %s6147_s24, 4096, %s6145_s17, %s3732_s13, %s5024_s30, %s5024_s30, %s5025_s22  }
 0x5bc PF: > { %s6227_s25 = sld [smem:[#allocation16_spill]]  ;;  %s6228_s26 = sld [smem:[#allocation17_spill]] }
 0x5bd   : > { %p4475_p11 = scmp.ge.s32.totalorder %s5009_s12, 2 }
 0x5c2   : > { %s3760_s9 = sand.u32 1, %s6227_s25   ;;  %p6229_p2 = scmp.ne.s32.totalorder %s6228_s26, 0 }
 0x5c3   : > { %s3761_s28 = scalar_lea.sflag [#allocation4], %s3760_s9 }
 0x5c4   : > { %p4463_p1 = pnand %p4475_p11, %p6229_p2 }
 0x5c6   : > { %4992 = dma.done.wait (!%p4463_p1), %s3761_s28, 4096  }
 0x5c7   : > { %4994 = vsyncadd (!%p4463_p1), %s3761_s28, 4294963200  ;;  %p24_p12 = scmp.ge.s32.totalorder %s5227_s27, 6   ;;  %s6230_s30 = smov %s5001_s10 }
 0x5c8   : > { %s6231_s10 = smov %s5005_s11  ;;  %s6232_s11 = smov %s5236_s18 }
 0x5c9   : > { %s6233_s12 = smov %s5227_s27  ;;  %26 = sbr.rel (!%p24_p12) target bundleno = 9 (0x9), region = 117 }
 0x5d0   :  { %3766 = vsyncpa [#allocation3], 1 }
 0x5d1   :  { %3768 = vsyncpa [#allocation3 + $0x1], 1 }
 0x5d2   :  { %3769 = vsyncpa [#allocation6], 1 }
 0x5d3   :  { %3770 = vsyncpa [#allocation9], 1 }
 0x5d4   :  { %3771 = vsyncpa [#allocation4], 1 }
 0x5d5   :  { %3773 = vsyncpa [#allocation4 + $0x1], 1 }

</bundles_post_ra>
